<compile_context>
chip_gen: v7x
topology: tpu7x:2x2x1
jax: 0.10.0
libtpu: 0.0.40
codegen_flags: <defaults>
</compile_context>

<pallas_src>
import math

import jax
import jax.numpy as jnp
import numpy as np
from jax import lax
from jax.experimental import pallas as pl
from jax.experimental.pallas import tpu as pltpu


H0 = W0 = 28                    # input spatial size (needed so conv8 output is 1x1)
F = H0 * W0                     # 784 flattened spatial frame (lane axis)
MARGIN = 128                    # margin so tap shifts never leave the frame
FRAME_W = MARGIN + F + MARGIN   # 1040
C_MAX = 16                      # max channel count in the network
BN_EPS = 1e-5


# ------------------------------- fused kernel ------------------------------ #

def _model10_kernel(x_ref, mask6_ref,
                    w1_ref, s1_ref, t1_ref,
                    w2_ref, s2_ref, t2_ref,
                    w3_ref,
                    w4_ref, s4_ref, t4_ref,
                    w5_ref, s5_ref, t5_ref,
                    w6_ref, s6_ref, t6_ref,
                    w7_ref, s7_ref, t7_ref,
                    w8_ref,
                    o_ref,
                    frame):
    """One image per grid step; every activation stays in VMEM."""

    def put(cin, y):
        frame[0:cin, MARGIN:MARGIN + F] = y

    def conv3x3(cin, cout, w_ref, row_stride, col_stride, pad):
        # Input activation must already live in frame[:cin, MARGIN:MARGIN+F].
        acc = jnp.zeros((cout, F), jnp.float32)
        for kh in range(3):
            for kw in range(3):
                d = (kh - pad) * row_stride + (kw - pad) * col_stride
                tap = frame[0:cin, MARGIN + d:MARGIN + d + F]   # lane-shifted view
                w_tap = w_ref[kh * 3 + kw]                      # (cout, cin)
                if cin == 1:
                    acc = acc + w_tap * tap                     # (cout,1)*(1,F)
                else:
                    acc = acc + jnp.dot(w_tap, tap,
                                        preferred_element_type=jnp.float32)
        return acc

    def relu_bn(y, s_ref, t_ref):
        return jnp.maximum(y, 0.0) * s_ref[...] + t_ref[...]

    # ---- block1: 3x3 conv 1->8 (valid) + ReLU + BN (dense frame, stride 28) --
    put(1, x_ref[0])
    y = relu_bn(conv3x3(1, 8, w1_ref, W0, 1, 0), s1_ref, t1_ref)        # 26x26
    # ---- block2: 3x3 conv 8->10 ---------------------------------------------
    put(8, y)
    y = relu_bn(conv3x3(8, 10, w2_ref, W0, 1, 0), s2_ref, t2_ref)       # 24x24
    # ---- block3: 1x1 conv 10->12 (no ReLU/BN) -------------------------------
    y = jnp.dot(w3_ref[...], y, preferred_element_type=jnp.float32)     # 24x24
    # ---- maxpool 2x2/2: valid values move to stride (56, 2) in the frame ----
    put(12, y)
    p00 = frame[0:12, MARGIN:MARGIN + F]
    p01 = frame[0:12, MARGIN + 1:MARGIN + 1 + F]
    p10 = frame[0:12, MARGIN + W0:MARGIN + W0 + F]
    p11 = frame[0:12, MARGIN + W0 + 1:MARGIN + W0 + 1 + F]
    y = jnp.maximum(jnp.maximum(p00, p01), jnp.maximum(p10, p11))       # 12x12
    # ---- blocks 4..6: 3x3 valid convs on the strided (56, 2) frame ----------
    put(12, y)
    y = relu_bn(conv3x3(12, 14, w4_ref, 2 * W0, 2, 0), s4_ref, t4_ref)  # 10x10
    put(14, y)
    y = relu_bn(conv3x3(14, 16, w5_ref, 2 * W0, 2, 0), s5_ref, t5_ref)  # 8x8
    put(16, y)
    y = relu_bn(conv3x3(16, 8, w6_ref, 2 * W0, 2, 0), s6_ref, t6_ref)   # 6x6
    # ---- block7: 3x3 conv 8->12, padding=1 (needs an exactly-zero halo) -----
    mask6 = mask6_ref[...] > 0.5              # True at the 36 valid 6x6 positions
    frame[...] = jnp.zeros_like(frame)        # zero margins + invalid positions
    frame[0:8, MARGIN:MARGIN + F] = jnp.where(mask6, y, 0.0)
    y = relu_bn(conv3x3(8, 12, w7_ref, 2 * W0, 2, 1), s7_ref, t7_ref)   # 6x6
    # ---- GAP(6) -> 1x1 conv 12->10 -> log_softmax ----------------------------
    gap = jnp.sum(jnp.where(mask6, y, 0.0), axis=1, keepdims=True) * (1.0 / 36.0)
    z = jnp.dot(w8_ref[...], gap, preferred_element_type=jnp.float32)   # (10, 1)
    m = jnp.max(z, axis=0, keepdims=True)
    s = z - m
    lse = jnp.log(jnp.sum(jnp.exp(s), axis=0, keepdims=True))
    o_ref[0] = (s - lse).astype(o_ref.dtype)


# ------------------------------ kernel wrapper ------------------------------ #

def _const_spec(shape):
    nd = len(shape)
    return pl.BlockSpec(shape, lambda i, _nd=nd: (0,) * _nd)


def _gap_mask():
    # Valid positions of a 6x6 activation stored in the 28-wide frame at
    # stride (56, 2): p = 56*i + 2*j, 0 <= i, j < 6.
    cols = np.arange(F)
    valid = (cols < 6 * 2 * W0) & ((cols % (2 * W0)) < 12) & ((cols % 2) == 0)
    return jnp.asarray(valid.astype(np.float32).reshape(1, F))


def prepare_kernel_params(params):
    """Reshape PyTorch-layout parameters into the layouts the kernel expects."""
    def w3x3(w):
        cout, cin = w.shape[0], w.shape[1]
        return jnp.transpose(w, (2, 3, 0, 1)).reshape(9, cout, cin)

    def w1x1(w):
        return w.reshape(w.shape[0], w.shape[1])

    def bn(gamma, beta, mean, var):
        scale = gamma / jnp.sqrt(var + BN_EPS)
        shift = beta - mean * scale
        return scale.reshape(-1, 1), shift.reshape(-1, 1)

    s1, t1 = bn(*params["bn1"]); s2, t2 = bn(*params["bn2"])
    s4, t4 = bn(*params["bn4"]); s5, t5 = bn(*params["bn5"])
    s6, t6 = bn(*params["bn6"]); s7, t7 = bn(*params["bn7"])
    return (w3x3(params["w1"]), s1, t1,
            w3x3(params["w2"]), s2, t2,
            w1x1(params["w3"]),
            w3x3(params["w4"]), s4, t4,
            w3x3(params["w5"]), s5, t5,
            w3x3(params["w6"]), s6, t6,
            w3x3(params["w7"]), s7, t7,
            w1x1(params["w8"]))


@jax.jit
def model10_forward(params, x):
    n = x.shape[0]
    assert x.shape[1:] == (1, H0, W0), x.shape   # conv8 output must be 1x1
    xf = x.reshape(n, 1, F)
    kparams = prepare_kernel_params(params)
    mask6 = _gap_mask()

    in_specs = [pl.BlockSpec((1, 1, F), lambda i: (i, 0, 0)),
                _const_spec((1, F))]
    in_specs += [_const_spec(a.shape) for a in kparams]

    out = pl.pallas_call(
        _model10_kernel,
        out_shape=jax.ShapeDtypeStruct((n, 10, 1), jnp.float32),
        grid=(n,),
        in_specs=in_specs,
        out_specs=pl.BlockSpec((1, 10, 1), lambda i: (i, 0, 0)),
        scratch_shapes=[pltpu.VMEM((C_MAX, FRAME_W), jnp.float32)],
        compiler_params=pltpu.CompilerParams(dimension_semantics=("parallel",)),
    )(xf, mask6, *kparams)
    return out.reshape(n, 10)


# --------------------------- model / parameters ----------------------------- #

_CONVS = [("w1", 8, 1, 3), ("w2", 10, 8, 3), ("w3", 12, 10, 1), ("w4", 14, 12, 3),
          ("w5", 16, 14, 3), ("w6", 8, 16, 3), ("w7", 12, 8, 3), ("w8", 10, 12, 1)]
_BNS = [("bn1", 8), ("bn2", 10), ("bn4", 14), ("bn5", 16), ("bn6", 8), ("bn7", 12)]


def init_params(key):
    p = {}
    for name, cout, cin, k in _CONVS:
        key, sub = jax.random.split(key)
        bound = 1.0 / math.sqrt(cin * k * k)
        p[name] = jax.random.uniform(sub, (cout, cin, k, k), jnp.float32, -bound, bound)
    for name, c in _BNS:
        key, k1, k2, k3, k4 = jax.random.split(key, 5)
        p[name] = (jax.random.uniform(k1, (c,), jnp.float32, 0.5, 1.5),    # gamma
                   jax.random.uniform(k2, (c,), jnp.float32, -0.3, 0.3),   # beta
                   jax.random.uniform(k3, (c,), jnp.float32, -0.3, 0.3),   # running mean
                   jax.random.uniform(k4, (c,), jnp.float32, 0.5, 1.5))    # running var
    return p


# ------------------------------- plain-JAX ref ------------------------------ #

def _ref_forward(params, x):
    def conv(x, w, pad):
        return lax.conv_general_dilated(
            x, w, window_strides=(1, 1), padding=((pad, pad), (pad, pad)),
            dimension_numbers=("NCHW", "OIHW", "NCHW"),
            precision=lax.Precision.HIGHEST)

    def bn(x, p):
        gamma, beta, mean, var = p
        inv = (gamma / jnp.sqrt(var + BN_EPS))[None, :, None, None]
        return (x - mean[None, :, None, None]) * inv + beta[None, :, None, None]

    x = bn(jax.nn.relu(conv(x, params["w1"], 0)), params["bn1"])
    x = bn(jax.nn.relu(conv(x, params["w2"], 0)), params["bn2"])
    x = conv(x, params["w3"], 0)
    x = lax.reduce_window(x, -jnp.inf, lax.max, (1, 1, 2, 2), (1, 1, 2, 2), "VALID")
    x = bn(jax.nn.relu(conv(x, params["w4"], 0)), params["bn4"])
    x = bn(jax.nn.relu(conv(x, params["w5"], 0)), params["bn5"])
    x = bn(jax.nn.relu(conv(x, params["w6"], 0)), params["bn6"])
    x = bn(jax.nn.relu(conv(x, params["w7"], 1)), params["bn7"])
    x = lax.reduce_window(x, 0.0, lax.add, (1, 1, 6, 6), (1, 1, 6, 6), "VALID") / 36.0
    x = conv(x, params["w8"], 0)
    return jax.nn.log_softmax(x.reshape(-1, 10), axis=-1)


if __name__ == "__main__":
    key = jax.random.PRNGKey(0)
    pkey, xkey = jax.random.split(key)
    params = init_params(pkey)
    # 28x28 (MNIST-shaped) input so the network's final spatial size is 1x1,
    # matching the module's x.view(-1, 10).
    x = jax.random.normal(xkey, (2, 1, 28, 28), jnp.float32)

    out = jax.block_until_ready(model10_forward(params, x))
    ref = jax.block_until_ready(_ref_forward(params, x))

    assert out.shape == (2, 10), out.shape
    assert bool(jnp.all(jnp.isfinite(out)))
    assert bool(jnp.allclose(out, ref, atol=1e-3, rtol=1e-3)), \
        float(jnp.max(jnp.abs(out - ref)))
    print("KERNEL_OK")
</pallas_src>

<mosaic_0001>
module attributes {stable_mosaic.version = 11 : i64} {
  func.func @_model10_kernel(%arg0: i32, %arg1: memref<1x1x784xf32, #tpu.memory_space<vmem>>, %arg2: memref<1x784xf32, #tpu.memory_space<vmem>>, %arg3: memref<9x8x1xf32, #tpu.memory_space<vmem>>, %arg4: memref<8x1xf32, #tpu.memory_space<vmem>>, %arg5: memref<8x1xf32, #tpu.memory_space<vmem>>, %arg6: memref<9x10x8xf32, #tpu.memory_space<vmem>>, %arg7: memref<10x1xf32, #tpu.memory_space<vmem>>, %arg8: memref<10x1xf32, #tpu.memory_space<vmem>>, %arg9: memref<12x10xf32, #tpu.memory_space<vmem>>, %arg10: memref<9x14x12xf32, #tpu.memory_space<vmem>>, %arg11: memref<14x1xf32, #tpu.memory_space<vmem>>, %arg12: memref<14x1xf32, #tpu.memory_space<vmem>>, %arg13: memref<9x16x14xf32, #tpu.memory_space<vmem>>, %arg14: memref<16x1xf32, #tpu.memory_space<vmem>>, %arg15: memref<16x1xf32, #tpu.memory_space<vmem>>, %arg16: memref<9x8x16xf32, #tpu.memory_space<vmem>>, %arg17: memref<8x1xf32, #tpu.memory_space<vmem>>, %arg18: memref<8x1xf32, #tpu.memory_space<vmem>>, %arg19: memref<9x12x8xf32, #tpu.memory_space<vmem>>, %arg20: memref<12x1xf32, #tpu.memory_space<vmem>>, %arg21: memref<12x1xf32, #tpu.memory_space<vmem>>, %arg22: memref<10x12xf32, #tpu.memory_space<vmem>>, %arg23: memref<1x10x1xf32, #tpu.memory_space<vmem>>, %arg24: memref<16x1040xf32, #tpu.memory_space<vmem>>) attributes {dimension_semantics = [#tpu.dimension_semantics<parallel>], iteration_bounds = array<i64: 2>, scalar_prefetch = 0 : i64, scratch_operands = 1 : i64, tpu.core_type = #tpu.core_type<tc>, window_params = [{transform_indices = @transform_0, window_bounds = array<i64: 1, 1, 784>}, {pipeline_mode = #tpu.pipeline_mode<synchronous>, transform_indices = @transform_1, window_bounds = array<i64: 1, 784>}, {pipeline_mode = #tpu.pipeline_mode<synchronous>, transform_indices = @transform_2, window_bounds = array<i64: 9, 8, 1>}, {pipeline_mode = #tpu.pipeline_mode<synchronous>, transform_indices = @transform_3, window_bounds = array<i64: 8, 1>}, {pipeline_mode = #tpu.pipeline_mode<synchronous>, transform_indices = @transform_4, window_bounds = array<i64: 8, 1>}, {pipeline_mode = #tpu.pipeline_mode<synchronous>, transform_indices = @transform_5, window_bounds = array<i64: 9, 10, 8>}, {pipeline_mode = #tpu.pipeline_mode<synchronous>, transform_indices = @transform_6, window_bounds = array<i64: 10, 1>}, {pipeline_mode = #tpu.pipeline_mode<synchronous>, transform_indices = @transform_7, window_bounds = array<i64: 10, 1>}, {pipeline_mode = #tpu.pipeline_mode<synchronous>, transform_indices = @transform_8, window_bounds = array<i64: 12, 10>}, {pipeline_mode = #tpu.pipeline_mode<synchronous>, transform_indices = @transform_9, window_bounds = array<i64: 9, 14, 12>}, {pipeline_mode = #tpu.pipeline_mode<synchronous>, transform_indices = @transform_10, window_bounds = array<i64: 14, 1>}, {pipeline_mode = #tpu.pipeline_mode<synchronous>, transform_indices = @transform_11, window_bounds = array<i64: 14, 1>}, {pipeline_mode = #tpu.pipeline_mode<synchronous>, transform_indices = @transform_12, window_bounds = array<i64: 9, 16, 14>}, {pipeline_mode = #tpu.pipeline_mode<synchronous>, transform_indices = @transform_13, window_bounds = array<i64: 16, 1>}, {pipeline_mode = #tpu.pipeline_mode<synchronous>, transform_indices = @transform_14, window_bounds = array<i64: 16, 1>}, {pipeline_mode = #tpu.pipeline_mode<synchronous>, transform_indices = @transform_15, window_bounds = array<i64: 9, 8, 16>}, {pipeline_mode = #tpu.pipeline_mode<synchronous>, transform_indices = @transform_16, window_bounds = array<i64: 8, 1>}, {pipeline_mode = #tpu.pipeline_mode<synchronous>, transform_indices = @transform_17, window_bounds = array<i64: 8, 1>}, {pipeline_mode = #tpu.pipeline_mode<synchronous>, transform_indices = @transform_18, window_bounds = array<i64: 9, 12, 8>}, {pipeline_mode = #tpu.pipeline_mode<synchronous>, transform_indices = @transform_19, window_bounds = array<i64: 12, 1>}, {pipeline_mode = #tpu.pipeline_mode<synchronous>, transform_indices = @transform_20, window_bounds = array<i64: 12, 1>}, {pipeline_mode = #tpu.pipeline_mode<synchronous>, transform_indices = @transform_21, window_bounds = array<i64: 10, 12>}, {transform_indices = @transform_22, window_bounds = array<i64: 1, 10, 1>}]} {
    %c0 = arith.constant 0 : index
    %c0_0 = arith.constant 0 : index
    %c0_1 = arith.constant 0 : index
    %0 = vector.load %arg1[%c0, %c0_0, %c0_1] : memref<1x1x784xf32, #tpu.memory_space<vmem>>, vector<1x1x784xf32>
    %1 = vector.shape_cast %0 : vector<1x1x784xf32> to vector<1x784xf32>
    %c0_2 = arith.constant 0 : index
    %c128 = arith.constant 128 : index
    %2 = vector.load %arg24[%c0_2, %c128] : memref<16x1040xf32, #tpu.memory_space<vmem>>, vector<1x784xf32>
    tpu.vector_store %arg24[%c0_2, %c128], %1 {strides = array<i32>} : memref<16x1040xf32, #tpu.memory_space<vmem>>, vector<1x784xf32>,
    %cst = arith.constant 0.000000e+00 : f32
    %3 = vector.broadcast %cst : f32 to vector<8x784xf32>
    %c0_3 = arith.constant 0 : index
    %c128_4 = arith.constant 128 : index
    %4 = vector.load %arg24[%c0_3, %c128_4] : memref<16x1040xf32, #tpu.memory_space<vmem>>, vector<1x784xf32>
    %c0_5 = arith.constant 0 : index
    %c0_6 = arith.constant 0 : index
    %c0_7 = arith.constant 0 : index
    %5 = vector.load %arg3[%c0_5, %c0_6, %c0_7] : memref<9x8x1xf32, #tpu.memory_space<vmem>>, vector<1x8x1xf32>
    %6 = vector.shape_cast %5 : vector<1x8x1xf32> to vector<8x1xf32>
    %7 = vector.broadcast %6 : vector<8x1xf32> to vector<8x784xf32>
    %8 = vector.broadcast %4 : vector<1x784xf32> to vector<8x784xf32>
    %9 = arith.mulf %7, %8 : vector<8x784xf32>
    %10 = arith.addf %3, %9 : vector<8x784xf32>
    %c0_8 = arith.constant 0 : index
    %c129 = arith.constant 129 : index
    %11 = vector.load %arg24[%c0_8, %c129] : memref<16x1040xf32, #tpu.memory_space<vmem>>, vector<1x784xf32>
    %c1 = arith.constant 1 : index
    %c0_9 = arith.constant 0 : index
    %c0_10 = arith.constant 0 : index
    %12 = vector.load %arg3[%c1, %c0_9, %c0_10] : memref<9x8x1xf32, #tpu.memory_space<vmem>>, vector<1x8x1xf32>
    %13 = vector.shape_cast %12 : vector<1x8x1xf32> to vector<8x1xf32>
    %14 = vector.broadcast %13 : vector<8x1xf32> to vector<8x784xf32>
    %15 = vector.broadcast %11 : vector<1x784xf32> to vector<8x784xf32>
    %16 = arith.mulf %14, %15 : vector<8x784xf32>
    %17 = arith.addf %10, %16 : vector<8x784xf32>
    %c0_11 = arith.constant 0 : index
    %c130 = arith.constant 130 : index
    %18 = vector.load %arg24[%c0_11, %c130] : memref<16x1040xf32, #tpu.memory_space<vmem>>, vector<1x784xf32>
    %c2 = arith.constant 2 : index
    %c0_12 = arith.constant 0 : index
    %c0_13 = arith.constant 0 : index
    %19 = vector.load %arg3[%c2, %c0_12, %c0_13] : memref<9x8x1xf32, #tpu.memory_space<vmem>>, vector<1x8x1xf32>
    %20 = vector.shape_cast %19 : vector<1x8x1xf32> to vector<8x1xf32>
    %21 = vector.broadcast %20 : vector<8x1xf32> to vector<8x784xf32>
    %22 = vector.broadcast %18 : vector<1x784xf32> to vector<8x784xf32>
    %23 = arith.mulf %21, %22 : vector<8x784xf32>
    %24 = arith.addf %17, %23 : vector<8x784xf32>
    %c0_14 = arith.constant 0 : index
    %c156 = arith.constant 156 : index
    %25 = vector.load %arg24[%c0_14, %c156] : memref<16x1040xf32, #tpu.memory_space<vmem>>, vector<1x784xf32>
    %c3 = arith.constant 3 : index
    %c0_15 = arith.constant 0 : index
    %c0_16 = arith.constant 0 : index
    %26 = vector.load %arg3[%c3, %c0_15, %c0_16] : memref<9x8x1xf32, #tpu.memory_space<vmem>>, vector<1x8x1xf32>
    %27 = vector.shape_cast %26 : vector<1x8x1xf32> to vector<8x1xf32>
    %28 = vector.broadcast %27 : vector<8x1xf32> to vector<8x784xf32>
    %29 = vector.broadcast %25 : vector<1x784xf32> to vector<8x784xf32>
    %30 = arith.mulf %28, %29 : vector<8x784xf32>
    %31 = arith.addf %24, %30 : vector<8x784xf32>
    %c0_17 = arith.constant 0 : index
    %c157 = arith.constant 157 : index
    %32 = vector.load %arg24[%c0_17, %c157] : memref<16x1040xf32, #tpu.memory_space<vmem>>, vector<1x784xf32>
    %c4 = arith.constant 4 : index
    %c0_18 = arith.constant 0 : index
    %c0_19 = arith.constant 0 : index
    %33 = vector.load %arg3[%c4, %c0_18, %c0_19] : memref<9x8x1xf32, #tpu.memory_space<vmem>>, vector<1x8x1xf32>
    %34 = vector.shape_cast %33 : vector<1x8x1xf32> to vector<8x1xf32>
    %35 = vector.broadcast %34 : vector<8x1xf32> to vector<8x784xf32>
    %36 = vector.broadcast %32 : vector<1x784xf32> to vector<8x784xf32>
    %37 = arith.mulf %35, %36 : vector<8x784xf32>
    %38 = arith.addf %31, %37 : vector<8x784xf32>
    %c0_20 = arith.constant 0 : index
    %c158 = arith.constant 158 : index
    %39 = vector.load %arg24[%c0_20, %c158] : memref<16x1040xf32, #tpu.memory_space<vmem>>, vector<1x784xf32>
    %c5 = arith.constant 5 : index
    %c0_21 = arith.constant 0 : index
    %c0_22 = arith.constant 0 : index
    %40 = vector.load %arg3[%c5, %c0_21, %c0_22] : memref<9x8x1xf32, #tpu.memory_space<vmem>>, vector<1x8x1xf32>
    %41 = vector.shape_cast %40 : vector<1x8x1xf32> to vector<8x1xf32>
    %42 = vector.broadcast %41 : vector<8x1xf32> to vector<8x784xf32>
    %43 = vector.broadcast %39 : vector<1x784xf32> to vector<8x784xf32>
    %44 = arith.mulf %42, %43 : vector<8x784xf32>
    %45 = arith.addf %38, %44 : vector<8x784xf32>
    %c0_23 = arith.constant 0 : index
    %c184 = arith.constant 184 : index
    %46 = vector.load %arg24[%c0_23, %c184] : memref<16x1040xf32, #tpu.memory_space<vmem>>, vector<1x784xf32>
    %c6 = arith.constant 6 : index
    %c0_24 = arith.constant 0 : index
    %c0_25 = arith.constant 0 : index
    %47 = vector.load %arg3[%c6, %c0_24, %c0_25] : memref<9x8x1xf32, #tpu.memory_space<vmem>>, vector<1x8x1xf32>
    %48 = vector.shape_cast %47 : vector<1x8x1xf32> to vector<8x1xf32>
    %49 = vector.broadcast %48 : vector<8x1xf32> to vector<8x784xf32>
    %50 = vector.broadcast %46 : vector<1x784xf32> to vector<8x784xf32>
    %51 = arith.mulf %49, %50 : vector<8x784xf32>
    %52 = arith.addf %45, %51 : vector<8x784xf32>
    %c0_26 = arith.constant 0 : index
    %c185 = arith.constant 185 : index
    %53 = vector.load %arg24[%c0_26, %c185] : memref<16x1040xf32, #tpu.memory_space<vmem>>, vector<1x784xf32>
    %c7 = arith.constant 7 : index
    %c0_27 = arith.constant 0 : index
    %c0_28 = arith.constant 0 : index
    %54 = vector.load %arg3[%c7, %c0_27, %c0_28] : memref<9x8x1xf32, #tpu.memory_space<vmem>>, vector<1x8x1xf32>
    %55 = vector.shape_cast %54 : vector<1x8x1xf32> to vector<8x1xf32>
    %56 = vector.broadcast %55 : vector<8x1xf32> to vector<8x784xf32>
    %57 = vector.broadcast %53 : vector<1x784xf32> to vector<8x784xf32>
    %58 = arith.mulf %56, %57 : vector<8x784xf32>
    %59 = arith.addf %52, %58 : vector<8x784xf32>
    %c0_29 = arith.constant 0 : index
    %c186 = arith.constant 186 : index
    %60 = vector.load %arg24[%c0_29, %c186] : memref<16x1040xf32, #tpu.memory_space<vmem>>, vector<1x784xf32>
    %c8 = arith.constant 8 : index
    %c0_30 = arith.constant 0 : index
    %c0_31 = arith.constant 0 : index
    %61 = vector.load %arg3[%c8, %c0_30, %c0_31] : memref<9x8x1xf32, #tpu.memory_space<vmem>>, vector<1x8x1xf32>
    %62 = vector.shape_cast %61 : vector<1x8x1xf32> to vector<8x1xf32>
    %63 = vector.broadcast %62 : vector<8x1xf32> to vector<8x784xf32>
    %64 = vector.broadcast %60 : vector<1x784xf32> to vector<8x784xf32>
    %65 = arith.mulf %63, %64 : vector<8x784xf32>
    %66 = arith.addf %59, %65 : vector<8x784xf32>
    %cst_32 = arith.constant 0.000000e+00 : f32
    %67 = vector.broadcast %cst_32 : f32 to vector<8x784xf32>
    %68 = arith.maximumf %66, %67 : vector<8x784xf32>
    %c0_33 = arith.constant 0 : index
    %c0_34 = arith.constant 0 : index
    %69 = vector.load %arg4[%c0_33, %c0_34] : memref<8x1xf32, #tpu.memory_space<vmem>>, vector<8x1xf32>
    %70 = vector.broadcast %69 : vector<8x1xf32> to vector<8x784xf32>
    %71 = arith.mulf %68, %70 : vector<8x784xf32>
    %c0_35 = arith.constant 0 : index
    %c0_36 = arith.constant 0 : index
    %72 = vector.load %arg5[%c0_35, %c0_36] : memref<8x1xf32, #tpu.memory_space<vmem>>, vector<8x1xf32>
    %73 = vector.broadcast %72 : vector<8x1xf32> to vector<8x784xf32>
    %74 = arith.addf %71, %73 : vector<8x784xf32>
    %c0_37 = arith.constant 0 : index
    %c128_38 = arith.constant 128 : index
    %75 = vector.load %arg24[%c0_37, %c128_38] : memref<16x1040xf32, #tpu.memory_space<vmem>>, vector<8x784xf32>
    tpu.vector_store %arg24[%c0_37, %c128_38], %74 {strides = array<i32>} : memref<16x1040xf32, #tpu.memory_space<vmem>>, vector<8x784xf32>,
    %cst_39 = arith.constant 0.000000e+00 : f32
    %76 = vector.broadcast %cst_39 : f32 to vector<10x784xf32>
    %c0_40 = arith.constant 0 : index
    %c128_41 = arith.constant 128 : index
    %77 = vector.load %arg24[%c0_40, %c128_41] : memref<16x1040xf32, #tpu.memory_space<vmem>>, vector<8x784xf32>
    %c0_42 = arith.constant 0 : index
    %c0_43 = arith.constant 0 : index
    %c0_44 = arith.constant 0 : index
    %78 = vector.load %arg6[%c0_42, %c0_43, %c0_44] : memref<9x10x8xf32, #tpu.memory_space<vmem>>, vector<1x10x8xf32>
    %79 = vector.shape_cast %78 : vector<1x10x8xf32> to vector<10x8xf32>
    %cst_45 = arith.constant dense<0.000000e+00> : vector<10x784xf32>
    %80 = tpu.matmul %79, %77, %cst_45 {dimension_numbers = #tpu.dot_dimension_numbers<[1], [0], [0], [1], [0, 0, 1, 1], [], []>} : vector<10x8xf32>, vector<8x784xf32>, vector<10x784xf32> -> vector<10x784xf32>
    %81 = arith.addf %76, %80 : vector<10x784xf32>
    %c0_46 = arith.constant 0 : index
    %c129_47 = arith.constant 129 : index
    %82 = vector.load %arg24[%c0_46, %c129_47] : memref<16x1040xf32, #tpu.memory_space<vmem>>, vector<8x784xf32>
    %c1_48 = arith.constant 1 : index
    %c0_49 = arith.constant 0 : index
    %c0_50 = arith.constant 0 : index
    %83 = vector.load %arg6[%c1_48, %c0_49, %c0_50] : memref<9x10x8xf32, #tpu.memory_space<vmem>>, vector<1x10x8xf32>
    %84 = vector.shape_cast %83 : vector<1x10x8xf32> to vector<10x8xf32>
    %cst_51 = arith.constant dense<0.000000e+00> : vector<10x784xf32>
    %85 = tpu.matmul %84, %82, %cst_51 {dimension_numbers = #tpu.dot_dimension_numbers<[1], [0], [0], [1], [0, 0, 1, 1], [], []>} : vector<10x8xf32>, vector<8x784xf32>, vector<10x784xf32> -> vector<10x784xf32>
    %86 = arith.addf %81, %85 : vector<10x784xf32>
    %c0_52 = arith.constant 0 : index
    %c130_53 = arith.constant 130 : index
    %87 = vector.load %arg24[%c0_52, %c130_53] : memref<16x1040xf32, #tpu.memory_space<vmem>>, vector<8x784xf32>
    %c2_54 = arith.constant 2 : index
    %c0_55 = arith.constant 0 : index
    %c0_56 = arith.constant 0 : index
    %88 = vector.load %arg6[%c2_54, %c0_55, %c0_56] : memref<9x10x8xf32, #tpu.memory_space<vmem>>, vector<1x10x8xf32>
    %89 = vector.shape_cast %88 : vector<1x10x8xf32> to vector<10x8xf32>
    %cst_57 = arith.constant dense<0.000000e+00> : vector<10x784xf32>
    %90 = tpu.matmul %89, %87, %cst_57 {dimension_numbers = #tpu.dot_dimension_numbers<[1], [0], [0], [1], [0, 0, 1, 1], [], []>} : vector<10x8xf32>, vector<8x784xf32>, vector<10x784xf32> -> vector<10x784xf32>
    %91 = arith.addf %86, %90 : vector<10x784xf32>
    %c0_58 = arith.constant 0 : index
    %c156_59 = arith.constant 156 : index
    %92 = vector.load %arg24[%c0_58, %c156_59] : memref<16x1040xf32, #tpu.memory_space<vmem>>, vector<8x784xf32>
    %c3_60 = arith.constant 3 : index
    %c0_61 = arith.constant 0 : index
    %c0_62 = arith.constant 0 : index
    %93 = vector.load %arg6[%c3_60, %c0_61, %c0_62] : memref<9x10x8xf32, #tpu.memory_space<vmem>>, vector<1x10x8xf32>
    %94 = vector.shape_cast %93 : vector<1x10x8xf32> to vector<10x8xf32>
    %cst_63 = arith.constant dense<0.000000e+00> : vector<10x784xf32>
    %95 = tpu.matmul %94, %92, %cst_63 {dimension_numbers = #tpu.dot_dimension_numbers<[1], [0], [0], [1], [0, 0, 1, 1], [], []>} : vector<10x8xf32>, vector<8x784xf32>, vector<10x784xf32> -> vector<10x784xf32>
    %96 = arith.addf %91, %95 : vector<10x784xf32>
    %c0_64 = arith.constant 0 : index
    %c157_65 = arith.constant 157 : index
    %97 = vector.load %arg24[%c0_64, %c157_65] : memref<16x1040xf32, #tpu.memory_space<vmem>>, vector<8x784xf32>
    %c4_66 = arith.constant 4 : index
    %c0_67 = arith.constant 0 : index
    %c0_68 = arith.constant 0 : index
    %98 = vector.load %arg6[%c4_66, %c0_67, %c0_68] : memref<9x10x8xf32, #tpu.memory_space<vmem>>, vector<1x10x8xf32>
    %99 = vector.shape_cast %98 : vector<1x10x8xf32> to vector<10x8xf32>
    %cst_69 = arith.constant dense<0.000000e+00> : vector<10x784xf32>
    %100 = tpu.matmul %99, %97, %cst_69 {dimension_numbers = #tpu.dot_dimension_numbers<[1], [0], [0], [1], [0, 0, 1, 1], [], []>} : vector<10x8xf32>, vector<8x784xf32>, vector<10x784xf32> -> vector<10x784xf32>
    %101 = arith.addf %96, %100 : vector<10x784xf32>
    %c0_70 = arith.constant 0 : index
    %c158_71 = arith.constant 158 : index
    %102 = vector.load %arg24[%c0_70, %c158_71] : memref<16x1040xf32, #tpu.memory_space<vmem>>, vector<8x784xf32>
    %c5_72 = arith.constant 5 : index
    %c0_73 = arith.constant 0 : index
    %c0_74 = arith.constant 0 : index
    %103 = vector.load %arg6[%c5_72, %c0_73, %c0_74] : memref<9x10x8xf32, #tpu.memory_space<vmem>>, vector<1x10x8xf32>
    %104 = vector.shape_cast %103 : vector<1x10x8xf32> to vector<10x8xf32>
    %cst_75 = arith.constant dense<0.000000e+00> : vector<10x784xf32>
    %105 = tpu.matmul %104, %102, %cst_75 {dimension_numbers = #tpu.dot_dimension_numbers<[1], [0], [0], [1], [0, 0, 1, 1], [], []>} : vector<10x8xf32>, vector<8x784xf32>, vector<10x784xf32> -> vector<10x784xf32>
    %106 = arith.addf %101, %105 : vector<10x784xf32>
    %c0_76 = arith.constant 0 : index
    %c184_77 = arith.constant 184 : index
    %107 = vector.load %arg24[%c0_76, %c184_77] : memref<16x1040xf32, #tpu.memory_space<vmem>>, vector<8x784xf32>
    %c6_78 = arith.constant 6 : index
    %c0_79 = arith.constant 0 : index
    %c0_80 = arith.constant 0 : index
    %108 = vector.load %arg6[%c6_78, %c0_79, %c0_80] : memref<9x10x8xf32, #tpu.memory_space<vmem>>, vector<1x10x8xf32>
    %109 = vector.shape_cast %108 : vector<1x10x8xf32> to vector<10x8xf32>
    %cst_81 = arith.constant dense<0.000000e+00> : vector<10x784xf32>
    %110 = tpu.matmul %109, %107, %cst_81 {dimension_numbers = #tpu.dot_dimension_numbers<[1], [0], [0], [1], [0, 0, 1, 1], [], []>} : vector<10x8xf32>, vector<8x784xf32>, vector<10x784xf32> -> vector<10x784xf32>
    %111 = arith.addf %106, %110 : vector<10x784xf32>
    %c0_82 = arith.constant 0 : index
    %c185_83 = arith.constant 185 : index
    %112 = vector.load %arg24[%c0_82, %c185_83] : memref<16x1040xf32, #tpu.memory_space<vmem>>, vector<8x784xf32>
    %c7_84 = arith.constant 7 : index
    %c0_85 = arith.constant 0 : index
    %c0_86 = arith.constant 0 : index
    %113 = vector.load %arg6[%c7_84, %c0_85, %c0_86] : memref<9x10x8xf32, #tpu.memory_space<vmem>>, vector<1x10x8xf32>
    %114 = vector.shape_cast %113 : vector<1x10x8xf32> to vector<10x8xf32>
    %cst_87 = arith.constant dense<0.000000e+00> : vector<10x784xf32>
    %115 = tpu.matmul %114, %112, %cst_87 {dimension_numbers = #tpu.dot_dimension_numbers<[1], [0], [0], [1], [0, 0, 1, 1], [], []>} : vector<10x8xf32>, vector<8x784xf32>, vector<10x784xf32> -> vector<10x784xf32>
    %116 = arith.addf %111, %115 : vector<10x784xf32>
    %c0_88 = arith.constant 0 : index
    %c186_89 = arith.constant 186 : index
    %117 = vector.load %arg24[%c0_88, %c186_89] : memref<16x1040xf32, #tpu.memory_space<vmem>>, vector<8x784xf32>
    %c8_90 = arith.constant 8 : index
    %c0_91 = arith.constant 0 : index
    %c0_92 = arith.constant 0 : index
    %118 = vector.load %arg6[%c8_90, %c0_91, %c0_92] : memref<9x10x8xf32, #tpu.memory_space<vmem>>, vector<1x10x8xf32>
    %119 = vector.shape_cast %118 : vector<1x10x8xf32> to vector<10x8xf32>
    %cst_93 = arith.constant dense<0.000000e+00> : vector<10x784xf32>
    %120 = tpu.matmul %119, %117, %cst_93 {dimension_numbers = #tpu.dot_dimension_numbers<[1], [0], [0], [1], [0, 0, 1, 1], [], []>} : vector<10x8xf32>, vector<8x784xf32>, vector<10x784xf32> -> vector<10x784xf32>
    %121 = arith.addf %116, %120 : vector<10x784xf32>
    %cst_94 = arith.constant 0.000000e+00 : f32
    %122 = vector.broadcast %cst_94 : f32 to vector<10x784xf32>
    %123 = arith.maximumf %121, %122 : vector<10x784xf32>
    %c0_95 = arith.constant 0 : index
    %c0_96 = arith.constant 0 : index
    %124 = vector.load %arg7[%c0_95, %c0_96] : memref<10x1xf32, #tpu.memory_space<vmem>>, vector<10x1xf32>
    %125 = vector.broadcast %124 : vector<10x1xf32> to vector<10x784xf32>
    %126 = arith.mulf %123, %125 : vector<10x784xf32>
    %c0_97 = arith.constant 0 : index
    %c0_98 = arith.constant 0 : index
    %127 = vector.load %arg8[%c0_97, %c0_98] : memref<10x1xf32, #tpu.memory_space<vmem>>, vector<10x1xf32>
    %128 = vector.broadcast %127 : vector<10x1xf32> to vector<10x784xf32>
    %129 = arith.addf %126, %128 : vector<10x784xf32>
    %c0_99 = arith.constant 0 : index
    %c0_100 = arith.constant 0 : index
    %130 = vector.load %arg9[%c0_99, %c0_100] : memref<12x10xf32, #tpu.memory_space<vmem>>, vector<12x10xf32>
    %cst_101 = arith.constant dense<0.000000e+00> : vector<12x784xf32>
    %131 = tpu.matmul %130, %129, %cst_101 {dimension_numbers = #tpu.dot_dimension_numbers<[1], [0], [0], [1], [0, 0, 1, 1], [], []>} : vector<12x10xf32>, vector<10x784xf32>, vector<12x784xf32> -> vector<12x784xf32>
    %c0_102 = arith.constant 0 : index
    %c128_103 = arith.constant 128 : index
    %132 = vector.load %arg24[%c0_102, %c128_103] : memref<16x1040xf32, #tpu.memory_space<vmem>>, vector<12x784xf32>
    tpu.vector_store %arg24[%c0_102, %c128_103], %131 {strides = array<i32>} : memref<16x1040xf32, #tpu.memory_space<vmem>>, vector<12x784xf32>,
    %c0_104 = arith.constant 0 : index
    %c128_105 = arith.constant 128 : index
    %133 = vector.load %arg24[%c0_104, %c128_105] : memref<16x1040xf32, #tpu.memory_space<vmem>>, vector<12x784xf32>
    %c0_106 = arith.constant 0 : index
    %c129_107 = arith.constant 129 : index
    %134 = vector.load %arg24[%c0_106, %c129_107] : memref<16x1040xf32, #tpu.memory_space<vmem>>, vector<12x784xf32>
    %c0_108 = arith.constant 0 : index
    %c156_109 = arith.constant 156 : index
    %135 = vector.load %arg24[%c0_108, %c156_109] : memref<16x1040xf32, #tpu.memory_space<vmem>>, vector<12x784xf32>
    %c0_110 = arith.constant 0 : index
    %c157_111 = arith.constant 157 : index
    %136 = vector.load %arg24[%c0_110, %c157_111] : memref<16x1040xf32, #tpu.memory_space<vmem>>, vector<12x784xf32>
    %137 = arith.maximumf %133, %134 : vector<12x784xf32>
    %138 = arith.maximumf %135, %136 : vector<12x784xf32>
    %139 = arith.maximumf %137, %138 : vector<12x784xf32>
    %c0_112 = arith.constant 0 : index
    %c128_113 = arith.constant 128 : index
    %140 = vector.load %arg24[%c0_112, %c128_113] : memref<16x1040xf32, #tpu.memory_space<vmem>>, vector<12x784xf32>
    tpu.vector_store %arg24[%c0_112, %c128_113], %139 {strides = array<i32>} : memref<16x1040xf32, #tpu.memory_space<vmem>>, vector<12x784xf32>,
    %cst_114 = arith.constant 0.000000e+00 : f32
    %141 = vector.broadcast %cst_114 : f32 to vector<14x784xf32>
    %c0_115 = arith.constant 0 : index
    %c128_116 = arith.constant 128 : index
    %142 = vector.load %arg24[%c0_115, %c128_116] : memref<16x1040xf32, #tpu.memory_space<vmem>>, vector<12x784xf32>
    %c0_117 = arith.constant 0 : index
    %c0_118 = arith.constant 0 : index
    %c0_119 = arith.constant 0 : index
    %143 = vector.load %arg10[%c0_117, %c0_118, %c0_119] : memref<9x14x12xf32, #tpu.memory_space<vmem>>, vector<1x14x12xf32>
    %144 = vector.shape_cast %143 : vector<1x14x12xf32> to vector<14x12xf32>
    %cst_120 = arith.constant dense<0.000000e+00> : vector<14x784xf32>
    %145 = tpu.matmul %144, %142, %cst_120 {dimension_numbers = #tpu.dot_dimension_numbers<[1], [0], [0], [1], [0, 0, 1, 1], [], []>} : vector<14x12xf32>, vector<12x784xf32>, vector<14x784xf32> -> vector<14x784xf32>
    %146 = arith.addf %141, %145 : vector<14x784xf32>
    %c0_121 = arith.constant 0 : index
    %c130_122 = arith.constant 130 : index
    %147 = vector.load %arg24[%c0_121, %c130_122] : memref<16x1040xf32, #tpu.memory_space<vmem>>, vector<12x784xf32>
    %c1_123 = arith.constant 1 : index
    %c0_124 = arith.constant 0 : index
    %c0_125 = arith.constant 0 : index
    %148 = vector.load %arg10[%c1_123, %c0_124, %c0_125] : memref<9x14x12xf32, #tpu.memory_space<vmem>>, vector<1x14x12xf32>
    %149 = vector.shape_cast %148 : vector<1x14x12xf32> to vector<14x12xf32>
    %cst_126 = arith.constant dense<0.000000e+00> : vector<14x784xf32>
    %150 = tpu.matmul %149, %147, %cst_126 {dimension_numbers = #tpu.dot_dimension_numbers<[1], [0], [0], [1], [0, 0, 1, 1], [], []>} : vector<14x12xf32>, vector<12x784xf32>, vector<14x784xf32> -> vector<14x784xf32>
    %151 = arith.addf %146, %150 : vector<14x784xf32>
    %c0_127 = arith.constant 0 : index
    %c132 = arith.constant 132 : index
    %152 = vector.load %arg24[%c0_127, %c132] : memref<16x1040xf32, #tpu.memory_space<vmem>>, vector<12x784xf32>
    %c2_128 = arith.constant 2 : index
    %c0_129 = arith.constant 0 : index
    %c0_130 = arith.constant 0 : index
    %153 = vector.load %arg10[%c2_128, %c0_129, %c0_130] : memref<9x14x12xf32, #tpu.memory_space<vmem>>, vector<1x14x12xf32>
    %154 = vector.shape_cast %153 : vector<1x14x12xf32> to vector<14x12xf32>
    %cst_131 = arith.constant dense<0.000000e+00> : vector<14x784xf32>
    %155 = tpu.matmul %154, %152, %cst_131 {dimension_numbers = #tpu.dot_dimension_numbers<[1], [0], [0], [1], [0, 0, 1, 1], [], []>} : vector<14x12xf32>, vector<12x784xf32>, vector<14x784xf32> -> vector<14x784xf32>
    %156 = arith.addf %151, %155 : vector<14x784xf32>
    %c0_132 = arith.constant 0 : index
    %c184_133 = arith.constant 184 : index
    %157 = vector.load %arg24[%c0_132, %c184_133] : memref<16x1040xf32, #tpu.memory_space<vmem>>, vector<12x784xf32>
    %c3_134 = arith.constant 3 : index
    %c0_135 = arith.constant 0 : index
    %c0_136 = arith.constant 0 : index
    %158 = vector.load %arg10[%c3_134, %c0_135, %c0_136] : memref<9x14x12xf32, #tpu.memory_space<vmem>>, vector<1x14x12xf32>
    %159 = vector.shape_cast %158 : vector<1x14x12xf32> to vector<14x12xf32>
    %cst_137 = arith.constant dense<0.000000e+00> : vector<14x784xf32>
    %160 = tpu.matmul %159, %157, %cst_137 {dimension_numbers = #tpu.dot_dimension_numbers<[1], [0], [0], [1], [0, 0, 1, 1], [], []>} : vector<14x12xf32>, vector<12x784xf32>, vector<14x784xf32> -> vector<14x784xf32>
    %161 = arith.addf %156, %160 : vector<14x784xf32>
    %c0_138 = arith.constant 0 : index
    %c186_139 = arith.constant 186 : index
    %162 = vector.load %arg24[%c0_138, %c186_139] : memref<16x1040xf32, #tpu.memory_space<vmem>>, vector<12x784xf32>
    %c4_140 = arith.constant 4 : index
    %c0_141 = arith.constant 0 : index
    %c0_142 = arith.constant 0 : index
    %163 = vector.load %arg10[%c4_140, %c0_141, %c0_142] : memref<9x14x12xf32, #tpu.memory_space<vmem>>, vector<1x14x12xf32>
    %164 = vector.shape_cast %163 : vector<1x14x12xf32> to vector<14x12xf32>
    %cst_143 = arith.constant dense<0.000000e+00> : vector<14x784xf32>
    %165 = tpu.matmul %164, %162, %cst_143 {dimension_numbers = #tpu.dot_dimension_numbers<[1], [0], [0], [1], [0, 0, 1, 1], [], []>} : vector<14x12xf32>, vector<12x784xf32>, vector<14x784xf32> -> vector<14x784xf32>
    %166 = arith.addf %161, %165 : vector<14x784xf32>
    %c0_144 = arith.constant 0 : index
    %c188 = arith.constant 188 : index
    %167 = vector.load %arg24[%c0_144, %c188] : memref<16x1040xf32, #tpu.memory_space<vmem>>, vector<12x784xf32>
    %c5_145 = arith.constant 5 : index
    %c0_146 = arith.constant 0 : index
    %c0_147 = arith.constant 0 : index
    %168 = vector.load %arg10[%c5_145, %c0_146, %c0_147] : memref<9x14x12xf32, #tpu.memory_space<vmem>>, vector<1x14x12xf32>
    %169 = vector.shape_cast %168 : vector<1x14x12xf32> to vector<14x12xf32>
    %cst_148 = arith.constant dense<0.000000e+00> : vector<14x784xf32>
    %170 = tpu.matmul %169, %167, %cst_148 {dimension_numbers = #tpu.dot_dimension_numbers<[1], [0], [0], [1], [0, 0, 1, 1], [], []>} : vector<14x12xf32>, vector<12x784xf32>, vector<14x784xf32> -> vector<14x784xf32>
    %171 = arith.addf %166, %170 : vector<14x784xf32>
    %c0_149 = arith.constant 0 : index
    %c240 = arith.constant 240 : index
    %172 = vector.load %arg24[%c0_149, %c240] : memref<16x1040xf32, #tpu.memory_space<vmem>>, vector<12x784xf32>
    %c6_150 = arith.constant 6 : index
    %c0_151 = arith.constant 0 : index
    %c0_152 = arith.constant 0 : index
    %173 = vector.load %arg10[%c6_150, %c0_151, %c0_152] : memref<9x14x12xf32, #tpu.memory_space<vmem>>, vector<1x14x12xf32>
    %174 = vector.shape_cast %173 : vector<1x14x12xf32> to vector<14x12xf32>
    %cst_153 = arith.constant dense<0.000000e+00> : vector<14x784xf32>
    %175 = tpu.matmul %174, %172, %cst_153 {dimension_numbers = #tpu.dot_dimension_numbers<[1], [0], [0], [1], [0, 0, 1, 1], [], []>} : vector<14x12xf32>, vector<12x784xf32>, vector<14x784xf32> -> vector<14x784xf32>
    %176 = arith.addf %171, %175 : vector<14x784xf32>
    %c0_154 = arith.constant 0 : index
    %c242 = arith.constant 242 : index
    %177 = vector.load %arg24[%c0_154, %c242] : memref<16x1040xf32, #tpu.memory_space<vmem>>, vector<12x784xf32>
    %c7_155 = arith.constant 7 : index
    %c0_156 = arith.constant 0 : index
    %c0_157 = arith.constant 0 : index
    %178 = vector.load %arg10[%c7_155, %c0_156, %c0_157] : memref<9x14x12xf32, #tpu.memory_space<vmem>>, vector<1x14x12xf32>
    %179 = vector.shape_cast %178 : vector<1x14x12xf32> to vector<14x12xf32>
    %cst_158 = arith.constant dense<0.000000e+00> : vector<14x784xf32>
    %180 = tpu.matmul %179, %177, %cst_158 {dimension_numbers = #tpu.dot_dimension_numbers<[1], [0], [0], [1], [0, 0, 1, 1], [], []>} : vector<14x12xf32>, vector<12x784xf32>, vector<14x784xf32> -> vector<14x784xf32>
    %181 = arith.addf %176, %180 : vector<14x784xf32>
    %c0_159 = arith.constant 0 : index
    %c244 = arith.constant 244 : index
    %182 = vector.load %arg24[%c0_159, %c244] : memref<16x1040xf32, #tpu.memory_space<vmem>>, vector<12x784xf32>
    %c8_160 = arith.constant 8 : index
    %c0_161 = arith.constant 0 : index
    %c0_162 = arith.constant 0 : index
    %183 = vector.load %arg10[%c8_160, %c0_161, %c0_162] : memref<9x14x12xf32, #tpu.memory_space<vmem>>, vector<1x14x12xf32>
    %184 = vector.shape_cast %183 : vector<1x14x12xf32> to vector<14x12xf32>
    %cst_163 = arith.constant dense<0.000000e+00> : vector<14x784xf32>
    %185 = tpu.matmul %184, %182, %cst_163 {dimension_numbers = #tpu.dot_dimension_numbers<[1], [0], [0], [1], [0, 0, 1, 1], [], []>} : vector<14x12xf32>, vector<12x784xf32>, vector<14x784xf32> -> vector<14x784xf32>
    %186 = arith.addf %181, %185 : vector<14x784xf32>
    %cst_164 = arith.constant 0.000000e+00 : f32
    %187 = vector.broadcast %cst_164 : f32 to vector<14x784xf32>
    %188 = arith.maximumf %186, %187 : vector<14x784xf32>
    %c0_165 = arith.constant 0 : index
    %c0_166 = arith.constant 0 : index
    %189 = vector.load %arg11[%c0_165, %c0_166] : memref<14x1xf32, #tpu.memory_space<vmem>>, vector<14x1xf32>
    %190 = vector.broadcast %189 : vector<14x1xf32> to vector<14x784xf32>
    %191 = arith.mulf %188, %190 : vector<14x784xf32>
    %c0_167 = arith.constant 0 : index
    %c0_168 = arith.constant 0 : index
    %192 = vector.load %arg12[%c0_167, %c0_168] : memref<14x1xf32, #tpu.memory_space<vmem>>, vector<14x1xf32>
    %193 = vector.broadcast %192 : vector<14x1xf32> to vector<14x784xf32>
    %194 = arith.addf %191, %193 : vector<14x784xf32>
    %c0_169 = arith.constant 0 : index
    %c128_170 = arith.constant 128 : index
    %195 = vector.load %arg24[%c0_169, %c128_170] : memref<16x1040xf32, #tpu.memory_space<vmem>>, vector<14x784xf32>
    tpu.vector_store %arg24[%c0_169, %c128_170], %194 {strides = array<i32>} : memref<16x1040xf32, #tpu.memory_space<vmem>>, vector<14x784xf32>,
    %cst_171 = arith.constant 0.000000e+00 : f32
    %196 = vector.broadcast %cst_171 : f32 to vector<16x784xf32>
    %c0_172 = arith.constant 0 : index
    %c128_173 = arith.constant 128 : index
    %197 = vector.load %arg24[%c0_172, %c128_173] : memref<16x1040xf32, #tpu.memory_space<vmem>>, vector<14x784xf32>
    %c0_174 = arith.constant 0 : index
    %c0_175 = arith.constant 0 : index
    %c0_176 = arith.constant 0 : index
    %198 = vector.load %arg13[%c0_174, %c0_175, %c0_176] : memref<9x16x14xf32, #tpu.memory_space<vmem>>, vector<1x16x14xf32>
    %199 = vector.shape_cast %198 : vector<1x16x14xf32> to vector<16x14xf32>
    %cst_177 = arith.constant dense<0.000000e+00> : vector<16x784xf32>
    %200 = tpu.matmul %199, %197, %cst_177 {dimension_numbers = #tpu.dot_dimension_numbers<[1], [0], [0], [1], [0, 0, 1, 1], [], []>} : vector<16x14xf32>, vector<14x784xf32>, vector<16x784xf32> -> vector<16x784xf32>
    %201 = arith.addf %196, %200 : vector<16x784xf32>
    %c0_178 = arith.constant 0 : index
    %c130_179 = arith.constant 130 : index
    %202 = vector.load %arg24[%c0_178, %c130_179] : memref<16x1040xf32, #tpu.memory_space<vmem>>, vector<14x784xf32>
    %c1_180 = arith.constant 1 : index
    %c0_181 = arith.constant 0 : index
    %c0_182 = arith.constant 0 : index
    %203 = vector.load %arg13[%c1_180, %c0_181, %c0_182] : memref<9x16x14xf32, #tpu.memory_space<vmem>>, vector<1x16x14xf32>
    %204 = vector.shape_cast %203 : vector<1x16x14xf32> to vector<16x14xf32>
    %cst_183 = arith.constant dense<0.000000e+00> : vector<16x784xf32>
    %205 = tpu.matmul %204, %202, %cst_183 {dimension_numbers = #tpu.dot_dimension_numbers<[1], [0], [0], [1], [0, 0, 1, 1], [], []>} : vector<16x14xf32>, vector<14x784xf32>, vector<16x784xf32> -> vector<16x784xf32>
    %206 = arith.addf %201, %205 : vector<16x784xf32>
    %c0_184 = arith.constant 0 : index
    %c132_185 = arith.constant 132 : index
    %207 = vector.load %arg24[%c0_184, %c132_185] : memref<16x1040xf32, #tpu.memory_space<vmem>>, vector<14x784xf32>
    %c2_186 = arith.constant 2 : index
    %c0_187 = arith.constant 0 : index
    %c0_188 = arith.constant 0 : index
    %208 = vector.load %arg13[%c2_186, %c0_187, %c0_188] : memref<9x16x14xf32, #tpu.memory_space<vmem>>, vector<1x16x14xf32>
    %209 = vector.shape_cast %208 : vector<1x16x14xf32> to vector<16x14xf32>
    %cst_189 = arith.constant dense<0.000000e+00> : vector<16x784xf32>
    %210 = tpu.matmul %209, %207, %cst_189 {dimension_numbers = #tpu.dot_dimension_numbers<[1], [0], [0], [1], [0, 0, 1, 1], [], []>} : vector<16x14xf32>, vector<14x784xf32>, vector<16x784xf32> -> vector<16x784xf32>
    %211 = arith.addf %206, %210 : vector<16x784xf32>
    %c0_190 = arith.constant 0 : index
    %c184_191 = arith.constant 184 : index
    %212 = vector.load %arg24[%c0_190, %c184_191] : memref<16x1040xf32, #tpu.memory_space<vmem>>, vector<14x784xf32>
    %c3_192 = arith.constant 3 : index
    %c0_193 = arith.constant 0 : index
    %c0_194 = arith.constant 0 : index
    %213 = vector.load %arg13[%c3_192, %c0_193, %c0_194] : memref<9x16x14xf32, #tpu.memory_space<vmem>>, vector<1x16x14xf32>
    %214 = vector.shape_cast %213 : vector<1x16x14xf32> to vector<16x14xf32>
    %cst_195 = arith.constant dense<0.000000e+00> : vector<16x784xf32>
    %215 = tpu.matmul %214, %212, %cst_195 {dimension_numbers = #tpu.dot_dimension_numbers<[1], [0], [0], [1], [0, 0, 1, 1], [], []>} : vector<16x14xf32>, vector<14x784xf32>, vector<16x784xf32> -> vector<16x784xf32>
    %216 = arith.addf %211, %215 : vector<16x784xf32>
    %c0_196 = arith.constant 0 : index
    %c186_197 = arith.constant 186 : index
    %217 = vector.load %arg24[%c0_196, %c186_197] : memref<16x1040xf32, #tpu.memory_space<vmem>>, vector<14x784xf32>
    %c4_198 = arith.constant 4 : index
    %c0_199 = arith.constant 0 : index
    %c0_200 = arith.constant 0 : index
    %218 = vector.load %arg13[%c4_198, %c0_199, %c0_200] : memref<9x16x14xf32, #tpu.memory_space<vmem>>, vector<1x16x14xf32>
    %219 = vector.shape_cast %218 : vector<1x16x14xf32> to vector<16x14xf32>
    %cst_201 = arith.constant dense<0.000000e+00> : vector<16x784xf32>
    %220 = tpu.matmul %219, %217, %cst_201 {dimension_numbers = #tpu.dot_dimension_numbers<[1], [0], [0], [1], [0, 0, 1, 1], [], []>} : vector<16x14xf32>, vector<14x784xf32>, vector<16x784xf32> -> vector<16x784xf32>
    %221 = arith.addf %216, %220 : vector<16x784xf32>
    %c0_202 = arith.constant 0 : index
    %c188_203 = arith.constant 188 : index
    %222 = vector.load %arg24[%c0_202, %c188_203] : memref<16x1040xf32, #tpu.memory_space<vmem>>, vector<14x784xf32>
    %c5_204 = arith.constant 5 : index
    %c0_205 = arith.constant 0 : index
    %c0_206 = arith.constant 0 : index
    %223 = vector.load %arg13[%c5_204, %c0_205, %c0_206] : memref<9x16x14xf32, #tpu.memory_space<vmem>>, vector<1x16x14xf32>
    %224 = vector.shape_cast %223 : vector<1x16x14xf32> to vector<16x14xf32>
    %cst_207 = arith.constant dense<0.000000e+00> : vector<16x784xf32>
    %225 = tpu.matmul %224, %222, %cst_207 {dimension_numbers = #tpu.dot_dimension_numbers<[1], [0], [0], [1], [0, 0, 1, 1], [], []>} : vector<16x14xf32>, vector<14x784xf32>, vector<16x784xf32> -> vector<16x784xf32>
    %226 = arith.addf %221, %225 : vector<16x784xf32>
    %c0_208 = arith.constant 0 : index
    %c240_209 = arith.constant 240 : index
    %227 = vector.load %arg24[%c0_208, %c240_209] : memref<16x1040xf32, #tpu.memory_space<vmem>>, vector<14x784xf32>
    %c6_210 = arith.constant 6 : index
    %c0_211 = arith.constant 0 : index
    %c0_212 = arith.constant 0 : index
    %228 = vector.load %arg13[%c6_210, %c0_211, %c0_212] : memref<9x16x14xf32, #tpu.memory_space<vmem>>, vector<1x16x14xf32>
    %229 = vector.shape_cast %228 : vector<1x16x14xf32> to vector<16x14xf32>
    %cst_213 = arith.constant dense<0.000000e+00> : vector<16x784xf32>
    %230 = tpu.matmul %229, %227, %cst_213 {dimension_numbers = #tpu.dot_dimension_numbers<[1], [0], [0], [1], [0, 0, 1, 1], [], []>} : vector<16x14xf32>, vector<14x784xf32>, vector<16x784xf32> -> vector<16x784xf32>
    %231 = arith.addf %226, %230 : vector<16x784xf32>
    %c0_214 = arith.constant 0 : index
    %c242_215 = arith.constant 242 : index
    %232 = vector.load %arg24[%c0_214, %c242_215] : memref<16x1040xf32, #tpu.memory_space<vmem>>, vector<14x784xf32>
    %c7_216 = arith.constant 7 : index
    %c0_217 = arith.constant 0 : index
    %c0_218 = arith.constant 0 : index
    %233 = vector.load %arg13[%c7_216, %c0_217, %c0_218] : memref<9x16x14xf32, #tpu.memory_space<vmem>>, vector<1x16x14xf32>
    %234 = vector.shape_cast %233 : vector<1x16x14xf32> to vector<16x14xf32>
    %cst_219 = arith.constant dense<0.000000e+00> : vector<16x784xf32>
    %235 = tpu.matmul %234, %232, %cst_219 {dimension_numbers = #tpu.dot_dimension_numbers<[1], [0], [0], [1], [0, 0, 1, 1], [], []>} : vector<16x14xf32>, vector<14x784xf32>, vector<16x784xf32> -> vector<16x784xf32>
    %236 = arith.addf %231, %235 : vector<16x784xf32>
    %c0_220 = arith.constant 0 : index
    %c244_221 = arith.constant 244 : index
    %237 = vector.load %arg24[%c0_220, %c244_221] : memref<16x1040xf32, #tpu.memory_space<vmem>>, vector<14x784xf32>
    %c8_222 = arith.constant 8 : index
    %c0_223 = arith.constant 0 : index
    %c0_224 = arith.constant 0 : index
    %238 = vector.load %arg13[%c8_222, %c0_223, %c0_224] : memref<9x16x14xf32, #tpu.memory_space<vmem>>, vector<1x16x14xf32>
    %239 = vector.shape_cast %238 : vector<1x16x14xf32> to vector<16x14xf32>
    %cst_225 = arith.constant dense<0.000000e+00> : vector<16x784xf32>
    %240 = tpu.matmul %239, %237, %cst_225 {dimension_numbers = #tpu.dot_dimension_numbers<[1], [0], [0], [1], [0, 0, 1, 1], [], []>} : vector<16x14xf32>, vector<14x784xf32>, vector<16x784xf32> -> vector<16x784xf32>
    %241 = arith.addf %236, %240 : vector<16x784xf32>
    %cst_226 = arith.constant 0.000000e+00 : f32
    %242 = vector.broadcast %cst_226 : f32 to vector<16x784xf32>
    %243 = arith.maximumf %241, %242 : vector<16x784xf32>
    %c0_227 = arith.constant 0 : index
    %c0_228 = arith.constant 0 : index
    %244 = vector.load %arg14[%c0_227, %c0_228] : memref<16x1xf32, #tpu.memory_space<vmem>>, vector<16x1xf32>
    %245 = vector.broadcast %244 : vector<16x1xf32> to vector<16x784xf32>
    %246 = arith.mulf %243, %245 : vector<16x784xf32>
    %c0_229 = arith.constant 0 : index
    %c0_230 = arith.constant 0 : index
    %247 = vector.load %arg15[%c0_229, %c0_230] : memref<16x1xf32, #tpu.memory_space<vmem>>, vector<16x1xf32>
    %248 = vector.broadcast %247 : vector<16x1xf32> to vector<16x784xf32>
    %249 = arith.addf %246, %248 : vector<16x784xf32>
    %c0_231 = arith.constant 0 : index
    %c128_232 = arith.constant 128 : index
    %250 = vector.load %arg24[%c0_231, %c128_232] : memref<16x1040xf32, #tpu.memory_space<vmem>>, vector<16x784xf32>
    tpu.vector_store %arg24[%c0_231, %c128_232], %249 {strides = array<i32>} : memref<16x1040xf32, #tpu.memory_space<vmem>>, vector<16x784xf32>,
    %cst_233 = arith.constant 0.000000e+00 : f32
    %251 = vector.broadcast %cst_233 : f32 to vector<8x784xf32>
    %c0_234 = arith.constant 0 : index
    %c128_235 = arith.constant 128 : index
    %252 = vector.load %arg24[%c0_234, %c128_235] : memref<16x1040xf32, #tpu.memory_space<vmem>>, vector<16x784xf32>
    %c0_236 = arith.constant 0 : index
    %c0_237 = arith.constant 0 : index
    %c0_238 = arith.constant 0 : index
    %253 = vector.load %arg16[%c0_236, %c0_237, %c0_238] : memref<9x8x16xf32, #tpu.memory_space<vmem>>, vector<1x8x16xf32>
    %254 = vector.shape_cast %253 : vector<1x8x16xf32> to vector<8x16xf32>
    %cst_239 = arith.constant dense<0.000000e+00> : vector<8x784xf32>
    %255 = tpu.matmul %254, %252, %cst_239 {dimension_numbers = #tpu.dot_dimension_numbers<[1], [0], [0], [1], [0, 0, 1, 1], [], []>} : vector<8x16xf32>, vector<16x784xf32>, vector<8x784xf32> -> vector<8x784xf32>
    %256 = arith.addf %251, %255 : vector<8x784xf32>
    %c0_240 = arith.constant 0 : index
    %c130_241 = arith.constant 130 : index
    %257 = vector.load %arg24[%c0_240, %c130_241] : memref<16x1040xf32, #tpu.memory_space<vmem>>, vector<16x784xf32>
    %c1_242 = arith.constant 1 : index
    %c0_243 = arith.constant 0 : index
    %c0_244 = arith.constant 0 : index
    %258 = vector.load %arg16[%c1_242, %c0_243, %c0_244] : memref<9x8x16xf32, #tpu.memory_space<vmem>>, vector<1x8x16xf32>
    %259 = vector.shape_cast %258 : vector<1x8x16xf32> to vector<8x16xf32>
    %cst_245 = arith.constant dense<0.000000e+00> : vector<8x784xf32>
    %260 = tpu.matmul %259, %257, %cst_245 {dimension_numbers = #tpu.dot_dimension_numbers<[1], [0], [0], [1], [0, 0, 1, 1], [], []>} : vector<8x16xf32>, vector<16x784xf32>, vector<8x784xf32> -> vector<8x784xf32>
    %261 = arith.addf %256, %260 : vector<8x784xf32>
    %c0_246 = arith.constant 0 : index
    %c132_247 = arith.constant 132 : index
    %262 = vector.load %arg24[%c0_246, %c132_247] : memref<16x1040xf32, #tpu.memory_space<vmem>>, vector<16x784xf32>
    %c2_248 = arith.constant 2 : index
    %c0_249 = arith.constant 0 : index
    %c0_250 = arith.constant 0 : index
    %263 = vector.load %arg16[%c2_248, %c0_249, %c0_250] : memref<9x8x16xf32, #tpu.memory_space<vmem>>, vector<1x8x16xf32>
    %264 = vector.shape_cast %263 : vector<1x8x16xf32> to vector<8x16xf32>
    %cst_251 = arith.constant dense<0.000000e+00> : vector<8x784xf32>
    %265 = tpu.matmul %264, %262, %cst_251 {dimension_numbers = #tpu.dot_dimension_numbers<[1], [0], [0], [1], [0, 0, 1, 1], [], []>} : vector<8x16xf32>, vector<16x784xf32>, vector<8x784xf32> -> vector<8x784xf32>
    %266 = arith.addf %261, %265 : vector<8x784xf32>
    %c0_252 = arith.constant 0 : index
    %c184_253 = arith.constant 184 : index
    %267 = vector.load %arg24[%c0_252, %c184_253] : memref<16x1040xf32, #tpu.memory_space<vmem>>, vector<16x784xf32>
    %c3_254 = arith.constant 3 : index
    %c0_255 = arith.constant 0 : index
    %c0_256 = arith.constant 0 : index
    %268 = vector.load %arg16[%c3_254, %c0_255, %c0_256] : memref<9x8x16xf32, #tpu.memory_space<vmem>>, vector<1x8x16xf32>
    %269 = vector.shape_cast %268 : vector<1x8x16xf32> to vector<8x16xf32>
    %cst_257 = arith.constant dense<0.000000e+00> : vector<8x784xf32>
    %270 = tpu.matmul %269, %267, %cst_257 {dimension_numbers = #tpu.dot_dimension_numbers<[1], [0], [0], [1], [0, 0, 1, 1], [], []>} : vector<8x16xf32>, vector<16x784xf32>, vector<8x784xf32> -> vector<8x784xf32>
    %271 = arith.addf %266, %270 : vector<8x784xf32>
    %c0_258 = arith.constant 0 : index
    %c186_259 = arith.constant 186 : index
    %272 = vector.load %arg24[%c0_258, %c186_259] : memref<16x1040xf32, #tpu.memory_space<vmem>>, vector<16x784xf32>
    %c4_260 = arith.constant 4 : index
    %c0_261 = arith.constant 0 : index
    %c0_262 = arith.constant 0 : index
    %273 = vector.load %arg16[%c4_260, %c0_261, %c0_262] : memref<9x8x16xf32, #tpu.memory_space<vmem>>, vector<1x8x16xf32>
    %274 = vector.shape_cast %273 : vector<1x8x16xf32> to vector<8x16xf32>
    %cst_263 = arith.constant dense<0.000000e+00> : vector<8x784xf32>
    %275 = tpu.matmul %274, %272, %cst_263 {dimension_numbers = #tpu.dot_dimension_numbers<[1], [0], [0], [1], [0, 0, 1, 1], [], []>} : vector<8x16xf32>, vector<16x784xf32>, vector<8x784xf32> -> vector<8x784xf32>
    %276 = arith.addf %271, %275 : vector<8x784xf32>
    %c0_264 = arith.constant 0 : index
    %c188_265 = arith.constant 188 : index
    %277 = vector.load %arg24[%c0_264, %c188_265] : memref<16x1040xf32, #tpu.memory_space<vmem>>, vector<16x784xf32>
    %c5_266 = arith.constant 5 : index
    %c0_267 = arith.constant 0 : index
    %c0_268 = arith.constant 0 : index
    %278 = vector.load %arg16[%c5_266, %c0_267, %c0_268] : memref<9x8x16xf32, #tpu.memory_space<vmem>>, vector<1x8x16xf32>
    %279 = vector.shape_cast %278 : vector<1x8x16xf32> to vector<8x16xf32>
    %cst_269 = arith.constant dense<0.000000e+00> : vector<8x784xf32>
    %280 = tpu.matmul %279, %277, %cst_269 {dimension_numbers = #tpu.dot_dimension_numbers<[1], [0], [0], [1], [0, 0, 1, 1], [], []>} : vector<8x16xf32>, vector<16x784xf32>, vector<8x784xf32> -> vector<8x784xf32>
    %281 = arith.addf %276, %280 : vector<8x784xf32>
    %c0_270 = arith.constant 0 : index
    %c240_271 = arith.constant 240 : index
    %282 = vector.load %arg24[%c0_270, %c240_271] : memref<16x1040xf32, #tpu.memory_space<vmem>>, vector<16x784xf32>
    %c6_272 = arith.constant 6 : index
    %c0_273 = arith.constant 0 : index
    %c0_274 = arith.constant 0 : index
    %283 = vector.load %arg16[%c6_272, %c0_273, %c0_274] : memref<9x8x16xf32, #tpu.memory_space<vmem>>, vector<1x8x16xf32>
    %284 = vector.shape_cast %283 : vector<1x8x16xf32> to vector<8x16xf32>
    %cst_275 = arith.constant dense<0.000000e+00> : vector<8x784xf32>
    %285 = tpu.matmul %284, %282, %cst_275 {dimension_numbers = #tpu.dot_dimension_numbers<[1], [0], [0], [1], [0, 0, 1, 1], [], []>} : vector<8x16xf32>, vector<16x784xf32>, vector<8x784xf32> -> vector<8x784xf32>
    %286 = arith.addf %281, %285 : vector<8x784xf32>
    %c0_276 = arith.constant 0 : index
    %c242_277 = arith.constant 242 : index
    %287 = vector.load %arg24[%c0_276, %c242_277] : memref<16x1040xf32, #tpu.memory_space<vmem>>, vector<16x784xf32>
    %c7_278 = arith.constant 7 : index
    %c0_279 = arith.constant 0 : index
    %c0_280 = arith.constant 0 : index
    %288 = vector.load %arg16[%c7_278, %c0_279, %c0_280] : memref<9x8x16xf32, #tpu.memory_space<vmem>>, vector<1x8x16xf32>
    %289 = vector.shape_cast %288 : vector<1x8x16xf32> to vector<8x16xf32>
    %cst_281 = arith.constant dense<0.000000e+00> : vector<8x784xf32>
    %290 = tpu.matmul %289, %287, %cst_281 {dimension_numbers = #tpu.dot_dimension_numbers<[1], [0], [0], [1], [0, 0, 1, 1], [], []>} : vector<8x16xf32>, vector<16x784xf32>, vector<8x784xf32> -> vector<8x784xf32>
    %291 = arith.addf %286, %290 : vector<8x784xf32>
    %c0_282 = arith.constant 0 : index
    %c244_283 = arith.constant 244 : index
    %292 = vector.load %arg24[%c0_282, %c244_283] : memref<16x1040xf32, #tpu.memory_space<vmem>>, vector<16x784xf32>
    %c8_284 = arith.constant 8 : index
    %c0_285 = arith.constant 0 : index
    %c0_286 = arith.constant 0 : index
    %293 = vector.load %arg16[%c8_284, %c0_285, %c0_286] : memref<9x8x16xf32, #tpu.memory_space<vmem>>, vector<1x8x16xf32>
    %294 = vector.shape_cast %293 : vector<1x8x16xf32> to vector<8x16xf32>
    %cst_287 = arith.constant dense<0.000000e+00> : vector<8x784xf32>
    %295 = tpu.matmul %294, %292, %cst_287 {dimension_numbers = #tpu.dot_dimension_numbers<[1], [0], [0], [1], [0, 0, 1, 1], [], []>} : vector<8x16xf32>, vector<16x784xf32>, vector<8x784xf32> -> vector<8x784xf32>
    %296 = arith.addf %291, %295 : vector<8x784xf32>
    %cst_288 = arith.constant 0.000000e+00 : f32
    %297 = vector.broadcast %cst_288 : f32 to vector<8x784xf32>
    %298 = arith.maximumf %296, %297 : vector<8x784xf32>
    %c0_289 = arith.constant 0 : index
    %c0_290 = arith.constant 0 : index
    %299 = vector.load %arg17[%c0_289, %c0_290] : memref<8x1xf32, #tpu.memory_space<vmem>>, vector<8x1xf32>
    %300 = vector.broadcast %299 : vector<8x1xf32> to vector<8x784xf32>
    %301 = arith.mulf %298, %300 : vector<8x784xf32>
    %c0_291 = arith.constant 0 : index
    %c0_292 = arith.constant 0 : index
    %302 = vector.load %arg18[%c0_291, %c0_292] : memref<8x1xf32, #tpu.memory_space<vmem>>, vector<8x1xf32>
    %303 = vector.broadcast %302 : vector<8x1xf32> to vector<8x784xf32>
    %304 = arith.addf %301, %303 : vector<8x784xf32>
    %c0_293 = arith.constant 0 : index
    %c0_294 = arith.constant 0 : index
    %305 = vector.load %arg2[%c0_293, %c0_294] : memref<1x784xf32, #tpu.memory_space<vmem>>, vector<1x784xf32>
    %cst_295 = arith.constant 5.000000e-01 : f32
    %306 = vector.broadcast %cst_295 : f32 to vector<1x784xf32>
    %307 = arith.cmpf ogt, %305, %306 : vector<1x784xf32>
    %cst_296 = arith.constant 0.000000e+00 : f32
    %308 = vector.broadcast %cst_296 : f32 to vector<16x1040xf32>
    %c0_297 = arith.constant 0 : index
    %c0_298 = arith.constant 0 : index
    %309 = vector.load %arg24[%c0_297, %c0_298] : memref<16x1040xf32, #tpu.memory_space<vmem>>, vector<16x1040xf32>
    tpu.vector_store %arg24[%c0_297, %c0_298], %308 {strides = array<i32>} : memref<16x1040xf32, #tpu.memory_space<vmem>>, vector<16x1040xf32>,
    %cst_299 = arith.constant 0.000000e+00 : f32
    %310 = vector.shape_cast %307 : vector<1x784xi1> to vector<1x784xi1>
    %311 = vector.broadcast %310 : vector<1x784xi1> to vector<8x784xi1>
    %312 = vector.broadcast %cst_299 : f32 to vector<8x784xf32>
    %313 = arith.select %311, %304, %312 : vector<8x784xi1>, vector<8x784xf32>
    %c0_300 = arith.constant 0 : index
    %c128_301 = arith.constant 128 : index
    %314 = vector.load %arg24[%c0_300, %c128_301] : memref<16x1040xf32, #tpu.memory_space<vmem>>, vector<8x784xf32>
    tpu.vector_store %arg24[%c0_300, %c128_301], %313 {strides = array<i32>} : memref<16x1040xf32, #tpu.memory_space<vmem>>, vector<8x784xf32>,
    %cst_302 = arith.constant 0.000000e+00 : f32
    %315 = vector.broadcast %cst_302 : f32 to vector<12x784xf32>
    %c0_303 = arith.constant 0 : index
    %c70 = arith.constant 70 : index
    %316 = vector.load %arg24[%c0_303, %c70] : memref<16x1040xf32, #tpu.memory_space<vmem>>, vector<8x784xf32>
    %c0_304 = arith.constant 0 : index
    %c0_305 = arith.constant 0 : index
    %c0_306 = arith.constant 0 : index
    %317 = vector.load %arg19[%c0_304, %c0_305, %c0_306] : memref<9x12x8xf32, #tpu.memory_space<vmem>>, vector<1x12x8xf32>
    %318 = vector.shape_cast %317 : vector<1x12x8xf32> to vector<12x8xf32>
    %cst_307 = arith.constant dense<0.000000e+00> : vector<12x784xf32>
    %319 = tpu.matmul %318, %316, %cst_307 {dimension_numbers = #tpu.dot_dimension_numbers<[1], [0], [0], [1], [0, 0, 1, 1], [], []>} : vector<12x8xf32>, vector<8x784xf32>, vector<12x784xf32> -> vector<12x784xf32>
    %320 = arith.addf %315, %319 : vector<12x784xf32>
    %c0_308 = arith.constant 0 : index
    %c72 = arith.constant 72 : index
    %321 = vector.load %arg24[%c0_308, %c72] : memref<16x1040xf32, #tpu.memory_space<vmem>>, vector<8x784xf32>
    %c1_309 = arith.constant 1 : index
    %c0_310 = arith.constant 0 : index
    %c0_311 = arith.constant 0 : index
    %322 = vector.load %arg19[%c1_309, %c0_310, %c0_311] : memref<9x12x8xf32, #tpu.memory_space<vmem>>, vector<1x12x8xf32>
    %323 = vector.shape_cast %322 : vector<1x12x8xf32> to vector<12x8xf32>
    %cst_312 = arith.constant dense<0.000000e+00> : vector<12x784xf32>
    %324 = tpu.matmul %323, %321, %cst_312 {dimension_numbers = #tpu.dot_dimension_numbers<[1], [0], [0], [1], [0, 0, 1, 1], [], []>} : vector<12x8xf32>, vector<8x784xf32>, vector<12x784xf32> -> vector<12x784xf32>
    %325 = arith.addf %320, %324 : vector<12x784xf32>
    %c0_313 = arith.constant 0 : index
    %c74 = arith.constant 74 : index
    %326 = vector.load %arg24[%c0_313, %c74] : memref<16x1040xf32, #tpu.memory_space<vmem>>, vector<8x784xf32>
    %c2_314 = arith.constant 2 : index
    %c0_315 = arith.constant 0 : index
    %c0_316 = arith.constant 0 : index
    %327 = vector.load %arg19[%c2_314, %c0_315, %c0_316] : memref<9x12x8xf32, #tpu.memory_space<vmem>>, vector<1x12x8xf32>
    %328 = vector.shape_cast %327 : vector<1x12x8xf32> to vector<12x8xf32>
    %cst_317 = arith.constant dense<0.000000e+00> : vector<12x784xf32>
    %329 = tpu.matmul %328, %326, %cst_317 {dimension_numbers = #tpu.dot_dimension_numbers<[1], [0], [0], [1], [0, 0, 1, 1], [], []>} : vector<12x8xf32>, vector<8x784xf32>, vector<12x784xf32> -> vector<12x784xf32>
    %330 = arith.addf %325, %329 : vector<12x784xf32>
    %c0_318 = arith.constant 0 : index
    %c126 = arith.constant 126 : index
    %331 = vector.load %arg24[%c0_318, %c126] : memref<16x1040xf32, #tpu.memory_space<vmem>>, vector<8x784xf32>
    %c3_319 = arith.constant 3 : index
    %c0_320 = arith.constant 0 : index
    %c0_321 = arith.constant 0 : index
    %332 = vector.load %arg19[%c3_319, %c0_320, %c0_321] : memref<9x12x8xf32, #tpu.memory_space<vmem>>, vector<1x12x8xf32>
    %333 = vector.shape_cast %332 : vector<1x12x8xf32> to vector<12x8xf32>
    %cst_322 = arith.constant dense<0.000000e+00> : vector<12x784xf32>
    %334 = tpu.matmul %333, %331, %cst_322 {dimension_numbers = #tpu.dot_dimension_numbers<[1], [0], [0], [1], [0, 0, 1, 1], [], []>} : vector<12x8xf32>, vector<8x784xf32>, vector<12x784xf32> -> vector<12x784xf32>
    %335 = arith.addf %330, %334 : vector<12x784xf32>
    %c0_323 = arith.constant 0 : index
    %c128_324 = arith.constant 128 : index
    %336 = vector.load %arg24[%c0_323, %c128_324] : memref<16x1040xf32, #tpu.memory_space<vmem>>, vector<8x784xf32>
    %c4_325 = arith.constant 4 : index
    %c0_326 = arith.constant 0 : index
    %c0_327 = arith.constant 0 : index
    %337 = vector.load %arg19[%c4_325, %c0_326, %c0_327] : memref<9x12x8xf32, #tpu.memory_space<vmem>>, vector<1x12x8xf32>
    %338 = vector.shape_cast %337 : vector<1x12x8xf32> to vector<12x8xf32>
    %cst_328 = arith.constant dense<0.000000e+00> : vector<12x784xf32>
    %339 = tpu.matmul %338, %336, %cst_328 {dimension_numbers = #tpu.dot_dimension_numbers<[1], [0], [0], [1], [0, 0, 1, 1], [], []>} : vector<12x8xf32>, vector<8x784xf32>, vector<12x784xf32> -> vector<12x784xf32>
    %340 = arith.addf %335, %339 : vector<12x784xf32>
    %c0_329 = arith.constant 0 : index
    %c130_330 = arith.constant 130 : index
    %341 = vector.load %arg24[%c0_329, %c130_330] : memref<16x1040xf32, #tpu.memory_space<vmem>>, vector<8x784xf32>
    %c5_331 = arith.constant 5 : index
    %c0_332 = arith.constant 0 : index
    %c0_333 = arith.constant 0 : index
    %342 = vector.load %arg19[%c5_331, %c0_332, %c0_333] : memref<9x12x8xf32, #tpu.memory_space<vmem>>, vector<1x12x8xf32>
    %343 = vector.shape_cast %342 : vector<1x12x8xf32> to vector<12x8xf32>
    %cst_334 = arith.constant dense<0.000000e+00> : vector<12x784xf32>
    %344 = tpu.matmul %343, %341, %cst_334 {dimension_numbers = #tpu.dot_dimension_numbers<[1], [0], [0], [1], [0, 0, 1, 1], [], []>} : vector<12x8xf32>, vector<8x784xf32>, vector<12x784xf32> -> vector<12x784xf32>
    %345 = arith.addf %340, %344 : vector<12x784xf32>
    %c0_335 = arith.constant 0 : index
    %c182 = arith.constant 182 : index
    %346 = vector.load %arg24[%c0_335, %c182] : memref<16x1040xf32, #tpu.memory_space<vmem>>, vector<8x784xf32>
    %c6_336 = arith.constant 6 : index
    %c0_337 = arith.constant 0 : index
    %c0_338 = arith.constant 0 : index
    %347 = vector.load %arg19[%c6_336, %c0_337, %c0_338] : memref<9x12x8xf32, #tpu.memory_space<vmem>>, vector<1x12x8xf32>
    %348 = vector.shape_cast %347 : vector<1x12x8xf32> to vector<12x8xf32>
    %cst_339 = arith.constant dense<0.000000e+00> : vector<12x784xf32>
    %349 = tpu.matmul %348, %346, %cst_339 {dimension_numbers = #tpu.dot_dimension_numbers<[1], [0], [0], [1], [0, 0, 1, 1], [], []>} : vector<12x8xf32>, vector<8x784xf32>, vector<12x784xf32> -> vector<12x784xf32>
    %350 = arith.addf %345, %349 : vector<12x784xf32>
    %c0_340 = arith.constant 0 : index
    %c184_341 = arith.constant 184 : index
    %351 = vector.load %arg24[%c0_340, %c184_341] : memref<16x1040xf32, #tpu.memory_space<vmem>>, vector<8x784xf32>
    %c7_342 = arith.constant 7 : index
    %c0_343 = arith.constant 0 : index
    %c0_344 = arith.constant 0 : index
    %352 = vector.load %arg19[%c7_342, %c0_343, %c0_344] : memref<9x12x8xf32, #tpu.memory_space<vmem>>, vector<1x12x8xf32>
    %353 = vector.shape_cast %352 : vector<1x12x8xf32> to vector<12x8xf32>
    %cst_345 = arith.constant dense<0.000000e+00> : vector<12x784xf32>
    %354 = tpu.matmul %353, %351, %cst_345 {dimension_numbers = #tpu.dot_dimension_numbers<[1], [0], [0], [1], [0, 0, 1, 1], [], []>} : vector<12x8xf32>, vector<8x784xf32>, vector<12x784xf32> -> vector<12x784xf32>
    %355 = arith.addf %350, %354 : vector<12x784xf32>
    %c0_346 = arith.constant 0 : index
    %c186_347 = arith.constant 186 : index
    %356 = vector.load %arg24[%c0_346, %c186_347] : memref<16x1040xf32, #tpu.memory_space<vmem>>, vector<8x784xf32>
    %c8_348 = arith.constant 8 : index
    %c0_349 = arith.constant 0 : index
    %c0_350 = arith.constant 0 : index
    %357 = vector.load %arg19[%c8_348, %c0_349, %c0_350] : memref<9x12x8xf32, #tpu.memory_space<vmem>>, vector<1x12x8xf32>
    %358 = vector.shape_cast %357 : vector<1x12x8xf32> to vector<12x8xf32>
    %cst_351 = arith.constant dense<0.000000e+00> : vector<12x784xf32>
    %359 = tpu.matmul %358, %356, %cst_351 {dimension_numbers = #tpu.dot_dimension_numbers<[1], [0], [0], [1], [0, 0, 1, 1], [], []>} : vector<12x8xf32>, vector<8x784xf32>, vector<12x784xf32> -> vector<12x784xf32>
    %360 = arith.addf %355, %359 : vector<12x784xf32>
    %cst_352 = arith.constant 0.000000e+00 : f32
    %361 = vector.broadcast %cst_352 : f32 to vector<12x784xf32>
    %362 = arith.maximumf %360, %361 : vector<12x784xf32>
    %c0_353 = arith.constant 0 : index
    %c0_354 = arith.constant 0 : index
    %363 = vector.load %arg20[%c0_353, %c0_354] : memref<12x1xf32, #tpu.memory_space<vmem>>, vector<12x1xf32>
    %364 = vector.broadcast %363 : vector<12x1xf32> to vector<12x784xf32>
    %365 = arith.mulf %362, %364 : vector<12x784xf32>
    %c0_355 = arith.constant 0 : index
    %c0_356 = arith.constant 0 : index
    %366 = vector.load %arg21[%c0_355, %c0_356] : memref<12x1xf32, #tpu.memory_space<vmem>>, vector<12x1xf32>
    %367 = vector.broadcast %366 : vector<12x1xf32> to vector<12x784xf32>
    %368 = arith.addf %365, %367 : vector<12x784xf32>
    %cst_357 = arith.constant 0.000000e+00 : f32
    %369 = vector.shape_cast %307 : vector<1x784xi1> to vector<1x784xi1>
    %370 = vector.broadcast %369 : vector<1x784xi1> to vector<12x784xi1>
    %371 = vector.broadcast %cst_357 : f32 to vector<12x784xf32>
    %372 = arith.select %370, %368, %371 : vector<12x784xi1>, vector<12x784xf32>
    %cst_358 = arith.constant dense<0.000000e+00> : vector<12xf32>
    %373 = vector.multi_reduction <add>, %372, %cst_358 [1] : vector<12x784xf32> to vector<12xf32>
    %374 = vector.shape_cast %373 : vector<12xf32> to vector<12x1xf32>
    %cst_359 = arith.constant 0.027777778 : f32
    %375 = vector.broadcast %cst_359 : f32 to vector<12x1xf32>
    %376 = arith.mulf %374, %375 : vector<12x1xf32>
    %c0_360 = arith.constant 0 : index
    %c0_361 = arith.constant 0 : index
    %377 = vector.load %arg22[%c0_360, %c0_361] : memref<10x12xf32, #tpu.memory_space<vmem>>, vector<10x12xf32>
    %cst_362 = arith.constant dense<0.000000e+00> : vector<10x1xf32>
    %378 = tpu.matmul %377, %376, %cst_362 {dimension_numbers = #tpu.dot_dimension_numbers<[1], [0], [0], [1], [0, 0, 1, 1], [], []>} : vector<10x12xf32>, vector<12x1xf32>, vector<10x1xf32> -> vector<10x1xf32>
    %cst_363 = arith.constant dense<0xFF800000> : vector<1xf32>
    %379 = vector.multi_reduction <maximumf>, %378, %cst_363 [0] : vector<10x1xf32> to vector<1xf32>
    %380 = vector.shape_cast %379 : vector<1xf32> to vector<1x1xf32>
    %381 = vector.broadcast %380 : vector<1x1xf32> to vector<10x1xf32>
    %382 = arith.subf %378, %381 : vector<10x1xf32>
    %383 = math.exp %382 : vector<10x1xf32>
    %cst_364 = arith.constant dense<0.000000e+00> : vector<1xf32>
    %384 = vector.multi_reduction <add>, %383, %cst_364 [0] : vector<10x1xf32> to vector<1xf32>
    %385 = vector.shape_cast %384 : vector<1xf32> to vector<1x1xf32>
    %386 = math.log %385 : vector<1x1xf32>
    %387 = vector.broadcast %386 : vector<1x1xf32> to vector<10x1xf32>
    %388 = arith.subf %382, %387 : vector<10x1xf32>
    %c0_365 = arith.constant 0 : index
    %c0_366 = arith.constant 0 : index
    %c0_367 = arith.constant 0 : index
    %389 = vector.load %arg23[%c0_365, %c0_366, %c0_367] : memref<1x10x1xf32, #tpu.memory_space<vmem>>, vector<1x10x1xf32>
    %390 = vector.shape_cast %389 : vector<1x10x1xf32> to vector<10x1xf32>
    %391 = vector.shape_cast %388 : vector<10x1xf32> to vector<1x10x1xf32>
    tpu.vector_store %arg23[%c0_365, %c0_366, %c0_367], %391 {strides = array<i32>} : memref<1x10x1xf32, #tpu.memory_space<vmem>>, vector<1x10x1xf32>,
    return
  }
  func.func @transform_0(%arg0: i32) -> (i32, i32, i32) {
    %c0_i32 = arith.constant 0 : i32
    %c0_i32_0 = arith.constant 0 : i32
    %c0_i32_1 = arith.constant 0 : i32
    return %arg0, %c0_i32, %c0_i32_0 : i32, i32, i32
  }
  func.func @transform_1(%arg0: i32) -> (i32, i32) {
    %c0_i32 = arith.constant 0 : i32
    %c0_i32_0 = arith.constant 0 : i32
    %c0_i32_1 = arith.constant 0 : i32
    return %c0_i32, %c0_i32_0 : i32, i32
  }
  func.func @transform_2(%arg0: i32) -> (i32, i32, i32) {
    %c0_i32 = arith.constant 0 : i32
    %c0_i32_0 = arith.constant 0 : i32
    %c0_i32_1 = arith.constant 0 : i32
    %c0_i32_2 = arith.constant 0 : i32
    return %c0_i32, %c0_i32_0, %c0_i32_1 : i32, i32, i32
  }
  func.func @transform_3(%arg0: i32) -> (i32, i32) {
    %c0_i32 = arith.constant 0 : i32
    %c0_i32_0 = arith.constant 0 : i32
    %c0_i32_1 = arith.constant 0 : i32
    return %c0_i32, %c0_i32_0 : i32, i32
  }
  func.func @transform_4(%arg0: i32) -> (i32, i32) {
    %c0_i32 = arith.constant 0 : i32
    %c0_i32_0 = arith.constant 0 : i32
    %c0_i32_1 = arith.constant 0 : i32
    return %c0_i32, %c0_i32_0 : i32, i32
  }
  func.func @transform_5(%arg0: i32) -> (i32, i32, i32) {
    %c0_i32 = arith.constant 0 : i32
    %c0_i32_0 = arith.constant 0 : i32
    %c0_i32_1 = arith.constant 0 : i32
    %c0_i32_2 = arith.constant 0 : i32
    return %c0_i32, %c0_i32_0, %c0_i32_1 : i32, i32, i32
  }
  func.func @transform_6(%arg0: i32) -> (i32, i32) {
    %c0_i32 = arith.constant 0 : i32
    %c0_i32_0 = arith.constant 0 : i32
    %c0_i32_1 = arith.constant 0 : i32
    return %c0_i32, %c0_i32_0 : i32, i32
  }
  func.func @transform_7(%arg0: i32) -> (i32, i32) {
    %c0_i32 = arith.constant 0 : i32
    %c0_i32_0 = arith.constant 0 : i32
    %c0_i32_1 = arith.constant 0 : i32
    return %c0_i32, %c0_i32_0 : i32, i32
  }
  func.func @transform_8(%arg0: i32) -> (i32, i32) {
    %c0_i32 = arith.constant 0 : i32
    %c0_i32_0 = arith.constant 0 : i32
    %c0_i32_1 = arith.constant 0 : i32
    return %c0_i32, %c0_i32_0 : i32, i32
  }
  func.func @transform_9(%arg0: i32) -> (i32, i32, i32) {
    %c0_i32 = arith.constant 0 : i32
    %c0_i32_0 = arith.constant 0 : i32
    %c0_i32_1 = arith.constant 0 : i32
    %c0_i32_2 = arith.constant 0 : i32
    return %c0_i32, %c0_i32_0, %c0_i32_1 : i32, i32, i32
  }
  func.func @transform_10(%arg0: i32) -> (i32, i32) {
    %c0_i32 = arith.constant 0 : i32
    %c0_i32_0 = arith.constant 0 : i32
    %c0_i32_1 = arith.constant 0 : i32
    return %c0_i32, %c0_i32_0 : i32, i32
  }
  func.func @transform_11(%arg0: i32) -> (i32, i32) {
    %c0_i32 = arith.constant 0 : i32
    %c0_i32_0 = arith.constant 0 : i32
    %c0_i32_1 = arith.constant 0 : i32
    return %c0_i32, %c0_i32_0 : i32, i32
  }
  func.func @transform_12(%arg0: i32) -> (i32, i32, i32) {
    %c0_i32 = arith.constant 0 : i32
    %c0_i32_0 = arith.constant 0 : i32
    %c0_i32_1 = arith.constant 0 : i32
    %c0_i32_2 = arith.constant 0 : i32
    return %c0_i32, %c0_i32_0, %c0_i32_1 : i32, i32, i32
  }
  func.func @transform_13(%arg0: i32) -> (i32, i32) {
    %c0_i32 = arith.constant 0 : i32
    %c0_i32_0 = arith.constant 0 : i32
    %c0_i32_1 = arith.constant 0 : i32
    return %c0_i32, %c0_i32_0 : i32, i32
  }
  func.func @transform_14(%arg0: i32) -> (i32, i32) {
    %c0_i32 = arith.constant 0 : i32
    %c0_i32_0 = arith.constant 0 : i32
    %c0_i32_1 = arith.constant 0 : i32
    return %c0_i32, %c0_i32_0 : i32, i32
  }
  func.func @transform_15(%arg0: i32) -> (i32, i32, i32) {
    %c0_i32 = arith.constant 0 : i32
    %c0_i32_0 = arith.constant 0 : i32
    %c0_i32_1 = arith.constant 0 : i32
    %c0_i32_2 = arith.constant 0 : i32
    return %c0_i32, %c0_i32_0, %c0_i32_1 : i32, i32, i32
  }
  func.func @transform_16(%arg0: i32) -> (i32, i32) {
    %c0_i32 = arith.constant 0 : i32
    %c0_i32_0 = arith.constant 0 : i32
    %c0_i32_1 = arith.constant 0 : i32
    return %c0_i32, %c0_i32_0 : i32, i32
  }
  func.func @transform_17(%arg0: i32) -> (i32, i32) {
    %c0_i32 = arith.constant 0 : i32
    %c0_i32_0 = arith.constant 0 : i32
    %c0_i32_1 = arith.constant 0 : i32
    return %c0_i32, %c0_i32_0 : i32, i32
  }
  func.func @transform_18(%arg0: i32) -> (i32, i32, i32) {
    %c0_i32 = arith.constant 0 : i32
    %c0_i32_0 = arith.constant 0 : i32
    %c0_i32_1 = arith.constant 0 : i32
    %c0_i32_2 = arith.constant 0 : i32
    return %c0_i32, %c0_i32_0, %c0_i32_1 : i32, i32, i32
  }
  func.func @transform_19(%arg0: i32) -> (i32, i32) {
    %c0_i32 = arith.constant 0 : i32
    %c0_i32_0 = arith.constant 0 : i32
    %c0_i32_1 = arith.constant 0 : i32
    return %c0_i32, %c0_i32_0 : i32, i32
  }
  func.func @transform_20(%arg0: i32) -> (i32, i32) {
    %c0_i32 = arith.constant 0 : i32
    %c0_i32_0 = arith.constant 0 : i32
    %c0_i32_1 = arith.constant 0 : i32
    return %c0_i32, %c0_i32_0 : i32, i32
  }
  func.func @transform_21(%arg0: i32) -> (i32, i32) {
    %c0_i32 = arith.constant 0 : i32
    %c0_i32_0 = arith.constant 0 : i32
    %c0_i32_1 = arith.constant 0 : i32
    return %c0_i32, %c0_i32_0 : i32, i32
  }
  func.func @transform_22(%arg0: i32) -> (i32, i32, i32) {
    %c0_i32 = arith.constant 0 : i32
    %c0_i32_0 = arith.constant 0 : i32
    %c0_i32_1 = arith.constant 0 : i32
    return %arg0, %c0_i32, %c0_i32_0 : i32, i32, i32
  }
}

</mosaic_0001>

<bundles_post_ra>
// kernel: model10_forward.1
= control target key start
LH: loop header
LB: loop body
LE: loop exit
PB: predicated region body
PF: predicated region fallthrough
CT: control target
= control target key end

     0   :  { %s26030_s0 = inlined_call_operand.vmem [shape: f32[2,1,784], index: 0, kind: input, shape index: {}]   ;;  %s26031_s1 = inlined_call_operand.vmem [shape: f32[1,784], index: 1, kind: input, shape index: {}]   ;;  %s26032_s2 = inlined_call_operand.vmem [shape: f32[9,8,1], index: 2, kind: input, shape index: {}]   ;;  %s26033_s3 = inlined_call_operand.vmem [shape: f32[8,1], index: 3, kind: input, shape index: {}]   ;;  %s26034_s4 = inlined_call_operand.vmem [shape: f32[8,1], index: 4, kind: input, shape index: {}]   ;;  %s26035_s5 = inlined_call_operand.vmem [shape: f32[9,10,8], index: 5, kind: input, shape index: {}]   ;;  %s26036_s6 = inlined_call_operand.vmem [shape: f32[10,1], index: 6, kind: input, shape index: {}]   ;;  %s26037_s7 = inlined_call_operand.vmem [shape: f32[10,1], index: 7, kind: input, shape index: {}]   ;;  %s26038_s8 = inlined_call_operand.vmem [shape: f32[12,10], index: 8, kind: input, shape index: {}]   ;;  %s26039_s9 = inlined_call_operand.vmem [shape: f32[9,14,12], index: 9, kind: input, shape index: {}]   ;;  %s26040_s10 = inlined_call_operand.vmem [shape: f32[14,1], index: 10, kind: input, shape index: {}]   ;;  %s26041_s11 = inlined_call_operand.vmem [shape: f32[14,1], index: 11, kind: input, shape index: {}]   ;;  %s26042_s12 = inlined_call_operand.vmem [shape: f32[9,16,14], index: 12, kind: input, shape index: {}]   ;;  %s26043_s13 = inlined_call_operand.vmem [shape: f32[16,1], index: 13, kind: input, shape index: {}]   ;;  %s26044_s14 = inlined_call_operand.vmem [shape: f32[16,1], index: 14, kind: input, shape index: {}]   ;;  %s26045_s15 = inlined_call_operand.vmem [shape: f32[9,8,16], index: 15, kind: input, shape index: {}]   ;;  %s26046_s16 = inlined_call_operand.vmem [shape: f32[8,1], index: 16, kind: input, shape index: {}]   ;;  %s26047_s17 = inlined_call_operand.vmem [shape: f32[8,1], index: 17, kind: input, shape index: {}]   ;;  %s26048_s18 = inlined_call_operand.vmem [shape: f32[9,12,8], index: 18, kind: input, shape index: {}]   ;;  %s26049_s19 = inlined_call_operand.vmem [shape: f32[12,1], index: 19, kind: input, shape index: {}]   ;;  %s26050_s20 = inlined_call_operand.vmem [shape: f32[12,1], index: 20, kind: input, shape index: {}]   ;;  %s26051_s21 = inlined_call_operand.vmem [shape: f32[10,12], index: 21, kind: input, shape index: {}]   ;;  %s26052_s22 = inlined_call_operand.vmem [shape: f32[2,10,1], index: 22, kind: output, shape index: {}]  }
   0x1   :  { %26075 = sst [smem:[#allocation3_spill]] %s26030_s0 }
   0x2   :  { %26076 = sst [smem:[#allocation4_spill]] %s26031_s1 }
   0x3   :  { %26077 = sst [smem:[#allocation5_spill]] %s26032_s2 }
   0x4   :  { %26078 = sst [smem:[#allocation6_spill]] %s26033_s3  ;;  %s22090_s3 = smov 0  }
   0x5   :  { %26079 = sst [smem:[#allocation7_spill]] %s26034_s4 }
   0x6   :  { %26080 = sst [smem:[#allocation8_spill]] %s26035_s5 }
   0x7   :  { %26081 = sst [smem:[#allocation9_spill]] %s26036_s6 }
   0x8 LB: > { %s18901_s28 = sadd.s32 4294967295, %s21950_s3   ;;  %p18905_p0 = scmp.ge.s32.totalorder %s21950_s3, 1  ;;  %s21950_s3 = sphi %s22090_s3, %s32_s3  }
   0x9   : > { %p611_p1 = scmp.lt.s32.totalorder %s21950_s3, 3 }
   0xb   : > { %p612_p2 = pnand %p18905_p0, %p611_p1 }
   0xc   : > { %s26082_s4 = sld [smem:[#allocation5_spill]] (!%p612_p2)  ;;  %p672_p3 = scmp.lt.s32.totalorder (!%p612_p2), %s18901_s28, 1  ;;  %v21952_v2 = vmov (!%p612_p2), 0   ;;  %v682_v3 = vlaneseq (!%p612_p2)  ;;  %vm783_vm1 = vcmask (!%p612_p2), 1039360   ;;  %vm839_vm2 = vcmask (!%p612_p2), 1031168  }
   0xd   : > { %615 = sbr.rel (%p612_p2) target bundleno = 3978 (0xf8a), region = 108  ;;  %21055 = vset.pattern.permute.xlu1 (!%p612_p2), %v21952_v2  ;;  %21054 = vset.pattern.permute.xlu0 (!%p612_p2), %v21952_v2  ;;  %s26083_s27 = sld [smem:[#allocation3_spill]] (!%p612_p2)  ;;  %vm895_vm3 = vcmask (!%p612_p2), 818176   ;;  %vm951_vm4 = vcmask (!%p612_p2), 809984   ;;  %vm1007_vm5 = vcmask (!%p612_p2), 801792   ;;  %vm1063_vm6 = vcmask (!%p612_p2), 588800  }
   0xe   : > { %vm684_vm0 = vcmp.lt.s32.totalorder (!%p612_p2), %v682_v3, 784  ;;  %s26085_s1 = sld [smem:[#allocation6_spill]] (!%p612_p2)  ;;  %v22139_v14 = vshrl.u32 (!%p612_p2), %v682_v3, 7  ;;  %s21953_s5 = smov (!%p612_p2), 127   ;;  %vm1119_vm7 = vcmask (!%p612_p2), 580608   ;;  %vm1175_vm8 = vcmask (!%p612_p2), 572416  }
   0xf   : > { %s26068_s24 = smov (!%p612_p2), 126   ;;  %s21955_s6 = smov (!%p612_p2), 100   ;;  %vm26074_vm9 = vcmask (!%p612_p2), 130048   ;;  %vm1283_vm10 = vcmask (!%p612_p2), 64512   ;;  %vm4475_vm11 = vcmask (!%p612_p2), 1041408   ;;  %vm21962_vm12 = vmmov (!%p612_p2), 1  }
  0x10   : > { %v709_v18 = vsub.s32 (!%p612_p2), 2, %v22139_v14  ;;  %v705_v19 = vsub.s32 (!%p612_p2), 1, %v22139_v14  ;;  %v713_v22 = vsub.s32 (!%p612_p2), 3, %v22139_v14  ;;  %v701_v23 = vsub.s32 (!%p612_p2), 0, %v22139_v14  ;;  %s21956_s26 = smov (!%p612_p2), 99   ;;  %s26058_s2 = smov (!%p612_p2), 72   ;;  %vm23166_vm13 = vmpackc.low (!%p612_p2), %vm4475_vm11, %vm21962_vm12 }
  0x11   : > { %v717_v44 = vsub.s32 (!%p612_p2), 4, %v22139_v14  ;;  %v721_v45 = vsub.s32 (!%p612_p2), 5, %v22139_v14  ;;  %s26056_s30 = smov (!%p612_p2), 70   ;;  %s26086_s23 = sld [smem:[#allocation8_spill]] (!%p612_p2)  ;;  %vm4468_vm14 = vcmask (!%p612_p2), 80896   ;;  %vm4816_vm15 = vcmask (!%p612_p2), 125952  }
  0x12   : > { %v18910_v0 = vld [vmem:[%s26082_s4 + $0x18] sm:$0xff] (!%p612_p2)  ;;  %v18908_v1 = vld [vmem:[%s26082_s4 + $0x8] sm:$0xff] (!%p612_p2)  ;;  %v18911_v4 = vld [vmem:[%s26082_s4 + $0x20] sm:$0xff] (!%p612_p2)  ;;  %s26087_s0 = smov (!%p612_p2), 70   ;;  %vm8600_vm11 = vcmask (!%p612_p2), 128000  }
  0x13   : > { %864 = vperm.xlu1 (!%p612_p2), %21055, %v18910_v0   ;;  %752 = vperm.xlu0 (!%p612_p2), %21054, %v18908_v1   ;;  %v18909_v5 = vld [vmem:[%s26082_s4 + $0x10] sm:$0xff] (!%p612_p2)  ;;  %v18912_v7 = vld [vmem:[%s26082_s4 + $0x28] sm:$0xff] (!%p612_p2)  ;;  %v18915_v9 = vld [vmem:[%s26082_s4 + $0x40] sm:$0xff] (!%p612_p2) }
  0x14   : > { %s26107_s28 = smov (!%p672_p3, %s18901_s28), 1  ;;  %v18913_v6 = vld [vmem:[%s26082_s4 + $0x30] sm:$0xff]  ;;  %v18914_v10 = vld [vmem:[%s26082_s4 + $0x38] sm:$0xff]  ;;  %v692_v12 = vld [vmem:[%s26082_s4] sm:$0xff]  ;;  %s21973_s4 = smov 2  }
  0x15   : > { %s21022_s25 = smul.u32 7, %s26107_s28  ;;  %v1203_v13 = vld [vmem:[%s26085_s1] sm:$0xff]  ;;  %s26060_s1 = smov 14  }
  0x17   : > { %920 = vperm.xlu1 %21055, %v18911_v4   ;;  %808 = vperm.xlu0 %21054, %v18909_v5   ;;  %s675_s29 = scalar_lea.vmem %s26083_s27, %s21022_s25  ;;  %s26084_s27 = sld [smem:[#allocation7_spill]] }
  0x18   : > { %v681_v8 = vld [vmem:[%s675_s29] sm:$0x7f]  ;;  %s21957_s25 = smov 98   ;;  %s26095_s29 = smov 68  }
  0x19   : > { %687 = vst.msk [vmem:[#allocation2 + $0x8] ss:$8 sm:$0xf] %vm684_vm0, %v681_v8  ;;  %688 = vst.msk [vmem:[#allocation2 + $0x8] ss:$8 sm:$0x70] %vm684_vm0, %v681_v8 }
  0x1a   : > { %vm5097_vm0 = vcmask 1043456  }
  0x1b   : > { %1032 = vperm.xlu1 %21055, %v18913_v6   ;;  %976 = vperm.xlu0 %21054, %v18912_v7  }
  0x1d   : > { %v1216_v11 = vld [vmem:[%s26084_s27] sm:$0xff]  ;;  %s21959_s27 = smov 71  }
  0x1f   : > { %1144 = vperm.xlu1 %21055, %v18915_v9   ;;  %1088 = vperm.xlu0 %21054, %v18914_v10  }
  0x20   : > { %v689_v15 = vld [vmem:[#allocation2 + $0x8] ss:$8 sm:$0xf] }
  0x21   : > { %v690_v16 = vld [vmem:[#allocation2 + $0x8] ss:$8 sm:$0x70] }
  0x22   : > { %v22141_v17 = vor.u32 %v690_v16, %v689_v15 }
  0x23   : > { %1219 = vperm.xlu1 %21055, %v1216_v11   ;;  %695 = vperm.xlu0 %21054, %v692_v12  }
  0x24   : > { %v22148_v20 = vrot.slane %v22141_v17, %v709_v18  ;;  %v22153_v21 = vrot.slane %v22141_v17, %v705_v19  ;;  %v22166_v27 = vrot.slane %v22141_v17, %v713_v22  ;;  %v22171_v28 = vrot.slane %v22141_v17, %v701_v23 }
  0x25   : > { %v22226_v48 = vrot.slane %v22141_v17, %v717_v44  ;;  %v22231_v49 = vrot.slane %v22141_v17, %v721_v45 }
  0x27   : > { %1206 = vperm.xlu0 %21054, %v1203_v13   ;;  %v725_v13 = vsub.s32 6, %v22139_v14 }
  0x92   : > { %v22157_v24 = vpop.permute.xlu0 %752  ;;  %v22193_v36 = vpop.permute.xlu1 %864 }
  0x93   : > { %v757_v25 = vmul.f32 %v22157_v24, %v22148_v20  ;;  %v756_v26 = vmul.f32 %v22157_v24, %v22153_v21  ;;  %v758_v29 = vmul.f32 %v22157_v24, %v22166_v27  ;;  %v755_v30 = vmul.f32 %v22157_v24, %v22171_v28 }
  0x94   : > { %v868_v37 = vmul.f32 %v22193_v36, %v22153_v21  ;;  %v869_v38 = vmul.f32 %v22193_v36, %v22148_v20  ;;  %v870_v39 = vmul.f32 %v22193_v36, %v22166_v27  ;;  %v867_v40 = vmul.f32 %v22193_v36, %v22171_v28 }
  0x95   : > { %773 = vrot.lane.b32.xlu0 %v757_v25, %s21953_s5  ;;  %771 = vrot.lane.b32.xlu1 %v756_v26, %s21953_s5  ;;  %v759_v50 = vmul.f32 %v22157_v24, %v22226_v48  ;;  %v760_v51 = vmul.f32 %v22157_v24, %v22231_v49  ;;  %v871_v0 = vmul.f32 %v22193_v36, %v22226_v48 }
  0x96   : > { %v22179_v31 = vpop.permute.xlu0 %808  ;;  %v22209_v41 = vpop.permute.xlu1 %920  ;;  %v872_v1 = vmul.f32 %v22193_v36, %v22231_v49  ;;  %v22305_v25 = vrot.slane %v22141_v17, %v725_v13 }
  0x97   : > { %v812_v32 = vmul.f32 %v22179_v31, %v22153_v21  ;;  %v813_v33 = vmul.f32 %v22179_v31, %v22148_v20  ;;  %v814_v34 = vmul.f32 %v22179_v31, %v22166_v27  ;;  %v811_v35 = vmul.f32 %v22179_v31, %v22171_v28 }
  0x98   : > { %v924_v42 = vmul.f32 %v22209_v41, %v22153_v21  ;;  %v925_v43 = vmul.f32 %v22209_v41, %v22148_v20  ;;  %v926_v46 = vmul.f32 %v22209_v41, %v22166_v27  ;;  %v923_v47 = vmul.f32 %v22209_v41, %v22171_v28 }
  0x99   : > { %775 = vrot.lane.b32.xlu1 %v758_v29, %s21953_s5  ;;  %769 = vrot.lane.b32.xlu0 %v755_v30, %s21953_s5  ;;  %v815_v57 = vmul.f32 %v22179_v31, %v22226_v48  ;;  %v816_v58 = vmul.f32 %v22179_v31, %v22231_v49  ;;  %v927_v7 = vmul.f32 %v22209_v41, %v22226_v48 }
  0x9a   : > { %v22239_v52 = vpop.permute.xlu0 %976  ;;  %v22261_v59 = vpop.permute.xlu1 %1032  ;;  %v928_v11 = vmul.f32 %v22209_v41, %v22231_v49  ;;  %v761_v26 = vmul.f32 %v22157_v24, %v22305_v25  ;;  %v817_v17 = vmul.f32 %v22179_v31, %v22305_v25 }
  0x9b   : > { %v980_v53 = vmul.f32 %v22239_v52, %v22153_v21  ;;  %v981_v54 = vmul.f32 %v22239_v52, %v22148_v20  ;;  %v982_v55 = vmul.f32 %v22239_v52, %v22166_v27  ;;  %v979_v56 = vmul.f32 %v22239_v52, %v22171_v28 }
  0x9c   : > { %v1036_v60 = vmul.f32 %v22261_v59, %v22153_v21  ;;  %v1037_v61 = vmul.f32 %v22261_v59, %v22148_v20  ;;  %v1038_v62 = vmul.f32 %v22261_v59, %v22166_v27  ;;  %v1035_v63 = vmul.f32 %v22261_v59, %v22171_v28 }
  0x9d   : > { %827 = vrot.lane.b32.xlu1 %v812_v32, %s26068_s24  ;;  %829 = vrot.lane.b32.xlu0 %v813_v33, %s26068_s24  ;;  %v983_v29 = vmul.f32 %v22239_v52, %v22226_v48  ;;  %v984_v30 = vmul.f32 %v22239_v52, %v22231_v49  ;;  %v1039_v24 = vmul.f32 %v22261_v59, %v22226_v48 }
  0x9e   : > { %v1089_v3 = vpop.permute.xlu0 %1088  ;;  %v1145_v8 = vpop.permute.xlu1 %1144  ;;  %v1040_v32 = vmul.f32 %v22261_v59, %v22231_v49  ;;  %v873_v33 = vmul.f32 %v22193_v36, %v22305_v25  ;;  %v985_v36 = vmul.f32 %v22239_v52, %v22305_v25 }
  0x9f   : > { %v1092_v4 = vmul.f32 %v1089_v3, %v22153_v21  ;;  %v1093_v5 = vmul.f32 %v1089_v3, %v22148_v20  ;;  %v1094_v6 = vmul.f32 %v1089_v3, %v22166_v27  ;;  %v1091_v9 = vmul.f32 %v1089_v3, %v22171_v28 }
  0xa0   : > { %v1148_v10 = vmul.f32 %v1145_v8, %v22153_v21  ;;  %v1150_v12 = vmul.f32 %v1145_v8, %v22166_v27  ;;  %v1149_v15 = vmul.f32 %v1145_v8, %v22148_v20  ;;  %v1147_v16 = vmul.f32 %v1145_v8, %v22171_v28 }
  0xa1   : > { %831 = vrot.lane.b32.xlu1 %v814_v34, %s26068_s24  ;;  %825 = vrot.lane.b32.xlu0 %v811_v35, %s26068_s24  ;;  %v1095_v34 = vmul.f32 %v1089_v3, %v22226_v48  ;;  %v1096_v31 = vmul.f32 %v1089_v3, %v22231_v49  ;;  %v929_v35 = vmul.f32 %v22209_v41, %v22305_v25 }
  0xa2   : > { %v1097_v41 = vmul.f32 %v1089_v3, %v22305_v25 }
  0xa5   : > { %883 = vrot.lane.b32.xlu1 %v868_v37, %s21955_s6  ;;  %885 = vrot.lane.b32.xlu0 %v869_v38, %s21955_s6  ;;  %v1151_v37 = vmul.f32 %v1145_v8, %v22226_v48  ;;  %v1152_v38 = vmul.f32 %v1145_v8, %v22231_v49 }
  0xa9   : > { %887 = vrot.lane.b32.xlu1 %v870_v39, %s21955_s6  ;;  %881 = vrot.lane.b32.xlu0 %v867_v40, %s21955_s6  ;;  %v1041_v39 = vmul.f32 %v22261_v59, %v22305_v25  ;;  %v22345_v40 = vpop.permute.xlu0 %695 }
  0xad   : > { %939 = vrot.lane.b32.xlu1 %v924_v42, %s21956_s26  ;;  %941 = vrot.lane.b32.xlu0 %v925_v43, %s21956_s26  ;;  %v1153_v42 = vmul.f32 %v1145_v8, %v22305_v25  ;;  %v22353_v43 = vpop.permute.xlu1 %1219 }
  0xb1   : > { %943 = vrot.lane.b32.xlu1 %v926_v46, %s21956_s26  ;;  %937 = vrot.lane.b32.xlu0 %v923_v47, %s21956_s26  ;;  %v22355_v46 = vpop.permute.xlu0 %1206 }
  0xb5   : > { %777 = vrot.lane.b32.xlu1 %v759_v50, %s21953_s5  ;;  %779 = vrot.lane.b32.xlu0 %v760_v51, %s21953_s5 }
  0xb9   : > { %995 = vrot.lane.b32.xlu1 %v980_v53, %s21957_s25  ;;  %997 = vrot.lane.b32.xlu0 %v981_v54, %s21957_s25 }
  0xbd   : > { %999 = vrot.lane.b32.xlu1 %v982_v55, %s21957_s25  ;;  %993 = vrot.lane.b32.xlu0 %v979_v56, %s21957_s25 }
  0xc1   : > { %833 = vrot.lane.b32.xlu1 %v815_v57, %s26068_s24  ;;  %835 = vrot.lane.b32.xlu0 %v816_v58, %s26068_s24 }
  0xc5   : > { %1051 = vrot.lane.b32.xlu1 %v1036_v60, %s26058_s2  ;;  %1053 = vrot.lane.b32.xlu0 %v1037_v61, %s26058_s2 }
  0xc9   : > { %1055 = vrot.lane.b32.xlu1 %v1038_v62, %s26058_s2  ;;  %1049 = vrot.lane.b32.xlu0 %v1035_v63, %s26058_s2 }
  0xcd   : > { %889 = vrot.lane.b32.xlu1 %v871_v0, %s21955_s6  ;;  %891 = vrot.lane.b32.xlu0 %v872_v1, %s21955_s6 }
  0xd1   : > { %1107 = vrot.lane.b32.xlu1 %v1092_v4, %s21959_s27  ;;  %1109 = vrot.lane.b32.xlu0 %v1093_v5, %s21959_s27 }
  0xd5   : > { %1111 = vrot.lane.b32.xlu1 %v1094_v6, %s21959_s27  ;;  %945 = vrot.lane.b32.xlu0 %v927_v7, %s21956_s26 }
  0xd9   : > { %1105 = vrot.lane.b32.xlu1 %v1091_v9, %s21959_s27  ;;  %1163 = vrot.lane.b32.xlu0 %v1148_v10, %s26056_s30 }
  0xdd   : > { %947 = vrot.lane.b32.xlu1 %v928_v11, %s21956_s26  ;;  %1167 = vrot.lane.b32.xlu0 %v1150_v12, %s26056_s30 }
  0xe1   : > { %1165 = vrot.lane.b32.xlu1 %v1149_v15, %s26056_s30  ;;  %1161 = vrot.lane.b32.xlu0 %v1147_v16, %s26056_s30 }
  0xe5   : > { %781 = vrot.lane.b32.xlu1 %v761_v26, %s21953_s5  ;;  %1001 = vrot.lane.b32.xlu0 %v983_v29, %s21957_s25 }
  0xe9   : > { %1003 = vrot.lane.b32.xlu1 %v984_v30, %s21957_s25  ;;  %837 = vrot.lane.b32.xlu0 %v817_v17, %s26068_s24 }
  0xed   : > { %1057 = vrot.lane.b32.xlu1 %v1039_v24, %s26058_s2  ;;  %1059 = vrot.lane.b32.xlu0 %v1040_v32, %s26058_s2 }
  0xf1   : > { %893 = vrot.lane.b32.xlu1 %v873_v33, %s21955_s6  ;;  %1113 = vrot.lane.b32.xlu0 %v1095_v34, %s21959_s27  ;;  %v735_v33 = vmul.f32 %v22153_v21, %v22345_v40  ;;  %v736_v34 = vmul.f32 %v22148_v20, %v22345_v40 }
  0xf5   : > { %1115 = vrot.lane.b32.xlu1 %v1096_v31, %s21959_s27  ;;  %949 = vrot.lane.b32.xlu0 %v929_v35, %s21956_s26  ;;  %v734_v31 = vmul.f32 %v22171_v28, %v22345_v40 }
  0xf9   : > { %1169 = vrot.lane.b32.xlu1 %v1151_v37, %s26056_s30  ;;  %1171 = vrot.lane.b32.xlu0 %v1152_v38, %s26056_s30 }
  0xfd   : > { %1005 = vrot.lane.b32.xlu1 %v985_v36, %s21957_s25  ;;  %1061 = vrot.lane.b32.xlu0 %v1041_v39, %s26058_s2 }
 0x101   : > { %1117 = vrot.lane.b32.xlu1 %v1097_v41, %s21959_s27  ;;  %1173 = vrot.lane.b32.xlu0 %v1153_v42, %s26056_s30  ;;  %s26071_s30 = smov 12  }
 0x107   : > { %v774_v47 = vpop.permute.xlu0 %773  ;;  %v772_v50 = vpop.permute.xlu1 %771 }
 0x108   : > { %v785_v17 = vsel %vm783_vm1, %v772_v50, %v774_v47 }
 0x109   : > { %v798_v36 = vadd.f32 %v785_v17, %v735_v33 }
 0x10b   : > { %v22357_v51 = vpop.permute.xlu1 %775  ;;  %v770_v52 = vpop.permute.xlu0 %769 }
 0x10c   : > { %v786_v24 = vsel %vm783_vm1, %v774_v47, %v22357_v51  ;;  %v784_v32 = vsel %vm783_vm1, %v770_v52, %v772_v50 }
 0x10d   : > { %v799_v39 = vadd.f32 %v786_v24, %v736_v34  ;;  %v797_v41 = vadd.f32 %v784_v32, %v734_v31 }
 0x10f   : > { %v828_v53 = vpop.permute.xlu1 %827  ;;  %v830_v54 = vpop.permute.xlu0 %829 }
 0x110   : > { %v841_v35 = vsel %vm839_vm2, %v828_v53, %v830_v54 }
 0x111   : > { %v854_v50 = vadd.f32 %v841_v35, %v798_v36 }
 0x113   : > { %v22359_v55 = vpop.permute.xlu1 %831  ;;  %v826_v56 = vpop.permute.xlu0 %825 }
 0x114   : > { %v842_v37 = vsel %vm839_vm2, %v830_v54, %v22359_v55  ;;  %v840_v38 = vsel %vm839_vm2, %v826_v56, %v828_v53 }
 0x115   : > { %v855_v52 = vadd.f32 %v842_v37, %v799_v39  ;;  %v853_v54 = vadd.f32 %v840_v38, %v797_v41 }
 0x117   : > { %v884_v57 = vpop.permute.xlu1 %883  ;;  %v886_v58 = vpop.permute.xlu0 %885 }
 0x118   : > { %v897_v20 = vsel %vm895_vm3, %v884_v57, %v886_v58 }
 0x119   : > { %v910_v24 = vadd.f32 %v897_v20, %v854_v50 }
 0x11b   : > { %v22361_v59 = vpop.permute.xlu1 %887  ;;  %v882_v60 = vpop.permute.xlu0 %881 }
 0x11c   : > { %v898_v28 = vsel %vm895_vm3, %v886_v58, %v22361_v59  ;;  %v896_v47 = vsel %vm895_vm3, %v882_v60, %v884_v57 }
 0x11d   : > { %v911_v32 = vadd.f32 %v898_v28, %v855_v52  ;;  %v909_v33 = vadd.f32 %v896_v47, %v853_v54 }
 0x11f   : > { %v940_v61 = vpop.permute.xlu1 %939  ;;  %v942_v62 = vpop.permute.xlu0 %941 }
 0x120   : > { %v953_v53 = vsel %vm951_vm4, %v940_v61, %v942_v62 }
 0x121   : > { %v966_v35 = vadd.f32 %v953_v53, %v910_v24 }
 0x123   : > { %v22363_v63 = vpop.permute.xlu1 %943  ;;  %v938_v0 = vpop.permute.xlu0 %937 }
 0x124   : > { %v954_v56 = vsel %vm951_vm4, %v942_v62, %v22363_v63  ;;  %v952_v17 = vsel %vm951_vm4, %v938_v0, %v940_v61 }
 0x125   : > { %v967_v37 = vadd.f32 %v954_v56, %v911_v32  ;;  %v965_v38 = vadd.f32 %v952_v17, %v909_v33 }
 0x127   : > { %v22365_v1 = vpop.permute.xlu1 %777  ;;  %v22367_v3 = vpop.permute.xlu0 %779 }
 0x12b   : > { %v996_v4 = vpop.permute.xlu1 %995  ;;  %v998_v5 = vpop.permute.xlu0 %997 }
 0x12c   : > { %v1009_v58 = vsel %vm1007_vm5, %v996_v4, %v998_v5 }
 0x12d   : > { %v1022_v36 = vadd.f32 %v1009_v58, %v966_v35 }
 0x12f   : > { %v22369_v6 = vpop.permute.xlu1 %999  ;;  %v994_v7 = vpop.permute.xlu0 %993 }
 0x130   : > { %v1010_v57 = vsel %vm1007_vm5, %v998_v5, %v22369_v6  ;;  %v1008_v60 = vsel %vm1007_vm5, %v994_v7, %v996_v4 }
 0x131   : > { %v1023_v39 = vadd.f32 %v1010_v57, %v967_v37  ;;  %v1021_v41 = vadd.f32 %v1008_v60, %v965_v38 }
 0x133   : > { %v22371_v8 = vpop.permute.xlu1 %833  ;;  %v22373_v9 = vpop.permute.xlu0 %835 }
 0x137   : > { %v1052_v10 = vpop.permute.xlu1 %1051  ;;  %v1054_v11 = vpop.permute.xlu0 %1053 }
 0x138   : > { %v1065_v62 = vsel %vm1063_vm6, %v1052_v10, %v1054_v11 }
 0x139   : > { %v1078_v47 = vadd.f32 %v1065_v62, %v1022_v36  ;;  %v787_v36 = vsel %vm783_vm1, %v22357_v51, %v22365_v1  ;;  %v843_v51 = vsel %vm839_vm2, %v22359_v55, %v22371_v8 }
 0x13b   : > { %v22375_v12 = vpop.permute.xlu1 %1055  ;;  %v1050_v15 = vpop.permute.xlu0 %1049 }
 0x13c   : > { %v1066_v61 = vsel %vm1063_vm6, %v1054_v11, %v22375_v12  ;;  %v1064_v0 = vsel %vm1063_vm6, %v1050_v15, %v1052_v10 }
 0x13d   : > { %v1079_v50 = vadd.f32 %v1066_v61, %v1023_v39  ;;  %v1077_v52 = vadd.f32 %v1064_v0, %v1021_v41  ;;  %v788_v39 = vsel %vm783_vm1, %v22365_v1, %v22367_v3  ;;  %v737_v41 = vmul.f32 %v22166_v27, %v22345_v40 }
 0x13e   : > { %v844_v1 = vsel %vm839_vm2, %v22371_v8, %v22373_v9 }
 0x13f   : > { %v22377_v16 = vpop.permute.xlu1 %889  ;;  %v22379_v26 = vpop.permute.xlu0 %891 }
 0x143   : > { %v1108_v29 = vpop.permute.xlu1 %1107  ;;  %v1110_v30 = vpop.permute.xlu0 %1109 }
 0x144   : > { %v1121_v4 = vsel %vm1119_vm7, %v1108_v29, %v1110_v30 }
 0x145   : > { %v1134_v11 = vadd.f32 %v1121_v4, %v1078_v47  ;;  %v738_v4 = vmul.f32 %v22226_v48, %v22345_v40 }
 0x147   : > { %v22395_v42 = vpop.permute.xlu1 %1111  ;;  %v22397_v21 = vpop.permute.xlu0 %945 }
 0x148   : > { %v1122_v5 = vsel %vm1119_vm7, %v1110_v30, %v22395_v42  ;;  %v955_v8 = vsel %vm951_vm4, %v22363_v63, %v22397_v21 }
 0x149   : > { %v1135_v10 = vadd.f32 %v1122_v5, %v1079_v50  ;;  %v800_v5 = vadd.f32 %v787_v36, %v737_v41  ;;  %v899_v50 = vsel %vm895_vm3, %v22361_v59, %v22377_v16 }
 0x14b   : > { %v1106_v34 = vpop.permute.xlu1 %1105  ;;  %v1164_v31 = vpop.permute.xlu0 %1163  ;;  %v856_v55 = vadd.f32 %v843_v51, %v800_v5  ;;  %v21961_v51 = vmov 0.0  }
 0x14c   : > { %v1120_v7 = vsel %vm1119_vm7, %v1106_v34, %v1108_v29  ;;  %1354 = vmatprep.mubr.f32.mxu0 %v21961_v51  ;;  %15368 = vst [vmem:[#allocation2] sm:$0xff] %v21961_v51 }
 0x14d   : > { %v1133_v15 = vadd.f32 %v1120_v7, %v1077_v52  ;;  %v801_v7 = vadd.f32 %v788_v39, %v738_v4  ;;  %v900_v52 = vsel %vm895_vm3, %v22377_v16, %v22379_v26 }
 0x14f   : > { %v22415_v20 = vpop.permute.xlu1 %947  ;;  %v22417_v28 = vpop.permute.xlu0 %1167 }
 0x153   : > { %v1166_v54 = vpop.permute.xlu1 %1165  ;;  %v1162_v53 = vpop.permute.xlu0 %1161 }
 0x154   : > { %v1177_v56 = vsel %vm1175_vm8, %v1164_v31, %v1166_v54  ;;  %v1178_v17 = vsel %vm1175_vm8, %v1166_v54, %v22417_v28  ;;  %v1176_v24 = vsel %vm1175_vm8, %v1162_v53, %v1164_v31 }
 0x155   : > { %v1190_v32 = vadd.f32 %v1177_v56, %v1134_v11  ;;  %v1191_v30 = vadd.f32 %v1178_v17, %v1135_v10  ;;  %v1189_v33 = vadd.f32 %v1176_v24, %v1133_v15  ;;  %v857_v11 = vadd.f32 %v844_v1, %v801_v7 }
 0x156   : > { %v956_v10 = vsel %vm951_vm4, %v22397_v21, %v22415_v20  ;;  %v912_v15 = vadd.f32 %v899_v50, %v856_v55 }
 0x157   : > { %v1197_v29 = vmax.f32 %v1190_v32, 0.0  ;;  %v1198_v34 = vmax.f32 %v1191_v30, 0.0  ;;  %v1196_v58 = vmax.f32 %v1189_v33, 0.0  ;;  %v782_v57 = vpop.permute.xlu1 %781  ;;  %v1002_v60 = vpop.permute.xlu0 %1001  ;;  %v913_v54 = vadd.f32 %v900_v52, %v857_v11 }
 0x158   : > { %v1011_v16 = vsel %vm1007_vm5, %v22369_v6, %v1002_v60  ;;  %v968_v17 = vadd.f32 %v955_v8, %v912_v15  ;;  %v740_v32 = vmul.f32 %v22305_v25, %v22345_v40  ;;  %v789_v63 = vsel %vm783_vm1, %v22367_v3, %v782_v57 }
 0x159   : > { %v1210_v35 = vmul.f32 %v22355_v46, %v1197_v29  ;;  %v1211_v37 = vmul.f32 %v22355_v46, %v1198_v34  ;;  %v1209_v31 = vmul.f32 %v22355_v46, %v1196_v58  ;;  %v969_v24 = vadd.f32 %v956_v10, %v913_v54 }
 0x15a   : > { %v739_v33 = vmul.f32 %v22231_v49, %v22345_v40  ;;  %v1024_v6 = vadd.f32 %v1011_v16, %v968_v17 }
 0x15b   : > { %v22430_v38 = vadd.f32 %v22353_v43, %v1210_v35  ;;  %v22433_v62 = vadd.f32 %v22353_v43, %v1211_v37  ;;  %v22436_v61 = vpop.permute.xlu1 %1003  ;;  %v838_v0 = vpop.permute.xlu0 %837  ;;  %v22459_v27 = vadd.f32 %v22353_v43, %v1209_v31 }
 0x15c   : > { %v1012_v56 = vsel %vm1007_vm5, %v1002_v60, %v22436_v61  ;;  %v803_v60 = vadd.f32 %v782_v57, %v740_v32  ;;  %v845_v35 = vsel %vm839_vm2, %v22373_v9, %v838_v0  ;;  %v802_v37 = vadd.f32 %v789_v63, %v739_v33 }
 0x15d   : > { %1258 = vrot.lane.b32.xlu1 %v22430_v38, %s21953_s5  ;;  %1260 = vrot.lane.b32.xlu0 %v22433_v62, %s21953_s5  ;;  %v1025_v29 = vadd.f32 %v1012_v56, %v969_v24 }
 0x15e   : > { %v859_v36 = vadd.f32 %v838_v0, %v803_v60  ;;  %v858_v40 = vadd.f32 %v845_v35, %v802_v37 }
 0x15f   : > { %v1058_v48 = vpop.permute.xlu1 %1057  ;;  %v1060_v47 = vpop.permute.xlu0 %1059 }
 0x160   : > { %v1067_v21 = vsel %vm1063_vm6, %v22375_v12, %v1058_v48  ;;  %v1068_v30 = vsel %vm1063_vm6, %v1058_v48, %v1060_v47 }
 0x161   : > { %1256 = vrot.lane.b32.xlu1 %v22459_v27, %s21953_s5  ;;  %v1080_v12 = vadd.f32 %v1067_v21, %v1024_v6  ;;  %v1081_v31 = vadd.f32 %v1068_v30, %v1025_v29 }
 0x163   : > { %v894_v59 = vpop.permute.xlu1 %893  ;;  %v1114_v53 = vpop.permute.xlu0 %1113 }
 0x164   : > { %v1123_v25 = vsel %vm1119_vm7, %v22395_v42, %v1114_v53  ;;  %v901_v49 = vsel %vm895_vm3, %v22379_v26, %v894_v59  ;;  %v915_v9 = vadd.f32 %v894_v59, %v859_v36 }
 0x165   : > { %v1136_v39 = vadd.f32 %v1123_v25, %v1080_v12  ;;  %v914_v26 = vadd.f32 %v901_v49, %v858_v40  ;;  %v22533_v25 = vld [vmem:[%s26086_s23] sm:$0xff]  ;;  %v18916_v49 = vld [vmem:[%s26086_s23 + $0x10] sm:$0xff] }
 0x166   : > { %19627 = vmatprep.mubr.msk.f32.mxu1 %vm1283_vm10, %v22533_v25 }
 0x167   : > { %v1116_v34 = vpop.permute.xlu1 %1115  ;;  %v950_v58 = vpop.permute.xlu0 %949 }
 0x168   : > { %v1124_v3 = vsel %vm1119_vm7, %v1114_v53, %v1116_v34  ;;  %v957_v42 = vsel %vm951_vm4, %v22415_v20, %v950_v58  ;;  %v971_v48 = vadd.f32 %v950_v58, %v915_v9 }
 0x169   : > { %v1137_v41 = vadd.f32 %v1124_v3, %v1081_v31  ;;  %v970_v50 = vadd.f32 %v957_v42, %v914_v26  ;;  %v22567_v3 = vld [vmem:[%s26086_s23 + $0x20] sm:$0xff] }
 0x16a   : > { %v4440_v26 = vld [vmem:[%s26037_s7] sm:$0xff] }
 0x16b   : > { %v1170_v4 = vpop.permute.xlu1 %1169  ;;  %v1172_v57 = vpop.permute.xlu0 %1171 }
 0x16c   : > { %v1179_v0 = vsel %vm1175_vm8, %v22417_v28, %v1170_v4  ;;  %v1180_v1 = vsel %vm1175_vm8, %v1170_v4, %v1172_v57 }
 0x16d   : > { %v1192_v5 = vadd.f32 %v1179_v0, %v1136_v39  ;;  %v1193_v7 = vadd.f32 %v1180_v1, %v1137_v41  ;;  %v18917_v39 = vld [vmem:[%s26086_s23 + $0x18] sm:$0x3]  ;;  %v4441_v1 = vld [vmem:[%s26037_s7 + $0x8] sm:$0x3] }
 0x16f   : > { %v1199_v52 = vmax.f32 %v1192_v5, 0.0  ;;  %v1200_v55 = vmax.f32 %v1193_v7, 0.0  ;;  %v1006_v11 = vpop.permute.xlu1 %1005  ;;  %v1062_v8 = vpop.permute.xlu0 %1061 }
 0x170   : > { %v1013_v10 = vsel %vm1007_vm5, %v22436_v61, %v1006_v11  ;;  %v1027_v15 = vadd.f32 %v1006_v11, %v971_v48  ;;  %v1069_v59 = vsel %vm1063_vm6, %v1060_v47, %v1062_v8 }
 0x171   : > { %v1212_v20 = vmul.f32 %v22355_v46, %v1199_v52  ;;  %v1213_v54 = vmul.f32 %v22355_v46, %v1200_v55  ;;  %v1026_v28 = vadd.f32 %v1013_v10, %v970_v50 }
 0x172   : > { %v1083_v53 = vadd.f32 %v1062_v8, %v1027_v15 }
 0x173   : > { %v22508_v16 = vadd.f32 %v22353_v43, %v1212_v20  ;;  %v22511_v56 = vadd.f32 %v22353_v43, %v1213_v54  ;;  %v1082_v17 = vadd.f32 %v1069_v59, %v1026_v28  ;;  %v1118_v24 = vpop.permute.xlu1 %1117  ;;  %v1174_v32 = vpop.permute.xlu0 %1173  ;;  %v22697_v20 = vld [vmem:[%s26086_s23 + $0x28] sm:$0x3]  ;;  %v22702_v54 = vld [vmem:[%s26086_s23 + $0x30] sm:$0xff] }
 0x174   : > { %v1125_v61 = vsel %vm1119_vm7, %v1116_v34, %v1118_v24  ;;  %v1139_v63 = vadd.f32 %v1118_v24, %v1083_v53  ;;  %v1181_v47 = vsel %vm1175_vm8, %v1172_v57, %v1174_v32 }
 0x175   : > { %v1138_v21 = vadd.f32 %v1125_v61, %v1082_v17  ;;  %1262 = vrot.lane.b32.xlu0 %v22508_v16, %s21953_s5  ;;  %1264 = vrot.lane.b32.xlu1 %v22511_v56, %s21953_s5  ;;  %v22749_v61 = vld [vmem:[%s26086_s23 + $0x38] sm:$0x3] }
 0x176   : > { %v1195_v30 = vadd.f32 %v1174_v32, %v1139_v63  ;;  %v22758_v63 = vld [vmem:[%s26086_s23 + $0x40] sm:$0xff] }
 0x177   : > { %v1194_v33 = vadd.f32 %v1181_v47, %v1138_v21 }
 0x178   : > { %v1202_v6 = vmax.f32 %v1195_v30, 0.0 }
 0x179   : > { %v1201_v29 = vmax.f32 %v1194_v33, 0.0 }
 0x17a   : > { %v1215_v58 = vmul.f32 %v22355_v46, %v1202_v6 }
 0x17b   : > { %v1214_v60 = vmul.f32 %v22355_v46, %v1201_v29 }
 0x17c   : > { %v1228_v34 = vadd.f32 %v22353_v43, %v1215_v58  ;;  %v22785_v58 = vld [vmem:[%s26086_s23 + $0x48] sm:$0x3] }
 0x17d   : > { %v22523_v35 = vadd.f32 %v22353_v43, %v1214_v60  ;;  %v22542_v43 = vld [vmem:[%s26086_s23 + $0x8] sm:$0x3]  ;;  %v22792_v60 = vld [vmem:[%s26086_s23 + $0x50] sm:$0xff] }
 0x17e   : > { %1236 = vst.msk [vmem:[#allocation2 + $0x38] sm:$0xff] %vm26074_vm9, %v1228_v34 }
 0x17f   : > { %1266 = vrot.lane.b32.xlu0 %v22523_v35, %s21953_s5 }
 0x183   : > { %1913 = vrot.lane.b32.xlu0 %v22430_v38, %s26068_s24 }
 0x185   : > { %v22535_v46 = vld [vmem:[#allocation2 + $0x38] sm:$0xff] }
 0x186   : > { %19625 = vmatprep.subr.mxu1 %v22535_v46  ;;  %1268 = vrot.lane.b32.xlu1 %v22535_v46, %s21953_s5 }
 0x187   : > { %19626 = vmatpush3.msra.mxu1 %v22535_v46  ;;  %1911 = vrot.lane.b32.xlu0 %v22459_v27, %s26068_s24 }
 0x188   : > { %19628 = vmatmul.mubr.msk.f32.vlgmr.msra.gmra.mrb[0].mxu1 %vm1283_vm10, %v22542_v43 }
 0x189   : > { %19632 = vmatprep.mubr.msk.f32.mxu1 %vm1283_vm10, %v22567_v3 }
 0x18a   : > { %1915 = vrot.lane.b32.xlu1 %v22433_v62, %s26068_s24 }
 0x18b   : > { %1919 = vrot.lane.b32.xlu0 %v22511_v56, %s26068_s24 }
 0x18e   : > { %1917 = vrot.lane.b32.xlu1 %v22508_v16, %s26068_s24 }
 0x18f   : > { %1923 = vrot.lane.b32.xlu0 %v22535_v46, %s26068_s24 }
 0x192   : > { %1921 = vrot.lane.b32.xlu1 %v22523_v35, %s26068_s24 }
 0x193   : > { %2271 = vrot.lane.b32.xlu0 %v22433_v62, %s21955_s6 }
 0x196   : > { %2269 = vrot.lane.b32.xlu1 %v22430_v38, %s21955_s6 }
 0x197   : > { %2273 = vrot.lane.b32.xlu0 %v22508_v16, %s21955_s6 }
 0x19a   : > { %2267 = vrot.lane.b32.xlu1 %v22459_v27, %s21955_s6 }
 0x19b   : > { %2277 = vrot.lane.b32.xlu0 %v22523_v35, %s21955_s6 }
 0x19e   : > { %2275 = vrot.lane.b32.xlu1 %v22511_v56, %s21955_s6 }
 0x19f   : > { %2625 = vrot.lane.b32.xlu0 %v22430_v38, %s21956_s26 }
 0x1a2   : > { %2279 = vrot.lane.b32.xlu1 %v22535_v46, %s21955_s6 }
 0x1a3   : > { %2623 = vrot.lane.b32.xlu0 %v22459_v27, %s21956_s26 }
 0x1a6   : > { %2627 = vrot.lane.b32.xlu1 %v22433_v62, %s21956_s26 }
 0x1a7   : > { %2631 = vrot.lane.b32.xlu0 %v22511_v56, %s21956_s26 }
 0x1aa   : > { %2629 = vrot.lane.b32.xlu1 %v22508_v16, %s21956_s26 }
 0x1ab   : > { %2635 = vrot.lane.b32.xlu0 %v22535_v46, %s21956_s26 }
 0x1ae   : > { %2633 = vrot.lane.b32.xlu1 %v22523_v35, %s21956_s26  ;;  %s26088_s26 = sld [smem:[#allocation9_spill]] }
 0x1af   : > { %2983 = vrot.lane.b32.xlu0 %v22433_v62, %s21957_s25 }
 0x1b2   : > { %2981 = vrot.lane.b32.xlu1 %v22430_v38, %s21957_s25 }
 0x1b3   : > { %2985 = vrot.lane.b32.xlu0 %v22508_v16, %s21957_s25 }
 0x1b4   : > { %v4415_v41 = vld [vmem:[%s26088_s26 + $0x8] sm:$0x3]  ;;  %v4414_v4 = vld [vmem:[%s26088_s26] sm:$0xff] }
 0x1b6   : > { %2979 = vrot.lane.b32.xlu1 %v22459_v27, %s21957_s25 }
 0x1b7   : > { %2989 = vrot.lane.b32.xlu0 %v22523_v35, %s21957_s25 }
 0x1ba   : > { %2987 = vrot.lane.b32.xlu1 %v22511_v56, %s21957_s25 }
 0x1bb   : > { %3337 = vrot.lane.b32.xlu0 %v22430_v38, %s26058_s2 }
 0x1be   : > { %2991 = vrot.lane.b32.xlu1 %v22535_v46, %s21957_s25  ;;  %s26062_s25 = smov 16  }
 0x1bf   : > { %3335 = vrot.lane.b32.xlu0 %v22459_v27, %s26058_s2 }
 0x1c2   : > { %3339 = vrot.lane.b32.xlu1 %v22433_v62, %s26058_s2 }
 0x1c3   : > { %3343 = vrot.lane.b32.xlu0 %v22511_v56, %s26058_s2 }
 0x1c6   : > { %3341 = vrot.lane.b32.xlu1 %v22508_v16, %s26058_s2 }
 0x1c7   : > { %3347 = vrot.lane.b32.xlu0 %v22535_v46, %s26058_s2 }
 0x1ca   : > { %3345 = vrot.lane.b32.xlu1 %v22523_v35, %s26058_s2  ;;  %s26064_s2 = smov 68  }
 0x1cb   : > { %3695 = vrot.lane.b32.xlu0 %v22433_v62, %s21959_s27 }
 0x1ce   : > { %3693 = vrot.lane.b32.xlu1 %v22430_v38, %s21959_s27 }
 0x1cf   : > { %v1259_v37 = vpop.permute.xlu1 %1258  ;;  %v1261_v12 = vpop.permute.xlu0 %1260  ;;  %3697 = vrot.lane.b32.xlu0 %v22508_v16, %s21959_s27 }
 0x1d0   : > { %v1271_v31 = vsel %vm783_vm1, %v1259_v37, %v1261_v12 }
 0x1d1   : > { %1290 = vmatprep.subr.mxu0 %v1271_v31 }
 0x1d2   : > { %3691 = vrot.lane.b32.xlu1 %v22459_v27, %s21959_s27 }
 0x1d3   : > { %3701 = vrot.lane.b32.xlu0 %v22523_v35, %s21959_s27  ;;  %v1257_v36 = vpop.permute.xlu1 %1256 }
 0x1d4   : > { %v1270_v40 = vsel %vm783_vm1, %v1257_v36, %v1259_v37 }
 0x1d5   : > { %1291 = vmatpush1.msra.mxu0 %v1270_v40 }
 0x1d6   : > { %3699 = vrot.lane.b32.xlu1 %v22511_v56, %s21959_s27  ;;  %18918 = vmatmul.mubr.msk.f32.vlgmr.msra.gmra.mrb[0].mxu0 %vm1283_vm10, %v18916_v49 }
 0x1d7   : > { %4049 = vrot.lane.b32.xlu0 %v22430_v38, %s26087_s0  ;;  %1360 = vmatprep.mubr.f32.mxu0 %v21961_v51 }
 0x1da   : > { %3703 = vrot.lane.b32.xlu1 %v22535_v46, %s21959_s27  ;;  %18919 = vmatmul.mubr.msk.f32.gmra.mrb[2].mxu0 %vm1283_vm10, %v18917_v39  ;;  %s26094_s27 = smov 124  }
 0x1db   : > { %4047 = vrot.lane.b32.xlu0 %v22459_v27, %s26087_s0  ;;  %1431 = vmatprep.mubr.f32.mxu0 %v21961_v51 }
 0x1de   : > { %4051 = vrot.lane.b32.xlu1 %v22433_v62, %s26087_s0 }
 0x1df   : > { %4055 = vrot.lane.b32.xlu0 %v22511_v56, %s26087_s0 }
 0x1e2   : > { %4053 = vrot.lane.b32.xlu1 %v22508_v16, %s26087_s0 }
 0x1e3   : > { %4059 = vrot.lane.b32.xlu0 %v22535_v46, %s26087_s0 }
 0x1e6   : > { %4057 = vrot.lane.b32.xlu1 %v22523_v35, %s26087_s0 }
 0x1e7   : > { %v1263_v57 = vpop.permute.xlu0 %1262  ;;  %4423 = vperm.xlu0 %21054, %v4415_v41   ;;  %v1265_v9 = vpop.permute.xlu1 %1264 }
 0x1e8   : > { %v1273_v42 = vsel %vm783_vm1, %v1263_v57, %v1265_v9  ;;  %v1272_v0 = vsel %vm783_vm1, %v1261_v12, %v1263_v57  ;;  %v22846_v57 = vld [vmem:[%s26086_s23 + $0x58] sm:$0x3] }
 0x1e9   : > { %1367 = vmatprep.subr.mxu0 %v1273_v42 }
 0x1ea   : > { %4418 = vperm.xlu1 %21055, %v4414_v4   ;;  %1368 = vmatpush1.msra.mxu0 %v1272_v0  ;;  %v22857_v0 = vld [vmem:[%s26086_s23 + $0x60] sm:$0xff] }
 0x1eb   : > { %4449 = vperm.xlu0 %21054, %v4441_v1   ;;  %18920 = vmatmul.mubr.msk.f32.vlgmr.msra.gmra.mrb[4].mxu0 %vm1283_vm10, %v18916_v49 }
 0x1ec   : > { %1437 = vmatprep.mubr.f32.mxu0 %v21961_v51 }
 0x1ee   : > { %4444 = vperm.xlu1 %21055, %v4440_v26  }
 0x1ef   : > { %18921 = vmatmul.mubr.msk.f32.gmra.mrb[6].mxu0 %vm1283_vm10, %v18917_v39 }
 0x1f0   : > { %1508 = vmatprep.mubr.f32.mxu0 %v21961_v51 }
 0x1f1   : > { %v1267_v5 = vpop.permute.xlu0 %1266 }
 0x1f2   : > { %v1274_v55 = vsel %vm783_vm1, %v1265_v9, %v1267_v5 }
 0x1f5   : > { %v1914_v7 = vpop.permute.xlu0 %1913 }
 0x1f8   : > { %v1269_v48 = vpop.permute.xlu1 %1268 }
 0x1f9   : > { %v1275_v50 = vsel %vm783_vm1, %v1267_v5, %v1269_v48  ;;  %v1912_v52 = vpop.permute.xlu0 %1911 }
 0x1fa   : > { %1444 = vmatprep.subr.mxu0 %v1275_v50  ;;  %v1925_v21 = vsel %vm839_vm2, %v1912_v52, %v1914_v7  ;;  %v22888_v50 = vld [vmem:[%s26086_s23 + $0x68] sm:$0x3]  ;;  %v22894_v52 = vld [vmem:[%s26086_s23 + $0x70] sm:$0xff] }
 0x1fb   : > { %1445 = vmatpush1.msra.mxu0 %v1274_v55 }
 0x1fc   : > { %v22685_v11 = vpop.permute.xlu1 %1915  ;;  %18922 = vmatmul.mubr.msk.f32.vlgmr.msra.gmra.mrb[8].mxu0 %vm1283_vm10, %v18916_v49  ;;  %19620 = vmatprep.subr.mxu0 %v1269_v48 }
 0x1fd   : > { %19621 = vmatpush3.msra.mxu0 %v1269_v48  ;;  %1514 = vmatprep.mubr.f32.mxu0 %v21961_v51  ;;  %v22689_v8 = vpop.permute.xlu0 %1919 }
 0x1fe   : > { %1602 = vmatprep.subr.mxu0 %v22430_v38 }
 0x200   : > { %v1918_v10 = vpop.permute.xlu1 %1917  ;;  %18923 = vmatmul.mubr.msk.f32.gmra.mrb[10].mxu0 %vm1283_vm10, %v18917_v39 }
 0x201   : > { %19622 = vmatprep.mubr.msk.f32.mxu0 %vm1283_vm10, %v18916_v49  ;;  %v1924_v15 = vpop.permute.xlu0 %1923  ;;  %v1928_v30 = vsel %vm839_vm2, %v1918_v10, %v22689_v8 }
 0x202   : > { %19630 = vmatprep.subr.mxu1 %v1924_v15 }
 0x203   : > { %19631 = vmatpush3.msra.mxu1 %v1924_v15 }
 0x204   : > { %v22704_v28 = vpop.permute.xlu1 %1921  ;;  %19623 = vmatmul.mubr.msk.f32.vlgmr.msra.gmra.mrb[12].mxu0 %vm1283_vm10, %v18917_v39  ;;  %19633 = vmatmul.mubr.msk.f32.vlgmr.msra.gmra.mrb[0].mxu1 %vm1283_vm10, %v22697_v20 }
 0x205   : > { %1603 = vmatpush1.msra.mxu0 %v22459_v27  ;;  %1666 = vmatprep.mubr.f32.mxu0 %v21961_v51  ;;  %v22711_v38 = vpop.permute.xlu0 %2271  ;;  %v1929_v31 = vsel %vm839_vm2, %v22689_v8, %v22704_v28 }
 0x206   : > { %1679 = vmatprep.subr.mxu0 %v22508_v16  ;;  %19637 = vmatprep.mubr.msk.f32.mxu1 %vm1283_vm10, %v22702_v54 }
 0x208   : > { %v22716_v59 = vpop.permute.xlu1 %2269  ;;  %18926 = vmatmul.mubr.msk.f32.vlgmr.msra.gmra.mrb[0].mxu0 %vm1283_vm10, %v22533_v25 }
 0x209   : > { %1680 = vmatpush1.msra.mxu0 %v22433_v62  ;;  %1672 = vmatprep.mubr.f32.mxu0 %v21961_v51  ;;  %v22722_v53 = vpop.permute.xlu0 %2273  ;;  %v1926_v62 = vsel %vm839_vm2, %v1914_v7, %v22685_v11  ;;  %v2282_v36 = vsel %vm895_vm3, %v22716_v59, %v22711_v38 }
 0x20a   : > { %1756 = vmatprep.subr.mxu0 %v22523_v35  ;;  %v1927_v35 = vsel %vm839_vm2, %v22685_v11, %v1918_v10  ;;  %v2283_v5 = vsel %vm895_vm3, %v22711_v38, %v22722_v53 }
 0x20c   : > { %v22725_v27 = vpop.permute.xlu1 %2267  ;;  %18927 = vmatmul.mubr.msk.f32.gmra.mrb[2].mxu0 %vm1283_vm10, %v22542_v43 }
 0x20d   : > { %1743 = vmatprep.mubr.f32.mxu0 %v21961_v51  ;;  %v22730_v16 = vpop.permute.xlu0 %2277  ;;  %v2281_v41 = vsel %vm895_vm3, %v22725_v27, %v22716_v59 }
 0x210   : > { %v22732_v17 = vpop.permute.xlu1 %2275  ;;  %18928 = vmatmul.mubr.msk.f32.vlgmr.msra.gmra.mrb[4].mxu0 %vm1283_vm10, %v22533_v25 }
 0x211   : > { %1757 = vmatpush1.msra.mxu0 %v22511_v56  ;;  %1749 = vmatprep.mubr.f32.mxu0 %v21961_v51  ;;  %v22740_v24 = vpop.permute.xlu0 %2625  ;;  %v2284_v9 = vsel %vm895_vm3, %v22722_v53, %v22732_v17  ;;  %v2285_v10 = vsel %vm895_vm3, %v22732_v17, %v22730_v16 }
 0x212   : > { %1944 = vmatprep.subr.mxu0 %v1926_v62  ;;  %v22948_v62 = vld [vmem:[%s26086_s23 + $0x78] sm:$0x3] }
 0x214   : > { %v22742_v32 = vpop.permute.xlu1 %2279  ;;  %18929 = vmatmul.mubr.msk.f32.gmra.mrb[6].mxu0 %vm1283_vm10, %v22542_v43 }
 0x215   : > { %19635 = vmatprep.subr.mxu1 %v22742_v32  ;;  %1820 = vmatprep.mubr.f32.mxu0 %v21961_v51  ;;  %v22753_v56 = vpop.permute.xlu0 %2623  ;;  %v2286_v7 = vsel %vm895_vm3, %v22730_v16, %v22742_v32 }
 0x216   : > { %19636 = vmatpush3.msra.mxu1 %v22742_v32  ;;  %v2637_v59 = vsel %vm951_vm4, %v22753_v56, %v22740_v24 }
 0x217   : > { %19638 = vmatmul.mubr.msk.f32.vlgmr.msra.gmra.mrb[0].mxu1 %vm1283_vm10, %v22749_v61 }
 0x218   : > { %v22764_v47 = vpop.permute.xlu1 %2627  ;;  %18930 = vmatmul.mubr.msk.f32.vlgmr.msra.gmra.mrb[8].mxu0 %vm1283_vm10, %v22533_v25  ;;  %19642 = vmatprep.mubr.msk.f32.mxu1 %vm1283_vm10, %v22758_v63  ;;  %v1930_v25 = vsel %vm839_vm2, %v22704_v28, %v1924_v15 }
 0x219   : > { %1945 = vmatpush1.msra.mxu0 %v1925_v21  ;;  %1826 = vmatprep.mubr.f32.mxu0 %v21961_v51  ;;  %v22773_v33 = vpop.permute.xlu0 %2631  ;;  %v2638_v15 = vsel %vm951_vm4, %v22740_v24, %v22764_v47  ;;  %v22957_v24 = vld [vmem:[%s26086_s23 + $0x80] sm:$0xff] }
 0x21a   : > { %2021 = vmatprep.subr.mxu0 %v1928_v30 }
 0x21c   : > { %v22775_v6 = vpop.permute.xlu1 %2629  ;;  %18931 = vmatmul.mubr.msk.f32.gmra.mrb[10].mxu0 %vm1283_vm10, %v22542_v43 }
 0x21d   : > { %2008 = vmatprep.mubr.f32.mxu0 %v21961_v51  ;;  %v22780_v29 = vpop.permute.xlu0 %2635  ;;  %v2640_v27 = vsel %vm951_vm4, %v22775_v6, %v22773_v33  ;;  %v2639_v32 = vsel %vm951_vm4, %v22764_v47, %v22775_v6  ;;  %v22983_v47 = vld [vmem:[%s26086_s23 + $0x88] sm:$0x3] }
 0x21e   : > { %19640 = vmatprep.subr.mxu1 %v22780_v29 }
 0x21f   : > { %19641 = vmatpush3.msra.mxu1 %v22780_v29 }
 0x220   : > { %v22794_v34 = vpop.permute.xlu1 %2633  ;;  %18936 = vmatmul.mubr.msk.f32.vlgmr.msra.gmra.mrb[0].mxu0 %vm1283_vm10, %v22567_v3  ;;  %19643 = vmatmul.mubr.msk.f32.vlgmr.msra.gmra.mrb[0].mxu1 %vm1283_vm10, %v22785_v58 }
 0x221   : > { %2022 = vmatpush1.msra.mxu0 %v1927_v35  ;;  %2014 = vmatprep.mubr.f32.mxu0 %v21961_v51  ;;  %v22805_v46 = vpop.permute.xlu0 %2983  ;;  %v2641_v30 = vsel %vm951_vm4, %v22773_v33, %v22794_v34 }
 0x222   : > { %2098 = vmatprep.subr.mxu0 %v1930_v25  ;;  %19647 = vmatprep.mubr.msk.f32.mxu1 %vm1283_vm10, %v22792_v60 }
 0x224   : > { %v22809_v43 = vpop.permute.xlu1 %2981  ;;  %18937 = vmatmul.mubr.msk.f32.gmra.mrb[2].mxu0 %vm1283_vm10, %v22697_v20 }
 0x225   : > { %2085 = vmatprep.mubr.f32.mxu0 %v21961_v51  ;;  %v22814_v37 = vpop.permute.xlu0 %2985  ;;  %v2994_v6 = vsel %vm1007_vm5, %v22809_v43, %v22805_v46 }
 0x228   : > { %v22816_v12 = vpop.permute.xlu1 %2979  ;;  %18938 = vmatmul.mubr.msk.f32.vlgmr.msra.gmra.mrb[4].mxu0 %vm1283_vm10, %v22567_v3 }
 0x229   : > { %2099 = vmatpush1.msra.mxu0 %v1929_v31  ;;  %2091 = vmatprep.mubr.f32.mxu0 %v21961_v51  ;;  %v22827_v49 = vpop.permute.xlu0 %2989  ;;  %v2993_v33 = vsel %vm1007_vm5, %v22816_v12, %v22809_v43 }
 0x22a   : > { %2300 = vmatprep.subr.mxu0 %v2282_v36 }
 0x22c   : > { %v22829_v40 = vpop.permute.xlu1 %2987  ;;  %18939 = vmatmul.mubr.msk.f32.gmra.mrb[6].mxu0 %vm1283_vm10, %v22697_v20 }
 0x22d   : > { %2162 = vmatprep.mubr.f32.mxu0 %v21961_v51  ;;  %v22834_v39 = vpop.permute.xlu0 %3337 }
 0x230   : > { %v22839_v4 = vpop.permute.xlu1 %2991  ;;  %18940 = vmatmul.mubr.msk.f32.vlgmr.msra.gmra.mrb[8].mxu0 %vm1283_vm10, %v22567_v3 }
 0x231   : > { %2301 = vmatpush1.msra.mxu0 %v2281_v41  ;;  %19645 = vmatprep.subr.mxu1 %v22839_v4  ;;  %v22852_v42 = vpop.permute.xlu0 %3335 }
 0x232   : > { %2377 = vmatprep.subr.mxu0 %v2284_v9  ;;  %19646 = vmatpush3.msra.mxu1 %v22839_v4  ;;  %v3349_v25 = vsel %vm1063_vm6, %v22852_v42, %v22834_v39 }
 0x233   : > { %2168 = vmatprep.mubr.f32.mxu0 %v21961_v51  ;;  %19648 = vmatmul.mubr.msk.f32.vlgmr.msra.gmra.mrb[0].mxu1 %vm1283_vm10, %v22846_v57 }
 0x234   : > { %v22863_v3 = vpop.permute.xlu1 %3339  ;;  %18941 = vmatmul.mubr.msk.f32.gmra.mrb[10].mxu0 %vm1283_vm10, %v22697_v20  ;;  %19652 = vmatprep.mubr.msk.f32.mxu1 %vm1283_vm10, %v22857_v0 }
 0x235   : > { %2364 = vmatprep.mubr.f32.mxu0 %v21961_v51  ;;  %v22870_v1 = vpop.permute.xlu0 %3343  ;;  %v3350_v35 = vsel %vm1063_vm6, %v22834_v39, %v22863_v3 }
 0x238   : > { %v22872_v26 = vpop.permute.xlu1 %3341  ;;  %18946 = vmatmul.mubr.msk.f32.vlgmr.msra.gmra.mrb[0].mxu0 %vm1283_vm10, %v22702_v54 }
 0x239   : > { %2378 = vmatpush1.msra.mxu0 %v2283_v5  ;;  %2370 = vmatprep.mubr.f32.mxu0 %v21961_v51  ;;  %v22883_v48 = vpop.permute.xlu0 %3347 }
 0x23a   : > { %2454 = vmatprep.subr.mxu0 %v2286_v7  ;;  %19650 = vmatprep.subr.mxu1 %v22883_v48 }
 0x23b   : > { %19651 = vmatpush3.msra.mxu1 %v22883_v48 }
 0x23c   : > { %v22897_v55 = vpop.permute.xlu1 %3345  ;;  %18947 = vmatmul.mubr.msk.f32.gmra.mrb[2].mxu0 %vm1283_vm10, %v22749_v61  ;;  %19653 = vmatmul.mubr.msk.f32.vlgmr.msra.gmra.mrb[0].mxu1 %vm1283_vm10, %v22888_v50 }
 0x23d   : > { %2441 = vmatprep.mubr.f32.mxu0 %v21961_v51  ;;  %v22904_v11 = vpop.permute.xlu0 %3695  ;;  %19657 = vmatprep.mubr.msk.f32.mxu1 %vm1283_vm10, %v22894_v52  ;;  %v3354_v43 = vsel %vm1063_vm6, %v22897_v55, %v22883_v48 }
 0x240   : > { %v22908_v8 = vpop.permute.xlu1 %3693  ;;  %18948 = vmatmul.mubr.msk.f32.vlgmr.msra.gmra.mrb[4].mxu0 %vm1283_vm10, %v22702_v54 }
 0x241   : > { %2455 = vmatpush1.msra.mxu0 %v2285_v10  ;;  %2447 = vmatprep.mubr.f32.mxu0 %v21961_v51  ;;  %v22919_v20 = vpop.permute.xlu0 %3697  ;;  %v3706_v12 = vsel %vm1119_vm7, %v22908_v8, %v22904_v11 }
 0x242   : > { %2656 = vmatprep.subr.mxu0 %v2638_v15 }
 0x244   : > { %v22921_v28 = vpop.permute.xlu1 %3691  ;;  %18949 = vmatmul.mubr.msk.f32.gmra.mrb[6].mxu0 %vm1283_vm10, %v22749_v61 }
 0x245   : > { %2518 = vmatprep.mubr.f32.mxu0 %v21961_v51  ;;  %v22926_v38 = vpop.permute.xlu0 %3701  ;;  %v3705_v31 = vsel %vm1119_vm7, %v22921_v28, %v22908_v8 }
 0x248   : > { %v22931_v53 = vpop.permute.xlu1 %3699  ;;  %18950 = vmatmul.mubr.msk.f32.vlgmr.msra.gmra.mrb[8].mxu0 %vm1283_vm10, %v22702_v54 }
 0x249   : > { %2657 = vmatpush1.msra.mxu0 %v2637_v59  ;;  %2524 = vmatprep.mubr.f32.mxu0 %v21961_v51  ;;  %v22939_v16 = vpop.permute.xlu0 %4049  ;;  %v3708_v36 = vsel %vm1119_vm7, %v22919_v20, %v22931_v53  ;;  %v3709_v41 = vsel %vm1119_vm7, %v22931_v53, %v22926_v38 }
 0x24a   : > { %2733 = vmatprep.subr.mxu0 %v2640_v27 }
 0x24c   : > { %v22941_v17 = vpop.permute.xlu1 %3703  ;;  %18951 = vmatmul.mubr.msk.f32.gmra.mrb[10].mxu0 %vm1283_vm10, %v22749_v61  ;;  %v2642_v61 = vsel %vm951_vm4, %v22794_v34, %v22780_v29  ;;  %v2996_v29 = vsel %vm1007_vm5, %v22814_v37, %v22829_v40  ;;  %v2998_v34 = vsel %vm1007_vm5, %v22827_v49, %v22839_v4  ;;  %vm5775_vm4 = vcmask 1014784  }
 0x24d   : > { %19655 = vmatprep.subr.mxu1 %v22941_v17  ;;  %2720 = vmatprep.mubr.f32.mxu0 %v21961_v51  ;;  %v22952_v54 = vpop.permute.xlu0 %4047 }
 0x24e   : > { %19656 = vmatpush3.msra.mxu1 %v22941_v17  ;;  %v4061_v9 = vsel %vm1175_vm8, %v22952_v54, %v22939_v16 }
 0x24f   : > { %19658 = vmatmul.mubr.msk.f32.vlgmr.msra.gmra.mrb[0].mxu1 %vm1283_vm10, %v22948_v62 }
 0x250   : > { %18956 = vmatmul.mubr.msk.f32.vlgmr.msra.gmra.mrb[0].mxu0 %vm1283_vm10, %v22758_v63  ;;  %19662 = vmatprep.mubr.msk.f32.mxu1 %vm1283_vm10, %v22957_v24  ;;  %v4052_v39 = vpop.permute.xlu1 %4051 }
 0x251   : > { %2734 = vmatpush1.msra.mxu0 %v2639_v32  ;;  %2726 = vmatprep.mubr.f32.mxu0 %v21961_v51  ;;  %v22973_v56 = vpop.permute.xlu0 %4055  ;;  %v4062_v4 = vsel %vm1175_vm8, %v22939_v16, %v4052_v39 }
 0x252   : > { %2810 = vmatprep.subr.mxu0 %v2642_v61 }
 0x254   : > { %18957 = vmatmul.mubr.msk.f32.gmra.mrb[2].mxu0 %vm1283_vm10, %v22785_v58 }
 0x255   : > { %2797 = vmatprep.mubr.f32.mxu0 %v21961_v51  ;;  %v22978_v21 = vpop.permute.xlu0 %4059 }
 0x256   : > { %19660 = vmatprep.subr.mxu1 %v22978_v21 }
 0x257   : > { %19661 = vmatpush3.msra.mxu1 %v22978_v21 }
 0x258   : > { %18958 = vmatmul.mubr.msk.f32.vlgmr.msra.gmra.mrb[4].mxu0 %vm1283_vm10, %v22758_v63  ;;  %19663 = vmatmul.mubr.msk.f32.vlgmr.msra.gmra.mrb[0].mxu1 %vm1283_vm10, %v22983_v47 }
 0x259   : > { %2811 = vmatpush1.msra.mxu0 %v2641_v30  ;;  %2803 = vmatprep.mubr.f32.mxu0 %v21961_v51 }
 0x25a   : > { %3012 = vmatprep.subr.mxu0 %v2994_v6  ;;  %4638 = vmatprep.mubr.f32.mxu1 %v21961_v51 }
 0x25c   : > { %18959 = vmatmul.mubr.msk.f32.gmra.mrb[6].mxu0 %vm1283_vm10, %v22785_v58 }
 0x25d   : > { %2874 = vmatprep.mubr.f32.mxu0 %v21961_v51 }
 0x260   : > { %18960 = vmatmul.mubr.msk.f32.vlgmr.msra.gmra.mrb[8].mxu0 %vm1283_vm10, %v22758_v63  ;;  %v2995_v63 = vsel %vm1007_vm5, %v22805_v46, %v22814_v37  ;;  %v3352_v46 = vsel %vm1063_vm6, %v22872_v26, %v22870_v1  ;;  %v3353_v37 = vsel %vm1063_vm6, %v22870_v1, %v22897_v55 }
 0x261   : > { %3013 = vmatpush1.msra.mxu0 %v2993_v33  ;;  %2880 = vmatprep.mubr.f32.mxu0 %v21961_v51 }
 0x262   : > { %3089 = vmatprep.subr.mxu0 %v2996_v29 }
 0x264   : > { %18961 = vmatmul.mubr.msk.f32.gmra.mrb[10].mxu0 %vm1283_vm10, %v22785_v58  ;;  %v2997_v58 = vsel %vm1007_vm5, %v22829_v40, %v22827_v49  ;;  %v3707_v49 = vsel %vm1119_vm7, %v22904_v11, %v22919_v20  ;;  %v3710_v40 = vsel %vm1119_vm7, %v22926_v38, %v22941_v17  ;;  %vm6946_vm5 = vcmask 556032  }
 0x265   : > { %3076 = vmatprep.mubr.f32.mxu0 %v21961_v51  ;;  %vm7763_vm7 = vcmask 113664  }
 0x266   : > { %v23143_v48 = vpop.permute.xlu0 %4423 }
 0x268   : > { %18966 = vmatmul.mubr.msk.f32.vlgmr.msra.gmra.mrb[0].mxu0 %vm1283_vm10, %v22792_v60 }
 0x269   : > { %3090 = vmatpush1.msra.mxu0 %v2995_v63  ;;  %3082 = vmatprep.mubr.f32.mxu0 %v21961_v51 }
 0x26a   : > { %3166 = vmatprep.subr.mxu0 %v2998_v34  ;;  %v23148_v28 = vpop.permute.xlu0 %4449 }
 0x26c   : > { %18967 = vmatmul.mubr.msk.f32.gmra.mrb[2].mxu0 %vm1283_vm10, %v22846_v57 }
 0x26d   : > { %3153 = vmatprep.mubr.f32.mxu0 %v21961_v51 }
 0x270   : > { %18968 = vmatmul.mubr.msk.f32.vlgmr.msra.gmra.mrb[4].mxu0 %vm1283_vm10, %v22792_v60 }
 0x271   : > { %3167 = vmatpush1.msra.mxu0 %v2997_v58  ;;  %3159 = vmatprep.mubr.f32.mxu0 %v21961_v51 }
 0x272   : > { %3368 = vmatprep.subr.mxu0 %v3350_v35 }
 0x274   : > { %18969 = vmatmul.mubr.msk.f32.gmra.mrb[6].mxu0 %vm1283_vm10, %v22846_v57 }
 0x275   : > { %3230 = vmatprep.mubr.f32.mxu0 %v21961_v51 }
 0x278   : > { %18970 = vmatmul.mubr.msk.f32.vlgmr.msra.gmra.mrb[8].mxu0 %vm1283_vm10, %v22792_v60  ;;  %v3351_v60 = vsel %vm1063_vm6, %v22863_v3, %v22872_v26 }
 0x279   : > { %3369 = vmatpush1.msra.mxu0 %v3349_v25  ;;  %3236 = vmatprep.mubr.f32.mxu0 %v21961_v51 }
 0x27a   : > { %3445 = vmatprep.subr.mxu0 %v3352_v46 }
 0x27c   : > { %18971 = vmatmul.mubr.msk.f32.gmra.mrb[10].mxu0 %vm1283_vm10, %v22846_v57  ;;  %v4054_v57 = vpop.permute.xlu1 %4053 }
 0x27d   : > { %3432 = vmatprep.mubr.f32.mxu0 %v21961_v51  ;;  %v4064_v42 = vsel %vm1175_vm8, %v4054_v57, %v22973_v56  ;;  %v4063_v3 = vsel %vm1175_vm8, %v4052_v39, %v4054_v57  ;;  %v4466_v57 = vld [vmem:[%s26038_s8] sm:$0xff] }
 0x280   : > { %18976 = vmatmul.mubr.msk.f32.vlgmr.msra.gmra.mrb[0].mxu0 %vm1283_vm10, %v22857_v0 }
 0x281   : > { %3446 = vmatpush1.msra.mxu0 %v3351_v60  ;;  %3438 = vmatprep.mubr.f32.mxu0 %v21961_v51 }
 0x282   : > { %3522 = vmatprep.subr.mxu0 %v3354_v43 }
 0x284   : > { %18977 = vmatmul.mubr.msk.f32.gmra.mrb[2].mxu0 %vm1283_vm10, %v22888_v50 }
 0x285   : > { %3509 = vmatprep.mubr.f32.mxu0 %v21961_v51 }
 0x288   : > { %18978 = vmatmul.mubr.msk.f32.vlgmr.msra.gmra.mrb[4].mxu0 %vm1283_vm10, %v22857_v0 }
 0x289   : > { %3523 = vmatpush1.msra.mxu0 %v3353_v37  ;;  %3515 = vmatprep.mubr.f32.mxu0 %v21961_v51 }
 0x28a   : > { %3724 = vmatprep.subr.mxu0 %v3706_v12 }
 0x28c   : > { %18979 = vmatmul.mubr.msk.f32.gmra.mrb[6].mxu0 %vm1283_vm10, %v22888_v50 }
 0x28d   : > { %3586 = vmatprep.mubr.f32.mxu0 %v21961_v51 }
 0x290   : > { %18980 = vmatmul.mubr.msk.f32.vlgmr.msra.gmra.mrb[8].mxu0 %vm1283_vm10, %v22857_v0  ;;  %v4058_v0 = vpop.permute.xlu1 %4057 }
 0x291   : > { %3725 = vmatpush1.msra.mxu0 %v3705_v31  ;;  %3592 = vmatprep.mubr.f32.mxu0 %v21961_v51  ;;  %v4066_v1 = vsel %vm1175_vm8, %v4058_v0, %v22978_v21  ;;  %v4065_v26 = vsel %vm1175_vm8, %v22973_v56, %v4058_v0 }
 0x292   : > { %3801 = vmatprep.subr.mxu0 %v3708_v36 }
 0x294   : > { %18981 = vmatmul.mubr.msk.f32.gmra.mrb[10].mxu0 %vm1283_vm10, %v22888_v50 }
 0x295   : > { %3788 = vmatprep.mubr.f32.mxu0 %v21961_v51 }
 0x298   : > { %18986 = vmatmul.mubr.msk.f32.vlgmr.msra.gmra.mrb[0].mxu0 %vm1283_vm10, %v22894_v52 }
 0x299   : > { %3802 = vmatpush1.msra.mxu0 %v3707_v49  ;;  %3794 = vmatprep.mubr.f32.mxu0 %v21961_v51 }
 0x29a   : > { %3878 = vmatprep.subr.mxu0 %v3710_v40 }
 0x29c   : > { %18987 = vmatmul.mubr.msk.f32.gmra.mrb[2].mxu0 %vm1283_vm10, %v22948_v62 }
 0x29d   : > { %3865 = vmatprep.mubr.f32.mxu0 %v21961_v51 }
 0x2a0   : > { %18988 = vmatmul.mubr.msk.f32.vlgmr.msra.gmra.mrb[4].mxu0 %vm1283_vm10, %v22894_v52 }
 0x2a1   : > { %3879 = vmatpush1.msra.mxu0 %v3709_v41  ;;  %3871 = vmatprep.mubr.f32.mxu0 %v21961_v51 }
 0x2a2   : > { %4080 = vmatprep.subr.mxu0 %v4062_v4 }
 0x2a4   : > { %18989 = vmatmul.mubr.msk.f32.gmra.mrb[6].mxu0 %vm1283_vm10, %v22948_v62 }
 0x2a5   : > { %3942 = vmatprep.mubr.f32.mxu0 %v21961_v51 }
 0x2a8   : > { %18990 = vmatmul.mubr.msk.f32.vlgmr.msra.gmra.mrb[8].mxu0 %vm1283_vm10, %v22894_v52  ;;  %v23145_v52 = vpop.permute.xlu1 %4418 }
 0x2a9   : > { %4081 = vmatpush1.msra.mxu0 %v4061_v9  ;;  %3948 = vmatprep.mubr.f32.mxu0 %v21961_v51 }
 0x2aa   : > { %4157 = vmatprep.subr.mxu0 %v4064_v42 }
 0x2ac   : > { %18991 = vmatmul.mubr.msk.f32.gmra.mrb[10].mxu0 %vm1283_vm10, %v22948_v62  ;;  %v23151_v59 = vpop.permute.xlu1 %4444 }
 0x2ad   : > { %4144 = vmatprep.mubr.f32.mxu0 %v21961_v51 }
 0x2b0   : > { %18996 = vmatmul.mubr.msk.f32.vlgmr.msra.gmra.mrb[0].mxu0 %vm1283_vm10, %v22957_v24 }
 0x2b1   : > { %4158 = vmatpush1.msra.mxu0 %v4063_v3  ;;  %4150 = vmatprep.mubr.f32.mxu0 %v21961_v51 }
 0x2b2   : > { %4234 = vmatprep.subr.mxu0 %v4066_v1 }
 0x2b4   : > { %18997 = vmatmul.mubr.msk.f32.gmra.mrb[2].mxu0 %vm1283_vm10, %v22983_v47 }
 0x2b5   : > { %4221 = vmatprep.mubr.f32.mxu0 %v21961_v51 }
 0x2b8   : > { %18998 = vmatmul.mubr.msk.f32.vlgmr.msra.gmra.mrb[4].mxu0 %vm1283_vm10, %v22957_v24 }
 0x2b9   : > { %4235 = vmatpush1.msra.mxu0 %v4065_v26  ;;  %4227 = vmatprep.mubr.f32.mxu0 %v21961_v51 }
 0x2bc   : > { %18999 = vmatmul.mubr.msk.f32.gmra.mrb[6].mxu0 %vm1283_vm10, %v22983_v47 }
 0x2bd   : > { %4298 = vmatprep.mubr.f32.mxu0 %v21961_v51 }
 0x2c0   : > { %19000 = vmatmul.mubr.msk.f32.vlgmr.msra.gmra.mrb[8].mxu0 %vm1283_vm10, %v22957_v24 }
 0x2c1   : > { %4304 = vmatprep.mubr.f32.mxu0 %v21961_v51 }
 0x2c4   : > { %19001 = vmatmul.mubr.msk.f32.gmra.mrb[10].mxu0 %vm1283_vm10, %v22983_v47 }
 0x2c5   : > { %4561 = vmatprep.mubr.f32.mxu0 %v21961_v51 }
 0x2d7   : > { %v19624_v5 = vpop.f32.mrb[12].mxu0 }
 0x2d8   : > { %v1587_v7 = vpop.f32.mrb[13].mxu0 }
 0x32b   : > { %v19664_v50 = vpop.f32.mrb[0].mxu1 }
 0x32c   : > { %v20510_v55 = vadd.f32 %v19664_v50, %v19624_v5  ;;  %v4377_v11 = vpop.f32.mrb[1].mxu1 }
 0x32d   : > { %v20511_v8 = vadd.f32 %v4377_v11, %v1587_v7  ;;  %v4467_v11 = vld [vmem:[%s26038_s8 + $0x8] sm:$0xf] }
 0x32e   : > { %v4413_v10 = vmax.f32 %v20510_v55, 0.0 }
 0x32f   : > { %v4406_v15 = vmax.f32 %v20511_v8, 0.0 }
 0x330   : > { %v4439_v20 = vmul.f32 %v23143_v48, %v4413_v10 }
 0x331   : > { %v4432_v38 = vmul.f32 %v23145_v52, %v4406_v15 }
 0x332   : > { %v4465_v53 = vadd.f32 %v23148_v28, %v4439_v20 }
 0x333   : > { %v4458_v27 = vadd.f32 %v23151_v59, %v4432_v38 }
 0x335   : > { %v23155_v16 = vpack.c.bf16 %v4465_v53, %v4458_v27 }
 0x383   : > { %v4146_v17 = vpop.f32.mrb[0].mxu0 }
 0x384   : > { %v4400_v62 = vmax.f32 %v4146_v17, 0.0  ;;  %v4148_v54 = vpop.f32.mrb[1].mxu0 }
 0x385   : > { %v4401_v24 = vmax.f32 %v4148_v54, 0.0 }
 0x386   : > { %v4426_v61 = vmul.f32 %v23145_v52, %v4400_v62 }
 0x387   : > { %v4152_v32 = vpop.f32.mrb[2].mxu0  ;;  %v4427_v47 = vmul.f32 %v23145_v52, %v4401_v24 }
 0x388   : > { %v4407_v56 = vmax.f32 %v4152_v32, 0.0  ;;  %v4154_v21 = vpop.f32.mrb[3].mxu0  ;;  %v4452_v63 = vadd.f32 %v23151_v59, %v4426_v61 }
 0x389   : > { %v4408_v30 = vmax.f32 %v4154_v21, 0.0  ;;  %v4453_v25 = vadd.f32 %v23151_v59, %v4427_v47 }
 0x38a   : > { %v4433_v6 = vmul.f32 %v23143_v48, %v4407_v56 }
 0x38b   : > { %v4434_v33 = vmul.f32 %v23143_v48, %v4408_v30  ;;  %v4223_v29 = vpop.f32.mrb[4].mxu0 }
 0x38c   : > { %v4459_v34 = vadd.f32 %v23148_v28, %v4433_v6  ;;  %v4402_v58 = vmax.f32 %v4223_v29, 0.0  ;;  %v4225_v35 = vpop.f32.mrb[5].mxu0 }
 0x38d   : > { %v4460_v46 = vadd.f32 %v23148_v28, %v4434_v33  ;;  %v4403_v60 = vmax.f32 %v4225_v35, 0.0 }
 0x38e   : > { %v19916_v43 = vpack.c.bf16 %v4459_v34, %v4452_v63  ;;  %v4428_v36 = vmul.f32 %v23145_v52, %v4402_v58 }
 0x38f   : > { %v19913_v12 = vpack.c.bf16 %v4460_v46, %v4453_v25  ;;  %v4229_v31 = vpop.f32.mrb[6].mxu0  ;;  %v4429_v39 = vmul.f32 %v23145_v52, %v4403_v60 }
 0x390   : > { %v4409_v49 = vmax.f32 %v4229_v31, 0.0  ;;  %v4231_v40 = vpop.f32.mrb[7].mxu0  ;;  %v4454_v0 = vadd.f32 %v23151_v59, %v4428_v36 }
 0x391   : > { %v4410_v41 = vmax.f32 %v4231_v40, 0.0  ;;  %19915 = vmatprep.subr.msk.bf16.mxu0 %vm23166_vm13, %v19913_v12  ;;  %v4455_v5 = vadd.f32 %v23151_v59, %v4429_v39 }
 0x392   : > { %v4435_v4 = vmul.f32 %v23143_v48, %v4409_v49  ;;  %19918 = vmatpush1.bf16.msk.msra.mxu0 %vm23166_vm13, %v19916_v43 }
 0x393   : > { %v4436_v9 = vmul.f32 %v23143_v48, %v4410_v41  ;;  %v4300_v42 = vpop.f32.mrb[8].mxu0 }
 0x394   : > { %v4461_v3 = vadd.f32 %v23148_v28, %v4435_v4  ;;  %v4404_v1 = vmax.f32 %v4300_v42, 0.0  ;;  %v4302_v26 = vpop.f32.mrb[9].mxu0 }
 0x395   : > { %v4462_v7 = vadd.f32 %v23148_v28, %v4436_v9  ;;  %v4405_v50 = vmax.f32 %v4302_v26, 0.0  ;;  %19006 = vmatmul.mubr.msk.f32.vlgmr.msra.gmra.mrb[14].mxu0 %vm4468_vm14, %v4466_v57 }
 0x396   : > { %v19922_v55 = vpack.c.bf16 %v4461_v3, %v4454_v0  ;;  %4567 = vmatprep.mubr.f32.mxu0 %v21961_v51  ;;  %v4430_v15 = vmul.f32 %v23145_v52, %v4404_v1 }
 0x397   : > { %v19919_v8 = vpack.c.bf16 %v4462_v7, %v4455_v5  ;;  %v4306_v10 = vpop.f32.mrb[10].mxu0  ;;  %v4431_v53 = vmul.f32 %v23145_v52, %v4405_v50 }
 0x398   : > { %v4411_v20 = vmax.f32 %v4306_v10, 0.0  ;;  %v4308_v38 = vpop.f32.mrb[11].mxu0  ;;  %v4456_v54 = vadd.f32 %v23151_v59, %v4430_v15 }
 0x399   : > { %v4412_v27 = vmax.f32 %v4308_v38, 0.0  ;;  %19007 = vmatmul.mubr.msk.f32.gmra.mrb[16].mxu0 %vm4468_vm14, %v4467_v11  ;;  %19921 = vmatprep.subr.msk.bf16.mxu1 %vm23166_vm13, %v19919_v8  ;;  %v4457_v52 = vadd.f32 %v23151_v59, %v4431_v53 }
 0x39a   : > { %v4437_v17 = vmul.f32 %v23143_v48, %v4411_v20  ;;  %19924 = vmatpush1.bf16.msk.msra.mxu1 %vm23166_vm13, %v19922_v55  ;;  %5253 = vmatprep.mubr.f32.mxu0 %v21961_v51 }
 0x39b   : > { %v4438_v62 = vmul.f32 %v23143_v48, %v4412_v27  ;;  %v23211_v48 = vld [vmem:[#allocation2] sm:$0xff] }
 0x39c   : > { %v4463_v24 = vadd.f32 %v23148_v28, %v4437_v17 }
 0x39d   : > { %v4464_v32 = vadd.f32 %v23148_v28, %v4438_v62  ;;  %19010 = vmatmul.mubr.msk.f32.vlgmr.msra.gmra.mrb[2].mxu1 %vm4468_vm14, %v4466_v57 }
 0x39e   : > { %v19928_v61 = vpack.c.bf16 %v4463_v24, %v4456_v54  ;;  %4644 = vmatprep.mubr.f32.mxu1 %v21961_v51 }
 0x39f   : > { %v19925_v56 = vpack.c.bf16 %v4464_v32, %v4457_v52 }
 0x3a1   : > { %19011 = vmatmul.mubr.msk.f32.gmra.mrb[4].mxu1 %vm4468_vm14, %v4467_v11  ;;  %19927 = vmatprep.subr.msk.bf16.mxu1 %vm23166_vm13, %v19925_v56 }
 0x3a2   : > { %19930 = vmatpush1.bf16.msk.msra.mxu1 %vm23166_vm13, %v19928_v61  ;;  %4715 = vmatprep.mubr.f32.mxu1 %v23211_v48 }
 0x3a3   : > { %19933 = vmatprep.subr.msk.bf16.mxu1 %vm23166_vm13, %v23155_v16 }
 0x3a5   : > { %19014 = vmatmul.mubr.msk.f32.vlgmr.msra.gmra.mrb[6].mxu1 %vm4468_vm14, %v4466_v57 }
 0x3a6   : > { %19936 = vmatpush3.bf16.msk.msra.mxu1 %vm23166_vm13, %v23155_v16  ;;  %4721 = vmatprep.mubr.f32.mxu1 %v23211_v48  ;;  %vm8688_vm13 = vcmask 1045504  }
 0x3a9   : > { %19015 = vmatmul.mubr.msk.f32.gmra.mrb[8].mxu1 %vm4468_vm14, %v4467_v11 }
 0x3aa   : > { %19669 = vmatprep.mubr.msk.f32.mxu1 %vm4468_vm14, %v4466_v57 }
 0x3ad   : > { %19670 = vmatmul.mubr.msk.f32.vlgmr.msra.gmra.mrb[10].mxu1 %vm4468_vm14, %v4467_v11  ;;  %vm24417_vm14 = vmpackc.low %vm8688_vm13, %vm21962_vm12 }
 0x3ae   : > { %5176 = vmatprep.mubr.f32.mxu1 %v23211_v48 }
 0x468   : > { %v4563_v51 = vpop.f32.mrb[14].mxu0 }
 0x469   : > { %v4565_v28 = vpop.f32.mrb[15].mxu0  ;;  %4846 = vrot.lane.b32.xlu1 %v4563_v51, %s21953_s5 }
 0x46c   : > { %v4569_v59 = vpop.f32.mrb[16].mxu0 }
 0x46d   : > { %4810 = vst [vmem:[#allocation2 + $0x50] sm:$0xf] %v4569_v59  ;;  %v4571_v21 = vpop.f32.mrb[17].mxu0  ;;  %4848 = vrot.lane.b32.xlu1 %v4565_v28, %s21953_s5 }
 0x46e   : > { %4811 = vst [vmem:[#allocation2 + $0x58] sm:$0xf] %v4571_v21 }
 0x470   : > { %v4640_v16 = vpop.f32.mrb[2].mxu1 }
 0x471   : > { %v23228_v47 = vpop.f32.mrb[3].mxu1 }
 0x474   : > { %v4646_v30 = vpop.f32.mrb[4].mxu1  ;;  %v4825_v6 = vld [vmem:[#allocation2 + $0x50] sm:$0xf] }
 0x475   : > { %4812 = vst [vmem:[#allocation2 + $0x60] sm:$0xf] %v4646_v30  ;;  %4860 = vrot.lane.b32.xlu0 %v4825_v6, %s21953_s5  ;;  %v4648_v33 = vpop.f32.mrb[5].mxu1  ;;  %v4826_v29 = vld [vmem:[#allocation2 + $0x58] sm:$0xf] }
 0x476   : > { %4813 = vst [vmem:[#allocation2 + $0x68] sm:$0xf] %v4648_v33  ;;  %4862 = vrot.lane.b32.xlu1 %v4826_v29, %s21953_s5 }
 0x478   : > { %v23232_v63 = vpop.f32.mrb[6].mxu1 }
 0x479   : > { %4850 = vrot.lane.b32.xlu0 %v4640_v16, %s21953_s5  ;;  %v23235_v34 = vpop.f32.mrb[7].mxu1 }
 0x47a   : > { %4852 = vrot.lane.b32.xlu1 %v23228_v47, %s21953_s5 }
 0x47c   : > { %v4723_v58 = vpop.f32.mrb[8].mxu1  ;;  %v4827_v35 = vld [vmem:[#allocation2 + $0x60] sm:$0xf] }
 0x47d   : > { %4814 = vst [vmem:[#allocation2 + $0x70] sm:$0xf] %v4723_v58  ;;  %4864 = vrot.lane.b32.xlu0 %v4827_v35, %s21953_s5  ;;  %v4725_v25 = vpop.f32.mrb[9].mxu1  ;;  %v4828_v46 = vld [vmem:[#allocation2 + $0x68] sm:$0xf] }
 0x47e   : > { %4815 = vst [vmem:[#allocation2 + $0x78] sm:$0xf] %v4725_v25  ;;  %4866 = vrot.lane.b32.xlu1 %v4828_v46, %s21953_s5 }
 0x480   : > { %v19671_v60 = vpop.f32.mrb[10].mxu1 }
 0x481   : > { %4817 = vst.msk [vmem:[#allocation2 + $0x80] sm:$0xf] %vm4816_vm15, %v19671_v60  ;;  %v4794_v43 = vpop.f32.mrb[11].mxu1  ;;  %4854 = vrot.lane.b32.xlu0 %v23232_v63, %s21953_s5 }
 0x482   : > { %4809 = vst.msk [vmem:[#allocation2 + $0x38] sm:$0xff] %vm26074_vm9, %v4794_v43  ;;  %4856 = vrot.lane.b32.xlu1 %v23235_v34, %s21953_s5 }
 0x484   : > { %v4829_v37 = vld [vmem:[#allocation2 + $0x70] sm:$0xf] }
 0x485   : > { %4868 = vrot.lane.b32.xlu0 %v4829_v37, %s21953_s5  ;;  %v4830_v12 = vld [vmem:[#allocation2 + $0x78] sm:$0xf] }
 0x486   : > { %4870 = vrot.lane.b32.xlu1 %v4830_v12, %s21953_s5 }
 0x488   : > { %v4831_v36 = vld [vmem:[#allocation2 + $0x80] sm:$0xf] }
 0x489   : > { %v4824_v31 = vld [vmem:[#allocation2 + $0x38] sm:$0xff] }
 0x48a   : > { %4858 = vrot.lane.b32.xlu0 %v4824_v31, %s21953_s5 }
 0x48e   : > { %4872 = vrot.lane.b32.xlu0 %v4831_v36, %s21953_s5  ;;  %s26066_s5 = smov 124  }
 0x4db   : > { %v4847_v49 = vpop.permute.xlu1 %4846 }
 0x4df   : > { %v4849_v40 = vpop.permute.xlu1 %4848 }
 0x4e0   : > { %v4874_v39 = vsel %vm783_vm1, %v4847_v49, %v4849_v40 }
 0x4e1   : > { %v23252_v41 = vmax.f32 %v4563_v51, %v4874_v39 }
 0x4e3   : > { %4928 = vrot.lane.b32.xlu1 %v23252_v41, %s21955_s6 }
 0x4e7   : > { %v4861_v4 = vpop.permute.xlu0 %4860 }
 0x4e8   : > { %v4863_v57 = vpop.permute.xlu1 %4862 }
 0x4e9   : > { %v4880_v9 = vsel %vm783_vm1, %v4861_v4, %v4863_v57 }
 0x4ea   : > { %v4907_v42 = vmax.f32 %v4825_v6, %v4880_v9 }
 0x4eb   : > { %v4851_v0 = vpop.permute.xlu0 %4850 }
 0x4ec   : > { %v4875_v3 = vsel %vm783_vm1, %v4849_v40, %v4851_v0  ;;  %4942 = vrot.lane.b32.xlu0 %v4907_v42, %s21955_s6  ;;  %v4853_v1 = vpop.permute.xlu1 %4852 }
 0x4ed   : > { %v4901_v26 = vmax.f32 %v4565_v28, %v4875_v3  ;;  %v4876_v5 = vsel %vm783_vm1, %v4851_v0, %v4853_v1 }
 0x4ee   : > { %v4902_v7 = vmax.f32 %v4640_v16, %v4876_v5 }
 0x4ef   : > { %v4865_v50 = vpop.permute.xlu0 %4864  ;;  %4930 = vrot.lane.b32.xlu1 %v4901_v26, %s21955_s6 }
 0x4f0   : > { %v4881_v55 = vsel %vm783_vm1, %v4863_v57, %v4865_v50  ;;  %4932 = vrot.lane.b32.xlu0 %v4902_v7, %s21955_s6  ;;  %v4867_v11 = vpop.permute.xlu1 %4866 }
 0x4f1   : > { %v4908_v8 = vmax.f32 %v4826_v29, %v4881_v55  ;;  %v4882_v10 = vsel %vm783_vm1, %v4865_v50, %v4867_v11 }
 0x4f2   : > { %v4909_v15 = vmax.f32 %v4827_v35, %v4882_v10 }
 0x4f3   : > { %v4855_v20 = vpop.permute.xlu0 %4854 }
 0x4f4   : > { %v4877_v38 = vsel %vm783_vm1, %v4853_v1, %v4855_v20  ;;  %4944 = vrot.lane.b32.xlu0 %v4908_v8, %s21955_s6  ;;  %4946 = vrot.lane.b32.xlu1 %v4909_v15, %s21955_s6  ;;  %v4857_v54 = vpop.permute.xlu1 %4856 }
 0x4f5   : > { %v23268_v53 = vmax.f32 %v23228_v47, %v4877_v38  ;;  %v4878_v47 = vsel %vm783_vm1, %v4855_v20, %v4857_v54 }
 0x4f6   : > { %v4904_v6 = vmax.f32 %v23232_v63, %v4878_v47 }
 0x4f7   : > { %v4869_v27 = vpop.permute.xlu0 %4868 }
 0x4f8   : > { %v4883_v17 = vsel %vm783_vm1, %v4867_v11, %v4869_v27  ;;  %4934 = vrot.lane.b32.xlu1 %v23268_v53, %s21955_s6  ;;  %v4871_v52 = vpop.permute.xlu1 %4870 }
 0x4f9   : > { %v23273_v62 = vmax.f32 %v4828_v46, %v4883_v17  ;;  %v4884_v21 = vsel %vm783_vm1, %v4869_v27, %v4871_v52 }
 0x4fa   : > { %v4911_v30 = vmax.f32 %v4829_v37, %v4884_v21 }
 0x4fb   : > { %4948 = vrot.lane.b32.xlu0 %v23273_v62, %s21955_s6 }
 0x4fc   : > { %v4859_v24 = vpop.permute.xlu0 %4858 }
 0x4fd   : > { %v4879_v28 = vsel %vm783_vm1, %v4857_v54, %v4859_v24  ;;  %v4906_v59 = vmax.f32 %v4824_v31, %v4859_v24 }
 0x4fe   : > { %v23283_v16 = vmax.f32 %v23235_v34, %v4879_v28 }
 0x500   : > { %v4873_v32 = vpop.permute.xlu0 %4872 }
 0x501   : > { %v4885_v61 = vsel %vm783_vm1, %v4871_v52, %v4873_v32  ;;  %v4913_v56 = vmax.f32 %v4831_v36, %v4873_v32  ;;  %vm23469_vm1 = vmpackc.low %vm5097_vm0, %vm21962_vm12  ;;  %vm21969_vm12 = vmmov 0  }
 0x502   : > { %v4912_v51 = vmax.f32 %v4830_v12, %v4885_v61 }
 0x503   : > { %4954 = vrot.lane.b32.xlu0 %v4913_v56, %s21955_s6 }
 0x504   : > { %4952 = vrot.lane.b32.xlu1 %v4912_v51, %s21955_s6 }
 0x507   : > { %4940 = vrot.lane.b32.xlu0 %v4906_v59, %s21955_s6 }
 0x508   : > { %4938 = vrot.lane.b32.xlu1 %v23283_v16, %s21955_s6 }
 0x50b   : > { %4950 = vrot.lane.b32.xlu0 %v4911_v30, %s21955_s6 }
 0x50c   : > { %4936 = vrot.lane.b32.xlu1 %v4904_v6, %s21955_s6  ;;  %s26091_s6 = smov 72  }
 0x555   : > { %v4929_v33 = vpop.permute.xlu1 %4928 }
 0x55e   : > { %v4943_v29 = vpop.permute.xlu0 %4942 }
 0x561   : > { %v4931_v58 = vpop.permute.xlu1 %4930 }
 0x562   : > { %v4933_v35 = vpop.permute.xlu0 %4932  ;;  %v4956_v40 = vsel %vm895_vm3, %v4929_v33, %v4931_v58 }
 0x563   : > { %v4957_v37 = vsel %vm895_vm3, %v4931_v58, %v4933_v35 }
 0x564   : > { %v23296_v36 = vmax.f32 %v4901_v26, %v4957_v37 }
 0x566   : > { %v4945_v34 = vpop.permute.xlu0 %4944  ;;  %v4947_v25 = vpop.permute.xlu1 %4946 }
 0x567   : > { %v4962_v46 = vsel %vm895_vm3, %v4943_v29, %v4945_v34  ;;  %v4963_v60 = vsel %vm895_vm3, %v4945_v34, %v4947_v25 }
 0x568   : > { %v4989_v43 = vmax.f32 %v4907_v42, %v4962_v46  ;;  %v4990_v12 = vmax.f32 %v4908_v8, %v4963_v60  ;;  %v23307_v42 = vmax.f32 %v23252_v41, %v4956_v40 }
 0x56a   : > { %5003 = vst [vmem:[#allocation2 + $0x50] sm:$0xf] %v4989_v43  ;;  %5004 = vst [vmem:[#allocation2 + $0x58] sm:$0xf] %v4990_v12  ;;  %v4935_v63 = vpop.permute.xlu1 %4934 }
 0x56b   : > { %v4958_v31 = vsel %vm895_vm3, %v4933_v35, %v4935_v63 }
 0x56c   : > { %v23298_v49 = vmax.f32 %v4902_v7, %v4958_v31 }
 0x56d   : > { %v4949_v39 = vpop.permute.xlu0 %4948 }
 0x56e   : > { %v4964_v4 = vsel %vm895_vm3, %v4947_v25, %v4949_v39  ;;  %v23304_v57 = vpack.i.bf16 %v23298_v49, %v23296_v36 }
 0x56f   : > { %v4991_v9 = vmax.f32 %v4909_v15, %v4964_v4  ;;  %v7703_v4 = vld [vmem:[#allocation2 + $0x40] sm:$0xff] }
 0x570   : > { %21057 = vrot.lane.b32.xlu1 %v23304_v57, %s26068_s24 }
 0x571   : > { %5005 = vst [vmem:[#allocation2 + $0x60] sm:$0xf] %v4991_v9  ;;  %v23311_v0 = vld [vmem:[#allocation2 + $0x50] sm:$0xf]  ;;  %v23321_v50 = vld [vmem:[#allocation2 + $0x58] sm:$0xf] }
 0x572   : > { %v23315_v3 = vpack.i.bf16 %v23311_v0, %v23307_v42  ;;  %v7704_v35 = vld [vmem:[#allocation2 + $0x50] sm:$0xf]  ;;  %v7705_v12 = vld [vmem:[#allocation2 + $0x58] sm:$0xf]  ;;  %v7711_v9 = vld [vmem:[#allocation2 + $0x88] sm:$0xf] }
 0x573   : > { %v21276_v25 = vpack.i.bf16 %v7704_v35, %v23307_v42 }
 0x574   : > { %21067 = vrot.lane.b32.xlu1 %v23315_v3, %s26068_s24 }
 0x575   : > { %v4955_v1 = vpop.permute.xlu0 %4954 }
 0x576   : > { %v4995_v26 = vmax.f32 %v4913_v56, %v4955_v1  ;;  %v4953_v5 = vpop.permute.xlu1 %4952 }
 0x577   : > { %v4967_v7 = vsel %vm895_vm3, %v4953_v5, %v4955_v1 }
 0x578   : > { %5009 = vst.msk [vmem:[#allocation2 + $0x80] sm:$0xf] %vm4816_vm15, %v4995_v26  ;;  %v4994_v41 = vmax.f32 %v4912_v51, %v4967_v7  ;;  %v23323_v55 = vld [vmem:[#allocation2 + $0x60] sm:$0xf] }
 0x579   : > { %v4941_v11 = vpop.permute.xlu0 %4940  ;;  %v23327_v8 = vpack.i.bf16 %v23323_v55, %v23321_v50  ;;  %v7706_v46 = vld [vmem:[#allocation2 + $0x60] sm:$0xf] }
 0x57a   : > { %5008 = vst [vmem:[#allocation2 + $0x78] sm:$0xf] %v4994_v41  ;;  %v4988_v10 = vmax.f32 %v4906_v59, %v4941_v11  ;;  %v4939_v15 = vpop.permute.xlu1 %4938  ;;  %v21261_v37 = vpack.i.bf16 %v7706_v46, %v7705_v12 }
 0x57b   : > { %21062 = vrot.lane.b32.xlu0 %v23327_v8, %s26068_s24  ;;  %v4961_v38 = vsel %vm895_vm3, %v4939_v15, %v4941_v11 }
 0x57c   : > { %5002 = vst.msk [vmem:[#allocation2 + $0x38] sm:$0xff] %vm26074_vm9, %v4988_v10  ;;  %v23348_v21 = vmax.f32 %v23283_v16, %v4961_v38 }
 0x57d   : > { %v4951_v20 = vpop.permute.xlu0 %4950 }
 0x57e   : > { %v4965_v27 = vsel %vm895_vm3, %v4949_v39, %v4951_v20  ;;  %v4966_v17 = vsel %vm895_vm3, %v4951_v20, %v4953_v5  ;;  %v4937_v54 = vpop.permute.xlu1 %4936 }
 0x57f   : > { %v4992_v24 = vmax.f32 %v23273_v62, %v4965_v27  ;;  %v4993_v52 = vmax.f32 %v4911_v30, %v4966_v17  ;;  %v4959_v32 = vsel %vm895_vm3, %v4935_v63, %v4937_v54  ;;  %v4960_v61 = vsel %vm895_vm3, %v4937_v54, %v4939_v15  ;;  %v23345_v59 = vld [vmem:[#allocation2 + $0x80] sm:$0xf] }
 0x580   : > { %v23339_v56 = vmax.f32 %v23268_v53, %v4959_v32  ;;  %v23341_v51 = vmax.f32 %v4904_v6, %v4960_v61  ;;  %v7710_v40 = vld [vmem:[#allocation2 + $0x80] sm:$0xf]  ;;  %vm26073_vm3 = vcmask 97280  }
 0x581   : > { %5006 = vst [vmem:[#allocation2 + $0x68] sm:$0xf] %v4992_v24  ;;  %5007 = vst [vmem:[#allocation2 + $0x70] sm:$0xf] %v4993_v52  ;;  %v23343_v28 = vld [vmem:[#allocation2 + $0x78] sm:$0xf] }
 0x582   : > { %v21071_v62 = vpack.i.bf16 %v23345_v59, %v23343_v28  ;;  %v23356_v53 = vpack.i.bf16 %v23341_v51, %v23339_v56  ;;  %v21316_v6 = vpack.i.bf16 %v23339_v56, %v23307_v42  ;;  %v7709_v31 = vld [vmem:[#allocation2 + $0x78] sm:$0xf]  ;;  %v21321_v26 = vpack.i.bf16 %v7704_v35, %v23341_v51  ;;  %v8561_v61 = vld [vmem:[%s26041_s11] sm:$0xff]  ;;  %v8562_v35 = vld [vmem:[%s26041_s11 + $0x8] sm:$0x3f] }
 0x583   : > { %v23352_v47 = vld [vmem:[#allocation2 + $0x38] sm:$0xff]  ;;  %v21286_v39 = vpack.i.bf16 %v7710_v40, %v7709_v31 }
 0x584   : > { %21072 = vrot.lane.b32.xlu1 %v21071_v62, %s26068_s24  ;;  %v23361_v30 = vpack.i.bf16 %v23352_v47, %v23348_v21 }
 0x586   : > { %21077 = vrot.lane.b32.xlu0 %v23361_v30, %s26068_s24 }
 0x588   : > { %21087 = vrot.lane.b32.xlu1 %v23304_v57, %s26066_s5  ;;  %v23369_v16 = vld [vmem:[#allocation2 + $0x70] sm:$0xf]  ;;  %v23371_v33 = vld [vmem:[#allocation2 + $0x68] sm:$0xf] }
 0x589   : > { %v21081_v29 = vpack.i.bf16 %v23369_v16, %v23341_v51  ;;  %v21096_v58 = vpack.i.bf16 %v23371_v33, %v23339_v56  ;;  %v21251_v34 = vpack.i.bf16 %v23369_v16, %v23371_v33  ;;  %v7707_v60 = vld [vmem:[#allocation2 + $0x68] sm:$0xf]  ;;  %v7708_v43 = vld [vmem:[#allocation2 + $0x70] sm:$0xf] }
 0x58a   : > { %v21281_v63 = vpack.i.bf16 %v7708_v43, %v7707_v60 }
 0x58b   : > { %21082 = vrot.lane.b32.xlu0 %v21081_v29, %s26068_s24 }
 0x58c   : > { %21097 = vrot.lane.b32.xlu1 %v21096_v58, %s26068_s24 }
 0x58f   : > { %21092 = vrot.lane.b32.xlu0 %v23327_v8, %s26066_s5 }
 0x590   : > { %21112 = vrot.lane.b32.xlu1 %v23361_v30, %s26066_s5 }
 0x593   : > { %21102 = vrot.lane.b32.xlu0 %v23315_v3, %s26066_s5 }
 0x594   : > { %21117 = vrot.lane.b32.xlu1 %v21081_v29, %s26066_s5 }
 0x597   : > { %21107 = vrot.lane.b32.xlu0 %v21071_v62, %s26066_s5 }
 0x598   : > { %21127 = vrot.lane.b32.xlu1 %v23327_v8, %s26091_s6 }
 0x59b   : > { %21122 = vrot.lane.b32.xlu0 %v23304_v57, %s26091_s6 }
 0x59c   : > { %21142 = vrot.lane.b32.xlu1 %v23361_v30, %s26091_s6 }
 0x59f   : > { %21132 = vrot.lane.b32.xlu0 %v23315_v3, %s26091_s6 }
 0x5a0   : > { %21147 = vrot.lane.b32.xlu1 %v21096_v58, %s26066_s5  ;;  %s21972_s5 = smov 54  }
 0x5a3   : > { %21137 = vrot.lane.b32.xlu0 %v21071_v62, %s26091_s6 }
 0x5a4   : > { %21157 = vrot.lane.b32.xlu1 %v23304_v57, %s26087_s0 }
 0x5a7   : > { %21152 = vrot.lane.b32.xlu0 %v21081_v29, %s26091_s6 }
 0x5a8   : > { %21167 = vrot.lane.b32.xlu1 %v23315_v3, %s26087_s0 }
 0x5ab   : > { %21162 = vrot.lane.b32.xlu0 %v23327_v8, %s26087_s0 }
 0x5ac   : > { %21187 = vrot.lane.b32.xlu1 %v23361_v30, %s26087_s0 }
 0x5af   : > { %21172 = vrot.lane.b32.xlu0 %v21096_v58, %s26091_s6 }
 0x5b0   : > { %21192 = vrot.lane.b32.xlu1 %v21081_v29, %s26087_s0 }
 0x5b3   : > { %21177 = vrot.lane.b32.xlu0 %v21071_v62, %s26087_s0 }
 0x5b4   : > { %21197 = vrot.lane.b32.xlu1 %v23327_v8, %s26064_s2 }
 0x5b7   : > { %21182 = vrot.lane.b32.xlu0 %v23304_v57, %s26064_s2 }
 0x5b8   : > { %21207 = vrot.lane.b32.xlu1 %v23315_v3, %s26064_s2 }
 0x5bb   : > { %21202 = vrot.lane.b32.xlu0 %v21096_v58, %s26087_s0 }
 0x5bc   : > { %21212 = vrot.lane.b32.xlu1 %v21071_v62, %s26064_s2 }
 0x5bf   : > { %21222 = vrot.lane.b32.xlu0 %v23361_v30, %s26064_s2 }
 0x5c0   : > { %21217 = vrot.lane.b32.xlu1 %v21096_v58, %s26064_s2 }
 0x5c3   : > { %21227 = vrot.lane.b32.xlu0 %v21081_v29, %s26064_s2  ;;  %s26100_s2 = smov 126  }
 0x5c4   : > { %21237 = vrot.lane.b32.xlu1 %v23327_v8, %s26062_s25  ;;  %v8535_v8 = vld [vmem:[%s26040_s10] sm:$0xff] }
 0x5c7   : > { %21232 = vrot.lane.b32.xlu0 %v23304_v57, %s26062_s25 }
 0x5c8   : > { %21257 = vrot.lane.b32.xlu1 %v23304_v57, %s26060_s1 }
 0x5cb   : > { %21242 = vrot.lane.b32.xlu0 %v23315_v3, %s26062_s25  ;;  %v21301_v3 = vpack.i.bf16 %v7711_v9, %v7703_v4 }
 0x5cc   : > { %21267 = vrot.lane.b32.xlu1 %v23361_v30, %s26062_s25 }
 0x5cf   : > { %21247 = vrot.lane.b32.xlu0 %v21071_v62, %s26062_s25  ;;  %v8536_v62 = vld [vmem:[%s26040_s10 + $0x8] sm:$0x3f] }
 0x5d0   : > { %21272 = vrot.lane.b32.xlu1 %v23356_v53, %s26062_s25 }
 0x5d3   : > { %21252 = vrot.lane.b32.xlu0 %v21251_v34, %s26062_s25  ;;  %v23502_v34 = vld [vmem:[%s26039_s9 + $0x18] sm:$0x3f]  ;;  %s26096_s25 = smov 16  }
 0x5d4   : > { %21277 = vrot.lane.b32.xlu1 %v21276_v25, %s26060_s1 }
 0x5d7   : > { %21262 = vrot.lane.b32.xlu0 %v21261_v37, %s26060_s1 }
 0x5d8   : > { %21282 = vrot.lane.b32.xlu1 %v21281_v63, %s26060_s1 }
 0x5db   : > { %21292 = vrot.lane.b32.xlu0 %v23356_v53, %s26060_s1  ;;  %v23491_v53 = vld [vmem:[%s26039_s9 + $0x10] sm:$0xff] }
 0x5dc   : > { %21287 = vrot.lane.b32.xlu1 %v21286_v39, %s26060_s1 }
 0x5df   : > { %21297 = vrot.lane.b32.xlu0 %v23361_v30, %s26060_s1 }
 0x5e0   : > { %21307 = vrot.lane.b32.xlu1 %v23304_v57, %s26071_s30 }
 0x5e2   : > { %v23449_v1 = vpop.permute.xlu1 %21057 }
 0x5e3   : > { %21302 = vrot.lane.b32.xlu0 %v21301_v3, %s26060_s1  ;;  %v21060_v57 = vunpack.i.h.bf16 %v23449_v1  ;;  %v21059_v7 = vunpack.i.l.bf16 %v23449_v1  ;;  %s26097_s1 = smov 14  }
 0x5e4   : > { %21317 = vrot.lane.b32.xlu1 %v21316_v6, %s26071_s30 }
 0x5e5   : > { %v5072_v17 = vsel %vm839_vm2, %v21059_v7, %v21060_v57 }
 0x5e6   : > { %v21068_v5 = vpop.permute.xlu1 %21067 }
 0x5e7   : > { %21312 = vrot.lane.b32.xlu0 %v21261_v37, %s26071_s30  ;;  %v21069_v41 = vunpack.i.l.bf16 %v21068_v5  ;;  %v21070_v20 = vunpack.i.h.bf16 %v21068_v5 }
 0x5e8   : > { %21327 = vrot.lane.b32.xlu1 %v21281_v63, %s26071_s30 }
 0x5e9   : > { %v5071_v24 = vsel %vm839_vm2, %v21069_v41, %v21059_v7 }
 0x5eb   : > { %21322 = vrot.lane.b32.xlu0 %v21321_v26, %s26071_s30 }
 0x5ec   : > { %21337 = vrot.lane.b32.xlu1 %v21286_v39, %s26071_s30 }
 0x5ed   : > { %v21063_v11 = vpop.permute.xlu0 %21062 }
 0x5ee   : > { %v21065_v10 = vunpack.i.h.bf16 %v21063_v11  ;;  %v21064_v15 = vunpack.i.l.bf16 %v21063_v11 }
 0x5ef   : > { %21332 = vrot.lane.b32.xlu0 %v23361_v30, %s26071_s30 }
 0x5f0   : > { %v5078_v27 = vsel %vm839_vm2, %v21064_v15, %v21065_v10  ;;  %8539 = vperm.xlu1 %21055, %v8535_v8   ;;  %v5077_v54 = vsel %vm839_vm2, %v21070_v20, %v21064_v15 }
 0x5f1   : > { %v19940_v52 = vpack.c.bf16 %v5077_v54, %v5071_v24  ;;  %v19937_v32 = vpack.c.bf16 %v5078_v27, %v5072_v17  ;;  %v19961_v27 = vpack.c.bf16 %v23321_v50, %v23296_v36  ;;  %v19964_v54 = vpack.c.bf16 %v23311_v0, %v23307_v42 }
 0x5f2   : > { %v19973_v36 = vpack.c.bf16 %v23343_v28, %v23348_v21  ;;  %v19967_v28 = vpack.c.bf16 %v23371_v33, %v23339_v56  ;;  %v5024_v33 = vld [vmem:[%s26039_s9] sm:$0xff] }
 0x5f3   : > { %19939 = vmatprep.subr.msk.bf16.mxu1 %vm23469_vm1, %v19937_v32  ;;  %21342 = vrot.lane.b32.xlu0 %v21301_v3, %s26071_s30 }
 0x5f4   : > { %8565 = vperm.xlu1 %21055, %v8561_v61   ;;  %19942 = vmatpush1.bf16.msk.msra.mxu1 %vm23469_vm1, %v19940_v52 }
 0x5f6   : > { %v21073_v30 = vpop.permute.xlu1 %21072 }
 0x5f7   : > { %v21075_v6 = vunpack.i.h.bf16 %v21073_v30  ;;  %v21074_v29 = vunpack.i.l.bf16 %v21073_v30  ;;  %8544 = vperm.xlu0 %21054, %v8536_v62   ;;  %19023 = vmatmul.mubr.msk.f32.vlgmr.msra.gmra.mrb[12].mxu1 %vm26073_vm3, %v23491_v53 }
 0x5f8   : > { %v21078_v58 = vpop.permute.xlu0 %21077  ;;  %5182 = vmatprep.mubr.f32.mxu1 %v23211_v48 }
 0x5f9   : > { %v21080_v25 = vunpack.i.h.bf16 %v21078_v58  ;;  %v21079_v46 = vunpack.i.l.bf16 %v21078_v58  ;;  %v5082_v43 = vsel %vm839_vm2, %v21074_v29, %v21075_v6 }
 0x5fa   : > { %v23504_v60 = vpop.permute.xlu1 %21087 }
 0x5fb   : > { %v5076_v12 = vsel %vm839_vm2, %v21079_v46, %v21080_v25  ;;  %8570 = vperm.xlu0 %21054, %v8562_v35   ;;  %19024 = vmatmul.mubr.msk.f32.gmra.mrb[14].mxu1 %vm26073_vm3, %v23502_v34  ;;  %v21090_v21 = vunpack.i.h.bf16 %v23504_v60  ;;  %v21089_v52 = vunpack.i.l.bf16 %v23504_v60 }
 0x5fc   : > { %v19949_v37 = vpack.c.bf16 %v5082_v43, %v5076_v12  ;;  %5330 = vmatprep.mubr.f32.mxu1 %v23211_v48 }
 0x5fd   : > { %v21083_v63 = vpop.permute.xlu0 %21082  ;;  %v5777_v62 = vsel %vm5775_vm4, %v21089_v52, %v21090_v21 }
 0x5fe   : > { %v21085_v31 = vunpack.i.h.bf16 %v21083_v63  ;;  %v21084_v40 = vunpack.i.l.bf16 %v21083_v63  ;;  %v21098_v39 = vpop.permute.xlu1 %21097  ;;  %19951 = vmatprep.subr.msk.bf16.mxu1 %vm23469_vm1, %v19949_v37 }
 0x5ff   : > { %v21100_v4 = vunpack.i.h.bf16 %v21098_v39  ;;  %v21099_v9 = vunpack.i.l.bf16 %v21098_v39 }
 0x600   : > { %v5075_v3 = vsel %vm839_vm2, %v21084_v40, %v21079_v46  ;;  %v5081_v1 = vsel %vm839_vm2, %v21085_v31, %v21074_v29 }
 0x601   : > { %v19952_v26 = vpack.c.bf16 %v5081_v1, %v5075_v3  ;;  %v5079_v5 = vsel %vm839_vm2, %v21065_v10, %v21100_v4  ;;  %v5080_v7 = vsel %vm839_vm2, %v21100_v4, %v21085_v31  ;;  %v5073_v41 = vsel %vm839_vm2, %v21060_v57, %v21099_v9  ;;  %v23518_v11 = vpop.permute.xlu0 %21092 }
 0x602   : > { %v5074_v8 = vsel %vm839_vm2, %v21099_v9, %v21084_v40  ;;  %v19946_v15 = vpack.c.bf16 %v5079_v5, %v5073_v41  ;;  %v23521_v20 = vpop.permute.xlu1 %21112  ;;  %v19955_v10 = vpack.c.bf16 %v21075_v6, %v21080_v25  ;;  %v21095_v50 = vunpack.i.h.bf16 %v23518_v11 }
 0x603   : > { %v19943_v17 = vpack.c.bf16 %v5080_v7, %v5074_v8  ;;  %19954 = vmatpush1.bf16.msk.msra.mxu1 %vm23469_vm1, %v19952_v26  ;;  %v21094_v42 = vunpack.i.l.bf16 %v23518_v11  ;;  %v19976_v6 = vpack.c.bf16 %v23369_v16, %v23341_v51  ;;  %v19970_v25 = vpack.c.bf16 %v23323_v55, %v23298_v49 }
 0x604   : > { %19963 = vmatprep.subr.msk.bf16.mxu1 %vm23469_vm1, %v19961_v27  ;;  %v19979_v16 = vpack.c.bf16 %v23345_v59, %v23352_v47  ;;  %v21115_v55 = vunpack.i.h.bf16 %v23521_v20  ;;  %v21114_v43 = vunpack.i.l.bf16 %v23521_v20 }
 0x605   : > { %19945 = vmatprep.subr.msk.bf16.mxu0 %vm23469_vm1, %v19943_v17  ;;  %v21103_v57 = vpop.permute.xlu0 %21102  ;;  %v5783_v56 = vsel %vm5775_vm4, %v21094_v42, %v21095_v50 }
 0x606   : > { %19948 = vmatpush1.bf16.msk.msra.mxu0 %vm23469_vm1, %v19946_v15  ;;  %v23535_v24 = vpop.permute.xlu1 %21117  ;;  %19031 = vmatmul.mubr.msk.f32.vlgmr.msra.gmra.mrb[16].mxu1 %vm26073_vm3, %v23491_v53  ;;  %v21105_v29 = vunpack.i.h.bf16 %v21103_v57  ;;  %v21104_v58 = vunpack.i.l.bf16 %v21103_v57  ;;  %v19985_v35 = vpack.c.bf16 %v5783_v56, %v5777_v62  ;;  %v5781_v26 = vsel %vm5775_vm4, %v21114_v43, %v21115_v55  ;;  %v19052_v62 = vld [vmem:[%s26039_s9 + $0x28] sm:$0x3f] }
 0x607   : > { %19957 = vmatprep.subr.msk.bf16.mxu0 %vm23469_vm1, %v19955_v10  ;;  %19966 = vmatpush1.bf16.msk.msra.mxu1 %vm23469_vm1, %v19964_v54  ;;  %v21119_v12 = vunpack.i.l.bf16 %v23535_v24  ;;  %v21120_v31 = vunpack.i.h.bf16 %v23535_v24  ;;  %v19051_v24 = vld [vmem:[%s26039_s9 + $0x20] sm:$0xff] }
 0x608   : > { %19975 = vmatprep.subr.msk.bf16.mxu1 %vm23469_vm1, %v19973_v36  ;;  %5336 = vmatprep.mubr.f32.mxu1 %v23211_v48  ;;  %v5782_v63 = vsel %vm5775_vm4, %v21105_v29, %v21094_v42 }
 0x609   : > { %19027 = vmatmul.mubr.msk.f32.vlgmr.msra.gmra.mrb[18].mxu0 %vm26073_vm3, %v23491_v53  ;;  %v23552_v0 = vpop.permute.xlu0 %21107  ;;  %v5780_v36 = vsel %vm5775_vm4, %v21119_v12, %v21114_v43 }
 0x60a   : > { %19960 = vmatpush3.bf16.msk.msra.mxu0 %vm23469_vm1, %v19955_v10  ;;  %v23560_v32 = vpop.permute.xlu1 %21127  ;;  %5259 = vmatprep.mubr.f32.mxu0 %v23211_v48  ;;  %v21110_v46 = vunpack.i.h.bf16 %v23552_v0  ;;  %v21109_v51 = vunpack.i.l.bf16 %v23552_v0 }
 0x60b   : > { %19969 = vmatprep.subr.msk.bf16.mxu0 %vm23469_vm1, %v19967_v28  ;;  %19032 = vmatmul.mubr.msk.f32.gmra.mrb[18].mxu1 %vm26073_vm3, %v23502_v34  ;;  %v21130_v15 = vunpack.i.h.bf16 %v23560_v32  ;;  %v21129_v20 = vunpack.i.l.bf16 %v23560_v32 }
 0x60c   : > { %5502 = vmatprep.mubr.f32.mxu1 %v23211_v48  ;;  %v5787_v40 = vsel %vm5775_vm4, %v21109_v51, %v21110_v46  ;;  %v5786_v11 = vsel %vm5775_vm4, %v21120_v31, %v21109_v51 }
 0x60d   : > { %19028 = vmatmul.mubr.msk.f32.gmra.mrb[20].mxu0 %vm26073_vm3, %v23502_v34  ;;  %v23576_v61 = vpop.permute.xlu0 %21122  ;;  %v19997_v8 = vpack.c.bf16 %v5787_v40, %v5781_v26  ;;  %v6173_v42 = vsel %vm1063_vm6, %v21129_v20, %v21130_v15  ;;  %v20000_v28 = vpack.c.bf16 %v5786_v11, %v5780_v36 }
 0x60e   : > { %v23581_v30 = vpop.permute.xlu1 %21142  ;;  %19676 = vmatprep.mubr.msk.f32.mxu0 %vm26073_vm3, %v23491_v53  ;;  %v5025_v53 = vld [vmem:[%s26039_s9 + $0x8] sm:$0x3f]  ;;  %v21125_v5 = vunpack.i.h.bf16 %v23576_v61  ;;  %v21124_v7 = vunpack.i.l.bf16 %v23576_v61 }
 0x60f   : > { %19038 = vmatmul.mubr.msk.f32.vlgmr.msra.gmra.mrb[12].mxu1 %vm26073_vm3, %v5024_v33  ;;  %v21144_v29 = vunpack.i.l.bf16 %v23581_v30 }
 0x610   : > { %19978 = vmatpush1.bf16.msk.msra.mxu1 %vm23469_vm1, %v19976_v6  ;;  %5508 = vmatprep.mubr.f32.mxu1 %v23211_v48  ;;  %v6167_v60 = vsel %vm1063_vm6, %v21124_v7, %v21125_v5  ;;  %v21145_v6 = vunpack.i.h.bf16 %v23581_v30 }
 0x611   : > { %19677 = vmatmul.mubr.msk.f32.vlgmr.msra.gmra.mrb[22].mxu0 %vm26073_vm3, %v23502_v34  ;;  %19987 = vmatprep.subr.msk.bf16.mxu1 %vm23469_vm1, %v19985_v35  ;;  %v23604_v49 = vpop.permute.xlu0 %21132  ;;  %v5776_v34 = vsel %vm5775_vm4, %v21104_v58, %v21089_v52  ;;  %v20009_v52 = vpack.c.bf16 %v6173_v42, %v6167_v60  ;;  %v19069_v42 = vld [vmem:[%s26039_s9 + $0x38] sm:$0x3f] }
 0x612   : > { %19972 = vmatpush1.bf16.msk.msra.mxu0 %vm23469_vm1, %v19970_v25  ;;  %v21148_v37 = vpop.permute.xlu1 %21147  ;;  %5579 = vmatprep.mubr.f32.mxu0 %v23211_v48  ;;  %v19988_v9 = vpack.c.bf16 %v5782_v63, %v5776_v34  ;;  %v21135_v32 = vunpack.i.h.bf16 %v23604_v49  ;;  %v21134_v56 = vunpack.i.l.bf16 %v23604_v49 }
 0x613   : > { %19981 = vmatprep.subr.msk.bf16.mxu0 %vm23469_vm1, %v19979_v16  ;;  %v21150_v59 = vunpack.i.h.bf16 %v21148_v37  ;;  %v21149_v47 = vunpack.i.l.bf16 %v21148_v37  ;;  %19039 = vmatmul.mubr.msk.f32.gmra.mrb[14].mxu1 %vm26073_vm3, %v5025_v53 }
 0x614   : > { %5656 = vmatprep.mubr.f32.mxu1 %v23211_v48  ;;  %v6166_v30 = vsel %vm1063_vm6, %v21134_v56, %v21124_v7 }
 0x615   : > { %v5779_v39 = vsel %vm5775_vm4, %v21149_v47, %v21119_v12  ;;  %19042 = vmatmul.mubr.msk.f32.vlgmr.msra.gmra.mrb[18].mxu0 %vm26073_vm3, %v5024_v33  ;;  %v23622_v4 = vpop.permute.xlu0 %21137  ;;  %v5785_v3 = vsel %vm5775_vm4, %v21150_v59, %v21120_v31  ;;  %v5784_v27 = vsel %vm5775_vm4, %v21095_v50, %v21150_v59  ;;  %v5778_v17 = vsel %vm5775_vm4, %v21090_v21, %v21149_v47 }
 0x616   : > { %19984 = vmatpush3.bf16.msk.msra.mxu0 %vm23469_vm1, %v19979_v16  ;;  %v23627_v1 = vpop.permute.xlu1 %21157  ;;  %5585 = vmatprep.mubr.f32.mxu0 %v23211_v48  ;;  %v19991_v41 = vpack.c.bf16 %v5785_v3, %v5779_v39  ;;  %v19994_v54 = vpack.c.bf16 %v5784_v27, %v5778_v17  ;;  %v20003_v50 = vpack.c.bf16 %v21110_v46, %v21115_v55  ;;  %v21139_v61 = vunpack.i.l.bf16 %v23622_v4 }
 0x617   : > { %19046 = vmatmul.mubr.msk.f32.vlgmr.msra.gmra.mrb[16].mxu1 %vm26073_vm3, %v5024_v33  ;;  %v6172_v16 = vsel %vm1063_vm6, %v21135_v32, %v21129_v20  ;;  %v6171_v59 = vsel %vm1063_vm6, %v21144_v29, %v21145_v6  ;;  %v21160_v26 = vunpack.i.h.bf16 %v23627_v1 }
 0x618   : > { %19990 = vmatpush1.bf16.msk.msra.mxu1 %vm23469_vm1, %v19988_v9  ;;  %5662 = vmatprep.mubr.f32.mxu1 %v23211_v48  ;;  %v20012_v47 = vpack.c.bf16 %v6172_v16, %v6166_v30 }
 0x619   : > { %19043 = vmatmul.mubr.msk.f32.gmra.mrb[20].mxu0 %vm26073_vm3, %v5025_v53  ;;  %19993 = vmatprep.subr.msk.bf16.mxu0 %vm23469_vm1, %v19991_v41  ;;  %v23648_v10 = vpop.permute.xlu0 %21152 }
 0x61a   : > { %19999 = vmatprep.subr.msk.bf16.mxu1 %vm23469_vm1, %v19997_v8  ;;  %v23652_v57 = vpop.permute.xlu1 %21167  ;;  %19683 = vmatprep.mubr.msk.f32.mxu0 %vm26073_vm3, %v5024_v33  ;;  %v21140_v33 = vunpack.i.h.bf16 %v23622_v4  ;;  %v21155_v35 = vunpack.i.h.bf16 %v23648_v10  ;;  %v21154_v25 = vunpack.i.l.bf16 %v23648_v10 }
 0x61b   : > { %19047 = vmatmul.mubr.msk.f32.gmra.mrb[18].mxu1 %vm26073_vm3, %v5025_v53  ;;  %v21170_v10 = vunpack.i.h.bf16 %v23652_v57 }
 0x61c   : > { %5879 = vmatprep.mubr.f32.mxu1 %v23211_v48  ;;  %v6177_v49 = vsel %vm1063_vm6, %v21139_v61, %v21140_v33  ;;  %v20027_v3 = vpack.c.bf16 %v21140_v33, %v21145_v6  ;;  %v6170_v41 = vsel %vm1063_vm6, %v21154_v25, %v21144_v29  ;;  %v6176_v8 = vsel %vm1063_vm6, %v21155_v35, %v21139_v61 }
 0x61d   : > { %19684 = vmatmul.mubr.msk.f32.vlgmr.msra.gmra.mrb[22].mxu0 %vm26073_vm3, %v5025_v53  ;;  %v23665_v0 = vpop.permute.xlu0 %21162  ;;  %v20021_v39 = vpack.c.bf16 %v6177_v49, %v6171_v59  ;;  %v20024_v17 = vpack.c.bf16 %v6176_v8, %v6170_v41  ;;  %v23802_v59 = vld [vmem:[%s26039_s9 + $0x40] sm:$0xff]  ;;  %v23833_v8 = vld [vmem:[%s26039_s9 + $0x48] sm:$0x3f] }
 0x61e   : > { %19996 = vmatpush1.bf16.msk.msra.mxu0 %vm23469_vm1, %v19994_v54  ;;  %v23669_v21 = vpop.permute.xlu1 %21187  ;;  %5956 = vmatprep.mubr.f32.mxu0 %v23211_v48  ;;  %v21165_v4 = vunpack.i.h.bf16 %v23665_v0  ;;  %v21164_v9 = vunpack.i.l.bf16 %v23665_v0  ;;  %v21169_v0 = vunpack.i.l.bf16 %v23652_v57 }
 0x61f   : > { %20005 = vmatprep.subr.msk.bf16.mxu0 %vm23469_vm1, %v20003_v50  ;;  %19055 = vmatmul.mubr.msk.f32.vlgmr.msra.gmra.mrb[12].mxu1 %vm26073_vm3, %v19051_v24  ;;  %v21190_v57 = vunpack.i.h.bf16 %v23669_v21 }
 0x620   : > { %20002 = vmatpush1.bf16.msk.msra.mxu1 %vm23469_vm1, %v20000_v28  ;;  %5885 = vmatprep.mubr.f32.mxu1 %v23211_v48  ;;  %v6563_v20 = vsel %vm1175_vm8, %v21164_v9, %v21165_v4 }
 0x621   : > { %19059 = vmatmul.mubr.msk.f32.vlgmr.msra.gmra.mrb[18].mxu0 %vm26073_vm3, %v19051_v24  ;;  %20011 = vmatprep.subr.msk.bf16.mxu1 %vm23469_vm1, %v20009_v52  ;;  %v21173_v58 = vpop.permute.xlu0 %21172 }
 0x622   : > { %20008 = vmatpush3.bf16.msk.msra.mxu0 %vm23469_vm1, %v20003_v50  ;;  %v21175_v53 = vunpack.i.h.bf16 %v21173_v58  ;;  %v21174_v46 = vunpack.i.l.bf16 %v21173_v58  ;;  %v23694_v51 = vpop.permute.xlu1 %21192  ;;  %5962 = vmatprep.mubr.f32.mxu0 %v23211_v48  ;;  %v6562_v58 = vsel %vm1175_vm8, %v21170_v10, %v21164_v9 }
 0x623   : > { %19056 = vmatmul.mubr.msk.f32.gmra.mrb[14].mxu1 %vm26073_vm3, %v19052_v62  ;;  %v21195_v60 = vunpack.i.h.bf16 %v23694_v51  ;;  %v21194_v54 = vunpack.i.l.bf16 %v23694_v51 }
 0x624   : > { %v6175_v55 = vsel %vm1063_vm6, %v21175_v53, %v21155_v35  ;;  %v6168_v43 = vsel %vm1063_vm6, %v21125_v5, %v21174_v46  ;;  %v6169_v12 = vsel %vm1063_vm6, %v21174_v46, %v21154_v25  ;;  %v6174_v37 = vsel %vm1063_vm6, %v21130_v15, %v21175_v53  ;;  %6033 = vmatprep.mubr.f32.mxu1 %v23211_v48  ;;  %v23778_v53 = vld [vmem:[#allocation2] sm:$0xff] }
 0x625   : > { %19060 = vmatmul.mubr.msk.f32.gmra.mrb[20].mxu0 %vm26073_vm3, %v19052_v62  ;;  %v23707_v34 = vpop.permute.xlu0 %21177  ;;  %v20015_v63 = vpack.c.bf16 %v6175_v55, %v6169_v12  ;;  %v20018_v31 = vpack.c.bf16 %v6174_v37, %v6168_v43  ;;  %v21159_v5 = vunpack.i.l.bf16 %v23627_v1  ;;  %v19068_v1 = vld [vmem:[%s26039_s9 + $0x30] sm:$0xff] }
 0x626   : > { %v23710_v40 = vpop.permute.xlu1 %21197  ;;  %19690 = vmatprep.mubr.msk.f32.mxu0 %vm26073_vm3, %v19051_v24  ;;  %v21180_v28 = vunpack.i.h.bf16 %v23707_v34  ;;  %v21179_v52 = vunpack.i.l.bf16 %v23707_v34 }
 0x627   : > { %19063 = vmatmul.mubr.msk.f32.vlgmr.msra.gmra.mrb[16].mxu1 %vm26073_vm3, %v19051_v24  ;;  %20017 = vmatprep.subr.msk.bf16.mxu0 %vm23469_vm1, %v20015_v63  ;;  %v6557_v27 = vsel %vm1175_vm8, %v21159_v5, %v21160_v26 }
 0x628   : > { %20014 = vmatpush1.bf16.msk.msra.mxu1 %vm23469_vm1, %v20012_v47  ;;  %6039 = vmatprep.mubr.f32.mxu1 %v23211_v48  ;;  %v20033_v32 = vpack.c.bf16 %v6563_v20, %v6557_v27  ;;  %v6567_v46 = vsel %vm1175_vm8, %v21179_v52, %v21180_v28  ;;  %v20051_v49 = vpack.c.bf16 %v21180_v28, %v21190_v57 }
 0x629   : > { %19691 = vmatmul.mubr.msk.f32.vlgmr.msra.gmra.mrb[22].mxu0 %vm26073_vm3, %v19052_v62  ;;  %20023 = vmatprep.subr.msk.bf16.mxu1 %vm23469_vm1, %v20021_v39  ;;  %v23726_v7 = vpop.permute.xlu0 %21182 }
 0x62a   : > { %20020 = vmatpush1.bf16.msk.msra.mxu0 %vm23469_vm1, %v20018_v31  ;;  %v23732_v15 = vpop.permute.xlu1 %21207  ;;  %6346 = vmatprep.mubr.f32.mxu0 %v23211_v48  ;;  %v21185_v31 = vunpack.i.h.bf16 %v23726_v7  ;;  %v21184_v39 = vunpack.i.l.bf16 %v23726_v7  ;;  %v21199_v7 = vunpack.i.l.bf16 %v23710_v40 }
 0x62b   : > { %20029 = vmatprep.subr.msk.bf16.mxu0 %vm23469_vm1, %v20027_v3  ;;  %19064 = vmatmul.mubr.msk.f32.gmra.mrb[18].mxu1 %vm26073_vm3, %v19052_v62  ;;  %v21189_v62 = vunpack.i.l.bf16 %v23669_v21  ;;  %v6556_v21 = vsel %vm1175_vm8, %v21169_v0, %v21159_v5  ;;  %v21200_v5 = vunpack.i.h.bf16 %v23710_v40  ;;  %v21209_v51 = vunpack.i.l.bf16 %v23732_v15 }
 0x62c   : > { %6269 = vmatprep.mubr.f32.mxu1 %v23211_v48  ;;  %v20036_v30 = vpack.c.bf16 %v6562_v58, %v6556_v21  ;;  %v6948_v40 = vsel %vm6946_vm5, %v21184_v39, %v21185_v31 }
 0x62d   : > { %19076 = vmatmul.mubr.msk.f32.vlgmr.msra.gmra.mrb[18].mxu0 %vm26073_vm3, %v19068_v1  ;;  %v21203_v11 = vpop.permute.xlu0 %21202  ;;  %v6561_v16 = vsel %vm1175_vm8, %v21189_v62, %v21190_v57  ;;  %v6560_v20 = vsel %vm1175_vm8, %v21194_v54, %v21189_v62  ;;  %v23885_v57 = vld [vmem:[%s26039_s9 + $0x50] sm:$0xff] }
 0x62e   : > { %20032 = vmatpush3.bf16.msk.msra.mxu0 %vm23469_vm1, %v20027_v3  ;;  %v21205_v24 = vunpack.i.h.bf16 %v21203_v11  ;;  %v21204_v36 = vunpack.i.l.bf16 %v21203_v11  ;;  %v23750_v50 = vpop.permute.xlu1 %21212  ;;  %6352 = vmatprep.mubr.f32.mxu0 %v23211_v48  ;;  %v20045_v47 = vpack.c.bf16 %v6567_v46, %v6561_v16  ;;  %v23911_v16 = vld [vmem:[%s26039_s9 + $0x58] sm:$0x3f] }
 0x62f   : > { %19072 = vmatmul.mubr.msk.f32.vlgmr.msra.gmra.mrb[12].mxu1 %vm26073_vm3, %v19068_v1 }
 0x630   : > { %v6564_v56 = vsel %vm1175_vm8, %v21165_v4, %v21205_v24  ;;  %v6558_v33 = vsel %vm1175_vm8, %v21160_v26, %v21204_v36  ;;  %v6559_v48 = vsel %vm1175_vm8, %v21204_v36, %v21194_v54  ;;  %v6565_v61 = vsel %vm1175_vm8, %v21205_v24, %v21195_v60  ;;  %20026 = vmatpush1.bf16.msk.msra.mxu1 %vm23469_vm1, %v20024_v17 }
 0x631   : > { %19077 = vmatmul.mubr.msk.f32.gmra.mrb[20].mxu0 %vm26073_vm3, %v19069_v42  ;;  %20035 = vmatprep.subr.msk.bf16.mxu1 %vm23469_vm1, %v20033_v32  ;;  %v23775_v6 = vpop.permute.xlu0 %21222  ;;  %v20039_v29 = vpack.c.bf16 %v6565_v61, %v6559_v48  ;;  %v20042_v35 = vpack.c.bf16 %v6564_v56, %v6558_v33  ;;  %v6954_v24 = vsel %vm6946_vm5, %v21199_v7, %v21200_v5  ;;  %v21210_v36 = vunpack.i.h.bf16 %v23732_v15 }
 0x632   : > { %v21218_v25 = vpop.permute.xlu1 %21217  ;;  %6275 = vmatprep.mubr.f32.mxu1 %v23778_v53  ;;  %19697 = vmatprep.mubr.msk.f32.mxu0 %vm26073_vm3, %v19068_v1  ;;  %v21225_v27 = vunpack.i.h.bf16 %v23775_v6  ;;  %v21215_v54 = vunpack.i.h.bf16 %v23750_v50  ;;  %v20057_v0 = vpack.c.bf16 %v6954_v24, %v6948_v40  ;;  %v21224_v28 = vunpack.i.l.bf16 %v23775_v6 }
 0x633   : > { %19073 = vmatmul.mubr.msk.f32.gmra.mrb[14].mxu1 %vm26073_vm3, %v19069_v42  ;;  %20041 = vmatprep.subr.msk.bf16.mxu0 %vm23469_vm1, %v20039_v29  ;;  %v21220_v43 = vunpack.i.h.bf16 %v21218_v25  ;;  %v21219_v12 = vunpack.i.l.bf16 %v21218_v25  ;;  %v6947_v56 = vsel %vm6946_vm5, %v21209_v51, %v21184_v39  ;;  %v6953_v33 = vsel %vm6946_vm5, %v21210_v36, %v21199_v7 }
 0x634   : > { %6423 = vmatprep.mubr.f32.mxu1 %v23778_v53  ;;  %v20075_v15 = vpack.c.bf16 %v21215_v54, %v21225_v27  ;;  %v21214_v48 = vunpack.i.l.bf16 %v23750_v50  ;;  %v6952_v50 = vsel %vm6946_vm5, %v21224_v28, %v21225_v27  ;;  %v20060_v62 = vpack.c.bf16 %v6953_v33, %v6947_v56 }
 0x635   : > { %19698 = vmatmul.mubr.msk.f32.vlgmr.msra.gmra.mrb[22].mxu0 %vm26073_vm3, %v19069_v42  ;;  %v23790_v55 = vpop.permute.xlu0 %21227  ;;  %v6949_v17 = vsel %vm6946_vm5, %v21185_v31, %v21219_v12  ;;  %v6955_v10 = vsel %vm6946_vm5, %v21200_v5, %v21220_v43 }
 0x636   : > { %20044 = vmatpush1.bf16.msk.msra.mxu0 %vm23469_vm1, %v20042_v35  ;;  %v21230_v37 = vunpack.i.h.bf16 %v23790_v55  ;;  %v21229_v34 = vunpack.i.l.bf16 %v23790_v55  ;;  %v23796_v63 = vpop.permute.xlu1 %21237  ;;  %6736 = vmatprep.mubr.f32.mxu0 %v23778_v53  ;;  %v6958_v35 = vsel %vm6946_vm5, %v21214_v48, %v21215_v54  ;;  %v23972_v54 = vld [vmem:[%s26039_s9 + $0x60] sm:$0xff] }
 0x637   : > { %20053 = vmatprep.subr.msk.bf16.mxu0 %vm23469_vm1, %v20051_v49  ;;  %19080 = vmatmul.mubr.msk.f32.vlgmr.msra.gmra.mrb[16].mxu1 %vm26073_vm3, %v19068_v1  ;;  %v6566_v1 = vsel %vm1175_vm8, %v21195_v60, %v21179_v52  ;;  %v20066_v52 = vpack.c.bf16 %v6955_v10, %v6949_v17  ;;  %v21240_v25 = vunpack.i.h.bf16 %v23796_v63 }
 0x638   : > { %v6950_v4 = vsel %vm6946_vm5, %v21219_v12, %v21229_v34  ;;  %v6956_v9 = vsel %vm6946_vm5, %v21220_v43, %v21230_v37  ;;  %20038 = vmatpush1.bf16.msk.msra.mxu1 %vm23469_vm1, %v20036_v30  ;;  %6429 = vmatprep.mubr.f32.mxu1 %v23778_v53  ;;  %v20048_v60 = vpack.c.bf16 %v6566_v1, %v6560_v20 }
 0x639   : > { %19093 = vmatmul.mubr.msk.f32.vlgmr.msra.gmra.mrb[18].mxu0 %vm26073_vm3, %v23802_v59  ;;  %20047 = vmatprep.subr.msk.bf16.mxu1 %vm23469_vm1, %v20045_v47  ;;  %v23821_v3 = vpop.permute.xlu0 %21232  ;;  %v20063_v26 = vpack.c.bf16 %v6956_v9, %v6950_v4  ;;  %v20069_v12 = vpack.c.bf16 %v6958_v35, %v6952_v50  ;;  %v6951_v47 = vsel %vm6946_vm5, %v21229_v34, %v21224_v28 }
 0x63a   : > { %20056 = vmatpush3.bf16.msk.msra.mxu0 %vm23469_vm1, %v20051_v49  ;;  %v23827_v41 = vpop.permute.xlu1 %21257  ;;  %6742 = vmatprep.mubr.f32.mxu0 %v23778_v53  ;;  %v21239_v49 = vunpack.i.l.bf16 %v23796_v63  ;;  %v21235_v43 = vunpack.i.h.bf16 %v23821_v3  ;;  %v21234_v31 = vunpack.i.l.bf16 %v23821_v3  ;;  %v6957_v63 = vsel %vm6946_vm5, %v21230_v37, %v21214_v48  ;;  %v24005_v48 = vld [vmem:[%s26039_s9 + $0x68] sm:$0x3f] }
 0x63b   : > { %19081 = vmatmul.mubr.msk.f32.gmra.mrb[18].mxu1 %vm26073_vm3, %v19069_v42  ;;  %20065 = vmatprep.subr.msk.bf16.mxu0 %vm23469_vm1, %v20063_v26  ;;  %v20072_v7 = vpack.c.bf16 %v6957_v63, %v6951_v47 }
 0x63c   : > { %6659 = vmatprep.mubr.f32.mxu1 %v23778_v53  ;;  %v7338_v1 = vsel %vm26074_vm9, %v21234_v31, %v21235_v43  ;;  %v7344_v40 = vsel %vm26074_vm9, %v21239_v49, %v21240_v25 }
 0x63d   : > { %19094 = vmatmul.mubr.msk.f32.gmra.mrb[20].mxu0 %vm26073_vm3, %v23833_v8  ;;  %v23852_v11 = vpop.permute.xlu0 %21242 }
 0x63e   : > { %v23857_v42 = vpop.permute.xlu1 %21267  ;;  %19704 = vmatprep.mubr.msk.f32.mxu0 %vm26073_vm3, %v23802_v59 }
 0x63f   : > { %19089 = vmatmul.mubr.msk.f32.vlgmr.msra.gmra.mrb[12].mxu1 %vm26073_vm3, %v23802_v59  ;;  %v21270_v5 = vunpack.i.h.bf16 %v23857_v42 }
 0x640   : > { %20050 = vmatpush1.bf16.msk.msra.mxu1 %vm23469_vm1, %v20048_v60  ;;  %6665 = vmatprep.mubr.f32.mxu1 %v23778_v53  ;;  %v21244_v60 = vunpack.i.l.bf16 %v23852_v11 }
 0x641   : > { %19705 = vmatmul.mubr.msk.f32.vlgmr.msra.gmra.mrb[22].mxu0 %vm26073_vm3, %v23833_v8  ;;  %20059 = vmatprep.subr.msk.bf16.mxu1 %vm23469_vm1, %v20057_v0  ;;  %v23872_v32 = vpop.permute.xlu0 %21247 }
 0x642   : > { %20068 = vmatpush1.bf16.msk.msra.mxu0 %vm23469_vm1, %v20066_v52  ;;  %v23879_v61 = vpop.permute.xlu1 %21272  ;;  %7127 = vmatprep.mubr.f32.mxu0 %v23778_v53  ;;  %v21249_v0 = vunpack.i.l.bf16 %v23872_v32  ;;  %v21269_v52 = vunpack.i.l.bf16 %v23857_v42  ;;  %v7337_v56 = vsel %vm26074_vm9, %v21244_v60, %v21234_v31 }
 0x643   : > { %20077 = vmatprep.subr.msk.bf16.mxu0 %vm23469_vm1, %v20075_v15  ;;  %19090 = vmatmul.mubr.msk.f32.gmra.mrb[14].mxu1 %vm26073_vm3, %v23833_v8  ;;  %v21275_v6 = vunpack.i.h.bf16 %v23879_v61  ;;  %v21274_v29 = vunpack.i.l.bf16 %v23879_v61 }
 0x644   : > { %6813 = vmatprep.mubr.f32.mxu1 %v23778_v53 }
 0x645   : > { %19110 = vmatmul.mubr.msk.f32.vlgmr.msra.gmra.mrb[18].mxu0 %vm26073_vm3, %v23885_v57  ;;  %v23897_v58 = vpop.permute.xlu0 %21252  ;;  %v7339_v34 = vsel %vm26074_vm9, %v21235_v43, %v21274_v29  ;;  %v7340_v9 = vsel %vm26074_vm9, %v21274_v29, %v21275_v6 }
 0x646   : > { %20080 = vmatpush3.bf16.msk.msra.mxu0 %vm23469_vm1, %v20075_v15  ;;  %v21255_v21 = vunpack.i.h.bf16 %v23897_v58  ;;  %v21254_v46 = vunpack.i.l.bf16 %v23897_v58  ;;  %v23905_v30 = vpop.permute.xlu1 %21277  ;;  %7133 = vmatprep.mubr.f32.mxu0 %v23778_v53 }
 0x647   : > { %19097 = vmatmul.mubr.msk.f32.vlgmr.msra.gmra.mrb[16].mxu1 %vm26073_vm3, %v23802_v59  ;;  %v21250_v59 = vunpack.i.h.bf16 %v23872_v32 }
 0x648   : > { %v7345_v39 = vsel %vm26074_vm9, %v21240_v25, %v21254_v46  ;;  %v7346_v4 = vsel %vm26074_vm9, %v21254_v46, %v21255_v21  ;;  %20062 = vmatpush1.bf16.msk.msra.mxu1 %vm23469_vm1, %v20060_v62  ;;  %6819 = vmatprep.mubr.f32.mxu1 %v23778_v53  ;;  %v21260_v62 = vunpack.i.h.bf16 %v23827_v41  ;;  %v7342_v46 = vsel %vm26074_vm9, %v21269_v52, %v21270_v5 }
 0x649   : > { %19111 = vmatmul.mubr.msk.f32.gmra.mrb[20].mxu0 %vm26073_vm3, %v23911_v16  ;;  %20071 = vmatprep.subr.msk.bf16.mxu1 %vm23469_vm1, %v20069_v12  ;;  %v23940_v3 = vpop.permute.xlu0 %21262  ;;  %v20090_v26 = vpack.c.bf16 %v7345_v39, %v7339_v34  ;;  %v20087_v37 = vpack.c.bf16 %v7346_v4, %v7340_v9  ;;  %v20099_v20 = vpack.c.bf16 %v21250_v59, %v21270_v5  ;;  %v21259_v5 = vunpack.i.l.bf16 %v23827_v41 }
 0x64a   : > { %v23942_v55 = vpop.permute.xlu1 %21282  ;;  %19711 = vmatprep.mubr.msk.f32.mxu0 %vm26073_vm3, %v23885_v57  ;;  %v21265_v29 = vunpack.i.h.bf16 %v23940_v3  ;;  %v7348_v35 = vsel %vm26074_vm9, %v21249_v0, %v21250_v59  ;;  %v21264_v34 = vunpack.i.l.bf16 %v23940_v3 }
 0x64b   : > { %19098 = vmatmul.mubr.msk.f32.gmra.mrb[18].mxu1 %vm26073_vm3, %v23833_v8  ;;  %20089 = vmatprep.subr.msk.bf16.mxu0 %vm23469_vm1, %v20087_v37  ;;  %v21285_v27 = vunpack.i.h.bf16 %v23942_v55  ;;  %v21284_v17 = vunpack.i.l.bf16 %v23942_v55  ;;  %v21245_v8 = vunpack.i.h.bf16 %v23852_v11  ;;  %v20081_v11 = vpack.c.bf16 %v7344_v40, %v7338_v1  ;;  %v24053_v1 = vld [vmem:[%s26039_s9 + $0x70] sm:$0xff] }
 0x64c   : > { %7050 = vmatprep.mubr.f32.mxu1 %v23778_v53  ;;  %v20093_v59 = vpack.c.bf16 %v7348_v35, %v7342_v46  ;;  %v7347_v40 = vsel %vm26074_vm9, %v21255_v21, %v21249_v0  ;;  %v7772_v41 = vsel %vm7763_vm7, %v21264_v34, %v21265_v29  ;;  %v21280_v0 = vunpack.i.h.bf16 %v23905_v30 }
 0x64d   : > { %19712 = vmatmul.mubr.msk.f32.vlgmr.msra.gmra.mrb[22].mxu0 %vm26073_vm3, %v23911_v16  ;;  %v23958_v10 = vpop.permute.xlu0 %21292  ;;  %v7774_v15 = vsel %vm7763_vm7, %v21284_v17, %v21285_v27  ;;  %v7343_v33 = vsel %vm26074_vm9, %v21245_v8, %v21239_v49  ;;  %v7773_v63 = vsel %vm7763_vm7, %v21265_v29, %v21284_v17  ;;  %v7765_v8 = vsel %vm7763_vm7, %v21259_v5, %v21260_v62 }
 0x64e   : > { %20092 = vmatpush1.bf16.msk.msra.mxu0 %vm23469_vm1, %v20090_v26  ;;  %v21295_v24 = vunpack.i.h.bf16 %v23958_v10  ;;  %v21294_v36 = vunpack.i.l.bf16 %v23958_v10  ;;  %v23966_v51 = vpop.permute.xlu1 %21287  ;;  %7517 = vmatprep.mubr.f32.mxu0 %v23778_v53  ;;  %v20084_v25 = vpack.c.bf16 %v7343_v33, %v7337_v56  ;;  %v7771_v29 = vsel %vm7763_vm7, %v21280_v0, %v21264_v34 }
 0x64f   : > { %20101 = vmatprep.subr.msk.bf16.mxu0 %vm23469_vm1, %v20099_v20  ;;  %19106 = vmatmul.mubr.msk.f32.vlgmr.msra.gmra.mrb[12].mxu1 %vm26073_vm3, %v23885_v57  ;;  %v21290_v12 = vunpack.i.h.bf16 %v23966_v51  ;;  %v21289_v56 = vunpack.i.l.bf16 %v23966_v51  ;;  %v19153_v51 = vld [vmem:[%s26039_s9 + $0x80] sm:$0xff] }
 0x650   : > { %v7767_v28 = vsel %vm7763_vm7, %v21294_v36, %v21295_v24  ;;  %20074 = vmatpush1.bf16.msk.msra.mxu1 %vm23469_vm1, %v20072_v7  ;;  %7056 = vmatprep.mubr.f32.mxu1 %v23778_v53  ;;  %v7766_v49 = vsel %vm7763_vm7, %v21260_v62, %v21294_v36 }
 0x651   : > { %20083 = vmatprep.subr.msk.bf16.mxu1 %vm23469_vm1, %v20081_v11  ;;  %19127 = vmatmul.mubr.msk.f32.vlgmr.msra.gmra.mrb[18].mxu0 %vm26073_vm3, %v23972_v54  ;;  %v23993_v32 = vpop.permute.xlu0 %21297  ;;  %v20111_v50 = vpack.c.bf16 %v7774_v15, %v7767_v28  ;;  %v20114_v9 = vpack.c.bf16 %v7773_v63, %v7766_v49  ;;  %v20105_v11 = vpack.c.bf16 %v7772_v41, %v7765_v8  ;;  %v21279_v28 = vunpack.i.l.bf16 %v23905_v30 }
 0x652   : > { %20104 = vmatpush3.bf16.msk.msra.mxu0 %vm23469_vm1, %v20099_v20  ;;  %v23999_v42 = vpop.permute.xlu1 %21307  ;;  %7523 = vmatprep.mubr.f32.mxu0 %v23778_v53  ;;  %v21300_v47 = vunpack.i.h.bf16 %v23993_v32  ;;  %v7341_v20 = vsel %vm26074_vm9, %v21275_v6, %v21269_v52  ;;  %v24083_v6 = vld [vmem:[%s26039_s9 + $0x78] sm:$0x3f]  ;;  %v21299_v52 = vunpack.i.l.bf16 %v23993_v32  ;;  %v7776_v63 = vsel %vm7763_vm7, %v21289_v56, %v21290_v12 }
 0x653   : > { %19107 = vmatmul.mubr.msk.f32.gmra.mrb[14].mxu1 %vm26073_vm3, %v23911_v16  ;;  %20113 = vmatprep.subr.msk.bf16.mxu0 %vm23469_vm1, %v20111_v50  ;;  %v20096_v60 = vpack.c.bf16 %v7347_v40, %v7341_v20  ;;  %v21310_v33 = vunpack.i.h.bf16 %v23999_v42  ;;  %v7764_v49 = vsel %vm7763_vm7, %v21279_v28, %v21259_v5  ;;  %v19154_v40 = vld [vmem:[%s26039_s9 + $0x88] sm:$0x3f]  ;;  %v7775_v10 = vsel %vm7763_vm7, %v21285_v27, %v21289_v56 }
 0x654   : > { %7204 = vmatprep.mubr.f32.mxu1 %v23778_v53  ;;  %v7768_v41 = vsel %vm7763_vm7, %v21295_v24, %v21299_v52 }
 0x655   : > { %19128 = vmatmul.mubr.msk.f32.gmra.mrb[20].mxu0 %vm26073_vm3, %v24005_v48  ;;  %v21303_v43 = vpop.permute.xlu0 %21302  ;;  %v20120_v24 = vpack.c.bf16 %v7775_v10, %v7768_v41 }
 0x656   : > { %v21305_v31 = vunpack.i.h.bf16 %v21303_v43  ;;  %v21304_v39 = vunpack.i.l.bf16 %v21303_v43  ;;  %v24021_v4 = vpop.permute.xlu1 %21317  ;;  %19718 = vmatprep.mubr.msk.f32.mxu0 %vm26073_vm3, %v23972_v54  ;;  %v7769_v43 = vsel %vm7763_vm7, %v21299_v52, %v21300_v47 }
 0x657   : > { %19114 = vmatmul.mubr.msk.f32.vlgmr.msra.gmra.mrb[16].mxu1 %vm26073_vm3, %v23885_v57  ;;  %v21320_v36 = vunpack.i.h.bf16 %v24021_v4  ;;  %v21319_v55 = vunpack.i.l.bf16 %v24021_v4 }
 0x658   : > { %v7770_v26 = vsel %vm7763_vm7, %v21300_v47, %v21304_v39  ;;  %v7777_v37 = vsel %vm7763_vm7, %v21290_v12, %v21305_v31  ;;  %20086 = vmatpush1.bf16.msk.msra.mxu1 %vm23469_vm1, %v20084_v25  ;;  %7210 = vmatprep.mubr.f32.mxu1 %v23778_v53  ;;  %v20108_v39 = vpack.c.bf16 %v7771_v29, %v7764_v49 }
 0x659   : > { %20095 = vmatprep.subr.msk.bf16.mxu1 %vm23469_vm1, %v20093_v59  ;;  %19719 = vmatmul.mubr.msk.f32.vlgmr.msra.gmra.mrb[22].mxu0 %vm26073_vm3, %v24005_v48  ;;  %v24042_v57 = vpop.permute.xlu0 %21312  ;;  %v20123_v3 = vpack.c.bf16 %v7777_v37, %v7770_v26  ;;  %v8162_v25 = vsel %vm26073_vm3, %v21310_v33, %v21320_v36  ;;  %v20117_v12 = vpack.c.bf16 %v7776_v63, %v7769_v43 }
 0x65a   : > { %20116 = vmatpush1.bf16.msk.msra.mxu0 %vm23469_vm1, %v20114_v9  ;;  %v24047_v7 = vpop.permute.xlu1 %21327  ;;  %7946 = vmatprep.mubr.f32.mxu0 %v23778_v53  ;;  %v21315_v17 = vunpack.i.h.bf16 %v24042_v57  ;;  %v21314_v26 = vunpack.i.l.bf16 %v24042_v57 }
 0x65b   : > { %19115 = vmatmul.mubr.msk.f32.gmra.mrb[18].mxu1 %vm26073_vm3, %v23911_v16  ;;  %20125 = vmatprep.subr.msk.bf16.mxu0 %vm23469_vm1, %v20123_v3  ;;  %v21330_v58 = vunpack.i.h.bf16 %v24047_v7  ;;  %v21329_v21 = vunpack.i.l.bf16 %v24047_v7 }
 0x65c   : > { %7440 = vmatprep.mubr.f32.mxu1 %v23778_v53 }
 0x65d   : > { %19144 = vmatmul.mubr.msk.f32.vlgmr.msra.gmra.mrb[18].mxu0 %vm26073_vm3, %v24053_v1  ;;  %v24072_v16 = vpop.permute.xlu0 %21322  ;;  %v8169_v50 = vsel %vm26073_vm3, %v21315_v17, %v21329_v21  ;;  %v8170_v30 = vsel %vm26073_vm3, %v21329_v21, %v21330_v58 }
 0x65e   : > { %20128 = vmatpush3.bf16.msk.msra.mxu0 %vm23469_vm1, %v20123_v3  ;;  %v21324_v61 = vunpack.i.l.bf16 %v24072_v16  ;;  %7952 = vmatprep.mubr.f32.mxu0 %v23778_v53  ;;  %v24114_v46 = vpop.permute.xlu1 %21337  ;;  %v20138_v31 = vpack.c.bf16 %v8169_v50, %v8162_v25  ;;  %v21325_v57 = vunpack.i.h.bf16 %v24072_v16 }
 0x65f   : > { %19123 = vmatmul.mubr.msk.f32.vlgmr.msra.gmra.mrb[12].mxu1 %vm26073_vm3, %v23972_v54  ;;  %v21340_v34 = vunpack.i.h.bf16 %v24114_v46  ;;  %v21339_v27 = vunpack.i.l.bf16 %v24114_v46 }
 0x660   : > { %v8163_v15 = vsel %vm26073_vm3, %v21320_v36, %v21324_v61  ;;  %20098 = vmatpush1.bf16.msk.msra.mxu1 %vm23469_vm1, %v20096_v60  ;;  %7446 = vmatprep.mubr.f32.mxu1 %v23778_v53  ;;  %v8167_v21 = vsel %vm26073_vm3, %v21325_v57, %v21314_v26 }
 0x661   : > { %20107 = vmatprep.subr.msk.bf16.mxu1 %vm23469_vm1, %v20105_v11  ;;  %19145 = vmatmul.mubr.msk.f32.gmra.mrb[20].mxu0 %vm26073_vm3, %v24083_v6  ;;  %v24108_v62 = vpop.permute.xlu0 %21332  ;;  %v20135_v35 = vpack.c.bf16 %v8170_v30, %v8163_v15  ;;  %v8172_v36 = vsel %vm26073_vm3, %v21339_v27, %v21340_v34 }
 0x662   : > { %19725 = vmatprep.mubr.msk.f32.mxu0 %vm26073_vm3, %v24053_v1  ;;  %v21335_v32 = vunpack.i.h.bf16 %v24108_v62 }
 0x663   : > { %19124 = vmatmul.mubr.msk.f32.gmra.mrb[14].mxu1 %vm26073_vm3, %v24005_v48  ;;  %20137 = vmatprep.subr.msk.bf16.mxu0 %vm23469_vm1, %v20135_v35 }
 0x664   : > { %7594 = vmatprep.mubr.f32.mxu1 %v23778_v53 }
 0x665   : > { %19726 = vmatmul.mubr.msk.f32.vlgmr.msra.gmra.mrb[22].mxu0 %vm26073_vm3, %v24083_v6  ;;  %v21343_v59 = vpop.permute.xlu0 %21342 }
 0x666   : > { %20140 = vmatpush1.bf16.msk.msra.mxu0 %vm23469_vm1, %v20138_v31  ;;  %v21345_v47 = vunpack.i.h.bf16 %v21343_v59  ;;  %v21344_v9 = vunpack.i.l.bf16 %v21343_v59  ;;  %8342 = vmatprep.mubr.f32.mxu0 %v23778_v53 }
 0x667   : > { %19131 = vmatmul.mubr.msk.f32.vlgmr.msra.gmra.mrb[16].mxu1 %vm26073_vm3, %v23972_v54  ;;  %v21309_v54 = vunpack.i.l.bf16 %v23999_v42  ;;  %v8168_v42 = vsel %vm26073_vm3, %v21314_v26, %v21315_v17  ;;  %v21334_v17 = vunpack.i.l.bf16 %v24108_v62 }
 0x668   : > { %v8166_v37 = vsel %vm26073_vm3, %v21335_v32, %v21344_v9  ;;  %v8173_v3 = vsel %vm26073_vm3, %v21340_v34, %v21345_v47  ;;  %20110 = vmatpush1.bf16.msk.msra.mxu1 %vm23469_vm1, %v20108_v39  ;;  %7600 = vmatprep.mubr.f32.mxu1 %v23778_v53 }
 0x669   : > { %20119 = vmatprep.subr.msk.bf16.mxu1 %vm23469_vm1, %v20117_v12  ;;  %19161 = vmatmul.mubr.msk.f32.vlgmr.msra.gmra.mrb[18].mxu0 %vm26073_vm3, %v19153_v51  ;;  %v20147_v5 = vpack.c.bf16 %v8173_v3, %v8166_v37  ;;  %v8165_v8 = vsel %vm26073_vm3, %v21334_v17, %v21335_v32  ;;  %v8160_v4 = vsel %vm26073_vm3, %v21319_v55, %v21309_v54 }
 0x66a   : > { %8348 = vmatprep.mubr.f32.mxu0 %v23778_v53  ;;  %v20132_v60 = vpack.c.bf16 %v8167_v21, %v8160_v4  ;;  %v20141_v11 = vpack.c.bf16 %v8172_v36, %v8165_v8  ;;  %v8164_v0 = vsel %vm26073_vm3, %v21324_v61, %v21334_v17 }
 0x66b   : > { %19132 = vmatmul.mubr.msk.f32.gmra.mrb[18].mxu1 %vm26073_vm3, %v24005_v48  ;;  %20149 = vmatprep.subr.msk.bf16.mxu0 %vm23469_vm1, %v20147_v5  ;;  %v8161_v48 = vsel %vm26073_vm3, %v21309_v54, %v21310_v33 }
 0x66c   : > { %20152 = vmatpush3.bf16.msk.msra.mxu0 %vm23469_vm1, %v20147_v5  ;;  %7869 = vmatprep.mubr.f32.mxu1 %v23778_v53  ;;  %v20129_v20 = vpack.c.bf16 %v8168_v42, %v8161_v48 }
 0x66d   : > { %19162 = vmatmul.mubr.msk.f32.gmra.mrb[20].mxu0 %vm26073_vm3, %v19154_v40 }
 0x66e   : > { %19732 = vmatprep.mubr.msk.f32.mxu0 %vm26073_vm3, %v19153_v51 }
 0x66f   : > { %19140 = vmatmul.mubr.msk.f32.vlgmr.msra.gmra.mrb[12].mxu1 %vm26073_vm3, %v24053_v1  ;;  %v24221_v56 = vpop.permute.xlu1 %8539 }
 0x670   : > { %20122 = vmatpush1.bf16.msk.msra.mxu1 %vm23469_vm1, %v20120_v24  ;;  %7875 = vmatprep.mubr.f32.mxu1 %v23778_v53 }
 0x671   : > { %20131 = vmatprep.subr.msk.bf16.mxu1 %vm23469_vm1, %v20129_v20  ;;  %19733 = vmatmul.mubr.msk.f32.vlgmr.msra.gmra.mrb[22].mxu0 %vm26073_vm3, %v19154_v40 }
 0x672   : > { %8767 = vmatprep.mubr.f32.mxu0 %v23778_v53 }
 0x673   : > { %19141 = vmatmul.mubr.msk.f32.gmra.mrb[14].mxu1 %vm26073_vm3, %v24083_v6  ;;  %v24231_v59 = vpop.permute.xlu1 %8565 }
 0x674   : > { %8023 = vmatprep.mubr.f32.mxu1 %v23778_v53 }
 0x676   : > { %v24219_v16 = vpop.permute.xlu0 %8544 }
 0x677   : > { %19148 = vmatmul.mubr.msk.f32.vlgmr.msra.gmra.mrb[16].mxu1 %vm26073_vm3, %v24053_v1  ;;  %v8171_v1 = vsel %vm26073_vm3, %v21330_v58, %v21339_v27 }
 0x678   : > { %20134 = vmatpush1.bf16.msk.msra.mxu1 %vm23469_vm1, %v20132_v60  ;;  %8029 = vmatprep.mubr.f32.mxu1 %v23778_v53  ;;  %v20144_v28 = vpack.c.bf16 %v8171_v1, %v8164_v0 }
 0x679   : > { %20143 = vmatprep.subr.msk.bf16.mxu1 %vm23469_vm1, %v20141_v11 }
 0x67a   : > { %v24224_v50 = vpop.permute.xlu0 %8570 }
 0x67b   : > { %19149 = vmatmul.mubr.msk.f32.gmra.mrb[18].mxu1 %vm26073_vm3, %v24083_v6 }
 0x67c   : > { %8265 = vmatprep.mubr.f32.mxu1 %v23778_v53 }
 0x67f   : > { %19157 = vmatmul.mubr.msk.f32.vlgmr.msra.gmra.mrb[12].mxu1 %vm26073_vm3, %v19153_v51 }
 0x680   : > { %20146 = vmatpush1.bf16.msk.msra.mxu1 %vm23469_vm1, %v20144_v28  ;;  %8271 = vmatprep.mubr.f32.mxu1 %v23778_v53 }
 0x683   : > { %19158 = vmatmul.mubr.msk.f32.gmra.mrb[14].mxu1 %vm26073_vm3, %v19154_v40 }
 0x684   : > { %8419 = vmatprep.mubr.f32.mxu1 %v23778_v53 }
 0x687   : > { %19165 = vmatmul.mubr.msk.f32.vlgmr.msra.gmra.mrb[16].mxu1 %vm26073_vm3, %v19153_v51 }
 0x688   : > { %8425 = vmatprep.mubr.f32.mxu1 %v23778_v53 }
 0x68b   : > { %19166 = vmatmul.mubr.msk.f32.gmra.mrb[18].mxu1 %vm26073_vm3, %v19154_v40 }
 0x68c   : > { %12341 = vmatprep.mubr.f32.mxu1 %v23778_v53 }
 0x73c   : > { %v8344_v7 = vpop.f32.mrb[18].mxu0 }
 0x73d   : > { %v8346_v58 = vpop.f32.mrb[19].mxu0  ;;  %v8523_v29 = vmax.f32 %v8344_v7, 0.0 }
 0x73e   : > { %v8524_v49 = vmax.f32 %v8346_v58, 0.0 }
 0x73f   : > { %v8549_v34 = vmul.f32 %v24221_v56, %v8523_v29 }
 0x740   : > { %v8350_v61 = vpop.f32.mrb[20].mxu0  ;;  %v8550_v47 = vmul.f32 %v24221_v56, %v8524_v49 }
 0x741   : > { %v8530_v6 = vmax.f32 %v8350_v61, 0.0  ;;  %v8352_v52 = vpop.f32.mrb[21].mxu0  ;;  %v24239_v51 = vadd.f32 %v24231_v59, %v8549_v34 }
 0x742   : > { %v8531_v15 = vmax.f32 %v8352_v52, 0.0  ;;  %v24242_v12 = vadd.f32 %v24231_v59, %v8550_v47 }
 0x743   : > { %v8556_v33 = vmul.f32 %v24219_v16, %v8530_v6 }
 0x744   : > { %v8557_v30 = vmul.f32 %v24219_v16, %v8531_v15  ;;  %v19734_v62 = vpop.f32.mrb[22].mxu0 }
 0x745   : > { %v8582_v35 = vadd.f32 %v24224_v50, %v8556_v33  ;;  %v8534_v25 = vmax.f32 %v19734_v62, 0.0  ;;  %v8498_v46 = vpop.f32.mrb[23].mxu0 }
 0x746   : > { %v8583_v43 = vadd.f32 %v24224_v50, %v8557_v30  ;;  %v8527_v31 = vmax.f32 %v8498_v46, 0.0 }
 0x747   : > { %8596 = vst [vmem:[#allocation2 + $0x60] sm:$0x3f] %v8582_v35  ;;  %v8560_v39 = vmul.f32 %v24219_v16, %v8534_v25 }
 0x748   : > { %8597 = vst [vmem:[#allocation2 + $0x68] sm:$0x3f] %v8583_v43  ;;  %v8553_v63 = vmul.f32 %v24221_v56, %v8527_v31 }
 0x749   : > { %v8586_v32 = vadd.f32 %v24224_v50, %v8560_v39 }
 0x74a   : > { %v8579_v9 = vadd.f32 %v24231_v59, %v8553_v63 }
 0x74b   : > { %8601 = vst.msk [vmem:[#allocation2 + $0x80] sm:$0x3f] %vm8600_vm11, %v8586_v32 }
 0x74c   : > { %8593 = vst.msk [vmem:[#allocation2 + $0x38] sm:$0xff] %vm26074_vm9, %v8579_v9 }
 0x74e   : > { %v24244_v26 = vld [vmem:[#allocation2 + $0x60] sm:$0x3f] }
 0x74f   : > { %v11295_v37 = vld [vmem:[#allocation2 + $0x60] sm:$0x3f]  ;;  %v24246_v3 = vld [vmem:[#allocation2 + $0x68] sm:$0x3f]  ;;  %v20186_v54 = vpack.c.bf16 %v24244_v26, %v24239_v51 }
 0x750   : > { %v24248_v5 = vld [vmem:[#allocation2 + $0x68] sm:$0x3f]  ;;  %15380 = vst [vmem:[#allocation2 + $0x60] sm:$0xff] %v23778_v53  ;;  %v20183_v40 = vpack.c.bf16 %v24246_v3, %v24242_v12 }
 0x751   : > { %15381 = vst [vmem:[#allocation2 + $0x68] sm:$0xff] %v23778_v53 }
 0x752   : > { %v8267_v41 = vpop.f32.mrb[12].mxu1 }
 0x753   : > { %v8269_v42 = vpop.f32.mrb[13].mxu1  ;;  %v8521_v60 = vmax.f32 %v8267_v41, 0.0 }
 0x754   : > { %v8522_v10 = vmax.f32 %v8269_v42, 0.0 }
 0x755   : > { %v8547_v58 = vmul.f32 %v24221_v56, %v8521_v60 }
 0x756   : > { %v8548_v24 = vmul.f32 %v24221_v56, %v8522_v10  ;;  %v8273_v48 = vpop.f32.mrb[14].mxu1 }
 0x757   : > { %v8528_v57 = vmax.f32 %v8273_v48, 0.0  ;;  %v8275_v20 = vpop.f32.mrb[15].mxu1  ;;  %v24282_v35 = vadd.f32 %v24231_v59, %v8547_v58 }
 0x758   : > { %v24258_v17 = vadd.f32 %v24231_v59, %v8548_v24  ;;  %v8529_v55 = vmax.f32 %v8275_v20, 0.0  ;;  %v24317_v24 = vld [vmem:[#allocation2 + $0x38] sm:$0xff] }
 0x759   : > { %v8554_v27 = vmul.f32 %v24219_v16, %v8528_v57  ;;  %v24327_v57 = vld [vmem:[#allocation2 + $0x80] sm:$0x3f] }
 0x75a   : > { %v8555_v21 = vmul.f32 %v24219_v16, %v8529_v55  ;;  %v8421_v8 = vpop.f32.mrb[16].mxu1  ;;  %v24264_v4 = vpack.i.bf16 %v24239_v51, %v24258_v17 }
 0x75b   : > { %v8580_v36 = vadd.f32 %v24224_v50, %v8554_v27  ;;  %v8525_v11 = vmax.f32 %v8421_v8, 0.0  ;;  %v8423_v0 = vpop.f32.mrb[17].mxu1  ;;  %v11299_v8 = vld [vmem:[#allocation2 + $0x80] sm:$0x3f] }
 0x75c   : > { %v8581_v1 = vadd.f32 %v24224_v50, %v8555_v21  ;;  %21347 = vrot.lane.b32.xlu1 %v24264_v4, %s26068_s24  ;;  %v8526_v62 = vmax.f32 %v8423_v0, 0.0 }
 0x75d   : > { %8594 = vst [vmem:[#allocation2 + $0x50] sm:$0x3f] %v8580_v36  ;;  %v8551_v28 = vmul.f32 %v24221_v56, %v8525_v11 }
 0x75e   : > { %8595 = vst [vmem:[#allocation2 + $0x58] sm:$0x3f] %v8581_v1  ;;  %v8427_v7 = vpop.f32.mrb[18].mxu1 }
 0x75f   : > { %v24273_v61 = vadd.f32 %v24231_v59, %v8551_v28  ;;  %v8532_v6 = vmax.f32 %v8427_v7, 0.0  ;;  %v8429_v52 = vpop.f32.mrb[19].mxu1  ;;  %v12124_v7 = vld [vmem:[%s26043_s13 + $0x8] sm:$0xff] }
 0x760   : > { %v8533_v15 = vmax.f32 %v8429_v52, 0.0 }
 0x761   : > { %v8558_v33 = vmul.f32 %v24219_v16, %v8532_v6  ;;  %v24278_v30 = vpack.i.bf16 %v24273_v61, %v24242_v12 }
 0x762   : > { %v8559_v29 = vmul.f32 %v24219_v16, %v8533_v15 }
 0x763   : > { %v8584_v25 = vadd.f32 %v24224_v50, %v8558_v33 }
 0x764   : > { %v8585_v46 = vadd.f32 %v24224_v50, %v8559_v29  ;;  %v24286_v49 = vld [vmem:[#allocation2 + $0x50] sm:$0x3f]  ;;  %v8552_v50 = vmul.f32 %v24221_v56, %v8526_v62  ;;  %v12149_v62 = vld [vmem:[%s26044_s14] sm:$0xff] }
 0x765   : > { %v11293_v43 = vld [vmem:[#allocation2 + $0x50] sm:$0x3f]  ;;  %8598 = vst [vmem:[#allocation2 + $0x70] sm:$0x3f] %v8584_v25  ;;  %v21356_v31 = vpack.i.bf16 %v24286_v49, %v24282_v35  ;;  %v24290_v39 = vld [vmem:[#allocation2 + $0x58] sm:$0x3f]  ;;  %v20180_v16 = vpack.c.bf16 %v24286_v49, %v24282_v35 }
 0x766   : > { %v11294_v63 = vld [vmem:[#allocation2 + $0x58] sm:$0x3f]  ;;  %v24293_v34 = vpack.i.bf16 %v11293_v43, %v24282_v35  ;;  %15378 = vst [vmem:[#allocation2 + $0x50] sm:$0xff] %v23778_v53  ;;  %8599 = vst [vmem:[#allocation2 + $0x78] sm:$0x3f] %v8585_v46  ;;  %v21351_v32 = vpack.i.bf16 %v24244_v26, %v24290_v39  ;;  %v20177_v9 = vpack.c.bf16 %v24290_v39, %v24258_v17  ;;  %v8616_v17 = vld [vmem:[%s26042_s12] sm:$0xff] }
 0x767   : > { %15379 = vst [vmem:[#allocation2 + $0x58] sm:$0xff] %v23778_v53  ;;  %21357 = vrot.lane.b32.xlu1 %v21356_v31, %s26068_s24  ;;  %v24303_v47 = vpack.i.bf16 %v11295_v37, %v11294_v63  ;;  %v24309_v41 = vadd.f32 %v24231_v59, %v8552_v50  ;;  %v8617_v35 = vld [vmem:[%s26042_s12 + $0x8] sm:$0xff] }
 0x768   : > { %21352 = vrot.lane.b32.xlu0 %v21351_v32, %s26068_s24 }
 0x769   : > { %v21371_v59 = vpack.i.bf16 %v24317_v24, %v24309_v41 }
 0x76c   : > { %21362 = vrot.lane.b32.xlu0 %v24278_v30, %s26068_s24  ;;  %v24313_v56 = vld [vmem:[#allocation2 + $0x70] sm:$0x3f] }
 0x76d   : > { %v11297_v42 = vld [vmem:[#allocation2 + $0x70] sm:$0x3f]  ;;  %v21366_v10 = vpack.i.bf16 %v24313_v56, %v24246_v3  ;;  %v24319_v37 = vld [vmem:[#allocation2 + $0x78] sm:$0x3f]  ;;  %v20192_v21 = vpack.c.bf16 %v24313_v56, %v24273_v61 }
 0x76e   : > { %v11298_v48 = vld [vmem:[#allocation2 + $0x78] sm:$0x3f]  ;;  %15382 = vst [vmem:[#allocation2 + $0x70] sm:$0xff] %v23778_v53  ;;  %v21576_v20 = vpack.i.bf16 %v11297_v42, %v24248_v5  ;;  %v21376_v55 = vpack.i.bf16 %v24327_v57, %v24319_v37  ;;  %v20189_v27 = vpack.c.bf16 %v24319_v37, %v24309_v41  ;;  %v11300_v5 = vld [vmem:[#allocation2 + $0x88] sm:$0x3f] }
 0x76f   : > { %15383 = vst [vmem:[#allocation2 + $0x78] sm:$0xff] %v23778_v53  ;;  %21367 = vrot.lane.b32.xlu1 %v21366_v10, %s26068_s24  ;;  %v11292_v53 = vld [vmem:[#allocation2 + $0x40] sm:$0xff]  ;;  %v21586_v36 = vpack.i.bf16 %v11299_v8, %v11298_v48 }
 0x770   : > { %21372 = vrot.lane.b32.xlu0 %v21371_v59, %s26068_s24  ;;  %v21591_v60 = vpack.i.bf16 %v11300_v5, %v11292_v53 }
 0x773   : > { %21377 = vrot.lane.b32.xlu1 %v21376_v55, %s26068_s24  ;;  %s21974_s24 = smov 74  }
 0x774   : > { %21382 = vrot.lane.b32.xlu0 %v24264_v4, %s26094_s27 }
 0x777   : > { %21387 = vrot.lane.b32.xlu1 %v21351_v32, %s26094_s27 }
 0x778   : > { %21392 = vrot.lane.b32.xlu0 %v21356_v31, %s26094_s27 }
 0x77b   : > { %21397 = vrot.lane.b32.xlu1 %v24278_v30, %s26094_s27 }
 0x77c   : > { %21402 = vrot.lane.b32.xlu0 %v21366_v10, %s26094_s27 }
 0x77f   : > { %21407 = vrot.lane.b32.xlu1 %v21371_v59, %s26094_s27 }
 0x780   : > { %21412 = vrot.lane.b32.xlu0 %v21376_v55, %s26094_s27 }
 0x783   : > { %21417 = vrot.lane.b32.xlu1 %v24264_v4, %s26091_s6 }
 0x784   : > { %21422 = vrot.lane.b32.xlu0 %v21351_v32, %s26091_s6 }
 0x787   : > { %21427 = vrot.lane.b32.xlu1 %v21356_v31, %s26091_s6 }
 0x788   : > { %21432 = vrot.lane.b32.xlu0 %v24278_v30, %s26091_s6 }
 0x78b   : > { %21437 = vrot.lane.b32.xlu1 %v21366_v10, %s26091_s6 }
 0x78c   : > { %21442 = vrot.lane.b32.xlu0 %v21371_v59, %s26091_s6 }
 0x78f   : > { %21447 = vrot.lane.b32.xlu1 %v21376_v55, %s26091_s6 }
 0x790   : > { %21452 = vrot.lane.b32.xlu0 %v24264_v4, %s26087_s0 }
 0x793   : > { %21457 = vrot.lane.b32.xlu1 %v21351_v32, %s26087_s0 }
 0x794   : > { %21462 = vrot.lane.b32.xlu0 %v21356_v31, %s26087_s0 }
 0x797   : > { %21467 = vrot.lane.b32.xlu1 %v24278_v30, %s26087_s0 }
 0x798   : > { %21472 = vrot.lane.b32.xlu0 %v21366_v10, %s26087_s0 }
 0x79b   : > { %21477 = vrot.lane.b32.xlu1 %v21371_v59, %s26087_s0 }
 0x79c   : > { %21482 = vrot.lane.b32.xlu0 %v21376_v55, %s26087_s0 }
 0x79f   : > { %21487 = vrot.lane.b32.xlu1 %v24264_v4, %s26095_s29 }
 0x7a0   : > { %21492 = vrot.lane.b32.xlu0 %v21351_v32, %s26095_s29 }
 0x7a3   : > { %21497 = vrot.lane.b32.xlu1 %v21356_v31, %s26095_s29 }
 0x7a4   : > { %21502 = vrot.lane.b32.xlu0 %v24278_v30, %s26095_s29 }
 0x7a7   : > { %21507 = vrot.lane.b32.xlu1 %v21366_v10, %s26095_s29 }
 0x7a8   : > { %21512 = vrot.lane.b32.xlu0 %v21371_v59, %s26095_s29 }
 0x7ab   : > { %21517 = vrot.lane.b32.xlu1 %v21376_v55, %s26095_s29 }
 0x7ac   : > { %21522 = vrot.lane.b32.xlu0 %v24264_v4, %s26096_s25 }
 0x7af   : > { %21527 = vrot.lane.b32.xlu1 %v21351_v32, %s26096_s25 }
 0x7b0   : > { %21532 = vrot.lane.b32.xlu0 %v21356_v31, %s26096_s25  ;;  %v12150_v31 = vld [vmem:[%s26044_s14 + $0x8] sm:$0xff] }
 0x7b3   : > { %21537 = vrot.lane.b32.xlu1 %v24278_v30, %s26096_s25 }
 0x7b4   : > { %21542 = vrot.lane.b32.xlu0 %v21366_v10, %s26096_s25  ;;  %v19170_v10 = vld [vmem:[%s26042_s12 + $0x10] sm:$0xff] }
 0x7b7   : > { %21547 = vrot.lane.b32.xlu1 %v21371_v59, %s26096_s25 }
 0x7b8   : > { %21552 = vrot.lane.b32.xlu0 %v21376_v55, %s26096_s25 }
 0x7bb   : > { %21557 = vrot.lane.b32.xlu1 %v24264_v4, %s26097_s1 }
 0x7bc   : > { %21562 = vrot.lane.b32.xlu0 %v24303_v47, %s26097_s1 }
 0x7bf   : > { %21567 = vrot.lane.b32.xlu1 %v24293_v34, %s26097_s1 }
 0x7c0   : > { %21572 = vrot.lane.b32.xlu0 %v24278_v30, %s26097_s1 }
 0x7c3   : > { %21577 = vrot.lane.b32.xlu1 %v21576_v20, %s26097_s1 }
 0x7c4   : > { %21582 = vrot.lane.b32.xlu0 %v21371_v59, %s26097_s1 }
 0x7c7   : > { %21587 = vrot.lane.b32.xlu1 %v21586_v36, %s26097_s1 }
 0x7c8   : > { %21592 = vrot.lane.b32.xlu0 %v21591_v60, %s26097_s1 }
 0x7cb   : > { %21597 = vrot.lane.b32.xlu1 %v24264_v4, %s26071_s30  ;;  %v12123_v4 = vld [vmem:[%s26043_s13] sm:$0xff] }
 0x7cc   : > { %21602 = vrot.lane.b32.xlu0 %v24303_v47, %s26071_s30 }
 0x7ce   : > { %v21348_v11 = vpop.permute.xlu1 %21347 }
 0x7cf   : > { %21607 = vrot.lane.b32.xlu1 %v24293_v34, %s26071_s30  ;;  %v21350_v0 = vunpack.i.h.bf16 %v21348_v11  ;;  %v21349_v1 = vunpack.i.l.bf16 %v21348_v11 }
 0x7d0   : > { %21612 = vrot.lane.b32.xlu0 %v24278_v30, %s26071_s30 }
 0x7d1   : > { %v8664_v25 = vsel %vm839_vm2, %v21349_v1, %v21350_v0 }
 0x7d3   : > { %21617 = vrot.lane.b32.xlu1 %v21576_v20, %s26071_s30 }
 0x7d4   : > { %21622 = vrot.lane.b32.xlu0 %v21371_v59, %s26071_s30 }
 0x7d7   : > { %21627 = vrot.lane.b32.xlu1 %v21586_v36, %s26071_s30 }
 0x7d8   : > { %21632 = vrot.lane.b32.xlu0 %v21591_v60, %s26071_s30 }
 0x7d9   : > { %v21358_v28 = vpop.permute.xlu1 %21357 }
 0x7da   : > { %v21360_v58 = vunpack.i.h.bf16 %v21358_v28  ;;  %v21359_v6 = vunpack.i.l.bf16 %v21358_v28  ;;  %v21353_v52 = vpop.permute.xlu0 %21352 }
 0x7db   : > { %v21355_v15 = vunpack.i.h.bf16 %v21353_v52  ;;  %v21354_v33 = vunpack.i.l.bf16 %v21353_v52  ;;  %12127 = vperm.xlu1 %21055, %v12123_v4  }
 0x7dc   : > { %v8663_v30 = vsel %vm839_vm2, %v21359_v6, %v21349_v1  ;;  %12132 = vperm.xlu0 %21054, %v12124_v7   ;;  %v24439_v1 = vld [vmem:[#allocation2] sm:$0xff] }
 0x7dd   : > { %v8669_v46 = vsel %vm839_vm2, %v21360_v58, %v21354_v33  ;;  %v8670_v43 = vsel %vm839_vm2, %v21354_v33, %v21355_v15 }
 0x7de   : > { %v20156_v63 = vpack.c.bf16 %v8669_v46, %v8663_v30  ;;  %v21363_v34 = vpop.permute.xlu0 %21362  ;;  %v20153_v50 = vpack.c.bf16 %v8670_v43, %v8664_v25 }
 0x7df   : > { %v21365_v32 = vunpack.i.h.bf16 %v21363_v34  ;;  %v21364_v47 = vunpack.i.l.bf16 %v21363_v34  ;;  %12153 = vperm.xlu1 %21055, %v12149_v62  }
 0x7e0   : > { %20155 = vmatprep.subr.msk.bf16.mxu0 %vm24417_vm14, %v20153_v50  ;;  %12158 = vperm.xlu0 %21054, %v12150_v31  }
 0x7e1   : > { %20158 = vmatpush1.bf16.msk.msra.mxu0 %vm24417_vm14, %v20156_v63  ;;  %v21368_v42 = vpop.permute.xlu1 %21367  ;;  %v8665_v55 = vsel %vm839_vm2, %v21350_v0, %v21364_v47  ;;  %v8666_v53 = vsel %vm839_vm2, %v21364_v47, %v21365_v32  ;;  %v19171_v0 = vld [vmem:[%s26042_s12 + $0x18] sm:$0xff] }
 0x7e2   : > { %v21370_v48 = vunpack.i.h.bf16 %v21368_v42  ;;  %v21369_v59 = vunpack.i.l.bf16 %v21368_v42  ;;  %v21373_v20 = vpop.permute.xlu0 %21372 }
 0x7e3   : > { %v21375_v60 = vunpack.i.h.bf16 %v21373_v20  ;;  %v21374_v36 = vunpack.i.l.bf16 %v21373_v20 }
 0x7e4   : > { %v8671_v5 = vsel %vm839_vm2, %v21355_v15, %v21369_v59  ;;  %v8672_v8 = vsel %vm839_vm2, %v21369_v59, %v21370_v48  ;;  %19174 = vmatmul.mubr.msk.f32.vlgmr.msra.gmra.mrb[24].mxu0 %vm7763_vm7, %v19170_v10 }
 0x7e5   : > { %v20162_v11 = vpack.c.bf16 %v8671_v5, %v8665_v55  ;;  %v21378_v4 = vpop.permute.xlu1 %21377  ;;  %8773 = vmatprep.mubr.f32.mxu0 %v24439_v1  ;;  %v20159_v28 = vpack.c.bf16 %v8672_v8, %v8666_v53  ;;  %v8667_v6 = vsel %vm839_vm2, %v21365_v32, %v21374_v36  ;;  %v8668_v52 = vsel %vm839_vm2, %v21374_v36, %v21375_v60 }
 0x7e6   : > { %v21380_v7 = vunpack.i.h.bf16 %v21378_v4  ;;  %v21379_v58 = vunpack.i.l.bf16 %v21378_v4  ;;  %v21383_v39 = vpop.permute.xlu0 %21382 }
 0x7e7   : > { %20161 = vmatprep.subr.msk.bf16.mxu0 %vm24417_vm14, %v20159_v28  ;;  %v21384_v49 = vunpack.i.l.bf16 %v21383_v39  ;;  %v19203_v28 = vld [vmem:[%s26042_s12 + $0x28] sm:$0xff] }
 0x7e8   : > { %v8673_v15 = vsel %vm839_vm2, %v21370_v48, %v21379_v58  ;;  %v8674_v33 = vsel %vm839_vm2, %v21379_v58, %v21380_v7  ;;  %19175 = vmatmul.mubr.msk.f32.gmra.mrb[26].mxu0 %vm7763_vm7, %v19171_v0  ;;  %v20171_v25 = vpack.c.bf16 %v21380_v7, %v21375_v60  ;;  %v19202_v60 = vld [vmem:[%s26042_s12 + $0x20] sm:$0xff] }
 0x7e9   : > { %v20168_v30 = vpack.c.bf16 %v8673_v15, %v8667_v6  ;;  %20164 = vmatpush1.bf16.msk.msra.mxu0 %vm24417_vm14, %v20162_v11  ;;  %8844 = vmatprep.mubr.f32.mxu0 %v24439_v1  ;;  %v20165_v62 = vpack.c.bf16 %v8674_v33, %v8668_v52  ;;  %v21388_v12 = vpop.permute.xlu1 %21387 }
 0x7ea   : > { %v21393_v51 = vpop.permute.xlu0 %21392  ;;  %v21390_v26 = vunpack.i.h.bf16 %v21388_v12  ;;  %v21389_v3 = vunpack.i.l.bf16 %v21388_v12 }
 0x7eb   : > { %20167 = vmatprep.subr.msk.bf16.mxu0 %vm24417_vm14, %v20165_v62  ;;  %v21395_v56 = vunpack.i.h.bf16 %v21393_v51 }
 0x7ec   : > { %19178 = vmatmul.mubr.msk.f32.vlgmr.msra.gmra.mrb[28].mxu0 %vm7763_vm7, %v19170_v10 }
 0x7ed   : > { %20170 = vmatpush1.bf16.msk.msra.mxu0 %vm24417_vm14, %v20168_v30  ;;  %8850 = vmatprep.mubr.f32.mxu0 %v24439_v1  ;;  %v9372_v34 = vsel %vm5775_vm4, %v21395_v56, %v21389_v3 }
 0x7ee   : > { %20173 = vmatprep.subr.msk.bf16.mxu0 %vm24417_vm14, %v20171_v25  ;;  %v21403_v41 = vpop.permute.xlu0 %21402 }
 0x7ef   : > { %v21404_v46 = vunpack.i.l.bf16 %v21403_v41 }
 0x7f0   : > { %19179 = vmatmul.mubr.msk.f32.gmra.mrb[30].mxu0 %vm7763_vm7, %v19171_v0 }
 0x7f1   : > { %8921 = vmatprep.mubr.f32.mxu0 %v24439_v1  ;;  %v9374_v55 = vsel %vm5775_vm4, %v21390_v26, %v21404_v46 }
 0x7f2   : > { %v21413_v31 = vpop.permute.xlu0 %21412 }
 0x7f3   : > { %v21414_v48 = vunpack.i.l.bf16 %v21413_v31 }
 0x7f4   : > { %19182 = vmatmul.mubr.msk.f32.vlgmr.msra.gmra.mrb[32].mxu0 %vm7763_vm7, %v19170_v10 }
 0x7f5   : > { %20176 = vmatpush3.bf16.msk.msra.mxu0 %vm24417_vm14, %v20171_v25  ;;  %8927 = vmatprep.mubr.f32.mxu0 %v24439_v1 }
 0x7f6   : > { %20179 = vmatprep.subr.msk.bf16.mxu0 %vm24417_vm14, %v20177_v9  ;;  %v21398_v9 = vpop.permute.xlu1 %21397  ;;  %v21423_v58 = vpop.permute.xlu0 %21422 }
 0x7f7   : > { %v21425_v62 = vunpack.i.h.bf16 %v21423_v58  ;;  %v21424_v25 = vunpack.i.l.bf16 %v21423_v58 }
 0x7f8   : > { %19183 = vmatmul.mubr.msk.f32.gmra.mrb[34].mxu0 %vm7763_vm7, %v19171_v0 }
 0x7f9   : > { %19739 = vmatprep.mubr.msk.f32.mxu0 %vm7763_vm7, %v19170_v10  ;;  %v21415_v10 = vunpack.i.h.bf16 %v21413_v31 }
 0x7fa   : > { %v21408_v43 = vpop.permute.xlu1 %21407  ;;  %v21433_v12 = vpop.permute.xlu0 %21432 }
 0x7fb   : > { %v21410_v47 = vunpack.i.h.bf16 %v21408_v43  ;;  %v21409_v42 = vunpack.i.l.bf16 %v21408_v43  ;;  %v9377_v8 = vsel %vm5775_vm4, %v21414_v48, %v21415_v10 }
 0x7fc   : > { %19740 = vmatmul.mubr.msk.f32.vlgmr.msra.gmra.mrb[36].mxu0 %vm7763_vm7, %v19171_v0 }
 0x7fd   : > { %20182 = vmatpush1.bf16.msk.msra.mxu0 %vm24417_vm14, %v20180_v16  ;;  %9093 = vmatprep.mubr.f32.mxu0 %v24439_v1  ;;  %v9373_v16 = vsel %vm5775_vm4, %v21389_v3, %v21390_v26  ;;  %v9371_v5 = vsel %vm5775_vm4, %v21409_v42, %v21410_v47  ;;  %v20219_v15 = vpack.c.bf16 %v21415_v10, %v21410_v47 }
 0x7fe   : > { %20185 = vmatprep.subr.msk.bf16.mxu0 %vm24417_vm14, %v20183_v40  ;;  %v21385_v40 = vunpack.i.h.bf16 %v21383_v39  ;;  %v21418_v11 = vpop.permute.xlu1 %21417  ;;  %v20213_v4 = vpack.c.bf16 %v9377_v8, %v9371_v5  ;;  %v21443_v56 = vpop.permute.xlu0 %21442 }
 0x7ff   : > { %v21420_v33 = vunpack.i.h.bf16 %v21418_v11  ;;  %v21419_v30 = vunpack.i.l.bf16 %v21418_v11  ;;  %v21444_v43 = vunpack.i.l.bf16 %v21443_v56 }
 0x800   : > { %19189 = vmatmul.mubr.msk.f32.vlgmr.msra.gmra.mrb[24].mxu0 %vm7763_vm7, %v8616_v17  ;;  %v9367_v61 = vsel %vm5775_vm4, %v21384_v49, %v21385_v40 }
 0x801   : > { %20188 = vmatpush1.bf16.msk.msra.mxu0 %vm24417_vm14, %v20186_v54  ;;  %9099 = vmatprep.mubr.f32.mxu0 %v24439_v1  ;;  %v20195_v54 = vpack.c.bf16 %v24327_v57, %v24317_v24  ;;  %v21394_v24 = vunpack.i.l.bf16 %v21393_v51  ;;  %v20201_v37 = vpack.c.bf16 %v9373_v16, %v9367_v61  ;;  %v21400_v57 = vunpack.i.h.bf16 %v21398_v9 }
 0x802   : > { %20191 = vmatprep.subr.msk.bf16.mxu0 %vm24417_vm14, %v20189_v27  ;;  %v21399_v27 = vunpack.i.l.bf16 %v21398_v9  ;;  %v21428_v6 = vpop.permute.xlu1 %21427  ;;  %v9757_v39 = vsel %vm1063_vm6, %v21419_v30, %v21420_v33  ;;  %v21435_v16 = vunpack.i.h.bf16 %v21433_v12  ;;  %v21434_v9 = vunpack.i.l.bf16 %v21433_v12  ;;  %v21453_v10 = vpop.permute.xlu0 %21452 }
 0x803   : > { %v9366_v63 = vsel %vm5775_vm4, %v21394_v24, %v21384_v49  ;;  %v9370_v0 = vsel %vm5775_vm4, %v21400_v57, %v21409_v42  ;;  %v21430_v51 = vunpack.i.h.bf16 %v21428_v6  ;;  %v21429_v26 = vunpack.i.l.bf16 %v21428_v6 }
 0x804   : > { %19190 = vmatmul.mubr.msk.f32.gmra.mrb[26].mxu0 %vm7763_vm7, %v8617_v35  ;;  %v9369_v50 = vsel %vm5775_vm4, %v21399_v27, %v21400_v57  ;;  %v20204_v59 = vpack.c.bf16 %v9372_v34, %v9366_v63  ;;  %v9368_v20 = vsel %vm5775_vm4, %v21385_v40, %v21399_v27 }
 0x805   : > { %9170 = vmatprep.mubr.f32.mxu0 %v24439_v1  ;;  %v20210_v36 = vpack.c.bf16 %v9374_v55, %v9368_v20  ;;  %v9756_v61 = vsel %vm1063_vm6, %v21429_v26, %v21419_v30 }
 0x806   : > { %v21463_v5 = vpop.permute.xlu0 %21462 }
 0x808   : > { %19193 = vmatmul.mubr.msk.f32.vlgmr.msra.gmra.mrb[28].mxu0 %vm7763_vm7, %v8616_v17 }
 0x809   : > { %20194 = vmatpush1.bf16.msk.msra.mxu0 %vm24417_vm14, %v20192_v21  ;;  %9176 = vmatprep.mubr.f32.mxu0 %v24439_v1  ;;  %v21405_v21 = vunpack.i.h.bf16 %v21403_v41  ;;  %v9762_v41 = vsel %vm1063_vm6, %v21430_v51, %v21424_v25 }
 0x80a   : > { %20197 = vmatprep.subr.msk.bf16.mxu0 %vm24417_vm14, %v20195_v54  ;;  %v20228_v27 = vpack.c.bf16 %v9762_v41, %v9756_v61  ;;  %v21473_v58 = vpop.permute.xlu0 %21472 }
 0x80b   : > { %v9375_v32 = vsel %vm5775_vm4, %v21404_v46, %v21405_v21  ;;  %v9376_v7 = vsel %vm5775_vm4, %v21405_v21, %v21414_v48  ;;  %v9759_v21 = vsel %vm1063_vm6, %v21434_v9, %v21435_v16  ;;  %v21445_v46 = vunpack.i.h.bf16 %v21443_v56 }
 0x80c   : > { %19194 = vmatmul.mubr.msk.f32.gmra.mrb[30].mxu0 %vm7763_vm7, %v8617_v35  ;;  %v20207_v53 = vpack.c.bf16 %v9375_v32, %v9369_v50  ;;  %v20216_v52 = vpack.c.bf16 %v9376_v7, %v9370_v0  ;;  %v19219_v50 = vld [vmem:[%s26042_s12 + $0x30] sm:$0xff]  ;;  %v9758_v32 = vsel %vm1063_vm6, %v21420_v33, %v21434_v9 }
 0x80d   : > { %9247 = vmatprep.mubr.f32.mxu0 %v24439_v1  ;;  %v9761_v42 = vsel %vm1063_vm6, %v21444_v43, %v21445_v46 }
 0x810   : > { %19197 = vmatmul.mubr.msk.f32.vlgmr.msra.gmra.mrb[32].mxu0 %vm7763_vm7, %v8616_v17 }
 0x811   : > { %20200 = vmatpush3.bf16.msk.msra.mxu0 %vm24417_vm14, %v20195_v54  ;;  %9253 = vmatprep.mubr.f32.mxu0 %v24439_v1 }
 0x812   : > { %20203 = vmatprep.subr.msk.bf16.mxu0 %vm24417_vm14, %v20201_v37 }
 0x814   : > { %19198 = vmatmul.mubr.msk.f32.gmra.mrb[34].mxu0 %vm7763_vm7, %v8617_v35 }
 0x815   : > { %19746 = vmatprep.mubr.msk.f32.mxu0 %vm7763_vm7, %v8616_v17  ;;  %v21438_v17 = vpop.permute.xlu1 %21437 }
 0x816   : > { %v21440_v54 = vunpack.i.h.bf16 %v21438_v17  ;;  %v21439_v40 = vunpack.i.l.bf16 %v21438_v17  ;;  %v21474_v17 = vunpack.i.l.bf16 %v21473_v58 }
 0x818   : > { %19747 = vmatmul.mubr.msk.f32.vlgmr.msra.gmra.mrb[36].mxu0 %vm7763_vm7, %v8617_v35  ;;  %v9763_v35 = vsel %vm1063_vm6, %v21424_v25, %v21425_v62  ;;  %v9765_v24 = vsel %vm1063_vm6, %v21439_v40, %v21440_v54  ;;  %v9764_v31 = vsel %vm1063_vm6, %v21425_v62, %v21439_v40  ;;  %v21475_v25 = vunpack.i.h.bf16 %v21473_v58 }
 0x819   : > { %20206 = vmatpush1.bf16.msk.msra.mxu0 %vm24417_vm14, %v20204_v59  ;;  %9469 = vmatprep.mubr.f32.mxu0 %v24439_v1  ;;  %v20225_v3 = vpack.c.bf16 %v9763_v35, %v9757_v39  ;;  %v21448_v49 = vpop.permute.xlu1 %21447  ;;  %v20231_v63 = vpack.c.bf16 %v9765_v24, %v9759_v21  ;;  %v20234_v47 = vpack.c.bf16 %v9764_v31, %v9758_v32  ;;  %v19220_v59 = vld [vmem:[%s26042_s12 + $0x38] sm:$0xff]  ;;  %v21483_v35 = vpop.permute.xlu0 %21482 }
 0x81a   : > { %20209 = vmatprep.subr.msk.bf16.mxu0 %vm24417_vm14, %v20207_v53  ;;  %v21450_v37 = vunpack.i.h.bf16 %v21448_v49  ;;  %v21449_v57 = vunpack.i.l.bf16 %v21448_v49  ;;  %v9760_v53 = vsel %vm1063_vm6, %v21435_v16, %v21444_v43  ;;  %v21485_v49 = vunpack.i.h.bf16 %v21483_v35  ;;  %v19237_v43 = vld [vmem:[%s26042_s12 + $0x48] sm:$0xff] }
 0x81b   : > { %v21484_v16 = vunpack.i.l.bf16 %v21483_v35 }
 0x81c   : > { %19206 = vmatmul.mubr.msk.f32.vlgmr.msra.gmra.mrb[24].mxu0 %vm7763_vm7, %v19202_v60  ;;  %v9767_v34 = vsel %vm1063_vm6, %v21449_v57, %v21450_v37  ;;  %v9766_v20 = vsel %vm1063_vm6, %v21440_v54, %v21449_v57  ;;  %v19236_v57 = vld [vmem:[%s26042_s12 + $0x40] sm:$0xff] }
 0x81d   : > { %20212 = vmatpush1.bf16.msk.msra.mxu0 %vm24417_vm14, %v20210_v36  ;;  %9475 = vmatprep.mubr.f32.mxu0 %v24439_v1  ;;  %v20237_v48 = vpack.c.bf16 %v9767_v34, %v9761_v42  ;;  %v21458_v55 = vpop.permute.xlu1 %21457  ;;  %v20240_v8 = vpack.c.bf16 %v9766_v20, %v9760_v53  ;;  %v21493_v34 = vpop.permute.xlu0 %21492 }
 0x81e   : > { %20215 = vmatprep.subr.msk.bf16.mxu0 %vm24417_vm14, %v20213_v4  ;;  %v21460_v36 = vunpack.i.h.bf16 %v21458_v55  ;;  %v21459_v11 = vunpack.i.l.bf16 %v21458_v55  ;;  %v21455_v4 = vunpack.i.h.bf16 %v21453_v10 }
 0x820   : > { %19207 = vmatmul.mubr.msk.f32.gmra.mrb[26].mxu0 %vm7763_vm7, %v19203_v28  ;;  %v10153_v0 = vsel %vm1175_vm8, %v21459_v11, %v21460_v36  ;;  %v10154_v61 = vsel %vm1175_vm8, %v21460_v36, %v21474_v17 }
 0x821   : > { %9546 = vmatprep.mubr.f32.mxu0 %v24439_v1  ;;  %v21468_v7 = vpop.permute.xlu1 %21467 }
 0x822   : > { %v21470_v30 = vunpack.i.h.bf16 %v21468_v7  ;;  %v21469_v62 = vunpack.i.l.bf16 %v21468_v7 }
 0x824   : > { %19210 = vmatmul.mubr.msk.f32.vlgmr.msra.gmra.mrb[28].mxu0 %vm7763_vm7, %v19202_v60  ;;  %v10149_v26 = vsel %vm1175_vm8, %v21469_v62, %v21470_v30  ;;  %v10148_v41 = vsel %vm1175_vm8, %v21455_v4, %v21469_v62 }
 0x825   : > { %20218 = vmatpush1.bf16.msk.msra.mxu0 %vm24417_vm14, %v20216_v52  ;;  %9552 = vmatprep.mubr.f32.mxu0 %v24439_v1  ;;  %v21465_v52 = vunpack.i.h.bf16 %v21463_v5  ;;  %v21478_v39 = vpop.permute.xlu1 %21477 }
 0x826   : > { %20221 = vmatprep.subr.msk.bf16.mxu0 %vm24417_vm14, %v20219_v15  ;;  %v21480_v54 = vunpack.i.h.bf16 %v21478_v39  ;;  %v21479_v40 = vunpack.i.l.bf16 %v21478_v39 }
 0x827   : > { %v10152_v51 = vsel %vm1175_vm8, %v21465_v52, %v21459_v11 }
 0x828   : > { %19211 = vmatmul.mubr.msk.f32.gmra.mrb[30].mxu0 %vm7763_vm7, %v19203_v28  ;;  %v10151_v24 = vsel %vm1175_vm8, %v21479_v40, %v21480_v54  ;;  %v10150_v31 = vsel %vm1175_vm8, %v21470_v30, %v21479_v40 }
 0x829   : > { %9623 = vmatprep.mubr.f32.mxu0 %v24439_v1  ;;  %v21488_v21 = vpop.permute.xlu1 %21487 }
 0x82a   : > { %v21490_v42 = vunpack.i.h.bf16 %v21488_v21 }
 0x82c   : > { %19214 = vmatmul.mubr.msk.f32.vlgmr.msra.gmra.mrb[32].mxu0 %vm7763_vm7, %v19202_v60 }
 0x82d   : > { %20224 = vmatpush3.bf16.msk.msra.mxu0 %vm24417_vm14, %v20219_v15  ;;  %9629 = vmatprep.mubr.f32.mxu0 %v24439_v1  ;;  %v21464_v15 = vunpack.i.l.bf16 %v21463_v5  ;;  %v21503_v5 = vpop.permute.xlu0 %21502 }
 0x82e   : > { %20227 = vmatprep.subr.msk.bf16.mxu0 %vm24417_vm14, %v20225_v3  ;;  %v10155_v3 = vsel %vm1175_vm8, %v21474_v17, %v21475_v25  ;;  %v21504_v7 = vunpack.i.l.bf16 %v21503_v5 }
 0x82f   : > { %v20255_v56 = vpack.c.bf16 %v10155_v3, %v10149_v26  ;;  %v19253_v26 = vld [vmem:[%s26042_s12 + $0x50] sm:$0xff] }
 0x830   : > { %19215 = vmatmul.mubr.msk.f32.gmra.mrb[34].mxu0 %vm7763_vm7, %v19203_v28  ;;  %v10538_v3 = vsel %vm6946_vm5, %v21490_v42, %v21504_v7 }
 0x831   : > { %19753 = vmatprep.mubr.msk.f32.mxu0 %vm7763_vm7, %v19202_v60  ;;  %v20243_v60 = vpack.c.bf16 %v21450_v37, %v21445_v46  ;;  %v10157_v37 = vsel %vm1175_vm8, %v21484_v16, %v21485_v49  ;;  %v21513_v52 = vpop.permute.xlu0 %21512 }
 0x832   : > { %v20261_v46 = vpack.c.bf16 %v10157_v37, %v10151_v24  ;;  %v21515_v17 = vunpack.i.h.bf16 %v21513_v52  ;;  %v21514_v39 = vunpack.i.l.bf16 %v21513_v52 }
 0x834   : > { %19754 = vmatmul.mubr.msk.f32.vlgmr.msra.gmra.mrb[36].mxu0 %vm7763_vm7, %v19203_v28  ;;  %v21454_v28 = vunpack.i.l.bf16 %v21453_v10  ;;  %v21489_v10 = vunpack.i.l.bf16 %v21488_v21  ;;  %v10541_v40 = vsel %vm6946_vm5, %v21514_v39, %v21515_v17 }
 0x835   : > { %20230 = vmatpush1.bf16.msk.msra.mxu0 %vm24417_vm14, %v20228_v27  ;;  %9859 = vmatprep.mubr.f32.mxu0 %v24439_v1  ;;  %v20258_v27 = vpack.c.bf16 %v10154_v61, %v10148_v41 }
 0x836   : > { %20233 = vmatprep.subr.msk.bf16.mxu0 %vm24417_vm14, %v20231_v63  ;;  %v10147_v6 = vsel %vm1175_vm8, %v21454_v28, %v21455_v4  ;;  %v10146_v12 = vsel %vm1175_vm8, %v21464_v15, %v21454_v28  ;;  %v10156_v63 = vsel %vm1175_vm8, %v21475_v25, %v21484_v16  ;;  %v10537_v55 = vsel %vm6946_vm5, %v21489_v10, %v21490_v42 }
 0x837   : > { %v20249_v33 = vpack.c.bf16 %v10153_v0, %v10147_v6  ;;  %v20252_v9 = vpack.c.bf16 %v10152_v51, %v10146_v12  ;;  %v20264_v32 = vpack.c.bf16 %v10156_v63, %v10150_v31  ;;  %v21505_v0 = vunpack.i.h.bf16 %v21503_v5 }
 0x838   : > { %19223 = vmatmul.mubr.msk.f32.vlgmr.msra.gmra.mrb[24].mxu0 %vm7763_vm7, %v19219_v50 }
 0x839   : > { %20236 = vmatpush1.bf16.msk.msra.mxu0 %vm24417_vm14, %v20234_v47  ;;  %9865 = vmatprep.mubr.f32.mxu0 %v24439_v1  ;;  %v20267_v47 = vpack.c.bf16 %v21485_v49, %v21480_v54  ;;  %v10539_v25 = vsel %vm6946_vm5, %v21504_v7, %v21505_v0  ;;  %v21523_v49 = vpop.permute.xlu0 %21522 }
 0x83a   : > { %20239 = vmatprep.subr.msk.bf16.mxu0 %vm24417_vm14, %v20237_v48  ;;  %v21495_v48 = vunpack.i.h.bf16 %v21493_v34 }
 0x83c   : > { %19224 = vmatmul.mubr.msk.f32.gmra.mrb[26].mxu0 %vm7763_vm7, %v19220_v59 }
 0x83d   : > { %9936 = vmatprep.mubr.f32.mxu0 %v24439_v1  ;;  %v21533_v24 = vpop.permute.xlu0 %21532 }
 0x840   : > { %19227 = vmatmul.mubr.msk.f32.vlgmr.msra.gmra.mrb[28].mxu0 %vm7763_vm7, %v19219_v50 }
 0x841   : > { %20242 = vmatpush1.bf16.msk.msra.mxu0 %vm24417_vm14, %v20240_v8  ;;  %9942 = vmatprep.mubr.f32.mxu0 %v24439_v1 }
 0x842   : > { %20245 = vmatprep.subr.msk.bf16.mxu0 %vm24417_vm14, %v20243_v60 }
 0x844   : > { %19228 = vmatmul.mubr.msk.f32.gmra.mrb[30].mxu0 %vm7763_vm7, %v19220_v59 }
 0x845   : > { %10013 = vmatprep.mubr.f32.mxu0 %v24439_v1 }
 0x848   : > { %19231 = vmatmul.mubr.msk.f32.vlgmr.msra.gmra.mrb[32].mxu0 %vm7763_vm7, %v19219_v50 }
 0x849   : > { %20248 = vmatpush3.bf16.msk.msra.mxu0 %vm24417_vm14, %v20243_v60  ;;  %10019 = vmatprep.mubr.f32.mxu0 %v24439_v1 }
 0x84a   : > { %20251 = vmatprep.subr.msk.bf16.mxu0 %vm24417_vm14, %v20249_v33 }
 0x84c   : > { %19232 = vmatmul.mubr.msk.f32.gmra.mrb[34].mxu0 %vm7763_vm7, %v19220_v59 }
 0x84d   : > { %19760 = vmatprep.mubr.msk.f32.mxu0 %vm7763_vm7, %v19219_v50  ;;  %v21498_v50 = vpop.permute.xlu1 %21497 }
 0x84e   : > { %v21500_v8 = vunpack.i.h.bf16 %v21498_v50  ;;  %v21499_v60 = vunpack.i.l.bf16 %v21498_v50 }
 0x850   : > { %19761 = vmatmul.mubr.msk.f32.vlgmr.msra.gmra.mrb[36].mxu0 %vm7763_vm7, %v19220_v59  ;;  %v21494_v59 = vunpack.i.l.bf16 %v21493_v34  ;;  %v10536_v6 = vsel %vm6946_vm5, %v21499_v60, %v21489_v10  ;;  %v21543_v34 = vpop.permute.xlu0 %21542 }
 0x851   : > { %20254 = vmatpush1.bf16.msk.msra.mxu0 %vm24417_vm14, %v20252_v9  ;;  %10249 = vmatprep.mubr.f32.mxu0 %v24439_v1  ;;  %v21508_v20 = vpop.permute.xlu1 %21507  ;;  %v19254_v9 = vld [vmem:[%s26042_s12 + $0x58] sm:$0xff] }
 0x852   : > { %20257 = vmatprep.subr.msk.bf16.mxu0 %vm24417_vm14, %v20255_v56  ;;  %v10543_v53 = vsel %vm6946_vm5, %v21494_v59, %v21495_v48  ;;  %v21510_v11 = vunpack.i.h.bf16 %v21508_v20  ;;  %v21509_v4 = vunpack.i.l.bf16 %v21508_v20  ;;  %v10542_v58 = vsel %vm6946_vm5, %v21500_v8, %v21494_v59 }
 0x853   : > { %v20273_v36 = vpack.c.bf16 %v10543_v53, %v10537_v55  ;;  %v20276_v62 = vpack.c.bf16 %v10542_v58, %v10536_v6  ;;  %v10540_v56 = vsel %vm6946_vm5, %v21505_v0, %v21514_v39  ;;  %v21545_v59 = vunpack.i.h.bf16 %v21543_v34  ;;  %v19271_v39 = vld [vmem:[%s26042_s12 + $0x68] sm:$0xff] }
 0x854   : > { %19240 = vmatmul.mubr.msk.f32.vlgmr.msra.gmra.mrb[24].mxu0 %vm7763_vm7, %v19236_v57  ;;  %v10545_v15 = vsel %vm6946_vm5, %v21509_v4, %v21510_v11  ;;  %v10544_v35 = vsel %vm6946_vm5, %v21495_v48, %v21509_v4  ;;  %v21544_v20 = vunpack.i.l.bf16 %v21543_v34  ;;  %v21553_v53 = vpop.permute.xlu0 %21552 }
 0x855   : > { %20260 = vmatpush1.bf16.msk.msra.mxu0 %vm24417_vm14, %v20258_v27  ;;  %10255 = vmatprep.mubr.f32.mxu0 %v24439_v1  ;;  %v21518_v28 = vpop.permute.xlu1 %21517  ;;  %v20279_v12 = vpack.c.bf16 %v10545_v15, %v10539_v25  ;;  %v20282_v54 = vpack.c.bf16 %v10544_v35, %v10538_v3  ;;  %v21554_v0 = vunpack.i.l.bf16 %v21553_v53 }
 0x856   : > { %20263 = vmatprep.subr.msk.bf16.mxu0 %vm24417_vm14, %v20261_v46  ;;  %v21520_v33 = vunpack.i.h.bf16 %v21518_v28  ;;  %v21519_v30 = vunpack.i.l.bf16 %v21518_v28  ;;  %v21525_v46 = vunpack.i.h.bf16 %v21523_v49  ;;  %v21555_v28 = vunpack.i.h.bf16 %v21553_v53 }
 0x858   : > { %19241 = vmatmul.mubr.msk.f32.gmra.mrb[26].mxu0 %vm7763_vm7, %v19237_v43  ;;  %v10547_v51 = vsel %vm6946_vm5, %v21519_v30, %v21520_v33  ;;  %v10546_v41 = vsel %vm6946_vm5, %v21510_v11, %v21519_v30  ;;  %v19270_v30 = vld [vmem:[%s26042_s12 + $0x60] sm:$0xff] }
 0x859   : > { %10326 = vmatprep.mubr.f32.mxu0 %v24439_v1  ;;  %v20285_v16 = vpack.c.bf16 %v10547_v51, %v10541_v40  ;;  %v21528_v61 = vpop.permute.xlu1 %21527  ;;  %v20288_v37 = vpack.c.bf16 %v10546_v41, %v10540_v56  ;;  %v21563_v51 = vpop.permute.xlu0 %21562 }
 0x85a   : > { %v21530_v27 = vunpack.i.h.bf16 %v21528_v61  ;;  %v21529_v21 = vunpack.i.l.bf16 %v21528_v61 }
 0x85c   : > { %19244 = vmatmul.mubr.msk.f32.vlgmr.msra.gmra.mrb[28].mxu0 %vm7763_vm7, %v19236_v57  ;;  %v10933_v31 = vsel %vm26074_vm9, %v21529_v21, %v21530_v27  ;;  %v10934_v6 = vsel %vm26074_vm9, %v21530_v27, %v21544_v20 }
 0x85d   : > { %20266 = vmatpush1.bf16.msk.msra.mxu0 %vm24417_vm14, %v20264_v32  ;;  %10332 = vmatprep.mubr.f32.mxu0 %v24439_v1  ;;  %v21538_v63 = vpop.permute.xlu1 %21537  ;;  %v21535_v32 = vunpack.i.h.bf16 %v21533_v24 }
 0x85e   : > { %20269 = vmatprep.subr.msk.bf16.mxu0 %vm24417_vm14, %v20267_v47  ;;  %v21540_v10 = vunpack.i.h.bf16 %v21538_v63  ;;  %v21539_v48 = vunpack.i.l.bf16 %v21538_v63 }
 0x85f   : > { %v10932_v8 = vsel %vm26074_vm9, %v21535_v32, %v21529_v21 }
 0x860   : > { %19245 = vmatmul.mubr.msk.f32.gmra.mrb[30].mxu0 %vm7763_vm7, %v19237_v43  ;;  %v10929_v60 = vsel %vm26074_vm9, %v21539_v48, %v21540_v10  ;;  %v10928_v58 = vsel %vm26074_vm9, %v21525_v46, %v21539_v48 }
 0x861   : > { %10403 = vmatprep.mubr.f32.mxu0 %v24439_v1  ;;  %v21548_v55 = vpop.permute.xlu1 %21547 }
 0x862   : > { %v21550_v11 = vunpack.i.h.bf16 %v21548_v55  ;;  %v21549_v4 = vunpack.i.l.bf16 %v21548_v55 }
 0x864   : > { %19248 = vmatmul.mubr.msk.f32.vlgmr.msra.gmra.mrb[32].mxu0 %vm7763_vm7, %v19236_v57  ;;  %v10931_v15 = vsel %vm26074_vm9, %v21549_v4, %v21550_v11  ;;  %v10930_v35 = vsel %vm26074_vm9, %v21540_v10, %v21549_v4 }
 0x865   : > { %20272 = vmatpush3.bf16.msk.msra.mxu0 %vm24417_vm14, %v20267_v47  ;;  %10409 = vmatprep.mubr.f32.mxu0 %v24439_v1  ;;  %v21534_v47 = vunpack.i.l.bf16 %v21533_v24  ;;  %v21558_v25 = vpop.permute.xlu1 %21557  ;;  %v21573_v24 = vpop.permute.xlu0 %21572 }
 0x866   : > { %20275 = vmatprep.subr.msk.bf16.mxu0 %vm24417_vm14, %v20273_v36  ;;  %v10935_v36 = vsel %vm26074_vm9, %v21544_v20, %v21545_v59  ;;  %v21560_v40 = vunpack.i.h.bf16 %v21558_v25  ;;  %v21574_v63 = vunpack.i.l.bf16 %v21573_v24 }
 0x867   : > { %v20303_v52 = vpack.c.bf16 %v10935_v36, %v10929_v60  ;;  %v19287_v60 = vld [vmem:[%s26042_s12 + $0x70] sm:$0xff] }
 0x868   : > { %19249 = vmatmul.mubr.msk.f32.gmra.mrb[34].mxu0 %vm7763_vm7, %v19237_v43  ;;  %v11354_v36 = vsel %vm7763_vm7, %v21560_v40, %v21574_v63 }
 0x869   : > { %19767 = vmatprep.mubr.msk.f32.mxu0 %vm7763_vm7, %v19236_v57  ;;  %v20291_v57 = vpack.c.bf16 %v21520_v33, %v21515_v17  ;;  %v10937_v33 = vsel %vm26074_vm9, %v21554_v0, %v21555_v28  ;;  %v21583_v32 = vpop.permute.xlu0 %21582 }
 0x86a   : > { %v20309_v17 = vpack.c.bf16 %v10937_v33, %v10931_v15  ;;  %v21585_v20 = vunpack.i.h.bf16 %v21583_v32  ;;  %v21584_v55 = vunpack.i.l.bf16 %v21583_v32 }
 0x86c   : > { %19768 = vmatmul.mubr.msk.f32.vlgmr.msra.gmra.mrb[36].mxu0 %vm7763_vm7, %v19237_v43  ;;  %v21524_v43 = vunpack.i.l.bf16 %v21523_v49  ;;  %v21559_v49 = vunpack.i.l.bf16 %v21558_v25 }
 0x86d   : > { %20278 = vmatpush1.bf16.msk.msra.mxu0 %vm24417_vm14, %v20276_v62  ;;  %10639 = vmatprep.mubr.f32.mxu0 %v24439_v1  ;;  %v20306_v62 = vpack.c.bf16 %v10934_v6, %v10928_v58 }
 0x86e   : > { %20281 = vmatprep.subr.msk.bf16.mxu0 %vm24417_vm14, %v20279_v12  ;;  %v10927_v50 = vsel %vm26074_vm9, %v21524_v43, %v21525_v46  ;;  %v10926_v5 = vsel %vm26074_vm9, %v21534_v47, %v21524_v43  ;;  %v10936_v12 = vsel %vm26074_vm9, %v21545_v59, %v21554_v0  ;;  %v11353_v61 = vsel %vm7763_vm7, %v21559_v49, %v21560_v40 }
 0x86f   : > { %v20297_v42 = vpack.c.bf16 %v10933_v31, %v10927_v50  ;;  %v20300_v7 = vpack.c.bf16 %v10932_v8, %v10926_v5  ;;  %v20312_v3 = vpack.c.bf16 %v10936_v12, %v10930_v35  ;;  %v21575_v31 = vunpack.i.h.bf16 %v21573_v24 }
 0x870   : > { %19257 = vmatmul.mubr.msk.f32.vlgmr.msra.gmra.mrb[24].mxu0 %vm7763_vm7, %v19253_v26 }
 0x871   : > { %20284 = vmatpush1.bf16.msk.msra.mxu0 %vm24417_vm14, %v20282_v54  ;;  %10645 = vmatprep.mubr.f32.mxu0 %v24439_v1  ;;  %v20315_v54 = vpack.c.bf16 %v21555_v28, %v21550_v11  ;;  %v11355_v59 = vsel %vm7763_vm7, %v21574_v63, %v21575_v31  ;;  %v21593_v11 = vpop.permute.xlu0 %21592  ;;  %v11357_v28 = vsel %vm7763_vm7, %v21584_v55, %v21585_v20 }
 0x872   : > { %20287 = vmatprep.subr.msk.bf16.mxu0 %vm24417_vm14, %v20285_v16  ;;  %v21565_v16 = vunpack.i.h.bf16 %v21563_v51  ;;  %v21595_v58 = vunpack.i.h.bf16 %v21593_v11  ;;  %v21594_v6 = vunpack.i.l.bf16 %v21593_v11 }
 0x874   : > { %19258 = vmatmul.mubr.msk.f32.gmra.mrb[26].mxu0 %vm7763_vm7, %v19254_v9  ;;  %v11358_v33 = vsel %vm7763_vm7, %v21585_v20, %v21594_v6  ;;  %v19304_v20 = vld [vmem:[%s26042_s12 + $0x80] sm:$0xff] }
 0x875   : > { %10716 = vmatprep.mubr.f32.mxu0 %v24439_v1  ;;  %v21603_v25 = vpop.permute.xlu0 %21602 }
 0x878   : > { %19261 = vmatmul.mubr.msk.f32.vlgmr.msra.gmra.mrb[28].mxu0 %vm7763_vm7, %v19253_v26 }
 0x879   : > { %20290 = vmatpush1.bf16.msk.msra.mxu0 %vm24417_vm14, %v20288_v37  ;;  %10722 = vmatprep.mubr.f32.mxu0 %v24439_v1 }
 0x87a   : > { %20293 = vmatprep.subr.msk.bf16.mxu0 %vm24417_vm14, %v20291_v57 }
 0x87c   : > { %19262 = vmatmul.mubr.msk.f32.gmra.mrb[30].mxu0 %vm7763_vm7, %v19254_v9 }
 0x87d   : > { %10793 = vmatprep.mubr.f32.mxu0 %v24439_v1 }
 0x880   : > { %19265 = vmatmul.mubr.msk.f32.vlgmr.msra.gmra.mrb[32].mxu0 %vm7763_vm7, %v19253_v26 }
 0x881   : > { %20296 = vmatpush3.bf16.msk.msra.mxu0 %vm24417_vm14, %v20291_v57  ;;  %10799 = vmatprep.mubr.f32.mxu0 %v24439_v1 }
 0x882   : > { %20299 = vmatprep.subr.msk.bf16.mxu0 %vm24417_vm14, %v20297_v42 }
 0x884   : > { %19266 = vmatmul.mubr.msk.f32.gmra.mrb[34].mxu0 %vm7763_vm7, %v19254_v9 }
 0x885   : > { %19774 = vmatprep.mubr.msk.f32.mxu0 %vm7763_vm7, %v19253_v26  ;;  %v21568_v26 = vpop.permute.xlu1 %21567 }
 0x886   : > { %v21570_v37 = vunpack.i.h.bf16 %v21568_v26  ;;  %v21569_v57 = vunpack.i.l.bf16 %v21568_v26  ;;  %v21605_v26 = vunpack.i.h.bf16 %v21603_v25 }
 0x888   : > { %19775 = vmatmul.mubr.msk.f32.vlgmr.msra.gmra.mrb[36].mxu0 %vm7763_vm7, %v19254_v9  ;;  %v21564_v9 = vunpack.i.l.bf16 %v21563_v51  ;;  %v11352_v50 = vsel %vm7763_vm7, %v21569_v57, %v21559_v49 }
 0x889   : > { %20302 = vmatpush1.bf16.msk.msra.mxu0 %vm24417_vm14, %v20300_v7  ;;  %11029 = vmatprep.mubr.f32.mxu0 %v24439_v1  ;;  %v21578_v41 = vpop.permute.xlu1 %21577 }
 0x88a   : > { %20305 = vmatprep.subr.msk.bf16.mxu0 %vm24417_vm14, %v20303_v52  ;;  %v11360_v56 = vsel %vm7763_vm7, %v21564_v9, %v21565_v16  ;;  %v21580_v21 = vunpack.i.h.bf16 %v21578_v41  ;;  %v21579_v46 = vunpack.i.l.bf16 %v21578_v41  ;;  %v11359_v34 = vsel %vm7763_vm7, %v21570_v37, %v21564_v9  ;;  %v19288_v52 = vld [vmem:[%s26042_s12 + $0x78] sm:$0xff] }
 0x88b   : > { %v20321_v27 = vpack.c.bf16 %v11360_v56, %v11353_v61  ;;  %v20324_v48 = vpack.c.bf16 %v11359_v34, %v11352_v50 }
 0x88c   : > { %19274 = vmatmul.mubr.msk.f32.vlgmr.msra.gmra.mrb[24].mxu0 %vm7763_vm7, %v19270_v30  ;;  %v11362_v47 = vsel %vm7763_vm7, %v21579_v46, %v21580_v21  ;;  %v11361_v53 = vsel %vm7763_vm7, %v21565_v16, %v21579_v46  ;;  %v21613_v16 = vpop.permute.xlu0 %21612 }
 0x88d   : > { %20308 = vmatpush1.bf16.msk.msra.mxu0 %vm24417_vm14, %v20306_v62  ;;  %11035 = vmatprep.mubr.f32.mxu0 %v24439_v1  ;;  %v21588_v43 = vpop.permute.xlu1 %21587  ;;  %v20327_v5 = vpack.c.bf16 %v11362_v47, %v11355_v59  ;;  %v20330_v4 = vpack.c.bf16 %v11361_v53, %v11354_v36  ;;  %v11356_v62 = vsel %vm7763_vm7, %v21575_v31, %v21584_v55  ;;  %v21615_v57 = vunpack.i.h.bf16 %v21613_v16 }
 0x88e   : > { %20311 = vmatprep.subr.msk.bf16.mxu0 %vm24417_vm14, %v20309_v17  ;;  %v21590_v42 = vunpack.i.h.bf16 %v21588_v43  ;;  %v21589_v10 = vunpack.i.l.bf16 %v21588_v43 }
 0x890   : > { %19275 = vmatmul.mubr.msk.f32.gmra.mrb[26].mxu0 %vm7763_vm7, %v19271_v39  ;;  %v11364_v8 = vsel %vm7763_vm7, %v21589_v10, %v21590_v42  ;;  %v11363_v15 = vsel %vm7763_vm7, %v21580_v21, %v21589_v10  ;;  %v21623_v43 = vpop.permute.xlu0 %21622 }
 0x891   : > { %11106 = vmatprep.mubr.f32.mxu0 %v24439_v1  ;;  %v24788_v0 = vpop.permute.xlu1 %21597  ;;  %v20333_v7 = vpack.c.bf16 %v11364_v8, %v11357_v28  ;;  %v21625_v47 = vunpack.i.h.bf16 %v21623_v43 }
 0x892   : > { %v21600_v12 = vunpack.i.h.bf16 %v24788_v0  ;;  %v21599_v51 = vunpack.i.l.bf16 %v24788_v0 }
 0x894   : > { %19278 = vmatmul.mubr.msk.f32.vlgmr.msra.gmra.mrb[28].mxu0 %vm7763_vm7, %v19270_v30  ;;  %v11749_v40 = vsel %vm26073_vm3, %v21599_v51, %v21600_v12  ;;  %v21633_v53 = vpop.permute.xlu0 %21632 }
 0x895   : > { %20314 = vmatpush1.bf16.msk.msra.mxu0 %vm24417_vm14, %v20312_v3  ;;  %11112 = vmatprep.mubr.f32.mxu0 %v24439_v1  ;;  %v21608_v17 = vpop.permute.xlu1 %21607  ;;  %v21604_v3 = vunpack.i.l.bf16 %v21603_v25  ;;  %v21635_v36 = vunpack.i.h.bf16 %v21633_v53  ;;  %v21634_v11 = vunpack.i.l.bf16 %v21633_v53  ;;  %v14598_v25 = vld [vmem:[#allocation2 + $0x40] sm:$0xff] }
 0x896   : > { %20317 = vmatprep.subr.msk.bf16.mxu0 %vm24417_vm14, %v20315_v54  ;;  %v21610_v9 = vunpack.i.h.bf16 %v21608_v17  ;;  %v21609_v41 = vunpack.i.l.bf16 %v21608_v17  ;;  %v14606_v17 = vld [vmem:[#allocation2 + $0x88] sm:$0xff] }
 0x897   : > { %v11756_v49 = vsel %vm26073_vm3, %v21604_v3, %v21605_v26  ;;  %v11754_v0 = vsel %vm26073_vm3, %v21625_v47, %v21634_v11  ;;  %v24876_v29 = vpack.i.bf16 %v14606_v17, %v14598_v25 }
 0x898   : > { %19279 = vmatmul.mubr.msk.f32.gmra.mrb[30].mxu0 %vm7763_vm7, %v19271_v39  ;;  %v20345_v61 = vpack.c.bf16 %v11756_v49, %v11749_v40  ;;  %v11755_v21 = vsel %vm26073_vm3, %v21610_v9, %v21604_v3  ;;  %v11748_v46 = vsel %vm26073_vm3, %v21609_v41, %v21599_v51 }
 0x899   : > { %11183 = vmatprep.mubr.f32.mxu0 %v24439_v1  ;;  %v20348_v50 = vpack.c.bf16 %v11755_v21, %v11748_v46 }
 0x89c   : > { %19282 = vmatmul.mubr.msk.f32.vlgmr.msra.gmra.mrb[32].mxu0 %vm7763_vm7, %v19270_v30 }
 0x89d   : > { %20320 = vmatpush3.bf16.msk.msra.mxu0 %vm24417_vm14, %v20315_v54  ;;  %11189 = vmatprep.mubr.f32.mxu0 %v24439_v1  ;;  %v21618_v54 = vpop.permute.xlu1 %21617 }
 0x89e   : > { %20323 = vmatprep.subr.msk.bf16.mxu0 %vm24417_vm14, %v20321_v27  ;;  %v21620_v56 = vunpack.i.h.bf16 %v21618_v54  ;;  %v21619_v24 = vunpack.i.l.bf16 %v21618_v54  ;;  %v21614_v27 = vunpack.i.l.bf16 %v21613_v16 }
 0x8a0   : > { %19283 = vmatmul.mubr.msk.f32.gmra.mrb[34].mxu0 %vm7763_vm7, %v19271_v39  ;;  %v11758_v31 = vsel %vm26073_vm3, %v21619_v24, %v21620_v56  ;;  %v11751_v32 = vsel %vm26073_vm3, %v21614_v27, %v21615_v57  ;;  %v11757_v10 = vsel %vm26073_vm3, %v21605_v26, %v21619_v24  ;;  %v11750_v55 = vsel %vm26073_vm3, %v21600_v12, %v21614_v27  ;;  %v24878_v12 = vld [vmem:[#allocation2] sm:$0xff] }
 0x8a1   : > { %19781 = vmatprep.mubr.msk.f32.mxu0 %vm7763_vm7, %v19270_v30  ;;  %v11365_v30 = vsel %vm7763_vm7, %v21590_v42, %v21595_v58  ;;  %v21628_v37 = vpop.permute.xlu1 %21627  ;;  %v21624_v42 = vunpack.i.l.bf16 %v21623_v43  ;;  %15376 = vst.msk [vmem:[#allocation2 + $0x40] sm:$0xff] %vm26074_vm9, %v24878_v12  ;;  %15385 = vst.msk [vmem:[#allocation2 + $0x88] sm:$0xff] %vm26074_vm9, %v24878_v12 }
 0x8a2   : > { %v20339_v35 = vpack.c.bf16 %v11365_v30, %v11358_v33  ;;  %v21630_v63 = vunpack.i.h.bf16 %v21628_v37  ;;  %v21629_v34 = vunpack.i.l.bf16 %v21628_v37 }
 0x8a3   : > { %v11753_v8 = vsel %vm26073_vm3, %v21624_v42, %v21625_v47  ;;  %v11752_v58 = vsel %vm26073_vm3, %v21615_v57, %v21624_v42 }
 0x8a4   : > { %19782 = vmatmul.mubr.msk.f32.vlgmr.msra.gmra.mrb[36].mxu0 %vm7763_vm7, %v19271_v39  ;;  %v20336_v39 = vpack.c.bf16 %v11363_v15, %v11356_v62  ;;  %v11760_v59 = vsel %vm26073_vm3, %v21629_v34, %v21630_v63  ;;  %v11759_v28 = vsel %vm26073_vm3, %v21620_v56, %v21629_v34 }
 0x8a5   : > { %20326 = vmatpush1.bf16.msk.msra.mxu0 %vm24417_vm14, %v20324_v48  ;;  %11457 = vmatprep.mubr.f32.mxu0 %v24439_v1  ;;  %v20351_v48 = vpack.c.bf16 %v11758_v31, %v11751_v32  ;;  %v20360_v6 = vpack.c.bf16 %v11759_v28, %v11752_v58  ;;  %v24872_v33 = vpop.permute.xlu1 %12127 }
 0x8a6   : > { %20329 = vmatprep.subr.msk.bf16.mxu0 %vm24417_vm14, %v20327_v5  ;;  %v20354_v5 = vpack.c.bf16 %v11757_v10, %v11750_v55 }
 0x8a8   : > { %19291 = vmatmul.mubr.msk.f32.vlgmr.msra.gmra.mrb[24].mxu0 %vm7763_vm7, %v19287_v60 }
 0x8a9   : > { %20332 = vmatpush1.bf16.msk.msra.mxu0 %vm24417_vm14, %v20330_v4  ;;  %11463 = vmatprep.mubr.f32.mxu0 %v24439_v1  ;;  %v19305_v4 = vld [vmem:[%s26042_s12 + $0x88] sm:$0xff]  ;;  %v24886_v49 = vpop.permute.xlu1 %12153 }
 0x8aa   : > { %20335 = vmatprep.subr.msk.bf16.mxu0 %vm24417_vm14, %v20333_v7  ;;  %v11761_v7 = vsel %vm26073_vm3, %v21630_v63, %v21635_v36 }
 0x8ac   : > { %19292 = vmatmul.mubr.msk.f32.gmra.mrb[26].mxu0 %vm7763_vm7, %v19288_v52 }
 0x8ad   : > { %11534 = vmatprep.mubr.f32.mxu0 %v24439_v1 }
 0x8b0   : > { %19295 = vmatmul.mubr.msk.f32.vlgmr.msra.gmra.mrb[28].mxu0 %vm7763_vm7, %v19287_v60 }
 0x8b1   : > { %20338 = vmatpush1.bf16.msk.msra.mxu0 %vm24417_vm14, %v20336_v39  ;;  %11540 = vmatprep.mubr.f32.mxu0 %v24439_v1  ;;  %v24874_v39 = vpop.permute.xlu0 %12132 }
 0x8b2   : > { %20341 = vmatprep.subr.msk.bf16.mxu0 %vm24417_vm14, %v20339_v35 }
 0x8b4   : > { %19296 = vmatmul.mubr.msk.f32.gmra.mrb[30].mxu0 %vm7763_vm7, %v19288_v52 }
 0x8b5   : > { %11611 = vmatprep.mubr.f32.mxu0 %v24439_v1  ;;  %v12159_v9 = vpop.permute.xlu0 %12158 }
 0x8b8   : > { %19299 = vmatmul.mubr.msk.f32.vlgmr.msra.gmra.mrb[32].mxu0 %vm7763_vm7, %v19287_v60 }
 0x8b9   : > { %20344 = vmatpush3.bf16.msk.msra.mxu0 %vm24417_vm14, %v20339_v35  ;;  %11617 = vmatprep.mubr.f32.mxu0 %v24439_v1 }
 0x8ba   : > { %20347 = vmatprep.subr.msk.bf16.mxu0 %vm24417_vm14, %v20345_v61 }
 0x8bc   : > { %19300 = vmatmul.mubr.msk.f32.gmra.mrb[34].mxu0 %vm7763_vm7, %v19288_v52 }
 0x8bd   : > { %19788 = vmatprep.mubr.msk.f32.mxu0 %vm7763_vm7, %v19287_v60  ;;  %v20357_v60 = vpack.c.bf16 %v11760_v59, %v11753_v8 }
 0x8c0   : > { %19789 = vmatmul.mubr.msk.f32.vlgmr.msra.gmra.mrb[36].mxu0 %vm7763_vm7, %v19288_v52  ;;  %v20363_v52 = vpack.c.bf16 %v11761_v7, %v11754_v0 }
 0x8c1   : > { %20350 = vmatpush1.bf16.msk.msra.mxu0 %vm24417_vm14, %v20348_v50  ;;  %11853 = vmatprep.mubr.f32.mxu0 %v24439_v1 }
 0x8c2   : > { %20353 = vmatprep.subr.msk.bf16.mxu0 %vm24417_vm14, %v20351_v48 }
 0x8c4   : > { %19308 = vmatmul.mubr.msk.f32.vlgmr.msra.gmra.mrb[24].mxu0 %vm7763_vm7, %v19304_v20 }
 0x8c5   : > { %20356 = vmatpush1.bf16.msk.msra.mxu0 %vm24417_vm14, %v20354_v5  ;;  %11859 = vmatprep.mubr.f32.mxu0 %v24439_v1 }
 0x8c6   : > { %20359 = vmatprep.subr.msk.bf16.mxu0 %vm24417_vm14, %v20357_v60 }
 0x8c8   : > { %19309 = vmatmul.mubr.msk.f32.gmra.mrb[26].mxu0 %vm7763_vm7, %v19305_v4 }
 0x8c9   : > { %11930 = vmatprep.mubr.f32.mxu0 %v24439_v1 }
 0x8cc   : > { %19312 = vmatmul.mubr.msk.f32.vlgmr.msra.gmra.mrb[28].mxu0 %vm7763_vm7, %v19304_v20 }
 0x8cd   : > { %20362 = vmatpush1.bf16.msk.msra.mxu0 %vm24417_vm14, %v20360_v6  ;;  %11936 = vmatprep.mubr.f32.mxu0 %v24439_v1 }
 0x8ce   : > { %20365 = vmatprep.subr.msk.bf16.mxu0 %vm24417_vm14, %v20363_v52 }
 0x8d0   : > { %19313 = vmatmul.mubr.msk.f32.gmra.mrb[30].mxu0 %vm7763_vm7, %v19305_v4 }
 0x8d1   : > { %12007 = vmatprep.mubr.f32.mxu0 %v24439_v1 }
 0x8d4   : > { %19316 = vmatmul.mubr.msk.f32.vlgmr.msra.gmra.mrb[32].mxu0 %vm7763_vm7, %v19304_v20 }
 0x8d5   : > { %20368 = vmatpush3.bf16.msk.msra.mxu0 %vm24417_vm14, %v20363_v52  ;;  %12013 = vmatprep.mubr.f32.mxu0 %v24439_v1 }
 0x8d8   : > { %19317 = vmatmul.mubr.msk.f32.gmra.mrb[34].mxu0 %vm7763_vm7, %v19305_v4 }
 0x8d9   : > { %19795 = vmatprep.mubr.msk.f32.mxu0 %vm7763_vm7, %v19304_v20 }
 0x8dc   : > { %19796 = vmatmul.mubr.msk.f32.vlgmr.msra.gmra.mrb[36].mxu0 %vm7763_vm7, %v19305_v4 }
 0x997   : > { %v11855_v15 = vpop.f32.mrb[24].mxu0 }
 0x998   : > { %v12109_v30 = vmax.f32 %v11855_v15, 0.0  ;;  %v11857_v62 = vpop.f32.mrb[25].mxu0 }
 0x999   : > { %v12110_v35 = vmax.f32 %v11857_v62, 0.0 }
 0x99a   : > { %v12135_v51 = vmul.f32 %v24872_v33, %v12109_v30 }
 0x99b   : > { %v11861_v1 = vpop.f32.mrb[26].mxu0  ;;  %v12136_v54 = vmul.f32 %v24872_v33, %v12110_v35 }
 0x99c   : > { %v12116_v26 = vmax.f32 %v11861_v1, 0.0  ;;  %v11863_v3 = vpop.f32.mrb[27].mxu0  ;;  %v24891_v56 = vadd.f32 %v24886_v49, %v12135_v51 }
 0x99d   : > { %v12117_v40 = vmax.f32 %v11863_v3, 0.0  ;;  %v24896_v27 = vadd.f32 %v24886_v49, %v12136_v54 }
 0x99e   : > { %v12142_v16 = vmul.f32 %v24874_v39, %v12116_v26 }
 0x99f   : > { %v12143_v41 = vmul.f32 %v24874_v39, %v12117_v40  ;;  %v11932_v61 = vpop.f32.mrb[28].mxu0 }
 0x9a0   : > { %v24893_v24 = vadd.f32 %v12159_v9, %v12142_v16  ;;  %v12111_v37 = vmax.f32 %v11932_v61, 0.0  ;;  %v11934_v57 = vpop.f32.mrb[29].mxu0 }
 0x9a1   : > { %v24898_v21 = vadd.f32 %v12159_v9, %v12143_v41  ;;  %v12112_v46 = vmax.f32 %v11934_v57, 0.0 }
 0x9a2   : > { %v12137_v43 = vmul.f32 %v24872_v33, %v12111_v37  ;;  %v24903_v31 = vpack.i.bf16 %v24893_v24, %v24891_v56  ;;  %v20386_v63 = vpack.c.bf16 %v24893_v24, %v24891_v56 }
 0x9a3   : > { %v11938_v34 = vpop.f32.mrb[30].mxu0  ;;  %v20384_v50 = vpack.c.bf16 %v24898_v21, %v24896_v27  ;;  %v12138_v10 = vmul.f32 %v24872_v33, %v12112_v46 }
 0x9a4   : > { %v24910_v32 = vadd.f32 %v24886_v49, %v12137_v43  ;;  %v12118_v47 = vmax.f32 %v11938_v34, 0.0  ;;  %v11940_v42 = vpop.f32.mrb[31].mxu0  ;;  %21637 = vrot.lane.b32.xlu1 %v24903_v31, %s26100_s2 }
 0x9a5   : > { %v12119_v48 = vmax.f32 %v11940_v42, 0.0  ;;  %v24926_v36 = vadd.f32 %v24886_v49, %v12138_v10 }
 0x9a6   : > { %v12144_v59 = vmul.f32 %v24874_v39, %v12118_v47  ;;  %v24918_v20 = vpack.i.bf16 %v24910_v32, %v24896_v27 }
 0x9a7   : > { %v12145_v55 = vmul.f32 %v24874_v39, %v12119_v48  ;;  %v12009_v53 = vpop.f32.mrb[32].mxu0 }
 0x9a8   : > { %v24921_v5 = vadd.f32 %v12159_v9, %v12144_v59  ;;  %v12113_v8 = vmax.f32 %v12009_v53, 0.0  ;;  %v12011_v60 = vpop.f32.mrb[33].mxu0  ;;  %21642 = vrot.lane.b32.xlu1 %v24918_v20, %s26100_s2 }
 0x9a9   : > { %v24928_v11 = vadd.f32 %v12159_v9, %v12145_v55  ;;  %v12114_v4 = vmax.f32 %v12011_v60, 0.0 }
 0x9aa   : > { %v12139_v28 = vmul.f32 %v24872_v33, %v12113_v8  ;;  %v24933_v0 = vpack.i.bf16 %v24921_v5, %v24898_v21  ;;  %v20390_v7 = vpack.c.bf16 %v24921_v5, %v24910_v32 }
 0x9ab   : > { %v12015_v58 = vpop.f32.mrb[34].mxu0  ;;  %v20388_v6 = vpack.c.bf16 %v24928_v11, %v24926_v36  ;;  %v12140_v62 = vmul.f32 %v24872_v33, %v12114_v4 }
 0x9ac   : > { %v24940_v52 = vadd.f32 %v24886_v49, %v12139_v28  ;;  %v12120_v15 = vmax.f32 %v12015_v58, 0.0  ;;  %v12017_v30 = vpop.f32.mrb[35].mxu0  ;;  %21647 = vrot.lane.b32.xlu0 %v24933_v0, %s26100_s2 }
 0x9ad   : > { %v12121_v25 = vmax.f32 %v12017_v30, 0.0  ;;  %v24956_v40 = vadd.f32 %v24886_v49, %v12140_v62 }
 0x9ae   : > { %v12146_v17 = vmul.f32 %v24874_v39, %v12120_v15  ;;  %v24948_v35 = vpack.i.bf16 %v24940_v52, %v24926_v36 }
 0x9af   : > { %v12147_v1 = vmul.f32 %v24874_v39, %v12121_v25  ;;  %v19797_v51 = vpop.f32.mrb[36].mxu0 }
 0x9b0   : > { %v24951_v26 = vadd.f32 %v12159_v9, %v12146_v17  ;;  %v12122_v3 = vmax.f32 %v19797_v51, 0.0  ;;  %v12086_v54 = vpop.f32.mrb[37].mxu0  ;;  %21652 = vrot.lane.b32.xlu0 %v24948_v35, %s26100_s2  ;;  %v15340_v17 = vld [vmem:[%s26046_s16] sm:$0xff] }
 0x9b1   : > { %v24958_v16 = vadd.f32 %v12159_v9, %v12147_v1  ;;  %v12115_v41 = vmax.f32 %v12086_v54, 0.0  ;;  %v19321_v1 = vld [vmem:[%s26045_s15 + $0x8] sm:$0xff] }
 0x9b2   : > { %v12148_v61 = vmul.f32 %v24874_v39, %v12122_v3  ;;  %v24963_v37 = vpack.i.bf16 %v24951_v26, %v24928_v11  ;;  %v20394_v57 = vpack.c.bf16 %v24951_v26, %v24940_v52 }
 0x9b3   : > { %v12141_v46 = vmul.f32 %v24872_v33, %v12115_v41  ;;  %v20392_v43 = vpack.c.bf16 %v24958_v16, %v24956_v40 }
 0x9b4   : > { %v12174_v34 = vadd.f32 %v12159_v9, %v12148_v61  ;;  %21657 = vrot.lane.b32.xlu1 %v24963_v37, %s26100_s2 }
 0x9b5   : > { %v12167_v47 = vadd.f32 %v24886_v49, %v12141_v46 }
 0x9b6   : > { %12188 = vst.msk [vmem:[#allocation2 + $0x80] sm:$0xff] %vm26074_vm9, %v12174_v34  ;;  %v15353_v34 = vld [vmem:[%s26047_s17] sm:$0xff] }
 0x9b7   : > { %12181 = vst.msk [vmem:[#allocation2 + $0x38] sm:$0xff] %vm26074_vm9, %v12167_v47 }
 0x9bd   : > { %v24975_v39 = vld [vmem:[#allocation2 + $0x80] sm:$0xff] }
 0x9be   : > { %v24979_v42 = vpack.i.bf16 %v24975_v39, %v24958_v16  ;;  %v24981_v33 = vld [vmem:[#allocation2 + $0x38] sm:$0xff]  ;;  %15384 = vst [vmem:[#allocation2 + $0x80] sm:$0xff] %v24878_v12 }
 0x9bf   : > { %v24986_v9 = vpack.i.bf16 %v24981_v33, %v24956_v40  ;;  %15375 = vst [vmem:[#allocation2 + $0x38] sm:$0xff] %v24878_v12  ;;  %v20397_v49 = vpack.c.bf16 %v24975_v39, %v24981_v33 }
 0x9c0   : > { %21667 = vrot.lane.b32.xlu1 %v24979_v42, %s26100_s2 }
 0x9c1   : > { %21662 = vrot.lane.b32.xlu0 %v24986_v9, %s26100_s2 }
 0x9c4   : > { %21677 = vrot.lane.b32.xlu1 %v24933_v0, %s26094_s27 }
 0x9c5   : > { %21672 = vrot.lane.b32.xlu0 %v24918_v20, %s26094_s27 }
 0x9c8   : > { %21687 = vrot.lane.b32.xlu1 %v24948_v35, %s26094_s27 }
 0x9c9   : > { %21682 = vrot.lane.b32.xlu0 %v24903_v31, %s26094_s27 }
 0x9cc   : > { %21702 = vrot.lane.b32.xlu1 %v24986_v9, %s26094_s27 }
 0x9cd   : > { %21692 = vrot.lane.b32.xlu0 %v24963_v37, %s26094_s27 }
 0x9d0   : > { %21707 = vrot.lane.b32.xlu1 %v24918_v20, %s26091_s6 }
 0x9d1   : > { %21697 = vrot.lane.b32.xlu0 %v24979_v42, %s26094_s27  ;;  %s26101_s27 = smov 12  }
 0x9d4   : > { %21717 = vrot.lane.b32.xlu1 %v24903_v31, %s26091_s6 }
 0x9d5   : > { %21712 = vrot.lane.b32.xlu0 %v24933_v0, %s26091_s6 }
 0x9d8   : > { %21727 = vrot.lane.b32.xlu1 %v24963_v37, %s26091_s6 }
 0x9d9   : > { %21722 = vrot.lane.b32.xlu0 %v24948_v35, %s26091_s6 }
 0x9dc   : > { %21732 = vrot.lane.b32.xlu1 %v24979_v42, %s26091_s6 }
 0x9dd   : > { %21737 = vrot.lane.b32.xlu0 %v24986_v9, %s26091_s6 }
 0x9e0   : > { %21747 = vrot.lane.b32.xlu1 %v24933_v0, %s26087_s0 }
 0x9e1   : > { %21742 = vrot.lane.b32.xlu0 %v24918_v20, %s26087_s0 }
 0x9e4   : > { %21757 = vrot.lane.b32.xlu1 %v24948_v35, %s26087_s0 }
 0x9e5   : > { %21752 = vrot.lane.b32.xlu0 %v24903_v31, %s26087_s0 }
 0x9e8   : > { %21772 = vrot.lane.b32.xlu1 %v24986_v9, %s26087_s0 }
 0x9e9   : > { %21762 = vrot.lane.b32.xlu0 %v24963_v37, %s26087_s0 }
 0x9ec   : > { %21777 = vrot.lane.b32.xlu1 %v24918_v20, %s26095_s29 }
 0x9ed   : > { %21767 = vrot.lane.b32.xlu0 %v24979_v42, %s26087_s0 }
 0x9f0   : > { %21787 = vrot.lane.b32.xlu1 %v24903_v31, %s26095_s29 }
 0x9f1   : > { %21782 = vrot.lane.b32.xlu0 %v24933_v0, %s26095_s29 }
 0x9f4   : > { %21797 = vrot.lane.b32.xlu1 %v24963_v37, %s26095_s29 }
 0x9f5   : > { %21792 = vrot.lane.b32.xlu0 %v24948_v35, %s26095_s29 }
 0x9f8   : > { %21802 = vrot.lane.b32.xlu1 %v24979_v42, %s26095_s29 }
 0x9f9   : > { %21807 = vrot.lane.b32.xlu0 %v24986_v9, %s26095_s29  ;;  %s26102_s29 = sld [smem:[#allocation4_spill]] }
 0x9fc   : > { %21817 = vrot.lane.b32.xlu1 %v24933_v0, %s26096_s25 }
 0x9fd   : > { %21812 = vrot.lane.b32.xlu0 %v24918_v20, %s26096_s25 }
 0xa00   : > { %21827 = vrot.lane.b32.xlu1 %v24948_v35, %s26096_s25 }
 0xa01   : > { %21822 = vrot.lane.b32.xlu0 %v24903_v31, %s26096_s25 }
 0xa04   : > { %21842 = vrot.lane.b32.xlu1 %v24986_v9, %s26096_s25 }
 0xa05   : > { %21832 = vrot.lane.b32.xlu0 %v24963_v37, %s26096_s25 }
 0xa08   : > { %21847 = vrot.lane.b32.xlu1 %v24918_v20, %s26097_s1 }
 0xa09   : > { %21837 = vrot.lane.b32.xlu0 %v24979_v42, %s26096_s25  ;;  %s21970_s25 = smov 56  }
 0xa0c   : > { %21857 = vrot.lane.b32.xlu1 %v24903_v31, %s26097_s1 }
 0xa0d   : > { %21852 = vrot.lane.b32.xlu0 %v24933_v0, %s26097_s1 }
 0xa10   : > { %21867 = vrot.lane.b32.xlu1 %v24963_v37, %s26097_s1 }
 0xa11   : > { %21862 = vrot.lane.b32.xlu0 %v24948_v35, %s26097_s1 }
 0xa14   : > { %21872 = vrot.lane.b32.xlu1 %v24979_v42, %s26097_s1 }
 0xa15   : > { %21877 = vrot.lane.b32.xlu0 %v24986_v9, %s26097_s1 }
 0xa16   : > { %v21638_v10 = vpop.permute.xlu1 %21637 }
 0xa17   : > { %v21640_v8 = vunpack.i.h.bf16 %v21638_v10  ;;  %v21639_v60 = vunpack.i.l.bf16 %v21638_v10 }
 0xa18   : > { %21887 = vrot.lane.b32.xlu1 %v24918_v20, %s26101_s27 }
 0xa19   : > { %21882 = vrot.lane.b32.xlu0 %v24876_v29, %s26097_s1  ;;  %s21971_s1 = smov 58  }
 0xa1a   : > { %v21643_v48 = vpop.permute.xlu1 %21642 }
 0xa1b   : > { %v21645_v59 = vunpack.i.h.bf16 %v21643_v48  ;;  %v21644_v55 = vunpack.i.l.bf16 %v21643_v48 }
 0xa1c   : > { %21897 = vrot.lane.b32.xlu1 %v24903_v31, %s26101_s27 }
 0xa1d   : > { %21892 = vrot.lane.b32.xlu0 %v24933_v0, %s26101_s27  ;;  %v12248_v20 = vsel %vm839_vm2, %v21639_v60, %v21644_v55  ;;  %v12249_v58 = vsel %vm839_vm2, %v21644_v55, %v21645_v59 }
 0xa1e   : > { %v21648_v53 = vpop.permute.xlu0 %21647 }
 0xa1f   : > { %v21650_v4 = vunpack.i.h.bf16 %v21648_v53  ;;  %v21649_v28 = vunpack.i.l.bf16 %v21648_v53 }
 0xa20   : > { %21907 = vrot.lane.b32.xlu1 %v24963_v37, %s26101_s27 }
 0xa21   : > { %21902 = vrot.lane.b32.xlu0 %v24948_v35, %s26101_s27  ;;  %v12254_v31 = vsel %vm839_vm2, %v21640_v8, %v21649_v28  ;;  %v12255_v0 = vsel %vm839_vm2, %v21649_v28, %v21650_v4 }
 0xa22   : > { %v21653_v15 = vpop.permute.xlu0 %21652  ;;  %v20369_v30 = vpack.c.bf16 %v12255_v0, %v12249_v58  ;;  %v20371_v62 = vpack.c.bf16 %v12254_v31, %v12248_v20 }
 0xa23   : > { %v21654_v25 = vunpack.i.l.bf16 %v21653_v15  ;;  %v21655_v35 = vunpack.i.h.bf16 %v21653_v15 }
 0xa24   : > { %21917 = vrot.lane.b32.xlu1 %v24979_v42, %s26101_s27  ;;  %20370 = vmatprep.subr.bf16.mxu1 %v20369_v30  ;;  %v21968_v30 = vmov 0.0|0.0  }
 0xa25   : > { %21912 = vrot.lane.b32.xlu0 %v24986_v9, %s26101_s27  ;;  %20372 = vmatpush1.bf16.msra.mxu1 %v20371_v62  ;;  %v12250_v41 = vsel %vm839_vm2, %v21645_v59, %v21654_v25  ;;  %v12251_v37 = vsel %vm839_vm2, %v21654_v25, %v21655_v35 }
 0xa26   : > { %v21658_v51 = vpop.permute.xlu1 %21657 }
 0xa27   : > { %v21660_v3 = vunpack.i.h.bf16 %v21658_v51  ;;  %v21659_v54 = vunpack.i.l.bf16 %v21658_v51  ;;  %v12203_v51 = vld [vmem:[%s26045_s15] sm:$0xff] }
 0xa28   : > { %15343 = vperm.xlu1 %21055, %v15340_v17   ;;  %19322 = vmatmul.mubr.msk.f32.vlgmr.msra.gmra.mrb[20].mxu1 %vm26074_vm9, %v19321_v1 }
 0xa29   : > { %21922 = vrot.lane.b32.xlu0 %v24876_v29, %s26101_s27  ;;  %v12256_v61 = vsel %vm839_vm2, %v21650_v4, %v21659_v54  ;;  %v12257_v46 = vsel %vm839_vm2, %v21659_v54, %v21660_v3  ;;  %12412 = vmatprep.mubr.f32.mxu1 %v24878_v12 }
 0xa2a   : > { %v20373_v47 = vpack.c.bf16 %v12257_v46, %v12251_v37  ;;  %v20375_v42 = vpack.c.bf16 %v12256_v61, %v12250_v41 }
 0xa2c   : > { %20374 = vmatprep.subr.bf16.mxu1 %v20373_v47 }
 0xa2d   : > { %15356 = vperm.xlu0 %21054, %v15353_v34   ;;  %20376 = vmatpush1.bf16.msra.mxu1 %v20375_v42 }
 0xa30   : > { %19323 = vmatmul.mubr.msk.f32.vlgmr.msra.gmra.mrb[22].mxu1 %vm26074_vm9, %v19321_v1 }
 0xa31   : > { %12483 = vmatprep.mubr.f32.mxu1 %v24878_v12 }
 0xa32   : > { %v21668_v29 = vpop.permute.xlu1 %21667 }
 0xa33   : > { %v21670_v9 = vunpack.i.h.bf16 %v21668_v29  ;;  %v21669_v10 = vunpack.i.l.bf16 %v21668_v29  ;;  %v21663_v48 = vpop.permute.xlu0 %21662 }
 0xa34   : > { %v21665_v59 = vunpack.i.h.bf16 %v21663_v48  ;;  %v21664_v55 = vunpack.i.l.bf16 %v21663_v48 }
 0xa35   : > { %v12258_v53 = vsel %vm839_vm2, %v21660_v3, %v21669_v10  ;;  %v12259_v8 = vsel %vm839_vm2, %v21669_v10, %v21670_v9 }
 0xa36   : > { %v12252_v60 = vsel %vm839_vm2, %v21655_v35, %v21664_v55  ;;  %v25121_v4 = vpop.permute.xlu1 %21677  ;;  %v12253_v28 = vsel %vm839_vm2, %v21664_v55, %v21665_v59  ;;  %v20382_v62 = vpack.c.bf16 %v21670_v9, %v21665_v59 }
 0xa37   : > { %v25124_v20 = vpop.permute.xlu0 %21672  ;;  %v20377_v31 = vpack.c.bf16 %v12259_v8, %v12253_v28  ;;  %v20379_v58 = vpack.c.bf16 %v12258_v53, %v12252_v60  ;;  %v21680_v27 = vunpack.i.h.bf16 %v25121_v4  ;;  %v21679_v21 = vunpack.i.l.bf16 %v25121_v4 }
 0xa38   : > { %v21675_v56 = vunpack.i.h.bf16 %v25124_v20  ;;  %v21674_v24 = vunpack.i.l.bf16 %v25124_v20 }
 0xa39   : > { %20378 = vmatprep.subr.bf16.mxu1 %v20377_v31  ;;  %v12883_v5 = vsel %vm5775_vm4, %v21679_v21, %v21680_v27 }
 0xa3a   : > { %v25126_v0 = vpop.permute.xlu1 %21687  ;;  %20380 = vmatpush1.bf16.msra.mxu1 %v20379_v58  ;;  %v12877_v32 = vsel %vm5775_vm4, %v21674_v24, %v21675_v56 }
 0xa3b   : > { %v21683_v15 = vpop.permute.xlu0 %21682  ;;  %20381 = vmatprep.subr.bf16.mxu1 %v21968_v30  ;;  %v21690_v40 = vunpack.i.h.bf16 %v25126_v0  ;;  %v21689_v16 = vunpack.i.l.bf16 %v25126_v0  ;;  %v20399_v52 = vpack.c.bf16 %v12883_v5, %v12877_v32 }
 0xa3c   : > { %v21685_v36 = vunpack.i.h.bf16 %v21683_v15  ;;  %v21684_v11 = vunpack.i.l.bf16 %v21683_v15 }
 0xa3d   : > { %19324 = vmatmul.mubr.msk.f32.vlgmr.msra.gmra.mrb[24].mxu1 %vm26074_vm9, %v19321_v1  ;;  %v12879_v29 = vsel %vm5775_vm4, %v21689_v16, %v21690_v40  ;;  %v12878_v48 = vsel %vm5775_vm4, %v21675_v56, %v21689_v16 }
 0xa3e   : > { %v25130_v25 = vpop.permute.xlu1 %21702  ;;  %20383 = vmatpush3.bf16.msra.mxu1 %v20382_v62  ;;  %19802 = vmatprep.mubr.msk.f32.mxu1 %vm21969_vm12, %v24878_v12  ;;  %v12876_v41 = vsel %vm5775_vm4, %v21684_v11, %v21674_v24 }
 0xa3f   : > { %v25134_v17 = vpop.permute.xlu0 %21692  ;;  %20385 = vmatprep.subr.bf16.mxu1 %v20384_v50  ;;  %v21705_v34 = vunpack.i.h.bf16 %v25130_v25  ;;  %v21704_v47 = vunpack.i.l.bf16 %v25130_v25 }
 0xa41   : > { %19803 = vmatmul.mubr.msk.f32.vlgmr.msra.gmra.mrb[26].mxu1 %vm26074_vm9, %v19321_v1  ;;  %v21694_v1 = vunpack.i.l.bf16 %v25134_v17  ;;  %v12881_v53 = vsel %vm5775_vm4, %v21704_v47, %v21705_v34  ;;  %v12880_v31 = vsel %vm5775_vm4, %v21690_v40, %v21704_v47 }
 0xa42   : > { %v25140_v35 = vpop.permute.xlu1 %21707  ;;  %20387 = vmatpush1.bf16.msra.mxu1 %v20386_v63  ;;  %12627 = vmatprep.mubr.f32.mxu1 %v24878_v12 }
 0xa43   : > { %v25149_v3 = vpop.permute.xlu0 %21697  ;;  %20389 = vmatprep.subr.bf16.mxu1 %v20388_v6  ;;  %v21695_v6 = vunpack.i.h.bf16 %v25134_v17  ;;  %v12884_v9 = vsel %vm5775_vm4, %v21680_v27, %v21694_v1  ;;  %v21710_v58 = vunpack.i.h.bf16 %v25140_v35  ;;  %v21709_v15 = vunpack.i.l.bf16 %v25140_v35 }
 0xa44   : > { %v21700_v26 = vunpack.i.h.bf16 %v25149_v3  ;;  %v20405_v55 = vpack.c.bf16 %v12884_v9, %v12878_v48 }
 0xa45   : > { %19326 = vmatmul.mubr.msk.f32.vlgmr.msra.gmra.mrb[20].mxu1 %vm26074_vm9, %v12203_v51  ;;  %v12885_v37 = vsel %vm5775_vm4, %v21694_v1, %v21695_v6 }
 0xa46   : > { %v25159_v63 = vpop.permute.xlu1 %21717  ;;  %20391 = vmatpush1.bf16.msra.mxu1 %v20390_v7  ;;  %12698 = vmatprep.mubr.f32.mxu1 %v24878_v12  ;;  %v20403_v39 = vpack.c.bf16 %v12885_v37, %v12879_v29  ;;  %v19335_v37 = vld [vmem:[%s26045_s15 + $0x18] sm:$0xff] }
 0xa47   : > { %v25165_v50 = vpop.permute.xlu0 %21712  ;;  %20393 = vmatprep.subr.bf16.mxu1 %v20392_v43  ;;  %v12882_v43 = vsel %vm5775_vm4, %v21685_v36, %v21679_v21  ;;  %v21720_v62 = vunpack.i.h.bf16 %v25159_v63  ;;  %v21719_v25 = vunpack.i.l.bf16 %v25159_v63  ;;  %v20412_v63 = vpack.c.bf16 %v21700_v26, %v21705_v34 }
 0xa48   : > { %v20401_v42 = vpack.c.bf16 %v12882_v43, %v12876_v41  ;;  %v21715_v4 = vunpack.i.h.bf16 %v25165_v50  ;;  %v21714_v28 = vunpack.i.l.bf16 %v25165_v50  ;;  %v13226_v36 = vsel %vm1063_vm6, %v21709_v15, %v21710_v58 }
 0xa49   : > { %19327 = vmatmul.mubr.msk.f32.vlgmr.msra.gmra.mrb[22].mxu1 %vm26074_vm9, %v12203_v51  ;;  %v13225_v50 = vsel %vm1063_vm6, %v21719_v25, %v21709_v15 }
 0xa4a   : > { %v25173_v54 = vpop.permute.xlu1 %21727  ;;  %20395 = vmatpush1.bf16.msra.mxu1 %v20394_v57  ;;  %12769 = vmatprep.mubr.f32.mxu1 %v24878_v12  ;;  %v21699_v57 = vunpack.i.l.bf16 %v25149_v3  ;;  %v13232_v35 = vsel %vm1063_vm6, %v21714_v28, %v21715_v4  ;;  %v13231_v11 = vsel %vm1063_vm6, %v21720_v62, %v21714_v28 }
 0xa4b   : > { %v25181_v7 = vpop.permute.xlu0 %21722  ;;  %20396 = vmatprep.subr.bf16.mxu1 %v21968_v30  ;;  %v21729_v3 = vunpack.i.l.bf16 %v25173_v54  ;;  %v20416_v41 = vpack.c.bf16 %v13231_v11, %v13225_v50 }
 0xa4c   : > { %v12887_v10 = vsel %vm5775_vm4, %v21699_v57, %v21700_v26  ;;  %v12886_v8 = vsel %vm5775_vm4, %v21695_v6, %v21699_v57  ;;  %v21725_v27 = vunpack.i.h.bf16 %v25181_v7  ;;  %v21724_v21 = vunpack.i.l.bf16 %v25181_v7 }
 0xa4d   : > { %19328 = vmatmul.mubr.msk.f32.vlgmr.msra.gmra.mrb[24].mxu1 %vm26074_vm9, %v12203_v51  ;;  %v20407_v60 = vpack.c.bf16 %v12887_v10, %v12881_v53  ;;  %v20409_v17 = vpack.c.bf16 %v12886_v8, %v12880_v31  ;;  %v20414_v6 = vpack.c.bf16 %v13232_v35, %v13226_v36 }
 0xa4e   : > { %v25191_v61 = vpop.permute.xlu1 %21732  ;;  %20398 = vmatpush3.bf16.msra.mxu1 %v20397_v49  ;;  %19809 = vmatprep.mubr.msk.f32.mxu1 %vm21969_vm12, %v24878_v12  ;;  %v19330_v49 = vld [vmem:[%s26045_s15 + $0x10] sm:$0xff]  ;;  %v13228_v1 = vsel %vm1063_vm6, %v21724_v21, %v21725_v27  ;;  %v13227_v26 = vsel %vm1063_vm6, %v21710_v58, %v21724_v21 }
 0xa4f   : > { %v25199_v46 = vpop.permute.xlu0 %21737  ;;  %20400 = vmatprep.subr.bf16.mxu1 %v20399_v52  ;;  %v21735_v32 = vunpack.i.h.bf16 %v25191_v61  ;;  %v21734_v5 = vunpack.i.l.bf16 %v25191_v61  ;;  %v13233_v52 = vsel %vm1063_vm6, %v21715_v4, %v21729_v3 }
 0xa50   : > { %v21740_v7 = vunpack.i.h.bf16 %v25199_v46  ;;  %v21739_v40 = vunpack.i.l.bf16 %v25199_v46 }
 0xa51   : > { %19810 = vmatmul.mubr.msk.f32.vlgmr.msra.gmra.mrb[26].mxu1 %vm26074_vm9, %v12203_v51  ;;  %v21730_v51 = vunpack.i.h.bf16 %v25173_v54  ;;  %v13236_v34 = vsel %vm1063_vm6, %v21734_v5, %v21735_v32 }
 0xa52   : > { %v25206_v33 = vpop.permute.xlu1 %21747  ;;  %20402 = vmatpush1.bf16.msra.mxu1 %v20401_v42  ;;  %12969 = vmatprep.mubr.f32.mxu1 %v24878_v12  ;;  %v13230_v46 = vsel %vm1063_vm6, %v21739_v40, %v21740_v7  ;;  %v20420_v42 = vpack.c.bf16 %v13233_v52, %v13227_v26  ;;  %v13229_v9 = vsel %vm1063_vm6, %v21725_v27, %v21739_v40 }
 0xa53   : > { %v25214_v59 = vpop.permute.xlu0 %21742  ;;  %20404 = vmatprep.subr.bf16.mxu1 %v20403_v39  ;;  %v13234_v54 = vsel %vm1063_vm6, %v21729_v3, %v21730_v51  ;;  %v13235_v29 = vsel %vm1063_vm6, %v21730_v51, %v21734_v5  ;;  %v20422_v39 = vpack.c.bf16 %v13236_v34, %v13230_v46  ;;  %v21749_v10 = vunpack.i.l.bf16 %v25206_v33 }
 0xa54   : > { %v20418_v57 = vpack.c.bf16 %v13234_v54, %v13228_v1  ;;  %v21745_v48 = vunpack.i.h.bf16 %v25214_v59 }
 0xa55   : > { %19331 = vmatmul.mubr.msk.f32.vlgmr.msra.gmra.mrb[20].mxu1 %vm26074_vm9, %v19330_v49 }
 0xa56   : > { %v25221_v20 = vpop.permute.xlu1 %21757  ;;  %20406 = vmatpush1.bf16.msra.mxu1 %v20405_v55  ;;  %13040 = vmatprep.mubr.f32.mxu1 %v24878_v12  ;;  %v21744_v55 = vunpack.i.l.bf16 %v25214_v59 }
 0xa57   : > { %v25226_v0 = vpop.permute.xlu0 %21752  ;;  %20408 = vmatprep.subr.bf16.mxu1 %v20407_v60  ;;  %v20424_v60 = vpack.c.bf16 %v13235_v29, %v13229_v9  ;;  %v21760_v25 = vunpack.i.h.bf16 %v25221_v20 }
 0xa58   : > { %v21755_v4 = vunpack.i.h.bf16 %v25226_v0  ;;  %v21754_v28 = vunpack.i.l.bf16 %v25226_v0  ;;  %v13575_v58 = vsel %vm1175_vm8, %v21744_v55, %v21745_v48  ;;  %v20427_v0 = vpack.c.bf16 %v21735_v32, %v21740_v7  ;;  %v19340_v32 = vld [vmem:[%s26045_s15 + $0x20] sm:$0xff] }
 0xa59   : > { %19332 = vmatmul.mubr.msk.f32.vlgmr.msra.gmra.mrb[22].mxu1 %vm26074_vm9, %v19330_v49 }
 0xa5a   : > { %v25236_v56 = vpop.permute.xlu1 %21772  ;;  %20410 = vmatpush1.bf16.msra.mxu1 %v20409_v17  ;;  %13111 = vmatprep.mubr.f32.mxu1 %v24878_v12  ;;  %v21759_v17 = vunpack.i.l.bf16 %v25221_v20  ;;  %v13580_v51 = vsel %vm1175_vm8, %v21755_v4, %v21749_v10  ;;  %v13574_v3 = vsel %vm1175_vm8, %v21754_v28, %v21744_v55 }
 0xa5b   : > { %v25240_v24 = vpop.permute.xlu0 %21762  ;;  %20411 = vmatprep.subr.bf16.mxu1 %v21968_v30  ;;  %v21775_v50 = vunpack.i.h.bf16 %v25236_v56  ;;  %v21774_v36 = vunpack.i.l.bf16 %v25236_v56  ;;  %v20431_v11 = vpack.c.bf16 %v13580_v51, %v13574_v3 }
 0xa5c   : > { %v21764_v31 = vunpack.i.l.bf16 %v25240_v24  ;;  %v13576_v7 = vsel %vm1175_vm8, %v21745_v48, %v21759_v17 }
 0xa5d   : > { %19333 = vmatmul.mubr.msk.f32.vlgmr.msra.gmra.mrb[24].mxu1 %vm26074_vm9, %v19330_v49  ;;  %v13579_v40 = vsel %vm1175_vm8, %v21774_v36, %v21775_v50  ;;  %v13578_v46 = vsel %vm1175_vm8, %v21760_v25, %v21774_v36 }
 0xa5e   : > { %v25253_v16 = vpop.permute.xlu1 %21777  ;;  %20413 = vmatpush3.bf16.msra.mxu1 %v20412_v63  ;;  %19816 = vmatprep.mubr.msk.f32.mxu1 %vm21969_vm12, %v24878_v12 }
 0xa5f   : > { %v25257_v43 = vpop.permute.xlu0 %21767  ;;  %20415 = vmatprep.subr.bf16.mxu1 %v20414_v6  ;;  %v13577_v6 = vsel %vm1175_vm8, %v21759_v17, %v21760_v25  ;;  %v21780_v34 = vunpack.i.h.bf16 %v25253_v16 }
 0xa60   : > { %v21770_v21 = vunpack.i.h.bf16 %v25257_v43  ;;  %v21769_v35 = vunpack.i.l.bf16 %v25257_v43 }
 0xa61   : > { %19817 = vmatmul.mubr.msk.f32.vlgmr.msra.gmra.mrb[26].mxu1 %vm26074_vm9, %v19330_v49  ;;  %v21750_v49 = vunpack.i.h.bf16 %v25206_v33  ;;  %v21765_v33 = vunpack.i.h.bf16 %v25240_v24 }
 0xa62   : > { %v25262_v61 = vpop.permute.xlu1 %21787  ;;  %20417 = vmatpush1.bf16.msra.mxu1 %v20416_v41  ;;  %13318 = vmatprep.mubr.f32.mxu1 %v24878_v12  ;;  %v13585_v5 = vsel %vm1175_vm8, %v21769_v35, %v21770_v21 }
 0xa63   : > { %v25270_v47 = vpop.permute.xlu0 %21782  ;;  %20419 = vmatprep.subr.bf16.mxu1 %v20418_v57  ;;  %v13581_v15 = vsel %vm1175_vm8, %v21749_v10, %v21750_v49  ;;  %v13583_v24 = vsel %vm1175_vm8, %v21764_v31, %v21765_v33  ;;  %v13582_v1 = vsel %vm1175_vm8, %v21750_v49, %v21764_v31  ;;  %v13584_v43 = vsel %vm1175_vm8, %v21765_v33, %v21769_v35 }
 0xa64   : > { %v20429_v27 = vpack.c.bf16 %v13581_v15, %v13575_v58  ;;  %v20433_v54 = vpack.c.bf16 %v13583_v24, %v13577_v6  ;;  %v20435_v56 = vpack.c.bf16 %v13582_v1, %v13576_v7  ;;  %v20437_v26 = vpack.c.bf16 %v13585_v5, %v13579_v40 }
 0xa65   : > { %19336 = vmatmul.mubr.msk.f32.vlgmr.msra.gmra.mrb[20].mxu1 %vm26074_vm9, %v19335_v37  ;;  %v21785_v57 = vunpack.i.h.bf16 %v25270_v47  ;;  %v20439_v29 = vpack.c.bf16 %v13584_v43, %v13578_v46  ;;  %v21790_v9 = vunpack.i.h.bf16 %v25262_v61 }
 0xa66   : > { %v25279_v53 = vpop.permute.xlu1 %21797  ;;  %20421 = vmatpush1.bf16.msra.mxu1 %v20420_v42  ;;  %13389 = vmatprep.mubr.f32.mxu1 %v24878_v12  ;;  %v21779_v42 = vunpack.i.l.bf16 %v25253_v16 }
 0xa67   : > { %v25282_v8 = vpop.permute.xlu0 %21792  ;;  %20423 = vmatprep.subr.bf16.mxu1 %v20422_v39  ;;  %v21789_v39 = vunpack.i.l.bf16 %v25262_v61  ;;  %v21800_v49 = vunpack.i.h.bf16 %v25279_v53  ;;  %v21799_v10 = vunpack.i.l.bf16 %v25279_v53  ;;  %v20442_v61 = vpack.c.bf16 %v21770_v21, %v21775_v50 }
 0xa68   : > { %v21794_v48 = vunpack.i.l.bf16 %v25282_v8  ;;  %v13924_v4 = vsel %vm6946_vm5, %v21779_v42, %v21780_v34 }
 0xa69   : > { %19337 = vmatmul.mubr.msk.f32.vlgmr.msra.gmra.mrb[22].mxu1 %vm26074_vm9, %v19335_v37  ;;  %v13923_v53 = vsel %vm6946_vm5, %v21789_v39, %v21779_v42  ;;  %v13932_v31 = vsel %vm6946_vm5, %v21799_v10, %v21800_v49  ;;  %v13931_v51 = vsel %vm6946_vm5, %v21785_v57, %v21799_v10 }
 0xa6a   : > { %v25289_v59 = vpop.permute.xlu1 %21802  ;;  %20425 = vmatpush1.bf16.msra.mxu1 %v20424_v60  ;;  %13460 = vmatprep.mubr.f32.mxu1 %v24878_v12  ;;  %v13925_v3 = vsel %vm6946_vm5, %v21780_v34, %v21794_v48 }
 0xa6b   : > { %v25294_v62 = vpop.permute.xlu0 %21807  ;;  %20426 = vmatprep.subr.bf16.mxu1 %v21968_v30  ;;  %v21805_v58 = vunpack.i.h.bf16 %v25289_v59  ;;  %v21804_v15 = vunpack.i.l.bf16 %v25289_v59  ;;  %v20450_v50 = vpack.c.bf16 %v13931_v51, %v13925_v3 }
 0xa6c   : > { %v21809_v25 = vunpack.i.l.bf16 %v25294_v62 }
 0xa6d   : > { %19338 = vmatmul.mubr.msk.f32.vlgmr.msra.gmra.mrb[24].mxu1 %vm26074_vm9, %v19335_v37  ;;  %v13934_v24 = vsel %vm6946_vm5, %v21804_v15, %v21805_v58  ;;  %v13933_v36 = vsel %vm6946_vm5, %v21800_v49, %v21804_v15 }
 0xa6e   : > { %20428 = vmatpush3.bf16.msra.mxu1 %v20427_v0  ;;  %19823 = vmatprep.mubr.msk.f32.mxu1 %vm21969_vm12, %v24878_v12  ;;  %v25307_v63 = vpop.permute.xlu1 %21817  ;;  %v21810_v0 = vunpack.i.h.bf16 %v25294_v62  ;;  %v19345_v62 = vld [vmem:[%s26045_s15 + $0x28] sm:$0xff] }
 0xa6f   : > { %v25309_v20 = vpop.permute.xlu0 %21812  ;;  %20430 = vmatprep.subr.bf16.mxu1 %v20429_v27  ;;  %v21820_v1 = vunpack.i.h.bf16 %v25307_v63 }
 0xa70   : > { %v13928_v35 = vsel %vm6946_vm5, %v21809_v25, %v21810_v0  ;;  %v21814_v5 = vunpack.i.l.bf16 %v25309_v20  ;;  %v20457_v46 = vpack.c.bf16 %v21805_v58, %v21810_v0 }
 0xa71   : > { %19824 = vmatmul.mubr.msk.f32.vlgmr.msra.gmra.mrb[26].mxu1 %vm26074_vm9, %v19335_v37  ;;  %v21784_v37 = vunpack.i.l.bf16 %v25270_v47  ;;  %v21795_v47 = vunpack.i.h.bf16 %v25282_v8  ;;  %v20452_v6 = vpack.c.bf16 %v13934_v24, %v13928_v35 }
 0xa72   : > { %20432 = vmatpush1.bf16.msra.mxu1 %v20431_v11  ;;  %13667 = vmatprep.mubr.f32.mxu1 %v24878_v12  ;;  %v25324_v41 = vpop.permute.xlu1 %21827 }
 0xa73   : > { %20434 = vmatprep.subr.bf16.mxu1 %v20433_v54  ;;  %v25326_v52 = vpop.permute.xlu0 %21822  ;;  %v13930_v16 = vsel %vm6946_vm5, %v21784_v37, %v21785_v57  ;;  %v13929_v8 = vsel %vm6946_vm5, %v21790_v9, %v21784_v37  ;;  %v13926_v33 = vsel %vm6946_vm5, %v21794_v48, %v21795_v47  ;;  %v13927_v11 = vsel %vm6946_vm5, %v21795_v47, %v21809_v25 }
 0xa74   : > { %v20444_v28 = vpack.c.bf16 %v13930_v16, %v13924_v4  ;;  %v20446_v17 = vpack.c.bf16 %v13929_v8, %v13923_v53  ;;  %v20448_v59 = vpack.c.bf16 %v13932_v31, %v13926_v33  ;;  %v21819_v54 = vunpack.i.l.bf16 %v25307_v63  ;;  %v19350_v8 = vld [vmem:[%s26045_s15 + $0x30] sm:$0xff] }
 0xa75   : > { %19341 = vmatmul.mubr.msk.f32.vlgmr.msra.gmra.mrb[20].mxu1 %vm26074_vm9, %v19340_v32  ;;  %v20454_v40 = vpack.c.bf16 %v13933_v36, %v13927_v11  ;;  %v21825_v43 = vunpack.i.h.bf16 %v25326_v52  ;;  %v21830_v34 = vunpack.i.h.bf16 %v25324_v41 }
 0xa76   : > { %20436 = vmatpush1.bf16.msra.mxu1 %v20435_v56  ;;  %13738 = vmatprep.mubr.f32.mxu1 %v24878_v12  ;;  %v25344_v55 = vpop.permute.xlu1 %21842  ;;  %v14279_v37 = vsel %vm26074_vm9, %v21819_v54, %v21820_v1 }
 0xa77   : > { %20438 = vmatprep.subr.bf16.mxu1 %v20437_v26  ;;  %v25346_v60 = vpop.permute.xlu0 %21832  ;;  %v21824_v26 = vunpack.i.l.bf16 %v25326_v52  ;;  %v21829_v52 = vunpack.i.l.bf16 %v25324_v41  ;;  %v14278_v42 = vsel %vm26074_vm9, %v21825_v43, %v21819_v54  ;;  %v21845_v16 = vunpack.i.h.bf16 %v25344_v55 }
 0xa78   : > { %v21835_v63 = vunpack.i.h.bf16 %v25346_v60  ;;  %v21834_v57 = vunpack.i.l.bf16 %v25346_v60  ;;  %v21844_v60 = vunpack.i.l.bf16 %v25344_v55 }
 0xa79   : > { %19342 = vmatmul.mubr.msk.f32.vlgmr.msra.gmra.mrb[22].mxu1 %vm26074_vm9, %v19340_v32 }
 0xa7a   : > { %20440 = vmatpush1.bf16.msra.mxu1 %v20439_v29  ;;  %13809 = vmatprep.mubr.f32.mxu1 %v24878_v12  ;;  %v25363_v27 = vpop.permute.xlu1 %21847  ;;  %v14272_v29 = vsel %vm26074_vm9, %v21824_v26, %v21814_v5  ;;  %v14281_v41 = vsel %vm26074_vm9, %v21834_v57, %v21835_v63  ;;  %v14280_v53 = vsel %vm26074_vm9, %v21820_v1, %v21834_v57 }
 0xa7b   : > { %20441 = vmatprep.subr.bf16.mxu1 %v21968_v30  ;;  %v25365_v21 = vpop.permute.xlu0 %21837  ;;  %v20461_v48 = vpack.c.bf16 %v14278_v42, %v14272_v29  ;;  %v14277_v15 = vsel %vm26074_vm9, %v21844_v60, %v21845_v16  ;;  %v14276_v3 = vsel %vm26074_vm9, %v21830_v34, %v21844_v60 }
 0xa7c   : > { %v21840_v10 = vunpack.i.h.bf16 %v25365_v21  ;;  %v21839_v47 = vunpack.i.l.bf16 %v25365_v21  ;;  %v21850_v21 = vunpack.i.h.bf16 %v25363_v27 }
 0xa7d   : > { %19343 = vmatmul.mubr.msk.f32.vlgmr.msra.gmra.mrb[24].mxu1 %vm26074_vm9, %v19340_v32 }
 0xa7e   : > { %20443 = vmatpush3.bf16.msra.mxu1 %v20442_v61  ;;  %19830 = vmatprep.mubr.msk.f32.mxu1 %vm21969_vm12, %v24878_v12  ;;  %v25382_v7 = vpop.permute.xlu1 %21857  ;;  %v14275_v61 = vsel %vm26074_vm9, %v21829_v52, %v21830_v34  ;;  %v14282_v0 = vsel %vm26074_vm9, %v21835_v63, %v21839_v47 }
 0xa7f   : > { %20445 = vmatprep.subr.bf16.mxu1 %v20444_v28  ;;  %v25384_v56 = vpop.permute.xlu0 %21852  ;;  %v20463_v4 = vpack.c.bf16 %v14281_v41, %v14275_v61  ;;  %v14283_v28 = vsel %vm26074_vm9, %v21839_v47, %v21840_v10  ;;  %v21860_v35 = vunpack.i.h.bf16 %v25382_v7  ;;  %v21859_v24 = vunpack.i.l.bf16 %v25382_v7 }
 0xa80   : > { %v20467_v25 = vpack.c.bf16 %v14283_v28, %v14277_v15  ;;  %v21854_v51 = vunpack.i.l.bf16 %v25384_v56 }
 0xa81   : > { %19831 = vmatmul.mubr.msk.f32.vlgmr.msra.gmra.mrb[26].mxu1 %vm26074_vm9, %v19340_v32  ;;  %v21815_v32 = vunpack.i.h.bf16 %v25309_v20 }
 0xa82   : > { %20447 = vmatpush1.bf16.msra.mxu1 %v20446_v17  ;;  %14016 = vmatprep.mubr.f32.mxu1 %v24878_v12  ;;  %v25399_v9 = vpop.permute.xlu1 %21867  ;;  %v21855_v17 = vunpack.i.h.bf16 %v25384_v56  ;;  %v14664_v56 = vsel %vm7763_vm7, %v21860_v35, %v21854_v51 }
 0xa83   : > { %20449 = vmatprep.subr.bf16.mxu1 %v20448_v59  ;;  %v14273_v20 = vsel %vm26074_vm9, %v21814_v5, %v21815_v32  ;;  %v25401_v39 = vpop.permute.xlu0 %21862  ;;  %v14274_v33 = vsel %vm26074_vm9, %v21815_v32, %v21829_v52  ;;  %v21849_v59 = vunpack.i.l.bf16 %v25363_v27  ;;  %v21869_v36 = vunpack.i.l.bf16 %v25399_v9 }
 0xa84   : > { %v20459_v49 = vpack.c.bf16 %v14279_v37, %v14273_v20  ;;  %v20465_v58 = vpack.c.bf16 %v14280_v53, %v14274_v33  ;;  %v21865_v11 = vunpack.i.h.bf16 %v25401_v39  ;;  %v14665_v27 = vsel %vm7763_vm7, %v21854_v51, %v21855_v17  ;;  %v25455_v37 = vld [vmem:[#allocation2] sm:$0xff] }
 0xa85   : > { %19346 = vmatmul.mubr.msk.f32.vlgmr.msra.gmra.mrb[20].mxu1 %vm26074_vm9, %v19345_v62  ;;  %v20472_v32 = vpack.c.bf16 %v21840_v10, %v21845_v16  ;;  %v14657_v5 = vsel %vm7763_vm7, %v21859_v24, %v21849_v59  ;;  %v14658_v7 = vsel %vm7763_vm7, %v21849_v59, %v21850_v21  ;;  %v14666_v42 = vsel %vm7763_vm7, %v21855_v17, %v21869_v36 }
 0xa86   : > { %20451 = vmatpush1.bf16.msra.mxu1 %v20450_v50  ;;  %14087 = vmatprep.mubr.f32.mxu1 %v24878_v12  ;;  %v25420_v31 = vpop.permute.xlu1 %21872  ;;  %v21870_v50 = vunpack.i.h.bf16 %v25399_v9  ;;  %v20476_v52 = vpack.c.bf16 %v14664_v56, %v14657_v5 }
 0xa87   : > { %20453 = vmatprep.subr.bf16.mxu1 %v20452_v6  ;;  %v25422_v55 = vpop.permute.xlu0 %21877  ;;  %v21864_v6 = vunpack.i.l.bf16 %v25401_v39  ;;  %v21874_v63 = vunpack.i.l.bf16 %v25420_v31  ;;  %v19355_v39 = vld [vmem:[%s26045_s15 + $0x38] sm:$0xff] }
 0xa88   : > { %v14667_v26 = vsel %vm7763_vm7, %v21869_v36, %v21870_v50  ;;  %v21880_v57 = vunpack.i.h.bf16 %v25422_v55  ;;  %v21879_v20 = vunpack.i.l.bf16 %v25422_v55 }
 0xa89   : > { %19347 = vmatmul.mubr.msk.f32.vlgmr.msra.gmra.mrb[22].mxu1 %vm26074_vm9, %v19345_v62  ;;  %v14660_v43 = vsel %vm7763_vm7, %v21864_v6, %v21865_v11  ;;  %v14659_v29 = vsel %vm7763_vm7, %v21850_v21, %v21864_v6  ;;  %v14668_v41 = vsel %vm7763_vm7, %v21870_v50, %v21874_v63 }
 0xa8a   : > { %20455 = vmatpush1.bf16.msra.mxu1 %v20454_v40  ;;  %14158 = vmatprep.mubr.f32.mxu1 %v24878_v12  ;;  %v25439_v1 = vpop.permute.xlu1 %21887  ;;  %v20474_v40 = vpack.c.bf16 %v14665_v27, %v14658_v7  ;;  %v20478_v9 = vpack.c.bf16 %v14667_v26, %v14660_v43  ;;  %v20480_v47 = vpack.c.bf16 %v14666_v42, %v14659_v29 }
 0xa8b   : > { %20456 = vmatprep.subr.bf16.mxu1 %v21968_v30  ;;  %v21883_v54 = vpop.permute.xlu0 %21882  ;;  %v21889_v55 = vunpack.i.l.bf16 %v25439_v1 }
 0xa8c   : > { %v21885_v16 = vunpack.i.h.bf16 %v21883_v54  ;;  %v21884_v60 = vunpack.i.l.bf16 %v21883_v54 }
 0xa8d   : > { %19348 = vmatmul.mubr.msk.f32.vlgmr.msra.gmra.mrb[24].mxu1 %vm26074_vm9, %v19345_v62 }
 0xa8e   : > { %20458 = vmatpush3.bf16.msra.mxu1 %v20457_v46  ;;  %19837 = vmatprep.mubr.msk.f32.mxu1 %vm21969_vm12, %v24878_v12  ;;  %v21898_v46 = vpop.permute.xlu1 %21897  ;;  %v14663_v15 = vsel %vm7763_vm7, %v21880_v57, %v21884_v60 }
 0xa8f   : > { %20460 = vmatprep.subr.bf16.mxu1 %v20459_v49  ;;  %v25459_v34 = vpop.permute.xlu0 %21892  ;;  %v14662_v49 = vsel %vm7763_vm7, %v21879_v20, %v21880_v57 }
 0xa90   : > { %v21894_v28 = vunpack.i.l.bf16 %v25459_v34 }
 0xa91   : > { %19838 = vmatmul.mubr.msk.f32.vlgmr.msra.gmra.mrb[26].mxu1 %vm26074_vm9, %v19345_v62  ;;  %v20469_v62 = vpack.c.bf16 %v14282_v0, %v14276_v3  ;;  %v21900_v0 = vunpack.i.h.bf16 %v21898_v46 }
 0xa92   : > { %20462 = vmatpush1.bf16.msra.mxu1 %v20461_v48  ;;  %14365 = vmatprep.mubr.f32.mxu1 %v24878_v12  ;;  %v14661_v48 = vsel %vm7763_vm7, %v21865_v11, %v21879_v20  ;;  %v21908_v61 = vpop.permute.xlu1 %21907 }
 0xa93   : > { %20464 = vmatprep.subr.bf16.mxu1 %v20463_v4  ;;  %v21903_v53 = vpop.permute.xlu0 %21902  ;;  %v20484_v33 = vpack.c.bf16 %v14668_v41, %v14661_v48  ;;  %v21910_v17 = vunpack.i.h.bf16 %v21908_v61  ;;  %v21909_v51 = vunpack.i.l.bf16 %v21908_v61  ;;  %v15019_v11 = vsel %vm26073_vm3, %v21900_v0, %v21894_v28  ;;  %v15366_v41 = vld [vmem:[%s26102_s29] sm:$0x7f]  ;;  %s19458_s29 = sshll.u32 %s26107_s28, 4 }
 0xa94   : > { %v21905_v3 = vunpack.i.h.bf16 %v21903_v53  ;;  %v21904_v21 = vunpack.i.l.bf16 %v21903_v53  ;;  %vm15367_vm4 = vcmp.gt.f32.partialorder %v15366_v41, 0.5 }
 0xa95   : > { %19351 = vmatmul.mubr.msk.f32.vlgmr.msra.gmra.mrb[20].mxu1 %vm26074_vm9, %v19350_v8  ;;  %v15022_v54 = vsel %vm26073_vm3, %v21909_v51, %v21910_v17  ;;  %v15386_v48 = vsel %vm15367_vm4, 1, %v21952_v2 }
 0xa96   : > { %20466 = vmatpush1.bf16.msra.mxu1 %v20465_v58  ;;  %14436 = vmatprep.mubr.f32.mxu1 %v24878_v12  ;;  %v25525_v53 = vrot.slane %v15386_v48, %v705_v19  ;;  %v25530_v2 = vrot.slane %v15386_v48, %v709_v18  ;;  %v25537_v19 = vrot.slane %v15386_v48, %v713_v22 }
 0xa97   : > { %20468 = vmatprep.subr.bf16.mxu1 %v20467_v25  ;;  %v21899_v25 = vunpack.i.l.bf16 %v21898_v46  ;;  %v21913_v35 = vpop.permute.xlu0 %21912 }
 0xa98   : > { %v21915_v5 = vunpack.i.h.bf16 %v21913_v35  ;;  %v21914_v7 = vunpack.i.l.bf16 %v21913_v35  ;;  %vm15417_vm11 = vcmp.eq.s32.totalorder %v25530_v2, 1  ;;  %vm15418_vm13 = vcmp.eq.s32.totalorder %v25537_v19, 1 }
 0xa99   : > { %19352 = vmatmul.mubr.msk.f32.vlgmr.msra.gmra.mrb[22].mxu1 %vm26074_vm9, %v19350_v8  ;;  %v15012_v50 = vsel %vm26073_vm3, %v21899_v25, %v21889_v55 }
 0xa9a   : > { %20470 = vmatpush1.bf16.msra.mxu1 %v20469_v62  ;;  %14507 = vmatprep.mubr.f32.mxu1 %v24878_v12  ;;  %v21875_v12 = vunpack.i.h.bf16 %v25420_v31  ;;  %v21890_v31 = vunpack.i.h.bf16 %v25439_v1  ;;  %v21918_v62 = vpop.permute.xlu1 %21917  ;;  %v15015_v1 = vsel %vm26073_vm3, %v21904_v21, %v21905_v3  ;;  %v20491_v56 = vpack.c.bf16 %v15019_v11, %v15012_v50 }
 0xa9b   : > { %20471 = vmatprep.subr.bf16.mxu1 %v21968_v30  ;;  %v21920_v27 = vunpack.i.h.bf16 %v21918_v62  ;;  %v20493_v26 = vpack.c.bf16 %v15022_v54, %v15015_v1  ;;  %v15017_v57 = vsel %vm26073_vm3, %v21914_v7, %v21915_v5  ;;  %v25585_v54 = vrot.slane %v15386_v48, %v725_v13 }
 0xa9c   : > { %v14669_v10 = vsel %vm7763_vm7, %v21874_v63, %v21875_v12  ;;  %v14670_v58 = vsel %vm7763_vm7, %v21875_v12, %v21885_v16  ;;  %v15013_v36 = vsel %vm26073_vm3, %v21889_v55, %v21890_v31  ;;  %v15014_v43 = vsel %vm26073_vm3, %v21890_v31, %v21904_v21  ;;  %v21923_v12 = vpop.permute.xlu0 %21922  ;;  %v19360_v63 = vld [vmem:[%s26045_s15 + $0x40] sm:$0xff] }
 0xa9d   : > { %19353 = vmatmul.mubr.msk.f32.vlgmr.msra.gmra.mrb[24].mxu1 %vm26074_vm9, %v19350_v8  ;;  %v20482_v4 = vpack.c.bf16 %v14669_v10, %v14662_v49  ;;  %v20487_v24 = vpack.c.bf16 %v14670_v58, %v14663_v15  ;;  %v21925_v42 = vunpack.i.h.bf16 %v21923_v12  ;;  %v21924_v29 = vunpack.i.l.bf16 %v21923_v12  ;;  %v18637_v12 = vld [vmem:[%s26049_s19 + $0x8] sm:$0xf] }
 0xa9e   : > { %20473 = vmatpush3.bf16.msra.mxu1 %v20472_v32  ;;  %19844 = vmatprep.mubr.msk.f32.mxu1 %vm21969_vm12, %v25455_v37  ;;  %v21919_v32 = vunpack.i.l.bf16 %v21918_v62  ;;  %vm15416_vm7 = vcmp.eq.s32.totalorder %v25525_v53, 1  ;;  %v25555_v21 = vrot.slane %v15386_v48, %v717_v44  ;;  %vm15421_vm4 = vcmp.eq.s32.totalorder %v25585_v54, 1 }
 0xa9f   : > { %20475 = vmatprep.subr.bf16.mxu1 %v20474_v40  ;;  %v15025_v49 = vsel %vm26073_vm3, %v21920_v27, %v21925_v42  ;;  %v15018_v10 = vsel %vm26073_vm3, %v21915_v5, %v21924_v29  ;;  %v19365_v29 = vld [vmem:[%s26048_s18 + $0x10] sm:$0xff] }
 0xaa0   : > { %v15024_v20 = vsel %vm26073_vm3, %v21919_v32, %v21920_v27  ;;  %vm15419_vm14 = vcmp.eq.s32.totalorder %v25555_v21, 1 }
 0xaa1   : > { %19845 = vmatmul.mubr.msk.f32.vlgmr.msra.gmra.mrb[26].mxu1 %vm26074_vm9, %v19350_v8  ;;  %v21895_v8 = vunpack.i.h.bf16 %v25459_v34  ;;  %v15023_v34 = vsel %vm26073_vm3, %v21910_v17, %v21919_v32 }
 0xaa2   : > { %20477 = vmatpush1.bf16.msra.mxu1 %v20476_v52  ;;  %14752 = vmatprep.mubr.f32.mxu1 %v25455_v37  ;;  %v15016_v52 = vsel %vm26073_vm3, %v21905_v3, %v21914_v7 }
 0xaa3   : > { %20479 = vmatprep.subr.bf16.mxu1 %v20478_v9  ;;  %v15020_v59 = vsel %vm26073_vm3, %v21894_v28, %v21895_v8  ;;  %v15021_v40 = vsel %vm26073_vm3, %v21895_v8, %v21909_v51  ;;  %v20497_v9 = vpack.c.bf16 %v15024_v20, %v15017_v57  ;;  %vm15469_vm3 = vcmask 457728   ;;  %v18663_v20 = vld [vmem:[%s26050_s20 + $0x8] sm:$0xf] }
 0xaa4   : > { %v20489_v6 = vpack.c.bf16 %v15020_v59, %v15013_v36  ;;  %v20495_v46 = vpack.c.bf16 %v15021_v40, %v15014_v43 }
 0xaa5   : > { %19356 = vmatmul.mubr.msk.f32.vlgmr.msra.gmra.mrb[20].mxu1 %vm26074_vm9, %v19355_v39 }
 0xaa6   : > { %20481 = vmatpush1.bf16.msra.mxu1 %v20480_v47  ;;  %14823 = vmatprep.mubr.f32.mxu1 %v25455_v37  ;;  %v20502_v47 = vpack.c.bf16 %v15025_v49, %v15018_v10  ;;  %v19366_v10 = vld [vmem:[%s26048_s18 + $0x18] sm:$0xf] }
 0xaa7   : > { %20483 = vmatprep.subr.bf16.mxu1 %v20482_v4  ;;  %v15344_v4 = vpop.permute.xlu1 %15343 }
 0xaa9   : > { %19357 = vmatmul.mubr.msk.f32.vlgmr.msra.gmra.mrb[22].mxu1 %vm26074_vm9, %v19355_v39 }
 0xaaa   : > { %20485 = vmatpush1.bf16.msra.mxu1 %v20484_v33  ;;  %14894 = vmatprep.mubr.f32.mxu1 %v25455_v37 }
 0xaab   : > { %20486 = vmatprep.subr.bf16.mxu1 %v21968_v30 }
 0xaac   : > { %v15357_v33 = vpop.permute.xlu0 %15356 }
 0xaad   : > { %19358 = vmatmul.mubr.msk.f32.vlgmr.msra.gmra.mrb[24].mxu1 %vm26074_vm9, %v19355_v39 }
 0xaae   : > { %20488 = vmatpush3.bf16.msra.mxu1 %v20487_v24  ;;  %19851 = vmatprep.mubr.msk.f32.mxu1 %vm21969_vm12, %v25455_v37  ;;  %v25565_v24 = vrot.slane %v15386_v48, %v721_v45 }
 0xaaf   : > { %20490 = vmatprep.subr.bf16.mxu1 %v20489_v6 }
 0xab1   : > { %19852 = vmatmul.mubr.msk.f32.vlgmr.msra.gmra.mrb[26].mxu1 %vm26074_vm9, %v19355_v39  ;;  %v20499_v39 = vpack.c.bf16 %v15023_v34, %v15016_v52  ;;  %v18662_v52 = vld [vmem:[%s26050_s20] sm:$0xff] }
 0xab2   : > { %20492 = vmatpush1.bf16.msra.mxu1 %v20491_v56  ;;  %15107 = vmatprep.mubr.f32.mxu1 %v25455_v37 }
 0xab3   : > { %20494 = vmatprep.subr.bf16.mxu1 %v20493_v26 }
 0xab5   : > { %19361 = vmatmul.mubr.msk.f32.vlgmr.msra.gmra.mrb[20].mxu1 %vm26074_vm9, %v19360_v63 }
 0xab6   : > { %20496 = vmatpush1.bf16.msra.mxu1 %v20495_v46  ;;  %15178 = vmatprep.mubr.f32.mxu1 %v25455_v37 }
 0xab7   : > { %20498 = vmatprep.subr.bf16.mxu1 %v20497_v9 }
 0xab9   : > { %19362 = vmatmul.mubr.msk.f32.vlgmr.msra.gmra.mrb[22].mxu1 %vm26074_vm9, %v19360_v63 }
 0xaba   : > { %20500 = vmatpush1.bf16.msra.mxu1 %v20499_v39  ;;  %15249 = vmatprep.mubr.f32.mxu1 %v25455_v37 }
 0xabb   : > { %20501 = vmatprep.subr.bf16.mxu1 %v21968_v30  ;;  %v25521_v30 = vrot.slane %v15386_v48, %v701_v23 }
 0xabd   : > { %19363 = vmatmul.mubr.msk.f32.vlgmr.msra.gmra.mrb[24].mxu1 %vm26074_vm9, %v19360_v63  ;;  %vm15415_vm5 = vcmp.eq.s32.totalorder %v25521_v30, 1 }
 0xabe   : > { %20503 = vmatpush3.bf16.msra.mxu1 %v20502_v47  ;;  %19858 = vmatprep.mubr.msk.f32.mxu1 %vm21969_vm12, %v25455_v37  ;;  %vm15420_vm12 = vcmp.eq.s32.totalorder %v25565_v24, 1 }
 0xac1   : > { %19859 = vmatmul.mubr.msk.f32.vlgmr.msra.gmra.mrb[26].mxu1 %vm26074_vm9, %v19360_v63  ;;  %v18636_v63 = vld [vmem:[%s26049_s19] sm:$0xff] }
 0xac2   : > { %15553 = vmatprep.mubr.f32.mxu1 %v25455_v37 }
 0xb88   : > { %v15109_v16 = vpop.f32.mrb[20].mxu1 }
 0xb89   : > { %v15333_v60 = vmax.f32 %v15109_v16, 0.0  ;;  %v15111_v61 = vpop.f32.mrb[21].mxu1 }
 0xb8a   : > { %v15334_v8 = vmax.f32 %v15111_v61, 0.0 }
 0xb8b   : > { %v15346_v28 = vmul.f32 %v15344_v4, %v15333_v60 }
 0xb8c   : > { %v15347_v31 = vmul.f32 %v15344_v4, %v15334_v8  ;;  %v15180_v55 = vpop.f32.mrb[22].mxu1 }
 0xb8d   : > { %v25532_v23 = vadd.f32 %v15357_v33, %v15346_v28  ;;  %v15335_v58 = vmax.f32 %v15180_v55, 0.0  ;;  %v15182_v15 = vpop.f32.mrb[23].mxu1 }
 0xb8e   : > { %v25539_v0 = vadd.f32 %v15357_v33, %v15347_v31  ;;  %v15336_v25 = vmax.f32 %v15182_v15, 0.0 }
 0xb8f   : > { %v25544_v17 = vsel %vm15415_vm5, %v25532_v23, 0.0  ;;  %v15348_v18 = vmul.f32 %v15344_v4, %v15335_v58 }
 0xb90   : > { %15429 = vst [vmem:[#allocation2 + $0x8] sm:$0xff] %v25544_v17  ;;  %v25550_v51 = vsel %vm15416_vm7, %v25539_v0, 0.0  ;;  %v15349_v22 = vmul.f32 %v15344_v4, %v15336_v25  ;;  %v15251_v3 = vpop.f32.mrb[24].mxu1  ;;  %15457 = vrot.lane.b32.xlu1 %v25544_v17, %s21970_s25  ;;  %v15443_v25 = vld [vmem:[%s26048_s18] sm:$0xff] }
 0xb91   : > { %15430 = vst [vmem:[#allocation2 + $0x10] sm:$0xff] %v25550_v51  ;;  %v25560_v59 = vadd.f32 %v15357_v33, %v15348_v18  ;;  %v15337_v62 = vmax.f32 %v15251_v3, 0.0  ;;  %v15253_v35 = vpop.f32.mrb[25].mxu1  ;;  %15459 = vrot.lane.b32.xlu0 %v25550_v51, %s21970_s25  ;;  %v15444_v3 = vld [vmem:[%s26048_s18 + $0x8] sm:$0xf] }
 0xb92   : > { %v25569_v44 = vadd.f32 %v15357_v33, %v15349_v22  ;;  %v15338_v50 = vmax.f32 %v15253_v35, 0.0 }
 0xb93   : > { %v25574_v36 = vsel %vm15417_vm11, %v25560_v59, 0.0  ;;  %v15350_v11 = vmul.f32 %v15344_v4, %v15337_v62 }
 0xb94   : > { %15431 = vst [vmem:[#allocation2 + $0x18] sm:$0xff] %v25574_v36  ;;  %v25580_v6 = vsel %vm15418_vm13, %v25569_v44, 0.0  ;;  %v15351_v45 = vmul.f32 %v15344_v4, %v15338_v50  ;;  %v15322_v1 = vpop.f32.mrb[26].mxu1  ;;  %15455 = vrot.lane.b32.xlu1 %v25455_v37, %s21970_s25 }
 0xb95   : > { %15432 = vst [vmem:[#allocation2 + $0x20] sm:$0xff] %v25580_v6  ;;  %v25590_v27 = vadd.f32 %v15357_v33, %v15350_v11  ;;  %v15339_v32 = vmax.f32 %v15322_v1, 0.0  ;;  %v19860_v5 = vpop.f32.mrb[27].mxu1  ;;  %15461 = vrot.lane.b32.xlu0 %v25574_v36, %s21970_s25 }
 0xb96   : > { %v25595_v7 = vadd.f32 %v15357_v33, %v15351_v45  ;;  %v19383_v5 = vld [vmem:[%s26048_s18 + $0x20] sm:$0xff] }
 0xb97   : > { %v25600_v14 = vsel %vm15419_vm14, %v25590_v27, 0.0  ;;  %v15352_v13 = vmul.f32 %v15344_v4, %v15339_v32 }
 0xb98   : > { %15433 = vst [vmem:[#allocation2 + $0x28] sm:$0xff] %v25600_v14  ;;  %v15427_v56 = vsel %vm15420_vm12, %v25595_v7, 0.0  ;;  %15463 = vrot.lane.b32.xlu1 %v25580_v6, %s21970_s25 }
 0xb99   : > { %15434 = vst [vmem:[#allocation2 + $0x30] sm:$0xff] %v15427_v56  ;;  %v15365_v40 = vadd.f32 %v15357_v33, %v15352_v13  ;;  %15465 = vrot.lane.b32.xlu0 %v25600_v14, %s21970_s25 }
 0xb9b   : > { %v15428_v43 = vsel %vm15421_vm4, %v15365_v40, 0.0 }
 0xb9c   : > { %15435 = vst.msk [vmem:[#allocation2 + $0x38] sm:$0xff] %vm26074_vm9, %v15428_v43  ;;  %15467 = vrot.lane.b32.xlu1 %v15427_v56, %s21970_s25  ;;  %vm15809_vm9 = vcmask 474112   ;;  %v19384_v43 = vld [vmem:[%s26048_s18 + $0x28] sm:$0xf] }
 0xb9d   : > { %15797 = vrot.lane.b32.xlu0 %v25544_v17, %s21971_s1 }
 0xba0   : > { %15799 = vrot.lane.b32.xlu1 %v25550_v51, %s21971_s1 }
 0xba1   : > { %15795 = vrot.lane.b32.xlu0 %v25455_v37, %s21971_s1 }
 0xba3   : > { %v25633_v26 = vld [vmem:[#allocation2 + $0x38] sm:$0xff] }
 0xba4   : > { %15801 = vrot.lane.b32.xlu1 %v25574_v36, %s21971_s1 }
 0xba5   : > { %15803 = vrot.lane.b32.xlu0 %v25580_v6, %s21971_s1 }
 0xba8   : > { %15805 = vrot.lane.b32.xlu1 %v25600_v14, %s21971_s1 }
 0xba9   : > { %15807 = vrot.lane.b32.xlu0 %v15427_v56, %s21971_s1 }
 0xbac   : > { %16140 = vrot.lane.b32.xlu1 %v25544_v17, %s21972_s5 }
 0xbad   : > { %16142 = vrot.lane.b32.xlu0 %v25550_v51, %s21972_s5 }
 0xbb0   : > { %16138 = vrot.lane.b32.xlu1 %v25455_v37, %s21972_s5 }
 0xbb1   : > { %16144 = vrot.lane.b32.xlu0 %v25574_v36, %s21972_s5 }
 0xbb4   : > { %16146 = vrot.lane.b32.xlu1 %v25580_v6, %s21972_s5 }
 0xbb5   : > { %16148 = vrot.lane.b32.xlu0 %v25600_v14, %s21972_s5 }
 0xbb8   : > { %16150 = vrot.lane.b32.xlu1 %v15427_v56, %s21972_s5  ;;  %s680_s5 = scalar_lea.vmem %s26052_s22, %s19458_s29 }
 0xbb9   : > { %16513 = vrot.lane.b32.xlu0 %v25544_v17, %s21973_s4 }
 0xbbc   : > { %16515 = vrot.lane.b32.xlu1 %v25550_v51, %s21973_s4 }
 0xbbd   : > { %16511 = vrot.lane.b32.xlu0 %v25455_v37, %s21973_s4 }
 0xbc0   : > { %16517 = vrot.lane.b32.xlu1 %v25574_v36, %s21973_s4 }
 0xbc1   : > { %16519 = vrot.lane.b32.xlu0 %v25580_v6, %s21973_s4 }
 0xbc4   : > { %16521 = vrot.lane.b32.xlu1 %v25600_v14, %s21973_s4 }
 0xbc5   : > { %16523 = vrot.lane.b32.xlu0 %v15427_v56, %s21973_s4 }
 0xbc8   : > { %16525 = vrot.lane.b32.xlu1 %v25633_v26, %s21973_s4 }
 0xbc9   : > { %17202 = vrot.lane.b32.xlu0 %v25550_v51, %s26100_s2 }
 0xbcc   : > { %17204 = vrot.lane.b32.xlu1 %v25574_v36, %s26100_s2 }
 0xbcd   : > { %17200 = vrot.lane.b32.xlu0 %v25544_v17, %s26100_s2 }
 0xbd0   : > { %17206 = vrot.lane.b32.xlu1 %v25580_v6, %s26100_s2 }
 0xbd1   : > { %17208 = vrot.lane.b32.xlu0 %v25600_v14, %s26100_s2 }
 0xbd4   : > { %17210 = vrot.lane.b32.xlu1 %v15427_v56, %s26100_s2 }
 0xbd5   : > { %17212 = vrot.lane.b32.xlu0 %v25633_v26, %s26100_s2 }
 0xbd8   : > { %17558 = vrot.lane.b32.xlu1 %v25550_v51, %s21974_s24 }
 0xbd9   : > { %17560 = vrot.lane.b32.xlu0 %v25574_v36, %s21974_s24 }
 0xbdc   : > { %17556 = vrot.lane.b32.xlu1 %v25544_v17, %s21974_s24 }
 0xbdd   : > { %17562 = vrot.lane.b32.xlu0 %v25580_v6, %s21974_s24 }
 0xbe0   : > { %17564 = vrot.lane.b32.xlu1 %v25600_v14, %s21974_s24 }
 0xbe1   : > { %17566 = vrot.lane.b32.xlu0 %v15427_v56, %s21974_s24 }
 0xbe4   : > { %17568 = vrot.lane.b32.xlu1 %v25633_v26, %s21974_s24 }
 0xbe5   : > { %17915 = vrot.lane.b32.xlu0 %v25550_v51, %s26091_s6 }
 0xbe8   : > { %17917 = vrot.lane.b32.xlu1 %v25574_v36, %s26091_s6 }
 0xbe9   : > { %17913 = vrot.lane.b32.xlu0 %v25544_v17, %s26091_s6 }
 0xbec   : > { %17919 = vrot.lane.b32.xlu1 %v25580_v6, %s26091_s6 }
 0xbed   : > { %17921 = vrot.lane.b32.xlu0 %v25600_v14, %s26091_s6 }
 0xbf0   : > { %17923 = vrot.lane.b32.xlu1 %v15427_v56, %s26091_s6 }
 0xbf1   : > { %17925 = vrot.lane.b32.xlu0 %v25633_v26, %s26091_s6 }
 0xbf4   : > { %18271 = vrot.lane.b32.xlu1 %v25550_v51, %s26087_s0 }
 0xbf5   : > { %18273 = vrot.lane.b32.xlu0 %v25574_v36, %s26087_s0 }
 0xbf8   : > { %18269 = vrot.lane.b32.xlu1 %v25544_v17, %s26087_s0 }
 0xbf9   : > { %18275 = vrot.lane.b32.xlu0 %v25580_v6, %s26087_s0 }
 0xbfc   : > { %18277 = vrot.lane.b32.xlu1 %v25600_v14, %s26087_s0 }
 0xbfd   : > { %18279 = vrot.lane.b32.xlu0 %v15427_v56, %s26087_s0 }
 0xc00   : > { %18281 = vrot.lane.b32.xlu1 %v25633_v26, %s26087_s0 }
 0xc01   : > { %18645 = vperm.xlu0 %21054, %v18637_v12  }
 0xc02   : > { %v15458_v57 = vpop.permute.xlu1 %15457 }
 0xc03   : > { %v15460_v46 = vpop.permute.xlu0 %15459 }
 0xc04   : > { %18640 = vperm.xlu1 %21055, %v18636_v63   ;;  %v15471_v34 = vsel %vm15469_vm3, %v15458_v57, %v15460_v46 }
 0xc05   : > { %15489 = vmatprep.subr.mxu1 %v15471_v34  ;;  %18671 = vperm.xlu0 %21054, %v18663_v20  }
 0xc06   : > { %v15456_v42 = vpop.permute.xlu1 %15455 }
 0xc07   : > { %v15470_v9 = vsel %vm15469_vm3, %v15456_v42, %v15458_v57  ;;  %v15462_v39 = vpop.permute.xlu0 %15461 }
 0xc08   : > { %15490 = vmatpush1.msra.mxu1 %v15470_v9  ;;  %18666 = vperm.xlu1 %21055, %v18662_v52   ;;  %v15472_v48 = vsel %vm15469_vm3, %v15460_v46, %v15462_v39  ;;  %v19393_v9 = vld [vmem:[%s26048_s18 + $0x30] sm:$0xff] }
 0xc09   : > { %19367 = vmatmul.mubr.msk.f32.vlgmr.msra.gmra.mrb[28].mxu1 %vm1283_vm10, %v19365_v29 }
 0xc0a   : > { %v15464_v49 = vpop.permute.xlu1 %15463  ;;  %15559 = vmatprep.mubr.f32.mxu1 %v25455_v37 }
 0xc0b   : > { %v15466_v47 = vpop.permute.xlu0 %15465  ;;  %v15473_v41 = vsel %vm15469_vm3, %v15462_v39, %v15464_v49 }
 0xc0c   : > { %15566 = vmatprep.subr.mxu1 %v15473_v41  ;;  %v15474_v61 = vsel %vm15469_vm3, %v15464_v49, %v15466_v47  ;;  %v19394_v41 = vld [vmem:[%s26048_s18 + $0x38] sm:$0xf] }
 0xc0d   : > { %19368 = vmatmul.mubr.msk.f32.gmra.mrb[30].mxu1 %vm1283_vm10, %v19366_v10 }
 0xc0e   : > { %15567 = vmatpush1.msra.mxu1 %v15472_v48  ;;  %v15468_v16 = vpop.permute.xlu1 %15467  ;;  %15630 = vmatprep.mubr.f32.mxu1 %v25455_v37 }
 0xc0f   : > { %v15475_v60 = vsel %vm15469_vm3, %v15466_v47, %v15468_v16  ;;  %v15798_v4 = vpop.permute.xlu0 %15797  ;;  %vm16152_vm3 = vcmask 441344  }
 0xc10   : > { %15643 = vmatprep.subr.mxu1 %v15475_v60 }
 0xc11   : > { %19369 = vmatmul.mubr.msk.f32.vlgmr.msra.gmra.mrb[32].mxu1 %vm1283_vm10, %v19365_v29 }
 0xc12   : > { %15644 = vmatpush1.msra.mxu1 %v15474_v61  ;;  %15636 = vmatprep.mubr.f32.mxu1 %v25455_v37  ;;  %v15800_v8 = vpop.permute.xlu1 %15799  ;;  %v19403_v61 = vld [vmem:[%s26048_s18 + $0x40] sm:$0xff] }
 0xc13   : > { %19861 = vmatprep.subr.mxu1 %v15468_v16  ;;  %v15796_v28 = vpop.permute.xlu0 %15795  ;;  %v15811_v33 = vsel %vm15809_vm9, %v15798_v4, %v15800_v8 }
 0xc14   : > { %v15810_v58 = vsel %vm15809_vm9, %v15796_v28, %v15798_v4 }
 0xc15   : > { %19370 = vmatmul.mubr.msk.f32.gmra.mrb[34].mxu1 %vm1283_vm10, %v19366_v10 }
 0xc16   : > { %15707 = vmatprep.mubr.f32.mxu1 %v25455_v37  ;;  %v15802_v31 = vpop.permute.xlu1 %15801 }
 0xc17   : > { %v15804_v55 = vpop.permute.xlu0 %15803  ;;  %v15812_v51 = vsel %vm15809_vm9, %v15800_v8, %v15802_v31 }
 0xc18   : > { %v15813_v15 = vsel %vm15809_vm9, %v15802_v31, %v15804_v55 }
 0xc19   : > { %19371 = vmatmul.mubr.msk.f32.vlgmr.msra.gmra.mrb[36].mxu1 %vm1283_vm10, %v19365_v29 }
 0xc1a   : > { %19862 = vmatpush3.msra.mxu1 %v15468_v16  ;;  %15713 = vmatprep.mubr.f32.mxu1 %v25455_v37  ;;  %v15806_v17 = vpop.permute.xlu1 %15805 }
 0xc1b   : > { %15829 = vmatprep.subr.mxu1 %v15811_v33  ;;  %v15808_v18 = vpop.permute.xlu0 %15807  ;;  %v15814_v62 = vsel %vm15809_vm9, %v15804_v55, %v15806_v17 }
 0xc1c   : > { %v15815_v22 = vsel %vm15809_vm9, %v15806_v17, %v15808_v18  ;;  %vm16527_vm9 = vcmask 15360  }
 0xc1d   : > { %19372 = vmatmul.mubr.msk.f32.gmra.mrb[38].mxu1 %vm1283_vm10, %v19366_v10 }
 0xc1e   : > { %19863 = vmatprep.mubr.msk.f32.mxu1 %vm1283_vm10, %v19365_v29  ;;  %v16141_v35 = vpop.permute.xlu1 %16140 }
 0xc1f   : > { %v16143_v50 = vpop.permute.xlu0 %16142 }
 0xc20   : > { %v16154_v11 = vsel %vm16152_vm3, %v16141_v35, %v16143_v50 }
 0xc21   : > { %19864 = vmatmul.mubr.msk.f32.vlgmr.msra.gmra.mrb[40].mxu1 %vm1283_vm10, %v19366_v10 }
 0xc22   : > { %15830 = vmatpush1.msra.mxu1 %v15810_v58  ;;  %15893 = vmatprep.mubr.f32.mxu1 %v25455_v37  ;;  %v16139_v36 = vpop.permute.xlu1 %16138 }
 0xc23   : > { %15906 = vmatprep.subr.mxu1 %v15813_v15  ;;  %v16145_v45 = vpop.permute.xlu0 %16144  ;;  %v16153_v1 = vsel %vm16152_vm3, %v16139_v36, %v16141_v35  ;;  %v19414_v15 = vld [vmem:[%s26048_s18 + $0x58] sm:$0xf]  ;;  %v19423_v36 = vld [vmem:[%s26048_s18 + $0x60] sm:$0xff] }
 0xc24   : > { %v16155_v13 = vsel %vm16152_vm3, %v16143_v50, %v16145_v45 }
 0xc25   : > { %19375 = vmatmul.mubr.msk.f32.vlgmr.msra.gmra.mrb[28].mxu1 %vm1283_vm10, %v15443_v25 }
 0xc26   : > { %15907 = vmatpush1.msra.mxu1 %v15812_v51  ;;  %15899 = vmatprep.mubr.f32.mxu1 %v25455_v37  ;;  %v16147_v6 = vpop.permute.xlu1 %16146 }
 0xc27   : > { %15983 = vmatprep.subr.mxu1 %v15815_v22  ;;  %v16156_v32 = vsel %vm16152_vm3, %v16145_v45, %v16147_v6  ;;  %v16149_v56 = vpop.permute.xlu0 %16148 }
 0xc28   : > { %v16157_v12 = vsel %vm16152_vm3, %v16147_v6, %v16149_v56 }
 0xc29   : > { %19376 = vmatmul.mubr.msk.f32.gmra.mrb[30].mxu1 %vm1283_vm10, %v15444_v3 }
 0xc2a   : > { %15970 = vmatprep.mubr.f32.mxu1 %v25455_v37  ;;  %v16151_v14 = vpop.permute.xlu1 %16150 }
 0xc2b   : > { %v16158_v40 = vsel %vm16152_vm3, %v16149_v56, %v16151_v14  ;;  %v16514_v63 = vpop.permute.xlu0 %16513  ;;  %vm17570_vm3 = vcmask 605184  }
 0xc2d   : > { %19377 = vmatmul.mubr.msk.f32.vlgmr.msra.gmra.mrb[32].mxu1 %vm1283_vm10, %v15443_v25 }
 0xc2e   : > { %15984 = vmatpush1.msra.mxu1 %v15814_v62  ;;  %15976 = vmatprep.mubr.f32.mxu1 %v25455_v37  ;;  %v16516_v57 = vpop.permute.xlu1 %16515 }
 0xc2f   : > { %19866 = vmatprep.subr.mxu1 %v15808_v18  ;;  %v16512_v20 = vpop.permute.xlu0 %16511  ;;  %v16529_v46 = vsel %vm16527_vm9, %v16514_v63, %v16516_v57 }
 0xc30   : > { %v16528_v42 = vsel %vm16527_vm9, %v16512_v20, %v16514_v63  ;;  %v19433_v20 = vld [vmem:[%s26048_s18 + $0x70] sm:$0xff] }
 0xc31   : > { %19378 = vmatmul.mubr.msk.f32.gmra.mrb[34].mxu1 %vm1283_vm10, %v15444_v3 }
 0xc32   : > { %16047 = vmatprep.mubr.f32.mxu1 %v25455_v37  ;;  %v16518_v34 = vpop.permute.xlu1 %16517 }
 0xc33   : > { %v16520_v52 = vpop.permute.xlu0 %16519  ;;  %v16530_v10 = vsel %vm16527_vm9, %v16516_v57, %v16518_v34 }
 0xc34   : > { %v16531_v29 = vsel %vm16527_vm9, %v16518_v34, %v16520_v52 }
 0xc35   : > { %19379 = vmatmul.mubr.msk.f32.vlgmr.msra.gmra.mrb[36].mxu1 %vm1283_vm10, %v15443_v25 }
 0xc36   : > { %19867 = vmatpush3.msra.mxu1 %v15808_v18  ;;  %16053 = vmatprep.mubr.f32.mxu1 %v25455_v37  ;;  %v16522_v39 = vpop.permute.xlu1 %16521 }
 0xc37   : > { %16172 = vmatprep.subr.mxu1 %v16154_v11  ;;  %v16524_v49 = vpop.permute.xlu0 %16523  ;;  %v16532_v16 = vsel %vm16527_vm9, %v16520_v52, %v16522_v39 }
 0xc38   : > { %v16533_v47 = vsel %vm16527_vm9, %v16522_v39, %v16524_v49 }
 0xc39   : > { %19380 = vmatmul.mubr.msk.f32.gmra.mrb[38].mxu1 %vm1283_vm10, %v15444_v3 }
 0xc3a   : > { %19868 = vmatprep.mubr.msk.f32.mxu1 %vm1283_vm10, %v15443_v25  ;;  %v16526_v48 = vpop.permute.xlu1 %16525 }
 0xc3b   : > { %v16534_v60 = vsel %vm16527_vm9, %v16524_v49, %v16526_v48  ;;  %v21937_v49 = vld [vmem:[#allocation2] sm:$0xff] }
 0xc3d   : > { %19869 = vmatmul.mubr.msk.f32.vlgmr.msra.gmra.mrb[40].mxu1 %vm1283_vm10, %v15444_v3 }
 0xc3e   : > { %16173 = vmatpush1.msra.mxu1 %v16153_v1  ;;  %16236 = vmatprep.mubr.f32.mxu1 %v25455_v37 }
 0xc3f   : > { %16249 = vmatprep.subr.mxu1 %v16156_v32  ;;  %v19424_v32 = vld [vmem:[%s26048_s18 + $0x68] sm:$0xf] }
 0xc41   : > { %19385 = vmatmul.mubr.msk.f32.vlgmr.msra.gmra.mrb[28].mxu1 %vm1283_vm10, %v19383_v5 }
 0xc42   : > { %16250 = vmatpush1.msra.mxu1 %v16155_v13  ;;  %16242 = vmatprep.mubr.f32.mxu1 %v25455_v37 }
 0xc43   : > { %16326 = vmatprep.subr.mxu1 %v16158_v40 }
 0xc45   : > { %19386 = vmatmul.mubr.msk.f32.gmra.mrb[30].mxu1 %vm1283_vm10, %v19384_v43 }
 0xc46   : > { %16313 = vmatprep.mubr.f32.mxu1 %v25455_v37 }
 0xc49   : > { %19387 = vmatmul.mubr.msk.f32.vlgmr.msra.gmra.mrb[32].mxu1 %vm1283_vm10, %v19383_v5 }
 0xc4a   : > { %16327 = vmatpush1.msra.mxu1 %v16157_v12  ;;  %16319 = vmatprep.mubr.f32.mxu1 %v25455_v37 }
 0xc4b   : > { %19871 = vmatprep.subr.mxu1 %v16151_v14 }
 0xc4d   : > { %19388 = vmatmul.mubr.msk.f32.gmra.mrb[34].mxu1 %vm1283_vm10, %v19384_v43 }
 0xc4e   : > { %16390 = vmatprep.mubr.f32.mxu1 %v25455_v37 }
 0xc51   : > { %19389 = vmatmul.mubr.msk.f32.vlgmr.msra.gmra.mrb[36].mxu1 %vm1283_vm10, %v19383_v5 }
 0xc52   : > { %19872 = vmatpush3.msra.mxu1 %v16151_v14  ;;  %16396 = vmatprep.mubr.f32.mxu1 %v25455_v37 }
 0xc53   : > { %16548 = vmatprep.subr.mxu1 %v16529_v46 }
 0xc55   : > { %19390 = vmatmul.mubr.msk.f32.gmra.mrb[38].mxu1 %vm1283_vm10, %v19384_v43 }
 0xc56   : > { %19873 = vmatprep.mubr.msk.f32.mxu1 %vm1283_vm10, %v19383_v5 }
 0xc59   : > { %19874 = vmatmul.mubr.msk.f32.vlgmr.msra.gmra.mrb[40].mxu1 %vm1283_vm10, %v19384_v43 }
 0xc5a   : > { %16549 = vmatpush1.msra.mxu1 %v16528_v42  ;;  %16612 = vmatprep.mubr.f32.mxu1 %v25455_v37 }
 0xc5b   : > { %16625 = vmatprep.subr.mxu1 %v16531_v29  ;;  %v19434_v29 = vld [vmem:[%s26048_s18 + $0x78] sm:$0xf] }
 0xc5d   : > { %19395 = vmatmul.mubr.msk.f32.vlgmr.msra.gmra.mrb[28].mxu1 %vm1283_vm10, %v19393_v9 }
 0xc5e   : > { %16626 = vmatpush1.msra.mxu1 %v16530_v10  ;;  %16618 = vmatprep.mubr.f32.mxu1 %v25455_v37 }
 0xc5f   : > { %16702 = vmatprep.subr.mxu1 %v16533_v47 }
 0xc61   : > { %19396 = vmatmul.mubr.msk.f32.gmra.mrb[30].mxu1 %vm1283_vm10, %v19394_v41 }
 0xc62   : > { %16689 = vmatprep.mubr.f32.mxu1 %v25455_v37 }
 0xc65   : > { %19397 = vmatmul.mubr.msk.f32.vlgmr.msra.gmra.mrb[32].mxu1 %vm1283_vm10, %v19393_v9 }
 0xc66   : > { %16703 = vmatpush1.msra.mxu1 %v16532_v16  ;;  %16695 = vmatprep.mubr.f32.mxu1 %v25455_v37 }
 0xc67   : > { %19876 = vmatprep.subr.mxu1 %v16534_v60 }
 0xc69   : > { %19398 = vmatmul.mubr.msk.f32.gmra.mrb[34].mxu1 %vm1283_vm10, %v19394_v41 }
 0xc6a   : > { %16766 = vmatprep.mubr.f32.mxu1 %v25455_v37 }
 0xc6d   : > { %19399 = vmatmul.mubr.msk.f32.vlgmr.msra.gmra.mrb[36].mxu1 %vm1283_vm10, %v19393_v9 }
 0xc6e   : > { %19877 = vmatpush3.msra.mxu1 %v16534_v60  ;;  %16772 = vmatprep.mubr.f32.mxu1 %v25455_v37 }
 0xc6f   : > { %21938 = vmatprep.subr.msk.mxu1 %vm15416_vm7, %v25539_v0  ;;  %v17203_v0 = vpop.permute.xlu0 %17202 }
 0xc71   : > { %19400 = vmatmul.mubr.msk.f32.gmra.mrb[38].mxu1 %vm1283_vm10, %v19394_v41 }
 0xc72   : > { %19878 = vmatprep.mubr.msk.f32.mxu1 %vm1283_vm10, %v19393_v9 }
 0xc75   : > { %19879 = vmatmul.mubr.msk.f32.vlgmr.msra.gmra.mrb[40].mxu1 %vm1283_vm10, %v19394_v41 }
 0xc76   : > { %21939 = vmatpush1.msk.msra.mxu1 %vm15415_vm5, %v25532_v23  ;;  %16941 = vmatprep.mubr.f32.mxu1 %v25455_v37  ;;  %v19404_v23 = vld [vmem:[%s26048_s18 + $0x48] sm:$0xf] }
 0xc77   : > { %21940 = vmatprep.subr.msk.mxu1 %vm15418_vm13, %v25569_v44  ;;  %v17201_v44 = vpop.permute.xlu0 %17200 }
 0xc78   : > { %v17214_v8 = vsel %vm839_vm2, %v17201_v44, %v17203_v0 }
 0xc79   : > { %19405 = vmatmul.mubr.msk.f32.vlgmr.msra.gmra.mrb[28].mxu1 %vm1283_vm10, %v19403_v61 }
 0xc7a   : > { %21941 = vmatpush1.msk.msra.mxu1 %vm15417_vm11, %v25560_v59  ;;  %16947 = vmatprep.mubr.f32.mxu1 %v25455_v37  ;;  %v17205_v59 = vpop.permute.xlu1 %17204 }
 0xc7b   : > { %21942 = vmatprep.subr.msk.mxu1 %vm15420_vm12, %v25595_v7  ;;  %v17215_v7 = vsel %vm839_vm2, %v17203_v0, %v17205_v59  ;;  %v17209_v4 = vpop.permute.xlu0 %17208 }
 0xc7d   : > { %19406 = vmatmul.mubr.msk.f32.gmra.mrb[30].mxu1 %vm1283_vm10, %v19404_v23 }
 0xc7e   : > { %17018 = vmatprep.mubr.f32.mxu1 %v25455_v37 }
 0xc7f   : > { %v17213_v31 = vpop.permute.xlu0 %17212 }
 0xc81   : > { %19407 = vmatmul.mubr.msk.f32.vlgmr.msra.gmra.mrb[32].mxu1 %vm1283_vm10, %v19403_v61 }
 0xc82   : > { %21943 = vmatpush1.msk.msra.mxu1 %vm15419_vm14, %v25590_v27  ;;  %17024 = vmatprep.mubr.f32.mxu1 %v25455_v37  ;;  %v17207_v27 = vpop.permute.xlu1 %17206 }
 0xc83   : > { %19881 = vmatprep.subr.mxu1 %v25633_v26  ;;  %v17217_v28 = vsel %vm839_vm2, %v17207_v27, %v17209_v4  ;;  %v17216_v55 = vsel %vm839_vm2, %v17205_v59, %v17207_v27  ;;  %v17561_v18 = vpop.permute.xlu0 %17560 }
 0xc85   : > { %19408 = vmatmul.mubr.msk.f32.gmra.mrb[34].mxu1 %vm1283_vm10, %v19404_v23 }
 0xc86   : > { %17095 = vmatprep.mubr.f32.mxu1 %v25455_v37  ;;  %v17211_v33 = vpop.permute.xlu1 %17210 }
 0xc87   : > { %v17219_v58 = vsel %vm839_vm2, %v17211_v33, %v17213_v31  ;;  %v17218_v25 = vsel %vm839_vm2, %v17209_v4, %v17211_v33  ;;  %v17563_v62 = vpop.permute.xlu0 %17562  ;;  %vm26103_vm2 = vcmask 130048  }
 0xc88   : > { %v17573_v6 = vsel %vm17570_vm3, %v17561_v18, %v17563_v62 }
 0xc89   : > { %19409 = vmatmul.mubr.msk.f32.vlgmr.msra.gmra.mrb[36].mxu1 %vm1283_vm10, %v19403_v61 }
 0xc8a   : > { %19882 = vmatpush3.msra.mxu1 %v25633_v26  ;;  %17101 = vmatprep.mubr.f32.mxu1 %v25455_v37  ;;  %v19413_v26 = vld [vmem:[%s26048_s18 + $0x50] sm:$0xff]  ;;  %v17559_v17 = vpop.permute.xlu1 %17558 }
 0xc8b   : > { %17233 = vmatprep.subr.mxu1 %v17215_v7  ;;  %v17572_v22 = vsel %vm17570_vm3, %v17559_v17, %v17561_v18  ;;  %v17567_v45 = vpop.permute.xlu0 %17566  ;;  %v19444_v7 = vld [vmem:[%s26048_s18 + $0x88] sm:$0xf] }
 0xc8d   : > { %19410 = vmatmul.mubr.msk.f32.gmra.mrb[38].mxu1 %vm1283_vm10, %v19404_v23 }
 0xc8e   : > { %19883 = vmatprep.mubr.msk.f32.mxu1 %vm1283_vm10, %v19403_v61  ;;  %v17557_v51 = vpop.permute.xlu1 %17556  ;;  %v19443_v61 = vld [vmem:[%s26048_s18 + $0x80] sm:$0xff] }
 0xc8f   : > { %v17571_v35 = vsel %vm17570_vm3, %v17557_v51, %v17559_v17  ;;  %v17916_v14 = vpop.permute.xlu0 %17915 }
 0xc91   : > { %19884 = vmatmul.mubr.msk.f32.vlgmr.msra.gmra.mrb[40].mxu1 %vm1283_vm10, %v19404_v23 }
 0xc92   : > { %17234 = vmatpush1.msra.mxu1 %v17214_v8  ;;  %17297 = vmatprep.mubr.f32.mxu1 %v25455_v37  ;;  %v17565_v3 = vpop.permute.xlu1 %17564 }
 0xc93   : > { %17310 = vmatprep.subr.mxu1 %v17217_v28  ;;  %v17574_v50 = vsel %vm17570_vm3, %v17563_v62, %v17565_v3  ;;  %v17575_v5 = vsel %vm17570_vm3, %v17565_v3, %v17567_v45  ;;  %v17914_v56 = vpop.permute.xlu0 %17913 }
 0xc94   : > { %v17927_v63 = vsel %vm1063_vm6, %v17914_v56, %v17916_v14 }
 0xc95   : > { %19415 = vmatmul.mubr.msk.f32.vlgmr.msra.gmra.mrb[28].mxu1 %vm1283_vm10, %v19413_v26 }
 0xc96   : > { %17311 = vmatpush1.msra.mxu1 %v17216_v55  ;;  %17303 = vmatprep.mubr.f32.mxu1 %v25455_v37  ;;  %v17569_v11 = vpop.permute.xlu1 %17568 }
 0xc97   : > { %17387 = vmatprep.subr.mxu1 %v17219_v58  ;;  %v17576_v1 = vsel %vm17570_vm3, %v17567_v45, %v17569_v11  ;;  %v17922_v12 = vpop.permute.xlu0 %17921 }
 0xc99   : > { %19416 = vmatmul.mubr.msk.f32.gmra.mrb[30].mxu1 %vm1283_vm10, %v19414_v15 }
 0xc9a   : > { %17374 = vmatprep.mubr.f32.mxu1 %v25455_v37  ;;  %v17918_v13 = vpop.permute.xlu1 %17917 }
 0xc9b   : > { %v17928_v40 = vsel %vm1063_vm6, %v17916_v14, %v17918_v13  ;;  %v17926_v34 = vpop.permute.xlu0 %17925 }
 0xc9d   : > { %19417 = vmatmul.mubr.msk.f32.vlgmr.msra.gmra.mrb[32].mxu1 %vm1283_vm10, %v19413_v26 }
 0xc9e   : > { %17388 = vmatpush1.msra.mxu1 %v17218_v25  ;;  %17380 = vmatprep.mubr.f32.mxu1 %v25455_v37  ;;  %v17920_v43 = vpop.permute.xlu1 %17919 }
 0xc9f   : > { %19886 = vmatprep.subr.mxu1 %v17213_v31  ;;  %v17930_v57 = vsel %vm1063_vm6, %v17920_v43, %v17922_v12  ;;  %v17929_v52 = vsel %vm1063_vm6, %v17918_v13, %v17920_v43  ;;  %v18274_v10 = vpop.permute.xlu0 %18273 }
 0xca1   : > { %19418 = vmatmul.mubr.msk.f32.gmra.mrb[34].mxu1 %vm1283_vm10, %v19414_v15 }
 0xca2   : > { %17451 = vmatprep.mubr.f32.mxu1 %v25455_v37  ;;  %v17924_v46 = vpop.permute.xlu1 %17923 }
 0xca3   : > { %v17932_v42 = vsel %vm1063_vm6, %v17924_v46, %v17926_v34  ;;  %v17931_v9 = vsel %vm1063_vm6, %v17922_v12, %v17924_v46  ;;  %vm26104_vm6 = vcmask 97280  }
 0xca5   : > { %19419 = vmatmul.mubr.msk.f32.vlgmr.msra.gmra.mrb[36].mxu1 %vm1283_vm10, %v19413_v26 }
 0xca6   : > { %19887 = vmatpush3.msra.mxu1 %v17213_v31  ;;  %17457 = vmatprep.mubr.f32.mxu1 %v25455_v37  ;;  %v18272_v39 = vpop.permute.xlu1 %18271 }
 0xca7   : > { %17590 = vmatprep.subr.mxu1 %v17572_v22  ;;  %v18284_v41 = vsel %vm1175_vm8, %v18272_v39, %v18274_v10 }
 0xca9   : > { %19420 = vmatmul.mubr.msk.f32.gmra.mrb[38].mxu1 %vm1283_vm10, %v19414_v15 }
 0xcaa   : > { %19888 = vmatprep.mubr.msk.f32.mxu1 %vm1283_vm10, %v19413_v26  ;;  %v18270_v47 = vpop.permute.xlu1 %18269 }
 0xcab   : > { %v18283_v16 = vsel %vm1175_vm8, %v18270_v47, %v18272_v39 }
 0xcad   : > { %19889 = vmatmul.mubr.msk.f32.vlgmr.msra.gmra.mrb[40].mxu1 %vm1283_vm10, %v19414_v15 }
 0xcae   : > { %17591 = vmatpush1.msra.mxu1 %v17571_v35  ;;  %17654 = vmatprep.mubr.f32.mxu1 %v25455_v37  ;;  %v18278_v48 = vpop.permute.xlu1 %18277 }
 0xcaf   : > { %17667 = vmatprep.subr.mxu1 %v17574_v50 }
 0xcb1   : > { %19425 = vmatmul.mubr.msk.f32.vlgmr.msra.gmra.mrb[28].mxu1 %vm1283_vm10, %v19423_v36 }
 0xcb2   : > { %17668 = vmatpush1.msra.mxu1 %v17573_v6  ;;  %17660 = vmatprep.mubr.f32.mxu1 %v25455_v37  ;;  %v18282_v23 = vpop.permute.xlu1 %18281 }
 0xcb3   : > { %17744 = vmatprep.subr.mxu1 %v17576_v1 }
 0xcb5   : > { %19426 = vmatmul.mubr.msk.f32.gmra.mrb[30].mxu1 %vm1283_vm10, %v19424_v32 }
 0xcb6   : > { %17731 = vmatprep.mubr.f32.mxu1 %v25455_v37  ;;  %v25933_v4 = vpop.permute.xlu1 %18640 }
 0xcb9   : > { %19427 = vmatmul.mubr.msk.f32.vlgmr.msra.gmra.mrb[32].mxu1 %vm1283_vm10, %v19423_v36 }
 0xcba   : > { %17745 = vmatpush1.msra.mxu1 %v17575_v5  ;;  %17737 = vmatprep.mubr.f32.mxu1 %v25455_v37  ;;  %v25938_v58 = vpop.permute.xlu1 %18666 }
 0xcbb   : > { %19891 = vmatprep.subr.mxu1 %v17569_v11 }
 0xcbd   : > { %19428 = vmatmul.mubr.msk.f32.gmra.mrb[34].mxu1 %vm1283_vm10, %v19424_v32 }
 0xcbe   : > { %17808 = vmatprep.mubr.f32.mxu1 %v25455_v37 }
 0xcc1   : > { %19429 = vmatmul.mubr.msk.f32.vlgmr.msra.gmra.mrb[36].mxu1 %vm1283_vm10, %v19423_v36 }
 0xcc2   : > { %19892 = vmatpush3.msra.mxu1 %v17569_v11  ;;  %17814 = vmatprep.mubr.f32.mxu1 %v25455_v37 }
 0xcc3   : > { %17946 = vmatprep.subr.mxu1 %v17928_v40 }
 0xcc5   : > { %19430 = vmatmul.mubr.msk.f32.gmra.mrb[38].mxu1 %vm1283_vm10, %v19424_v32 }
 0xcc6   : > { %19893 = vmatprep.mubr.msk.f32.mxu1 %vm1283_vm10, %v19423_v36 }
 0xcc9   : > { %19894 = vmatmul.mubr.msk.f32.vlgmr.msra.gmra.mrb[40].mxu1 %vm1283_vm10, %v19424_v32 }
 0xcca   : > { %17947 = vmatpush1.msra.mxu1 %v17927_v63  ;;  %18010 = vmatprep.mubr.f32.mxu1 %v25455_v37 }
 0xccb   : > { %18023 = vmatprep.subr.mxu1 %v17930_v57 }
 0xccd   : > { %19435 = vmatmul.mubr.msk.f32.vlgmr.msra.gmra.mrb[28].mxu1 %vm1283_vm10, %v19433_v20 }
 0xcce   : > { %18024 = vmatpush1.msra.mxu1 %v17929_v52  ;;  %18016 = vmatprep.mubr.f32.mxu1 %v25455_v37 }
 0xccf   : > { %18100 = vmatprep.subr.mxu1 %v17932_v42 }
 0xcd1   : > { %19436 = vmatmul.mubr.msk.f32.gmra.mrb[30].mxu1 %vm1283_vm10, %v19434_v29 }
 0xcd2   : > { %18087 = vmatprep.mubr.f32.mxu1 %v25455_v37 }
 0xcd5   : > { %19437 = vmatmul.mubr.msk.f32.vlgmr.msra.gmra.mrb[32].mxu1 %vm1283_vm10, %v19433_v20 }
 0xcd6   : > { %18101 = vmatpush1.msra.mxu1 %v17931_v9  ;;  %18093 = vmatprep.mubr.f32.mxu1 %v25455_v37  ;;  %v18276_v37 = vpop.permute.xlu0 %18275 }
 0xcd7   : > { %19896 = vmatprep.subr.mxu1 %v17926_v34  ;;  %v18286_v60 = vsel %vm1175_vm8, %v18276_v37, %v18278_v48  ;;  %v18285_v0 = vsel %vm1175_vm8, %v18274_v10, %v18276_v37 }
 0xcd9   : > { %19438 = vmatmul.mubr.msk.f32.gmra.mrb[34].mxu1 %vm1283_vm10, %v19434_v29 }
 0xcda   : > { %18164 = vmatprep.mubr.f32.mxu1 %v21937_v49  ;;  %v18280_v59 = vpop.permute.xlu0 %18279 }
 0xcdb   : > { %v18288_v44 = vsel %vm1175_vm8, %v18280_v59, %v18282_v23  ;;  %v18287_v27 = vsel %vm1175_vm8, %v18278_v48, %v18280_v59  ;;  %vm26105_vm8 = vmmov %vm26104_vm6 }
 0xcdd   : > { %19439 = vmatmul.mubr.msk.f32.vlgmr.msra.gmra.mrb[36].mxu1 %vm1283_vm10, %v19433_v20 }
 0xcde   : > { %19897 = vmatpush3.msra.mxu1 %v17926_v34  ;;  %18170 = vmatprep.mubr.f32.mxu1 %v21937_v49  ;;  %v25935_v33 = vpop.permute.xlu0 %18645 }
 0xcdf   : > { %18302 = vmatprep.subr.mxu1 %v18284_v41 }
 0xce1   : > { %19440 = vmatmul.mubr.msk.f32.gmra.mrb[38].mxu1 %vm1283_vm10, %v19434_v29 }
 0xce2   : > { %19898 = vmatprep.mubr.msk.f32.mxu1 %vm1283_vm10, %v19433_v20  ;;  %v25946_v50 = vpop.permute.xlu0 %18671 }
 0xce5   : > { %19899 = vmatmul.mubr.msk.f32.vlgmr.msra.gmra.mrb[40].mxu1 %vm1283_vm10, %v19434_v29 }
 0xce6   : > { %18303 = vmatpush1.msra.mxu1 %v18283_v16  ;;  %18366 = vmatprep.mubr.f32.mxu1 %v21937_v49 }
 0xce7   : > { %18379 = vmatprep.subr.mxu1 %v18286_v60 }
 0xce9   : > { %19445 = vmatmul.mubr.msk.f32.vlgmr.msra.gmra.mrb[28].mxu1 %vm1283_vm10, %v19443_v61 }
 0xcea   : > { %18380 = vmatpush1.msra.mxu1 %v18285_v0  ;;  %18372 = vmatprep.mubr.f32.mxu1 %v21937_v49 }
 0xceb   : > { %18456 = vmatprep.subr.mxu1 %v18288_v44 }
 0xced   : > { %19446 = vmatmul.mubr.msk.f32.gmra.mrb[30].mxu1 %vm1283_vm10, %v19444_v7 }
 0xcee   : > { %18443 = vmatprep.mubr.f32.mxu1 %v21937_v49 }
 0xcf1   : > { %19447 = vmatmul.mubr.msk.f32.vlgmr.msra.gmra.mrb[32].mxu1 %vm1283_vm10, %v19443_v61 }
 0xcf2   : > { %18457 = vmatpush1.msra.mxu1 %v18287_v27  ;;  %18449 = vmatprep.mubr.f32.mxu1 %v21937_v49 }
 0xcf3   : > { %19901 = vmatprep.subr.mxu1 %v18282_v23 }
 0xcf5   : > { %19448 = vmatmul.mubr.msk.f32.gmra.mrb[34].mxu1 %vm1283_vm10, %v19444_v7 }
 0xcf6   : > { %18520 = vmatprep.mubr.f32.mxu1 %v21937_v49 }
 0xcf9   : > { %19449 = vmatmul.mubr.msk.f32.vlgmr.msra.gmra.mrb[36].mxu1 %vm1283_vm10, %v19443_v61 }
 0xcfa   : > { %19902 = vmatpush3.msra.mxu1 %v18282_v23  ;;  %18526 = vmatprep.mubr.f32.mxu1 %v21937_v49 }
 0xcfd   : > { %19450 = vmatmul.mubr.msk.f32.gmra.mrb[38].mxu1 %vm1283_vm10, %v19444_v7 }
 0xcfe   : > { %19903 = vmatprep.mubr.msk.f32.mxu1 %vm1283_vm10, %v19443_v61 }
 0xd01   : > { %19904 = vmatmul.mubr.msk.f32.vlgmr.msra.gmra.mrb[40].mxu1 %vm1283_vm10, %v19444_v7  ;;  %vm18816_vm10 = vcmask 1024  }
 0xdbc   : > { %v18368_v8 = vpop.f32.mrb[28].mxu1 }
 0xdbd   : > { %v18622_v28 = vmax.f32 %v18368_v8, 0.0  ;;  %v18370_v26 = vpop.f32.mrb[29].mxu1 }
 0xdbe   : > { %v18623_v31 = vmax.f32 %v18370_v26, 0.0 }
 0xdbf   : > { %v18648_v55 = vmul.f32 %v25933_v4, %v18622_v28 }
 0xdc0   : > { %v18649_v15 = vmul.f32 %v25933_v4, %v18623_v31  ;;  %v18374_v25 = vpop.f32.mrb[30].mxu1 }
 0xdc1   : > { %v18674_v17 = vadd.f32 %v25938_v58, %v18648_v55  ;;  %v18629_v18 = vmax.f32 %v18374_v25, 0.0  ;;  %v18376_v51 = vpop.f32.mrb[31].mxu1 }
 0xdc2   : > { %v18675_v22 = vadd.f32 %v25938_v58, %v18649_v15  ;;  %v18630_v3 = vmax.f32 %v18376_v51, 0.0 }
 0xdc3   : > { %v18688_v62 = vsel %vm15415_vm5, %v18674_v17, 0.0  ;;  %v18655_v35 = vmul.f32 %v25935_v33, %v18629_v18 }
 0xdc4   : > { %v18689_v36 = vsel %vm15416_vm7, %v18675_v22, 0.0  ;;  %v18656_v11 = vmul.f32 %v25935_v33, %v18630_v3  ;;  %v18445_v6 = vpop.f32.mrb[32].mxu1 }
 0xdc5   : > { %v18702_v45 = vadd.f32 %v18689_v36, %v18688_v62  ;;  %v18681_v1 = vadd.f32 %v25946_v50, %v18655_v35  ;;  %v18624_v32 = vmax.f32 %v18445_v6, 0.0  ;;  %v18447_v5 = vpop.f32.mrb[33].mxu1 }
 0xdc6   : > { %v18682_v14 = vadd.f32 %v25946_v50, %v18656_v11  ;;  %v18625_v13 = vmax.f32 %v18447_v5, 0.0 }
 0xdc7   : > { %v18695_v56 = vsel %vm15415_vm5, %v18681_v1, 0.0  ;;  %v18650_v40 = vmul.f32 %v25933_v4, %v18624_v32 }
 0xdc8   : > { %v18711_v43 = vsel %vm5097_vm0, %v18695_v56, 0.0  ;;  %v18696_v12 = vsel %vm15416_vm7, %v18682_v14, 0.0  ;;  %v18651_v63 = vmul.f32 %v25933_v4, %v18625_v13  ;;  %v18451_v57 = vpop.f32.mrb[34].mxu1 }
 0xdc9   : > { %v18712_v20 = vsel %vm5097_vm0, %v18696_v12, 0.0  ;;  %v18676_v46 = vadd.f32 %v25938_v58, %v18650_v40  ;;  %v18631_v34 = vmax.f32 %v18451_v57, 0.0  ;;  %v18453_v52 = vpop.f32.mrb[35].mxu1 }
 0xdca   : > { %v18713_v42 = vadd.f32 %v18712_v20, %v18711_v43  ;;  %v18677_v30 = vadd.f32 %v25938_v58, %v18651_v63  ;;  %v18632_v29 = vmax.f32 %v18453_v52, 0.0 }
 0xdcb   : > { %v18690_v9 = vsel %vm15417_vm11, %v18676_v46, 0.0  ;;  %v18657_v39 = vmul.f32 %v25935_v33, %v18631_v34 }
 0xdcc   : > { %v18703_v53 = vadd.f32 %v18702_v45, %v18690_v9  ;;  %v18691_v49 = vsel %vm15418_vm13, %v18677_v30, 0.0  ;;  %v18658_v10 = vmul.f32 %v25935_v33, %v18632_v29  ;;  %v18522_v47 = vpop.f32.mrb[36].mxu1 }
 0xdcd   : > { %v18683_v41 = vadd.f32 %v25946_v50, %v18657_v39  ;;  %v18626_v48 = vmax.f32 %v18522_v47, 0.0  ;;  %v18524_v37 = vpop.f32.mrb[37].mxu1 }
 0xdce   : > { %v18704_v16 = vadd.f32 %v18703_v53, %v18691_v49  ;;  %v18684_v60 = vadd.f32 %v25946_v50, %v18658_v10  ;;  %v18627_v61 = vmax.f32 %v18524_v37, 0.0 }
 0xdcf   : > { %v18697_v23 = vsel %vm15417_vm11, %v18683_v41, 0.0  ;;  %v18652_v0 = vmul.f32 %v25933_v4, %v18626_v48 }
 0xdd0   : > { %v18714_v59 = vsel %vm5097_vm0, %v18697_v23, 0.0  ;;  %v18698_v44 = vsel %vm15418_vm13, %v18684_v60, 0.0  ;;  %v18653_v7 = vmul.f32 %v25933_v4, %v18627_v61  ;;  %v18528_v27 = vpop.f32.mrb[38].mxu1 }
 0xdd1   : > { %v18715_v8 = vadd.f32 %v18714_v59, %v18713_v42  ;;  %v18716_v28 = vsel %vm5097_vm0, %v18698_v44, 0.0  ;;  %v18678_v26 = vadd.f32 %v25938_v58, %v18652_v0  ;;  %v18633_v31 = vmax.f32 %v18528_v27, 0.0  ;;  %v18530_v55 = vpop.f32.mrb[39].mxu1  ;;  %v18729_v42 = vld [vmem:[%s26051_s21 + $0x8] sm:$0x3] }
 0xdd2   : > { %v18679_v2 = vadd.f32 %v25938_v58, %v18653_v7  ;;  %v18634_v15 = vmax.f32 %v18530_v55, 0.0 }
 0xdd3   : > { %v18717_v25 = vadd.f32 %v18716_v28, %v18715_v8  ;;  %v18692_v17 = vsel %vm15419_vm14, %v18678_v26, 0.0  ;;  %v18659_v19 = vmul.f32 %v25935_v33, %v18633_v31 }
 0xdd4   : > { %v18705_v18 = vadd.f32 %v18704_v16, %v18692_v17  ;;  %v18693_v51 = vsel %vm15420_vm12, %v18679_v2, 0.0  ;;  %v18660_v22 = vmul.f32 %v25935_v33, %v18634_v15  ;;  %v19905_v3 = vpop.f32.mrb[40].mxu1 }
 0xdd5   : > { %v18685_v62 = vadd.f32 %v25946_v50, %v18659_v19  ;;  %v18635_v35 = vmax.f32 %v19905_v3, 0.0  ;;  %v18599_v36 = vpop.f32.mrb[41].mxu1 }
 0xdd6   : > { %v18686_v11 = vadd.f32 %v25946_v50, %v18660_v22  ;;  %v18628_v6 = vmax.f32 %v18599_v36, 0.0  ;;  %v18706_v45 = vadd.f32 %v18705_v18, %v18693_v51 }
 0xdd7   : > { %v18699_v1 = vsel %vm15419_vm14, %v18685_v62, 0.0  ;;  %v18661_v32 = vmul.f32 %v25935_v33, %v18635_v35 }
 0xdd8   : > { %v18718_v5 = vsel %vm5097_vm0, %v18699_v1, 0.0  ;;  %v18700_v14 = vsel %vm15420_vm12, %v18686_v11, 0.0  ;;  %v18654_v13 = vmul.f32 %v25933_v4, %v18628_v6 }
 0xdd9   : > { %v18687_v56 = vadd.f32 %v25946_v50, %v18661_v32  ;;  %v18719_v40 = vadd.f32 %v18718_v5, %v18717_v25  ;;  %v18720_v43 = vsel %vm5097_vm0, %v18700_v14, 0.0  ;;  %v18728_v50 = vld [vmem:[%s26051_s21] sm:$0xff] }
 0xdda   : > { %v18680_v12 = vadd.f32 %v25938_v58, %v18654_v13  ;;  %19910 = vmatprep.mubr.msk.f32.mxu0 %vm26104_vm6, %v18728_v50 }
 0xddb   : > { %v18701_v21 = vsel %vm15421_vm4, %v18687_v56, 0.0  ;;  %v18721_v63 = vadd.f32 %v18720_v43, %v18719_v40 }
 0xddc   : > { %v18694_v33 = vsel %vm15421_vm4, %v18680_v12, 0.0  ;;  %v18722_v57 = vsel %vm4816_vm15, %v18701_v21, 0.0  ;;  %vm18814_vm15 = vcmask 7168  }
 0xddd   : > { %v18723_v24 = vadd.f32 %v18722_v57, %v18721_v63  ;;  %v18707_v20 = vsel %vm26103_vm2, %v18694_v33, 0.0 }
 0xdde   : > { %v18708_v4 = vadd.f32 %v18707_v20, %v18706_v45 }
 0xddf   : > { %18724 = vadd.xlane.f32.xlu1 %v18723_v24 }
 0xde0   : > { %18709 = vadd.xlane.f32.xlu0 %v18708_v4 }
 0xe6c   : > { %v18725_v58 = vpop.xlane.xlu1 %18724 }
 0xe6d   : > { %v18727_v46 = vmul.f32 0.027777778, %v18725_v58  ;;  %v18710_v34 = vpop.xlane.xlu0 %18709 }
 0xe6e   : > { %v18726_v52 = vmul.f32 0.027777778, %v18710_v34 }
 0xe70   : > { %v20504_v54 = vpack.c.bf16 %v18727_v46, %v18726_v52 }
 0xe72   : > { %20506 = vmatprep.subr.msk.bf16.mxu0 %vm23469_vm1, %v20504_v54 }
 0xe73   : > { %20509 = vmatpush3.bf16.msk.msra.mxu0 %vm23469_vm1, %v20504_v54 }
 0xe76   : > { %19911 = vmatmul.mubr.msk.f32.vlgmr.msra.gmra.mrb[38].mxu0 %vm26105_vm8, %v18729_v42 }
 0xf49   : > { %v19912_v30 = vpop.f32.mrb[38].mxu0 }
 0xf4a   : > { %v18817_v29 = vsel %vm18816_vm10, %v19912_v30, -inf  ;;  %v18805_v9 = vpop.f32.mrb[39].mxu0 }
 0xf4b   : > { %v18815_v39 = vsel %vm18814_vm15, %v18805_v9, -inf }
 0xf4c   : > { %v18818_v53 = vmax.f32 %v18815_v39, %v18817_v29 }
 0xf4e   : > { %v18819_v49 = vrot.slane %v18818_v53, 4 }
 0xf50   : > { %v18820_v10 = vmax.f32 %v18818_v53, %v18819_v49 }
 0xf52   : > { %v18821_v47 = vrot.slane %v18820_v10, 2 }
 0xf54   : > { %v18822_v38 = vmax.f32 %v18820_v10, %v18821_v47 }
 0xf56   : > { %v18823_v41 = vrot.slane %v18822_v38, 1 }
 0xf58   : > { %v18824_v48 = vmax.f32 %v18822_v38, %v18823_v41 }
 0xf5a   : > { %v18825_v37 = vsub.f32 %v18805_v9, %v18824_v48  ;;  %v18826_v16 = vsub.f32 %v19912_v30, %v18824_v48 }
 0xf5c   : > { %v18827_v60 = vmul.f32 1.442695, %v18825_v37  ;;  %v18829_v61 = vmul.f32 1.442695, %v18826_v16 }
 0xf5e   : > { %21926 = vpow2.f32 %v18827_v60 }
 0xf5f   : > { %21928 = vpow2.f32 %v18829_v61 }
 0xf68   : > { %v21927_v23 = vpop.eup %21926 }
 0xf69   : > { %v21929_v0 = vpop.eup %21928  ;;  %v18831_v59 = vsel %vm18814_vm15, %v21927_v23, 0.0 }
 0xf6a   : > { %v18832_v44 = vsel %vm18816_vm10, %v21929_v0, 0.0 }
 0xf6b   : > { %v18833_v7 = vadd.f32 %v18832_v44, %v18831_v59 }
 0xf6d   : > { %v18834_v27 = vrot.slane %v18833_v7, 4 }
 0xf6f   : > { %v18835_v8 = vadd.f32 %v18834_v27, %v18833_v7 }
 0xf71   : > { %v18836_v28 = vrot.slane %v18835_v8, 2 }
 0xf73   : > { %v18837_v26 = vadd.f32 %v18836_v28, %v18835_v8 }
 0xf75   : > { %v18838_v31 = vrot.slane %v18837_v26, 1 }
 0xf77   : > { %v18839_v55 = vadd.f32 %v18838_v31, %v18837_v26 }
 0xf79   : > { %21930 = vlog2.f32 %v18839_v55 }
 0xf83   : > { %v21931_v2 = vpop.eup %21930 }
 0xf84   : > { %v18841_v15 = vmul.f32 0.6931472, %v21931_v2 }
 0xf86   : > { %v18842_v25 = vsub.f32 %v18825_v37, %v18841_v15  ;;  %v18843_v17 = vsub.f32 %v18826_v16, %v18841_v15 }
 0xf88   : > { %18844 = vst.msk [vmem:[%s680_s5] sm:$0xff] %vm18814_vm15, %v18842_v25 }
 0xf89   : > { %18845 = vst.msk [vmem:[%s680_s5 + $0x8] sm:$0x3] %vm18816_vm10, %v18843_v17 }
 0xf8a PF: > { %s32_s3 = sadd.s32 1, %s21950_s3  }
 0xf8b   : > { %p29_p4 = scmp.ge.s32.totalorder %s32_s3, 4  }
 0xf8d   :  { %31 = sbr.rel (!%p29_p4) target bundleno = 8 (0x8), region = 187 }

</bundles_post_ra>
